<compile_context>
chip_gen: v6e
topology: v6e:2x2x1
jax: 0.10.0
libtpu: 0.0.40
codegen_flags: <defaults>
</compile_context>

<pallas_src>
import math
import functools

import jax
import jax.numpy as jnp
from jax.experimental import pallas as pl
from jax.experimental.pallas import tpu as pltpu

# --- model constants (350 and 30 are hard-coded in the PyTorch module) ---
N_SERIES = 8
RNN_HID_SIZE = 32
SEQ_LEN = 8
ATTN_HEADS = 30
S1_DIM = 350
S1_PAD = 384                # 3 * 128 lanes; padded weights are zero -> exact
G4 = 4 * RNN_HID_SIZE       # 128 fused LSTM gate lanes, PyTorch order i|f|g|o


def _sum_all(v):
    """(R, C) -> (1, 1) via two single-axis keepdims reductions (lanes, then sublanes)."""
    return jnp.sum(jnp.sum(v, axis=1, keepdims=True), axis=0, keepdims=True)


def _lane_chunk(vec, k, width):
    """Extract lanes [k*width, (k+1)*width) of a (B, 128) value as (B, width).

    Uses an XLU lane rotation (free slot) + offset-0 prefix slice.
    """
    if k == 0:
        return vec[:, :width]
    shift = vec.shape[-1] - k * width   # np.roll semantics: result[l] = vec[l + k*width]
    return pltpu.roll(vec, shift=shift, axis=1)[:, :width]


# ----------------------------------------------------------------------------
# Fused kernel: in-kernel precompute + unrolled RITS recurrence + attention head
# + classifier + both loss reductions.
# ----------------------------------------------------------------------------
def fused_rits_attn_kernel(
    seq_ref, labels_ref, istrain_ref,
    wdh_ref, bdh_ref, wdxd_ref, bdx_ref,
    wcombgx_ref, bcomb_ref,
    whcat_ref, bhist_ref, wfeat_ref, bfeat_ref,
    wxg_ref, wmcat_ref, bgate_ref,
    ws1o_ref, bs1_ref, ws2_ref, bs2_ref, bout_ref,
    imp_ref, pred_ref, limp_ref, lclf_ref, loss_ref,
):
    f32 = jnp.float32
    B = seq_ref.shape[1]
    N = seq_ref.shape[2]
    H = RNN_HID_SIZE

    # Hoist the small recurrent-path weights into vregs (read once, reused 8x).
    wdh = wdh_ref[...]
    bdh = bdh_ref[...]
    wdxd = wdxd_ref[...]
    bdx = bdx_ref[...]
    wcomb_gx = wcombgx_ref[...]
    bcomb = bcomb_ref[...]
    whcat = whcat_ref[...]            # (H, 256) = [Wh_gates (128) | W_hist (8) | 0]
    bhist = bhist_ref[...]
    wfeat = wfeat_ref[...]
    bfeat = bfeat_ref[...]
    wxg = wxg_ref[...]                # (N, 128)  fused x-side gate weights
    wmcat = wmcat_ref[...]            # (N, 256) = [Wm_gates (128) | W_comb_m (8) | 0]
    bgate = bgate_ref[...]            # (1, 128)  b_ih + b_hh
    bs1 = bs1_ref[...]                # (1, 384)
    bs2 = bs2_ref[...]                # (1, 30)

    h = jnp.zeros((B, H), f32)
    c = jnp.zeros((B, H), f32)
    x_loss = jnp.zeros((1, 1), f32)
    m_max = num = den = None

    # Statically unrolled recurrence: straight-line code, h/c carried in vregs.
    for t in range(SEQ_LEN):
        x = seq_ref[3 * t + 0]        # (B, N)
        m = seq_ref[3 * t + 1]        # (B, N)
        d = seq_ref[3 * t + 2]        # (B, N)

        # --- input-only precompute: independent of (h, c); overlapped by the scheduler ---
        gh = jnp.exp(-jax.nn.relu(jnp.dot(d, wdh, preferred_element_type=f32) + bdh))    # (B, H)
        gx = jnp.exp(-jax.nn.relu(d * wdxd + bdx))                                        # (B, N)
        mdot = jnp.dot(m, wmcat, preferred_element_type=f32)                              # (B, 256)
        pre_m = mdot[:, :G4]                                                              # gate m-term
        # NOTE: the reference applies NO sigmoid to weight_combine's output.
        alpha = (jnp.dot(gx, wcomb_gx, preferred_element_type=f32)
                 + mdot[:, G4:G4 + N] + bcomb)                                            # (B, N)
        msum = _sum_all(m)                                                                # (1, 1)

        # --- recurrent serial path ---
        h = h * gh
        hdot = jnp.dot(h, whcat, preferred_element_type=f32)     # (B, 256): gates | hist
        h_gate = hdot[:, :G4]
        x_h = hdot[:, G4:G4 + N] + bhist
        x_c = m * x + (1.0 - m) * x_h
        z_h = jnp.dot(x_c, wfeat, preferred_element_type=f32) + bfeat
        c_h = alpha * z_h + (1.0 - alpha) * x_h
        c_c = m * x + (1.0 - m) * c_h
        imp_ref[t] = c_c

        err = (jnp.abs(x - x_h) + jnp.abs(x - z_h) + jnp.abs(x - c_h)) * m
        x_loss = x_loss + _sum_all(err) / (msum + 1e-5)

        # LSTMCell(cat([c_c, m]), (h, c)) with fused gate weights.
        gates = (jnp.dot(c_c, wxg, preferred_element_type=f32) + h_gate + pre_m + bgate)  # (B, 128)
        sg = jax.nn.sigmoid(gates)
        tg = jnp.tanh(gates)
        i_g = _lane_chunk(sg, 0, H)
        f_g = _lane_chunk(sg, 1, H)
        g_g = _lane_chunk(tg, 2, H)
        o_g = _lane_chunk(sg, 3, H)
        c = f_g * c + i_g * g_g
        h = o_g * jnp.tanh(c)

        # --- attention-head projections of the new hidden state (independent filler work) ---
        hproj = jnp.dot(h, ws1o_ref[...], preferred_element_type=f32)   # (B, 512)
        s1 = jnp.tanh(hproj[:, :S1_PAD] + bs1)
        logit = jnp.dot(s1, ws2_ref[...], preferred_element_type=f32) + bs2   # (B, A)
        proj = hproj[:, S1_PAD:S1_PAD + ATTN_HEADS]                            # (B, A)

        # Online (flash-style) softmax-over-time accumulator: 3 live accumulators.
        if t == 0:
            m_max, num, den = logit, proj, jnp.ones_like(logit)
        else:
            new_max = jnp.maximum(m_max, logit)
            scale = jnp.exp(m_max - new_max)
            e = jnp.exp(logit - new_max)
            num = num * scale + e * proj
            den = den * scale + e
            m_max = new_max

    # Classifier head: y_b = sum_a (sum_t e_t * proj_t) / (sum_t e_t) + b_out.
    y_h = (jnp.sum(num * pl.reciprocal(den, approx=True), axis=1, keepdims=True)
           + bout_ref[...])                                                    # (B, 1)
    pred_ref[...] = jax.nn.sigmoid(y_h)

    # binary_cross_entropy_with_logits (reduce=False formula from the reference)
    labels = labels_ref[...]
    istr = istrain_ref[...]
    max_val = jnp.maximum(-y_h, 0.0)
    bce = y_h - y_h * labels + max_val + jnp.log(jnp.exp(-max_val) + jnp.exp(-y_h - max_val))
    y_loss = _sum_all(bce * istr) / (_sum_all(istr) + 1e-5)

    loss_imp = x_loss * (1.0 / SEQ_LEN)
    loss_clf = y_loss * 0.1
    limp_ref[...] = loss_imp
    lclf_ref[...] = loss_clf
    loss_ref[...] = loss_imp + loss_clf


def run_fused_model(p, seq, labels, is_train):
    _, B, N = seq.shape
    return pl.pallas_call(
        fused_rits_attn_kernel,
        out_shape=(
            jax.ShapeDtypeStruct((SEQ_LEN, B, N), jnp.float32),   # imputations (time-major)
            jax.ShapeDtypeStruct((B, 1), jnp.float32),            # predictions (sigmoid)
            jax.ShapeDtypeStruct((1, 1), jnp.float32),            # loss_imp
            jax.ShapeDtypeStruct((1, 1), jnp.float32),            # loss_clf
            jax.ShapeDtypeStruct((1, 1), jnp.float32),            # total loss
        ),
    )(seq, labels, is_train,
      p['wdh'], p['bdh'], p['wdx_diag'], p['bdx'],
      p['wcomb_gx'], p['bcomb'],
      p['wh_cat'], p['bhist'], p['wfeat'], p['bfeat'],
      p['wx_gates'], p['wm_cat'], p['b_gates'],
      p['ws1o_cat'], p['bs1'], p['ws2'], p['bs2'], p['bout'])


# ----------------------------------------------------------------------------
# Parameter init (deterministic, mirrors the PyTorch module's shapes / scales).
# ----------------------------------------------------------------------------
def init_params(key):
    ks = jax.random.split(key, 20)

    def U(k, shape, scale):
        return jax.random.uniform(k, shape, jnp.float32, -scale, scale)

    H, N, A = RNN_HID_SIZE, N_SERIES, ATTN_HEADS
    # TemporalDecay h: W (H, N), b (H,)
    s = 1.0 / math.sqrt(H)
    wdh, bdh = U(ks[0], (H, N), s), U(ks[1], (H,), s)
    # TemporalDecay x (diag): only the diagonal of W matters
    s = 1.0 / math.sqrt(N)
    wdx, bdx = U(ks[2], (N, N), s), U(ks[3], (N,), s)
    # hist_reg: Linear(H -> N)
    s = 1.0 / math.sqrt(H)
    whist, bhist = U(ks[4], (N, H), s), U(ks[5], (N,), s)
    # feat_reg: W (N, N) masked with (1 - eye)
    s = 1.0 / math.sqrt(N)
    wfeat = U(ks[6], (N, N), s) * (1.0 - jnp.eye(N, dtype=jnp.float32))
    bfeat = U(ks[7], (N,), s)
    # weight_combine: Linear(2N -> N)
    s = 1.0 / math.sqrt(2 * N)
    wcomb, bcomb = U(ks[8], (N, 2 * N), s), U(ks[9], (N,), s)
    # LSTMCell(2N, H): gate order i, f, g, o
    s = 1.0 / math.sqrt(H)
    wih, whh = U(ks[10], (G4, 2 * N), s), U(ks[11], (G4, H), s)
    bih, bhh = U(ks[12], (G4,), s), U(ks[13], (G4,), s)
    # attention + classifier
    s = 1.0 / math.sqrt(H)
    ws1, bs1 = U(ks[14], (S1_DIM, H), s), U(ks[15], (S1_DIM,), s)
    s = 1.0 / math.sqrt(S1_DIM)
    ws2, bs2 = U(ks[16], (A, S1_DIM), s), U(ks[17], (A,), s)
    s = 1.0 / math.sqrt(H * A)
    wout, bout = U(ks[18], (1, H * A), s), U(ks[19], (1,), s)

    # --- kernel-friendly fused layouts ---
    wih_t = wih.T                    # (2N, 4H), gate columns i|f|g|o
    whh_t = whh.T                    # (H, 4H)
    b_gates = (bih + bhh).reshape(1, G4)
    wx_gates = wih_t[:N, :]          # (N, 4H)   c_c-dependent gate term
    wm_gates = wih_t[N:, :]          # (N, 4H)   m-dependent gate term

    # fused h RHS: [gate h-part | hist_reg], lane-padded to 256 (padding is zero -> exact)
    wh_cat = jnp.zeros((H, 2 * G4), jnp.float32)
    wh_cat = wh_cat.at[:, :G4].set(whh_t)
    wh_cat = wh_cat.at[:, G4:G4 + N].set(whist.T)

    # fused m RHS: [gate m-part | weight_combine m-part], padded to 256
    wm_cat = jnp.zeros((N, 2 * G4), jnp.float32)
    wm_cat = wm_cat.at[:, :G4].set(wm_gates)
    wm_cat = wm_cat.at[:, G4:G4 + N].set(wcomb.T[N:, :])

    # fused attention RHS: [W_s1 (zero-padded to 384 lanes) | per-head W_out rows], padded to 512
    ws1o_cat = jnp.zeros((H, 512), jnp.float32)
    ws1o_cat = ws1o_cat.at[:, :S1_DIM].set(ws1.T)
    ws1o_cat = ws1o_cat.at[:, S1_PAD:S1_PAD + A].set(wout.reshape(A, H).T)

    ws2_p = jnp.zeros((S1_PAD, A), jnp.float32).at[:S1_DIM, :].set(ws2.T)
    bs1_p = jnp.zeros((1, S1_PAD), jnp.float32).at[:, :S1_DIM].set(bs1[None, :])

    return dict(
        wdh=wdh.T, bdh=bdh.reshape(1, H),
        wdx_diag=jnp.diagonal(wdx).reshape(1, N), bdx=bdx.reshape(1, N),
        wcomb_gx=wcomb.T[:N, :], bcomb=bcomb.reshape(1, N),
        wh_cat=wh_cat, bhist=bhist.reshape(1, N),
        wfeat=wfeat.T, bfeat=bfeat.reshape(1, N),
        wx_gates=wx_gates, wm_cat=wm_cat, b_gates=b_gates,
        ws1o_cat=ws1o_cat, bs1=bs1_p, ws2=ws2_p, bs2=bs2.reshape(1, A),
        bout=bout.reshape(1, 1),
    )


# ----------------------------------------------------------------------------
# Full forward pass: a single input pack, one fused Pallas kernel, scalar glue.
# ----------------------------------------------------------------------------
def model_forward(params, values, masks, deltas, labels, is_train):
    B = values.shape[0]
    # Pack values/masks/deltas into a single time-major (3*SEQ, B, N) tensor so the kernel
    # sees clean leading-axis tile reads and the wrapper does ONE pack, not three transposes.
    seq = jnp.transpose(
        jnp.stack([values, masks, deltas], axis=0).astype(jnp.float32),
        (2, 0, 1, 3)).reshape(SEQ_LEN * 3, B, N_SERIES)
    labels2 = labels.reshape(B, 1).astype(jnp.float32)
    istr2 = is_train.reshape(B, 1).astype(jnp.float32)

    imp_t, pred, loss_imp, loss_clf, loss = run_fused_model(params, seq, labels2, istr2)

    # TODO(synk): 'evals'/'eval_masks' are pure pass-through in the reference and are omitted here.
    return {
        'loss_imp': loss_imp[0, 0],
        'loss_clf': loss_clf[0, 0],
        'loss': loss[0, 0],
        'predictions': pred,
        'imputations': jnp.transpose(imp_t, (1, 0, 2)),   # back to (B, SEQ, N)
        'label': labels2,
        'is_train': istr2,
    }


if __name__ == "__main__":
    B = 2
    key = jax.random.PRNGKey(0)
    k_v, k_m, k_d, k_l, k_p = jax.random.split(key, 5)

    values = jax.random.normal(k_v, (B, SEQ_LEN, N_SERIES), jnp.float32)
    masks = (jax.random.uniform(k_m, (B, SEQ_LEN, N_SERIES)) > 0.3).astype(jnp.float32)
    deltas = jax.random.uniform(k_d, (B, SEQ_LEN, N_SERIES), jnp.float32, 0.0, 3.0)
    labels = jax.random.bernoulli(k_l, 0.5, (B,)).astype(jnp.float32)
    is_train = jnp.ones((B,), jnp.float32)

    params = init_params(k_p)

    fwd = jax.jit(functools.partial(model_forward, params))
    out = fwd(values, masks, deltas, labels, is_train)
    jax.block_until_ready(out)

    assert out['predictions'].shape == (B, 1)
    assert out['imputations'].shape == (B, SEQ_LEN, N_SERIES)
    assert bool(jnp.isfinite(out['loss']))
    print("KERNEL_OK")
</pallas_src>

<mosaic_0001>
module attributes {stable_mosaic.version = 11 : i64} {
  func.func @fused_rits_attn_kernel(%arg0: memref<24x2x8xf32, #tpu.memory_space<vmem>>, %arg1: memref<2x1xf32, #tpu.memory_space<vmem>>, %arg2: memref<2x1xf32, #tpu.memory_space<vmem>>, %arg3: memref<8x32xf32, #tpu.memory_space<vmem>>, %arg4: memref<1x32xf32, #tpu.memory_space<vmem>>, %arg5: memref<1x8xf32, #tpu.memory_space<vmem>>, %arg6: memref<1x8xf32, #tpu.memory_space<vmem>>, %arg7: memref<8x8xf32, #tpu.memory_space<vmem>>, %arg8: memref<1x8xf32, #tpu.memory_space<vmem>>, %arg9: memref<32x256xf32, #tpu.memory_space<vmem>>, %arg10: memref<1x8xf32, #tpu.memory_space<vmem>>, %arg11: memref<8x8xf32, #tpu.memory_space<vmem>>, %arg12: memref<1x8xf32, #tpu.memory_space<vmem>>, %arg13: memref<8x128xf32, #tpu.memory_space<vmem>>, %arg14: memref<8x256xf32, #tpu.memory_space<vmem>>, %arg15: memref<1x128xf32, #tpu.memory_space<vmem>>, %arg16: memref<32x512xf32, #tpu.memory_space<vmem>>, %arg17: memref<1x384xf32, #tpu.memory_space<vmem>>, %arg18: memref<384x30xf32, #tpu.memory_space<vmem>>, %arg19: memref<1x30xf32, #tpu.memory_space<vmem>>, %arg20: memref<1x1xf32, #tpu.memory_space<vmem>>, %arg21: memref<8x2x8xf32, #tpu.memory_space<vmem>>, %arg22: memref<2x1xf32, #tpu.memory_space<vmem>>, %arg23: memref<1x1xf32, #tpu.memory_space<vmem>>, %arg24: memref<1x1xf32, #tpu.memory_space<vmem>>, %arg25: memref<1x1xf32, #tpu.memory_space<vmem>>) attributes {dimension_semantics = [], scalar_prefetch = 0 : i64, scratch_operands = 0 : i64, tpu.core_type = #tpu.core_type<tc>} {
    %c0 = arith.constant 0 : index
    %c0_0 = arith.constant 0 : index
    %0 = vector.load %arg3[%c0, %c0_0] : memref<8x32xf32, #tpu.memory_space<vmem>>, vector<8x32xf32>
    %c0_1 = arith.constant 0 : index
    %c0_2 = arith.constant 0 : index
    %1 = vector.load %arg4[%c0_1, %c0_2] : memref<1x32xf32, #tpu.memory_space<vmem>>, vector<1x32xf32>
    %c0_3 = arith.constant 0 : index
    %c0_4 = arith.constant 0 : index
    %2 = vector.load %arg5[%c0_3, %c0_4] : memref<1x8xf32, #tpu.memory_space<vmem>>, vector<1x8xf32>
    %c0_5 = arith.constant 0 : index
    %c0_6 = arith.constant 0 : index
    %3 = vector.load %arg6[%c0_5, %c0_6] : memref<1x8xf32, #tpu.memory_space<vmem>>, vector<1x8xf32>
    %c0_7 = arith.constant 0 : index
    %c0_8 = arith.constant 0 : index
    %4 = vector.load %arg7[%c0_7, %c0_8] : memref<8x8xf32, #tpu.memory_space<vmem>>, vector<8x8xf32>
    %c0_9 = arith.constant 0 : index
    %c0_10 = arith.constant 0 : index
    %5 = vector.load %arg8[%c0_9, %c0_10] : memref<1x8xf32, #tpu.memory_space<vmem>>, vector<1x8xf32>
    %c0_11 = arith.constant 0 : index
    %c0_12 = arith.constant 0 : index
    %6 = vector.load %arg9[%c0_11, %c0_12] : memref<32x256xf32, #tpu.memory_space<vmem>>, vector<32x256xf32>
    %c0_13 = arith.constant 0 : index
    %c0_14 = arith.constant 0 : index
    %7 = vector.load %arg10[%c0_13, %c0_14] : memref<1x8xf32, #tpu.memory_space<vmem>>, vector<1x8xf32>
    %c0_15 = arith.constant 0 : index
    %c0_16 = arith.constant 0 : index
    %8 = vector.load %arg11[%c0_15, %c0_16] : memref<8x8xf32, #tpu.memory_space<vmem>>, vector<8x8xf32>
    %c0_17 = arith.constant 0 : index
    %c0_18 = arith.constant 0 : index
    %9 = vector.load %arg12[%c0_17, %c0_18] : memref<1x8xf32, #tpu.memory_space<vmem>>, vector<1x8xf32>
    %c0_19 = arith.constant 0 : index
    %c0_20 = arith.constant 0 : index
    %10 = vector.load %arg13[%c0_19, %c0_20] : memref<8x128xf32, #tpu.memory_space<vmem>>, vector<8x128xf32>
    %c0_21 = arith.constant 0 : index
    %c0_22 = arith.constant 0 : index
    %11 = vector.load %arg14[%c0_21, %c0_22] : memref<8x256xf32, #tpu.memory_space<vmem>>, vector<8x256xf32>
    %c0_23 = arith.constant 0 : index
    %c0_24 = arith.constant 0 : index
    %12 = vector.load %arg15[%c0_23, %c0_24] : memref<1x128xf32, #tpu.memory_space<vmem>>, vector<1x128xf32>
    %c0_25 = arith.constant 0 : index
    %c0_26 = arith.constant 0 : index
    %13 = vector.load %arg17[%c0_25, %c0_26] : memref<1x384xf32, #tpu.memory_space<vmem>>, vector<1x384xf32>
    %c0_27 = arith.constant 0 : index
    %c0_28 = arith.constant 0 : index
    %14 = vector.load %arg19[%c0_27, %c0_28] : memref<1x30xf32, #tpu.memory_space<vmem>>, vector<1x30xf32>
    %cst = arith.constant 0.000000e+00 : f32
    %15 = vector.broadcast %cst : f32 to vector<2x32xf32>
    %cst_29 = arith.constant 0.000000e+00 : f32
    %16 = vector.broadcast %cst_29 : f32 to vector<2x32xf32>
    %cst_30 = arith.constant 0.000000e+00 : f32
    %17 = vector.broadcast %cst_30 : f32 to vector<1x1xf32>
    %c0_31 = arith.constant 0 : index
    %c0_32 = arith.constant 0 : index
    %c0_33 = arith.constant 0 : index
    %18 = vector.load %arg0[%c0_31, %c0_32, %c0_33] : memref<24x2x8xf32, #tpu.memory_space<vmem>>, vector<1x2x8xf32>
    %19 = vector.shape_cast %18 : vector<1x2x8xf32> to vector<2x8xf32>
    %c1 = arith.constant 1 : index
    %c0_34 = arith.constant 0 : index
    %c0_35 = arith.constant 0 : index
    %20 = vector.load %arg0[%c1, %c0_34, %c0_35] : memref<24x2x8xf32, #tpu.memory_space<vmem>>, vector<1x2x8xf32>
    %21 = vector.shape_cast %20 : vector<1x2x8xf32> to vector<2x8xf32>
    %c2 = arith.constant 2 : index
    %c0_36 = arith.constant 0 : index
    %c0_37 = arith.constant 0 : index
    %22 = vector.load %arg0[%c2, %c0_36, %c0_37] : memref<24x2x8xf32, #tpu.memory_space<vmem>>, vector<1x2x8xf32>
    %23 = vector.shape_cast %22 : vector<1x2x8xf32> to vector<2x8xf32>
    %cst_38 = arith.constant dense<0.000000e+00> : vector<2x32xf32>
    %24 = tpu.matmul %23, %0, %cst_38 {dimension_numbers = #tpu.dot_dimension_numbers<[1], [0], [0], [1], [0, 0, 1, 1], [], []>} : vector<2x8xf32>, vector<8x32xf32>, vector<2x32xf32> -> vector<2x32xf32>
    %25 = vector.broadcast %1 : vector<1x32xf32> to vector<2x32xf32>
    %26 = arith.addf %24, %25 : vector<2x32xf32>
    %cst_39 = arith.constant 0.000000e+00 : f32
    %27 = vector.broadcast %cst_39 : f32 to vector<2x32xf32>
    %28 = arith.maximumf %26, %27 : vector<2x32xf32>
    %cst_40 = arith.constant 0.000000e+00 : f32
    %29 = vector.broadcast %cst_40 : f32 to vector<2x32xf32>
    %30 = arith.subf %29, %28 : vector<2x32xf32>
    %31 = math.exp %30 : vector<2x32xf32>
    %32 = vector.broadcast %2 : vector<1x8xf32> to vector<2x8xf32>
    %33 = arith.mulf %23, %32 : vector<2x8xf32>
    %34 = vector.broadcast %3 : vector<1x8xf32> to vector<2x8xf32>
    %35 = arith.addf %33, %34 : vector<2x8xf32>
    %cst_41 = arith.constant 0.000000e+00 : f32
    %36 = vector.broadcast %cst_41 : f32 to vector<2x8xf32>
    %37 = arith.maximumf %35, %36 : vector<2x8xf32>
    %cst_42 = arith.constant 0.000000e+00 : f32
    %38 = vector.broadcast %cst_42 : f32 to vector<2x8xf32>
    %39 = arith.subf %38, %37 : vector<2x8xf32>
    %40 = math.exp %39 : vector<2x8xf32>
    %cst_43 = arith.constant dense<0.000000e+00> : vector<2x256xf32>
    %41 = tpu.matmul %21, %11, %cst_43 {dimension_numbers = #tpu.dot_dimension_numbers<[1], [0], [0], [1], [0, 0, 1, 1], [], []>} : vector<2x8xf32>, vector<8x256xf32>, vector<2x256xf32> -> vector<2x256xf32>
    %42 = vector.extract_strided_slice %41 {offsets = [0, 0], sizes = [2, 128], strides = [1, 1]} : vector<2x256xf32> to vector<2x128xf32>
    %cst_44 = arith.constant dense<0.000000e+00> : vector<2x8xf32>
    %43 = tpu.matmul %40, %4, %cst_44 {dimension_numbers = #tpu.dot_dimension_numbers<[1], [0], [0], [1], [0, 0, 1, 1], [], []>} : vector<2x8xf32>, vector<8x8xf32>, vector<2x8xf32> -> vector<2x8xf32>
    %44 = vector.extract_strided_slice %41 {offsets = [0, 128], sizes = [2, 8], strides = [1, 1]} : vector<2x256xf32> to vector<2x8xf32>
    %45 = arith.addf %43, %44 : vector<2x8xf32>
    %46 = vector.broadcast %5 : vector<1x8xf32> to vector<2x8xf32>
    %47 = arith.addf %45, %46 : vector<2x8xf32>
    %cst_45 = arith.constant dense<0.000000e+00> : vector<2xf32>
    %48 = vector.multi_reduction <add>, %21, %cst_45 [1] : vector<2x8xf32> to vector<2xf32>
    %49 = vector.shape_cast %48 : vector<2xf32> to vector<2x1xf32>
    %cst_46 = arith.constant dense<0.000000e+00> : vector<1xf32>
    %50 = vector.multi_reduction <add>, %49, %cst_46 [0] : vector<2x1xf32> to vector<1xf32>
    %51 = vector.shape_cast %50 : vector<1xf32> to vector<1x1xf32>
    %52 = arith.mulf %15, %31 : vector<2x32xf32>
    %cst_47 = arith.constant dense<0.000000e+00> : vector<2x256xf32>
    %53 = tpu.matmul %52, %6, %cst_47 {dimension_numbers = #tpu.dot_dimension_numbers<[1], [0], [0], [1], [0, 0, 1, 1], [], []>} : vector<2x32xf32>, vector<32x256xf32>, vector<2x256xf32> -> vector<2x256xf32>
    %54 = vector.extract_strided_slice %53 {offsets = [0, 0], sizes = [2, 128], strides = [1, 1]} : vector<2x256xf32> to vector<2x128xf32>
    %55 = vector.extract_strided_slice %53 {offsets = [0, 128], sizes = [2, 8], strides = [1, 1]} : vector<2x256xf32> to vector<2x8xf32>
    %56 = vector.broadcast %7 : vector<1x8xf32> to vector<2x8xf32>
    %57 = arith.addf %55, %56 : vector<2x8xf32>
    %58 = arith.mulf %21, %19 : vector<2x8xf32>
    %cst_48 = arith.constant 1.000000e+00 : f32
    %59 = vector.broadcast %cst_48 : f32 to vector<2x8xf32>
    %60 = arith.subf %59, %21 : vector<2x8xf32>
    %61 = arith.mulf %60, %57 : vector<2x8xf32>
    %62 = arith.addf %58, %61 : vector<2x8xf32>
    %cst_49 = arith.constant dense<0.000000e+00> : vector<2x8xf32>
    %63 = tpu.matmul %62, %8, %cst_49 {dimension_numbers = #tpu.dot_dimension_numbers<[1], [0], [0], [1], [0, 0, 1, 1], [], []>} : vector<2x8xf32>, vector<8x8xf32>, vector<2x8xf32> -> vector<2x8xf32>
    %64 = vector.broadcast %9 : vector<1x8xf32> to vector<2x8xf32>
    %65 = arith.addf %63, %64 : vector<2x8xf32>
    %66 = arith.mulf %47, %65 : vector<2x8xf32>
    %cst_50 = arith.constant 1.000000e+00 : f32
    %67 = vector.broadcast %cst_50 : f32 to vector<2x8xf32>
    %68 = arith.subf %67, %47 : vector<2x8xf32>
    %69 = arith.mulf %68, %57 : vector<2x8xf32>
    %70 = arith.addf %66, %69 : vector<2x8xf32>
    %71 = arith.mulf %21, %19 : vector<2x8xf32>
    %cst_51 = arith.constant 1.000000e+00 : f32
    %72 = vector.broadcast %cst_51 : f32 to vector<2x8xf32>
    %73 = arith.subf %72, %21 : vector<2x8xf32>
    %74 = arith.mulf %73, %70 : vector<2x8xf32>
    %75 = arith.addf %71, %74 : vector<2x8xf32>
    %c0_52 = arith.constant 0 : index
    %c0_53 = arith.constant 0 : index
    %c0_54 = arith.constant 0 : index
    %76 = vector.load %arg21[%c0_52, %c0_53, %c0_54] : memref<8x2x8xf32, #tpu.memory_space<vmem>>, vector<1x2x8xf32>
    %77 = vector.shape_cast %76 : vector<1x2x8xf32> to vector<2x8xf32>
    %78 = vector.shape_cast %75 : vector<2x8xf32> to vector<1x2x8xf32>
    tpu.vector_store %arg21[%c0_52, %c0_53, %c0_54], %78 {strides = array<i32>} : memref<8x2x8xf32, #tpu.memory_space<vmem>>, vector<1x2x8xf32>,
    %79 = arith.subf %19, %57 : vector<2x8xf32>
    %80 = math.absf %79 : vector<2x8xf32>
    %81 = arith.subf %19, %65 : vector<2x8xf32>
    %82 = math.absf %81 : vector<2x8xf32>
    %83 = arith.addf %80, %82 : vector<2x8xf32>
    %84 = arith.subf %19, %70 : vector<2x8xf32>
    %85 = math.absf %84 : vector<2x8xf32>
    %86 = arith.addf %83, %85 : vector<2x8xf32>
    %87 = arith.mulf %86, %21 : vector<2x8xf32>
    %cst_55 = arith.constant dense<0.000000e+00> : vector<2xf32>
    %88 = vector.multi_reduction <add>, %87, %cst_55 [1] : vector<2x8xf32> to vector<2xf32>
    %89 = vector.shape_cast %88 : vector<2xf32> to vector<2x1xf32>
    %cst_56 = arith.constant dense<0.000000e+00> : vector<1xf32>
    %90 = vector.multi_reduction <add>, %89, %cst_56 [0] : vector<2x1xf32> to vector<1xf32>
    %91 = vector.shape_cast %90 : vector<1xf32> to vector<1x1xf32>
    %cst_57 = arith.constant 9.99999974E-6 : f32
    %92 = vector.broadcast %cst_57 : f32 to vector<1x1xf32>
    %93 = arith.addf %51, %92 : vector<1x1xf32>
    %94 = arith.divf %91, %93 : vector<1x1xf32>
    %95 = arith.addf %17, %94 : vector<1x1xf32>
    %cst_58 = arith.constant dense<0.000000e+00> : vector<2x128xf32>
    %96 = tpu.matmul %75, %10, %cst_58 {dimension_numbers = #tpu.dot_dimension_numbers<[1], [0], [0], [1], [0, 0, 1, 1], [], []>} : vector<2x8xf32>, vector<8x128xf32>, vector<2x128xf32> -> vector<2x128xf32>
    %97 = arith.addf %96, %54 : vector<2x128xf32>
    %98 = arith.addf %97, %42 : vector<2x128xf32>
    %99 = vector.broadcast %12 : vector<1x128xf32> to vector<2x128xf32>
    %100 = arith.addf %98, %99 : vector<2x128xf32>
    %101 = arith.negf %100 : vector<2x128xf32>
    %102 = math.exp %101 : vector<2x128xf32>
    %cst_59 = arith.constant 1.000000e+00 : f32
    %103 = vector.broadcast %cst_59 : f32 to vector<2x128xf32>
    %104 = arith.addf %103, %102 : vector<2x128xf32>
    %105 = arith.divf %103, %104 : vector<2x128xf32>
    %106 = math.tanh %100 : vector<2x128xf32>
    %107 = vector.extract_strided_slice %105 {offsets = [0, 0], sizes = [2, 32], strides = [1, 1]} : vector<2x128xf32> to vector<2x32xf32>
    %c96_i32 = arith.constant 96 : i32
    %108 = tpu.dynamic_rotate %105 by %c96_i32 dim 1 : vector<2x128xf32>, i32 -> vector<2x128xf32>
    %109 = vector.extract_strided_slice %108 {offsets = [0, 0], sizes = [2, 32], strides = [1, 1]} : vector<2x128xf32> to vector<2x32xf32>
    %c64_i32 = arith.constant 64 : i32
    %110 = tpu.dynamic_rotate %106 by %c64_i32 dim 1 : vector<2x128xf32>, i32 -> vector<2x128xf32>
    %111 = vector.extract_strided_slice %110 {offsets = [0, 0], sizes = [2, 32], strides = [1, 1]} : vector<2x128xf32> to vector<2x32xf32>
    %c32_i32 = arith.constant 32 : i32
    %112 = tpu.dynamic_rotate %105 by %c32_i32 dim 1 : vector<2x128xf32>, i32 -> vector<2x128xf32>
    %113 = vector.extract_strided_slice %112 {offsets = [0, 0], sizes = [2, 32], strides = [1, 1]} : vector<2x128xf32> to vector<2x32xf32>
    %114 = arith.mulf %109, %16 : vector<2x32xf32>
    %115 = arith.mulf %107, %111 : vector<2x32xf32>
    %116 = arith.addf %114, %115 : vector<2x32xf32>
    %117 = math.tanh %116 : vector<2x32xf32>
    %118 = arith.mulf %113, %117 : vector<2x32xf32>
    %c0_60 = arith.constant 0 : index
    %c0_61 = arith.constant 0 : index
    %119 = vector.load %arg16[%c0_60, %c0_61] : memref<32x512xf32, #tpu.memory_space<vmem>>, vector<32x512xf32>
    %cst_62 = arith.constant dense<0.000000e+00> : vector<2x512xf32>
    %120 = tpu.matmul %118, %119, %cst_62 {dimension_numbers = #tpu.dot_dimension_numbers<[1], [0], [0], [1], [0, 0, 1, 1], [], []>} : vector<2x32xf32>, vector<32x512xf32>, vector<2x512xf32> -> vector<2x512xf32>
    %121 = vector.extract_strided_slice %120 {offsets = [0, 0], sizes = [2, 384], strides = [1, 1]} : vector<2x512xf32> to vector<2x384xf32>
    %122 = vector.broadcast %13 : vector<1x384xf32> to vector<2x384xf32>
    %123 = arith.addf %121, %122 : vector<2x384xf32>
    %124 = math.tanh %123 : vector<2x384xf32>
    %c0_63 = arith.constant 0 : index
    %c0_64 = arith.constant 0 : index
    %125 = vector.load %arg18[%c0_63, %c0_64] : memref<384x30xf32, #tpu.memory_space<vmem>>, vector<384x30xf32>
    %cst_65 = arith.constant dense<0.000000e+00> : vector<2x30xf32>
    %126 = tpu.matmul %124, %125, %cst_65 {dimension_numbers = #tpu.dot_dimension_numbers<[1], [0], [0], [1], [0, 0, 1, 1], [], []>} : vector<2x384xf32>, vector<384x30xf32>, vector<2x30xf32> -> vector<2x30xf32>
    %127 = vector.broadcast %14 : vector<1x30xf32> to vector<2x30xf32>
    %128 = arith.addf %126, %127 : vector<2x30xf32>
    %129 = vector.extract_strided_slice %120 {offsets = [0, 384], sizes = [2, 30], strides = [1, 1]} : vector<2x512xf32> to vector<2x30xf32>
    %cst_66 = arith.constant 1.000000e+00 : f32
    %130 = vector.broadcast %cst_66 : f32 to vector<2x30xf32>
    %c3 = arith.constant 3 : index
    %c0_67 = arith.constant 0 : index
    %c0_68 = arith.constant 0 : index
    %131 = vector.load %arg0[%c3, %c0_67, %c0_68] : memref<24x2x8xf32, #tpu.memory_space<vmem>>, vector<1x2x8xf32>
    %132 = vector.shape_cast %131 : vector<1x2x8xf32> to vector<2x8xf32>
    %c4 = arith.constant 4 : index
    %c0_69 = arith.constant 0 : index
    %c0_70 = arith.constant 0 : index
    %133 = vector.load %arg0[%c4, %c0_69, %c0_70] : memref<24x2x8xf32, #tpu.memory_space<vmem>>, vector<1x2x8xf32>
    %134 = vector.shape_cast %133 : vector<1x2x8xf32> to vector<2x8xf32>
    %c5 = arith.constant 5 : index
    %c0_71 = arith.constant 0 : index
    %c0_72 = arith.constant 0 : index
    %135 = vector.load %arg0[%c5, %c0_71, %c0_72] : memref<24x2x8xf32, #tpu.memory_space<vmem>>, vector<1x2x8xf32>
    %136 = vector.shape_cast %135 : vector<1x2x8xf32> to vector<2x8xf32>
    %cst_73 = arith.constant dense<0.000000e+00> : vector<2x32xf32>
    %137 = tpu.matmul %136, %0, %cst_73 {dimension_numbers = #tpu.dot_dimension_numbers<[1], [0], [0], [1], [0, 0, 1, 1], [], []>} : vector<2x8xf32>, vector<8x32xf32>, vector<2x32xf32> -> vector<2x32xf32>
    %138 = vector.broadcast %1 : vector<1x32xf32> to vector<2x32xf32>
    %139 = arith.addf %137, %138 : vector<2x32xf32>
    %cst_74 = arith.constant 0.000000e+00 : f32
    %140 = vector.broadcast %cst_74 : f32 to vector<2x32xf32>
    %141 = arith.maximumf %139, %140 : vector<2x32xf32>
    %cst_75 = arith.constant 0.000000e+00 : f32
    %142 = vector.broadcast %cst_75 : f32 to vector<2x32xf32>
    %143 = arith.subf %142, %141 : vector<2x32xf32>
    %144 = math.exp %143 : vector<2x32xf32>
    %145 = vector.broadcast %2 : vector<1x8xf32> to vector<2x8xf32>
    %146 = arith.mulf %136, %145 : vector<2x8xf32>
    %147 = vector.broadcast %3 : vector<1x8xf32> to vector<2x8xf32>
    %148 = arith.addf %146, %147 : vector<2x8xf32>
    %cst_76 = arith.constant 0.000000e+00 : f32
    %149 = vector.broadcast %cst_76 : f32 to vector<2x8xf32>
    %150 = arith.maximumf %148, %149 : vector<2x8xf32>
    %cst_77 = arith.constant 0.000000e+00 : f32
    %151 = vector.broadcast %cst_77 : f32 to vector<2x8xf32>
    %152 = arith.subf %151, %150 : vector<2x8xf32>
    %153 = math.exp %152 : vector<2x8xf32>
    %cst_78 = arith.constant dense<0.000000e+00> : vector<2x256xf32>
    %154 = tpu.matmul %134, %11, %cst_78 {dimension_numbers = #tpu.dot_dimension_numbers<[1], [0], [0], [1], [0, 0, 1, 1], [], []>} : vector<2x8xf32>, vector<8x256xf32>, vector<2x256xf32> -> vector<2x256xf32>
    %155 = vector.extract_strided_slice %154 {offsets = [0, 0], sizes = [2, 128], strides = [1, 1]} : vector<2x256xf32> to vector<2x128xf32>
    %cst_79 = arith.constant dense<0.000000e+00> : vector<2x8xf32>
    %156 = tpu.matmul %153, %4, %cst_79 {dimension_numbers = #tpu.dot_dimension_numbers<[1], [0], [0], [1], [0, 0, 1, 1], [], []>} : vector<2x8xf32>, vector<8x8xf32>, vector<2x8xf32> -> vector<2x8xf32>
    %157 = vector.extract_strided_slice %154 {offsets = [0, 128], sizes = [2, 8], strides = [1, 1]} : vector<2x256xf32> to vector<2x8xf32>
    %158 = arith.addf %156, %157 : vector<2x8xf32>
    %159 = vector.broadcast %5 : vector<1x8xf32> to vector<2x8xf32>
    %160 = arith.addf %158, %159 : vector<2x8xf32>
    %cst_80 = arith.constant dense<0.000000e+00> : vector<2xf32>
    %161 = vector.multi_reduction <add>, %134, %cst_80 [1] : vector<2x8xf32> to vector<2xf32>
    %162 = vector.shape_cast %161 : vector<2xf32> to vector<2x1xf32>
    %cst_81 = arith.constant dense<0.000000e+00> : vector<1xf32>
    %163 = vector.multi_reduction <add>, %162, %cst_81 [0] : vector<2x1xf32> to vector<1xf32>
    %164 = vector.shape_cast %163 : vector<1xf32> to vector<1x1xf32>
    %165 = arith.mulf %118, %144 : vector<2x32xf32>
    %cst_82 = arith.constant dense<0.000000e+00> : vector<2x256xf32>
    %166 = tpu.matmul %165, %6, %cst_82 {dimension_numbers = #tpu.dot_dimension_numbers<[1], [0], [0], [1], [0, 0, 1, 1], [], []>} : vector<2x32xf32>, vector<32x256xf32>, vector<2x256xf32> -> vector<2x256xf32>
    %167 = vector.extract_strided_slice %166 {offsets = [0, 0], sizes = [2, 128], strides = [1, 1]} : vector<2x256xf32> to vector<2x128xf32>
    %168 = vector.extract_strided_slice %166 {offsets = [0, 128], sizes = [2, 8], strides = [1, 1]} : vector<2x256xf32> to vector<2x8xf32>
    %169 = vector.broadcast %7 : vector<1x8xf32> to vector<2x8xf32>
    %170 = arith.addf %168, %169 : vector<2x8xf32>
    %171 = arith.mulf %134, %132 : vector<2x8xf32>
    %cst_83 = arith.constant 1.000000e+00 : f32
    %172 = vector.broadcast %cst_83 : f32 to vector<2x8xf32>
    %173 = arith.subf %172, %134 : vector<2x8xf32>
    %174 = arith.mulf %173, %170 : vector<2x8xf32>
    %175 = arith.addf %171, %174 : vector<2x8xf32>
    %cst_84 = arith.constant dense<0.000000e+00> : vector<2x8xf32>
    %176 = tpu.matmul %175, %8, %cst_84 {dimension_numbers = #tpu.dot_dimension_numbers<[1], [0], [0], [1], [0, 0, 1, 1], [], []>} : vector<2x8xf32>, vector<8x8xf32>, vector<2x8xf32> -> vector<2x8xf32>
    %177 = vector.broadcast %9 : vector<1x8xf32> to vector<2x8xf32>
    %178 = arith.addf %176, %177 : vector<2x8xf32>
    %179 = arith.mulf %160, %178 : vector<2x8xf32>
    %cst_85 = arith.constant 1.000000e+00 : f32
    %180 = vector.broadcast %cst_85 : f32 to vector<2x8xf32>
    %181 = arith.subf %180, %160 : vector<2x8xf32>
    %182 = arith.mulf %181, %170 : vector<2x8xf32>
    %183 = arith.addf %179, %182 : vector<2x8xf32>
    %184 = arith.mulf %134, %132 : vector<2x8xf32>
    %cst_86 = arith.constant 1.000000e+00 : f32
    %185 = vector.broadcast %cst_86 : f32 to vector<2x8xf32>
    %186 = arith.subf %185, %134 : vector<2x8xf32>
    %187 = arith.mulf %186, %183 : vector<2x8xf32>
    %188 = arith.addf %184, %187 : vector<2x8xf32>
    %c1_87 = arith.constant 1 : index
    %c0_88 = arith.constant 0 : index
    %c0_89 = arith.constant 0 : index
    %189 = vector.load %arg21[%c1_87, %c0_88, %c0_89] : memref<8x2x8xf32, #tpu.memory_space<vmem>>, vector<1x2x8xf32>
    %190 = vector.shape_cast %189 : vector<1x2x8xf32> to vector<2x8xf32>
    %191 = vector.shape_cast %188 : vector<2x8xf32> to vector<1x2x8xf32>
    tpu.vector_store %arg21[%c1_87, %c0_88, %c0_89], %191 {strides = array<i32>} : memref<8x2x8xf32, #tpu.memory_space<vmem>>, vector<1x2x8xf32>,
    %192 = arith.subf %132, %170 : vector<2x8xf32>
    %193 = math.absf %192 : vector<2x8xf32>
    %194 = arith.subf %132, %178 : vector<2x8xf32>
    %195 = math.absf %194 : vector<2x8xf32>
    %196 = arith.addf %193, %195 : vector<2x8xf32>
    %197 = arith.subf %132, %183 : vector<2x8xf32>
    %198 = math.absf %197 : vector<2x8xf32>
    %199 = arith.addf %196, %198 : vector<2x8xf32>
    %200 = arith.mulf %199, %134 : vector<2x8xf32>
    %cst_90 = arith.constant dense<0.000000e+00> : vector<2xf32>
    %201 = vector.multi_reduction <add>, %200, %cst_90 [1] : vector<2x8xf32> to vector<2xf32>
    %202 = vector.shape_cast %201 : vector<2xf32> to vector<2x1xf32>
    %cst_91 = arith.constant dense<0.000000e+00> : vector<1xf32>
    %203 = vector.multi_reduction <add>, %202, %cst_91 [0] : vector<2x1xf32> to vector<1xf32>
    %204 = vector.shape_cast %203 : vector<1xf32> to vector<1x1xf32>
    %cst_92 = arith.constant 9.99999974E-6 : f32
    %205 = vector.broadcast %cst_92 : f32 to vector<1x1xf32>
    %206 = arith.addf %164, %205 : vector<1x1xf32>
    %207 = arith.divf %204, %206 : vector<1x1xf32>
    %208 = arith.addf %95, %207 : vector<1x1xf32>
    %cst_93 = arith.constant dense<0.000000e+00> : vector<2x128xf32>
    %209 = tpu.matmul %188, %10, %cst_93 {dimension_numbers = #tpu.dot_dimension_numbers<[1], [0], [0], [1], [0, 0, 1, 1], [], []>} : vector<2x8xf32>, vector<8x128xf32>, vector<2x128xf32> -> vector<2x128xf32>
    %210 = arith.addf %209, %167 : vector<2x128xf32>
    %211 = arith.addf %210, %155 : vector<2x128xf32>
    %212 = vector.broadcast %12 : vector<1x128xf32> to vector<2x128xf32>
    %213 = arith.addf %211, %212 : vector<2x128xf32>
    %214 = arith.negf %213 : vector<2x128xf32>
    %215 = math.exp %214 : vector<2x128xf32>
    %cst_94 = arith.constant 1.000000e+00 : f32
    %216 = vector.broadcast %cst_94 : f32 to vector<2x128xf32>
    %217 = arith.addf %216, %215 : vector<2x128xf32>
    %218 = arith.divf %216, %217 : vector<2x128xf32>
    %219 = math.tanh %213 : vector<2x128xf32>
    %220 = vector.extract_strided_slice %218 {offsets = [0, 0], sizes = [2, 32], strides = [1, 1]} : vector<2x128xf32> to vector<2x32xf32>
    %c96_i32_95 = arith.constant 96 : i32
    %221 = tpu.dynamic_rotate %218 by %c96_i32_95 dim 1 : vector<2x128xf32>, i32 -> vector<2x128xf32>
    %222 = vector.extract_strided_slice %221 {offsets = [0, 0], sizes = [2, 32], strides = [1, 1]} : vector<2x128xf32> to vector<2x32xf32>
    %c64_i32_96 = arith.constant 64 : i32
    %223 = tpu.dynamic_rotate %219 by %c64_i32_96 dim 1 : vector<2x128xf32>, i32 -> vector<2x128xf32>
    %224 = vector.extract_strided_slice %223 {offsets = [0, 0], sizes = [2, 32], strides = [1, 1]} : vector<2x128xf32> to vector<2x32xf32>
    %c32_i32_97 = arith.constant 32 : i32
    %225 = tpu.dynamic_rotate %218 by %c32_i32_97 dim 1 : vector<2x128xf32>, i32 -> vector<2x128xf32>
    %226 = vector.extract_strided_slice %225 {offsets = [0, 0], sizes = [2, 32], strides = [1, 1]} : vector<2x128xf32> to vector<2x32xf32>
    %227 = arith.mulf %222, %116 : vector<2x32xf32>
    %228 = arith.mulf %220, %224 : vector<2x32xf32>
    %229 = arith.addf %227, %228 : vector<2x32xf32>
    %230 = math.tanh %229 : vector<2x32xf32>
    %231 = arith.mulf %226, %230 : vector<2x32xf32>
    %c0_98 = arith.constant 0 : index
    %c0_99 = arith.constant 0 : index
    %232 = vector.load %arg16[%c0_98, %c0_99] : memref<32x512xf32, #tpu.memory_space<vmem>>, vector<32x512xf32>
    %cst_100 = arith.constant dense<0.000000e+00> : vector<2x512xf32>
    %233 = tpu.matmul %231, %232, %cst_100 {dimension_numbers = #tpu.dot_dimension_numbers<[1], [0], [0], [1], [0, 0, 1, 1], [], []>} : vector<2x32xf32>, vector<32x512xf32>, vector<2x512xf32> -> vector<2x512xf32>
    %234 = vector.extract_strided_slice %233 {offsets = [0, 0], sizes = [2, 384], strides = [1, 1]} : vector<2x512xf32> to vector<2x384xf32>
    %235 = vector.broadcast %13 : vector<1x384xf32> to vector<2x384xf32>
    %236 = arith.addf %234, %235 : vector<2x384xf32>
    %237 = math.tanh %236 : vector<2x384xf32>
    %c0_101 = arith.constant 0 : index
    %c0_102 = arith.constant 0 : index
    %238 = vector.load %arg18[%c0_101, %c0_102] : memref<384x30xf32, #tpu.memory_space<vmem>>, vector<384x30xf32>
    %cst_103 = arith.constant dense<0.000000e+00> : vector<2x30xf32>
    %239 = tpu.matmul %237, %238, %cst_103 {dimension_numbers = #tpu.dot_dimension_numbers<[1], [0], [0], [1], [0, 0, 1, 1], [], []>} : vector<2x384xf32>, vector<384x30xf32>, vector<2x30xf32> -> vector<2x30xf32>
    %240 = vector.broadcast %14 : vector<1x30xf32> to vector<2x30xf32>
    %241 = arith.addf %239, %240 : vector<2x30xf32>
    %242 = vector.extract_strided_slice %233 {offsets = [0, 384], sizes = [2, 30], strides = [1, 1]} : vector<2x512xf32> to vector<2x30xf32>
    %243 = arith.maximumf %128, %241 : vector<2x30xf32>
    %244 = arith.subf %128, %243 : vector<2x30xf32>
    %245 = math.exp %244 : vector<2x30xf32>
    %246 = arith.subf %241, %243 : vector<2x30xf32>
    %247 = math.exp %246 : vector<2x30xf32>
    %248 = arith.mulf %129, %245 : vector<2x30xf32>
    %249 = arith.mulf %247, %242 : vector<2x30xf32>
    %250 = arith.addf %248, %249 : vector<2x30xf32>
    %251 = arith.mulf %130, %245 : vector<2x30xf32>
    %252 = arith.addf %251, %247 : vector<2x30xf32>
    %c6 = arith.constant 6 : index
    %c0_104 = arith.constant 0 : index
    %c0_105 = arith.constant 0 : index
    %253 = vector.load %arg0[%c6, %c0_104, %c0_105] : memref<24x2x8xf32, #tpu.memory_space<vmem>>, vector<1x2x8xf32>
    %254 = vector.shape_cast %253 : vector<1x2x8xf32> to vector<2x8xf32>
    %c7 = arith.constant 7 : index
    %c0_106 = arith.constant 0 : index
    %c0_107 = arith.constant 0 : index
    %255 = vector.load %arg0[%c7, %c0_106, %c0_107] : memref<24x2x8xf32, #tpu.memory_space<vmem>>, vector<1x2x8xf32>
    %256 = vector.shape_cast %255 : vector<1x2x8xf32> to vector<2x8xf32>
    %c8 = arith.constant 8 : index
    %c0_108 = arith.constant 0 : index
    %c0_109 = arith.constant 0 : index
    %257 = vector.load %arg0[%c8, %c0_108, %c0_109] : memref<24x2x8xf32, #tpu.memory_space<vmem>>, vector<1x2x8xf32>
    %258 = vector.shape_cast %257 : vector<1x2x8xf32> to vector<2x8xf32>
    %cst_110 = arith.constant dense<0.000000e+00> : vector<2x32xf32>
    %259 = tpu.matmul %258, %0, %cst_110 {dimension_numbers = #tpu.dot_dimension_numbers<[1], [0], [0], [1], [0, 0, 1, 1], [], []>} : vector<2x8xf32>, vector<8x32xf32>, vector<2x32xf32> -> vector<2x32xf32>
    %260 = vector.broadcast %1 : vector<1x32xf32> to vector<2x32xf32>
    %261 = arith.addf %259, %260 : vector<2x32xf32>
    %cst_111 = arith.constant 0.000000e+00 : f32
    %262 = vector.broadcast %cst_111 : f32 to vector<2x32xf32>
    %263 = arith.maximumf %261, %262 : vector<2x32xf32>
    %cst_112 = arith.constant 0.000000e+00 : f32
    %264 = vector.broadcast %cst_112 : f32 to vector<2x32xf32>
    %265 = arith.subf %264, %263 : vector<2x32xf32>
    %266 = math.exp %265 : vector<2x32xf32>
    %267 = vector.broadcast %2 : vector<1x8xf32> to vector<2x8xf32>
    %268 = arith.mulf %258, %267 : vector<2x8xf32>
    %269 = vector.broadcast %3 : vector<1x8xf32> to vector<2x8xf32>
    %270 = arith.addf %268, %269 : vector<2x8xf32>
    %cst_113 = arith.constant 0.000000e+00 : f32
    %271 = vector.broadcast %cst_113 : f32 to vector<2x8xf32>
    %272 = arith.maximumf %270, %271 : vector<2x8xf32>
    %cst_114 = arith.constant 0.000000e+00 : f32
    %273 = vector.broadcast %cst_114 : f32 to vector<2x8xf32>
    %274 = arith.subf %273, %272 : vector<2x8xf32>
    %275 = math.exp %274 : vector<2x8xf32>
    %cst_115 = arith.constant dense<0.000000e+00> : vector<2x256xf32>
    %276 = tpu.matmul %256, %11, %cst_115 {dimension_numbers = #tpu.dot_dimension_numbers<[1], [0], [0], [1], [0, 0, 1, 1], [], []>} : vector<2x8xf32>, vector<8x256xf32>, vector<2x256xf32> -> vector<2x256xf32>
    %277 = vector.extract_strided_slice %276 {offsets = [0, 0], sizes = [2, 128], strides = [1, 1]} : vector<2x256xf32> to vector<2x128xf32>
    %cst_116 = arith.constant dense<0.000000e+00> : vector<2x8xf32>
    %278 = tpu.matmul %275, %4, %cst_116 {dimension_numbers = #tpu.dot_dimension_numbers<[1], [0], [0], [1], [0, 0, 1, 1], [], []>} : vector<2x8xf32>, vector<8x8xf32>, vector<2x8xf32> -> vector<2x8xf32>
    %279 = vector.extract_strided_slice %276 {offsets = [0, 128], sizes = [2, 8], strides = [1, 1]} : vector<2x256xf32> to vector<2x8xf32>
    %280 = arith.addf %278, %279 : vector<2x8xf32>
    %281 = vector.broadcast %5 : vector<1x8xf32> to vector<2x8xf32>
    %282 = arith.addf %280, %281 : vector<2x8xf32>
    %cst_117 = arith.constant dense<0.000000e+00> : vector<2xf32>
    %283 = vector.multi_reduction <add>, %256, %cst_117 [1] : vector<2x8xf32> to vector<2xf32>
    %284 = vector.shape_cast %283 : vector<2xf32> to vector<2x1xf32>
    %cst_118 = arith.constant dense<0.000000e+00> : vector<1xf32>
    %285 = vector.multi_reduction <add>, %284, %cst_118 [0] : vector<2x1xf32> to vector<1xf32>
    %286 = vector.shape_cast %285 : vector<1xf32> to vector<1x1xf32>
    %287 = arith.mulf %231, %266 : vector<2x32xf32>
    %cst_119 = arith.constant dense<0.000000e+00> : vector<2x256xf32>
    %288 = tpu.matmul %287, %6, %cst_119 {dimension_numbers = #tpu.dot_dimension_numbers<[1], [0], [0], [1], [0, 0, 1, 1], [], []>} : vector<2x32xf32>, vector<32x256xf32>, vector<2x256xf32> -> vector<2x256xf32>
    %289 = vector.extract_strided_slice %288 {offsets = [0, 0], sizes = [2, 128], strides = [1, 1]} : vector<2x256xf32> to vector<2x128xf32>
    %290 = vector.extract_strided_slice %288 {offsets = [0, 128], sizes = [2, 8], strides = [1, 1]} : vector<2x256xf32> to vector<2x8xf32>
    %291 = vector.broadcast %7 : vector<1x8xf32> to vector<2x8xf32>
    %292 = arith.addf %290, %291 : vector<2x8xf32>
    %293 = arith.mulf %256, %254 : vector<2x8xf32>
    %cst_120 = arith.constant 1.000000e+00 : f32
    %294 = vector.broadcast %cst_120 : f32 to vector<2x8xf32>
    %295 = arith.subf %294, %256 : vector<2x8xf32>
    %296 = arith.mulf %295, %292 : vector<2x8xf32>
    %297 = arith.addf %293, %296 : vector<2x8xf32>
    %cst_121 = arith.constant dense<0.000000e+00> : vector<2x8xf32>
    %298 = tpu.matmul %297, %8, %cst_121 {dimension_numbers = #tpu.dot_dimension_numbers<[1], [0], [0], [1], [0, 0, 1, 1], [], []>} : vector<2x8xf32>, vector<8x8xf32>, vector<2x8xf32> -> vector<2x8xf32>
    %299 = vector.broadcast %9 : vector<1x8xf32> to vector<2x8xf32>
    %300 = arith.addf %298, %299 : vector<2x8xf32>
    %301 = arith.mulf %282, %300 : vector<2x8xf32>
    %cst_122 = arith.constant 1.000000e+00 : f32
    %302 = vector.broadcast %cst_122 : f32 to vector<2x8xf32>
    %303 = arith.subf %302, %282 : vector<2x8xf32>
    %304 = arith.mulf %303, %292 : vector<2x8xf32>
    %305 = arith.addf %301, %304 : vector<2x8xf32>
    %306 = arith.mulf %256, %254 : vector<2x8xf32>
    %cst_123 = arith.constant 1.000000e+00 : f32
    %307 = vector.broadcast %cst_123 : f32 to vector<2x8xf32>
    %308 = arith.subf %307, %256 : vector<2x8xf32>
    %309 = arith.mulf %308, %305 : vector<2x8xf32>
    %310 = arith.addf %306, %309 : vector<2x8xf32>
    %c2_124 = arith.constant 2 : index
    %c0_125 = arith.constant 0 : index
    %c0_126 = arith.constant 0 : index
    %311 = vector.load %arg21[%c2_124, %c0_125, %c0_126] : memref<8x2x8xf32, #tpu.memory_space<vmem>>, vector<1x2x8xf32>
    %312 = vector.shape_cast %311 : vector<1x2x8xf32> to vector<2x8xf32>
    %313 = vector.shape_cast %310 : vector<2x8xf32> to vector<1x2x8xf32>
    tpu.vector_store %arg21[%c2_124, %c0_125, %c0_126], %313 {strides = array<i32>} : memref<8x2x8xf32, #tpu.memory_space<vmem>>, vector<1x2x8xf32>,
    %314 = arith.subf %254, %292 : vector<2x8xf32>
    %315 = math.absf %314 : vector<2x8xf32>
    %316 = arith.subf %254, %300 : vector<2x8xf32>
    %317 = math.absf %316 : vector<2x8xf32>
    %318 = arith.addf %315, %317 : vector<2x8xf32>
    %319 = arith.subf %254, %305 : vector<2x8xf32>
    %320 = math.absf %319 : vector<2x8xf32>
    %321 = arith.addf %318, %320 : vector<2x8xf32>
    %322 = arith.mulf %321, %256 : vector<2x8xf32>
    %cst_127 = arith.constant dense<0.000000e+00> : vector<2xf32>
    %323 = vector.multi_reduction <add>, %322, %cst_127 [1] : vector<2x8xf32> to vector<2xf32>
    %324 = vector.shape_cast %323 : vector<2xf32> to vector<2x1xf32>
    %cst_128 = arith.constant dense<0.000000e+00> : vector<1xf32>
    %325 = vector.multi_reduction <add>, %324, %cst_128 [0] : vector<2x1xf32> to vector<1xf32>
    %326 = vector.shape_cast %325 : vector<1xf32> to vector<1x1xf32>
    %cst_129 = arith.constant 9.99999974E-6 : f32
    %327 = vector.broadcast %cst_129 : f32 to vector<1x1xf32>
    %328 = arith.addf %286, %327 : vector<1x1xf32>
    %329 = arith.divf %326, %328 : vector<1x1xf32>
    %330 = arith.addf %208, %329 : vector<1x1xf32>
    %cst_130 = arith.constant dense<0.000000e+00> : vector<2x128xf32>
    %331 = tpu.matmul %310, %10, %cst_130 {dimension_numbers = #tpu.dot_dimension_numbers<[1], [0], [0], [1], [0, 0, 1, 1], [], []>} : vector<2x8xf32>, vector<8x128xf32>, vector<2x128xf32> -> vector<2x128xf32>
    %332 = arith.addf %331, %289 : vector<2x128xf32>
    %333 = arith.addf %332, %277 : vector<2x128xf32>
    %334 = vector.broadcast %12 : vector<1x128xf32> to vector<2x128xf32>
    %335 = arith.addf %333, %334 : vector<2x128xf32>
    %336 = arith.negf %335 : vector<2x128xf32>
    %337 = math.exp %336 : vector<2x128xf32>
    %cst_131 = arith.constant 1.000000e+00 : f32
    %338 = vector.broadcast %cst_131 : f32 to vector<2x128xf32>
    %339 = arith.addf %338, %337 : vector<2x128xf32>
    %340 = arith.divf %338, %339 : vector<2x128xf32>
    %341 = math.tanh %335 : vector<2x128xf32>
    %342 = vector.extract_strided_slice %340 {offsets = [0, 0], sizes = [2, 32], strides = [1, 1]} : vector<2x128xf32> to vector<2x32xf32>
    %c96_i32_132 = arith.constant 96 : i32
    %343 = tpu.dynamic_rotate %340 by %c96_i32_132 dim 1 : vector<2x128xf32>, i32 -> vector<2x128xf32>
    %344 = vector.extract_strided_slice %343 {offsets = [0, 0], sizes = [2, 32], strides = [1, 1]} : vector<2x128xf32> to vector<2x32xf32>
    %c64_i32_133 = arith.constant 64 : i32
    %345 = tpu.dynamic_rotate %341 by %c64_i32_133 dim 1 : vector<2x128xf32>, i32 -> vector<2x128xf32>
    %346 = vector.extract_strided_slice %345 {offsets = [0, 0], sizes = [2, 32], strides = [1, 1]} : vector<2x128xf32> to vector<2x32xf32>
    %c32_i32_134 = arith.constant 32 : i32
    %347 = tpu.dynamic_rotate %340 by %c32_i32_134 dim 1 : vector<2x128xf32>, i32 -> vector<2x128xf32>
    %348 = vector.extract_strided_slice %347 {offsets = [0, 0], sizes = [2, 32], strides = [1, 1]} : vector<2x128xf32> to vector<2x32xf32>
    %349 = arith.mulf %344, %229 : vector<2x32xf32>
    %350 = arith.mulf %342, %346 : vector<2x32xf32>
    %351 = arith.addf %349, %350 : vector<2x32xf32>
    %352 = math.tanh %351 : vector<2x32xf32>
    %353 = arith.mulf %348, %352 : vector<2x32xf32>
    %c0_135 = arith.constant 0 : index
    %c0_136 = arith.constant 0 : index
    %354 = vector.load %arg16[%c0_135, %c0_136] : memref<32x512xf32, #tpu.memory_space<vmem>>, vector<32x512xf32>
    %cst_137 = arith.constant dense<0.000000e+00> : vector<2x512xf32>
    %355 = tpu.matmul %353, %354, %cst_137 {dimension_numbers = #tpu.dot_dimension_numbers<[1], [0], [0], [1], [0, 0, 1, 1], [], []>} : vector<2x32xf32>, vector<32x512xf32>, vector<2x512xf32> -> vector<2x512xf32>
    %356 = vector.extract_strided_slice %355 {offsets = [0, 0], sizes = [2, 384], strides = [1, 1]} : vector<2x512xf32> to vector<2x384xf32>
    %357 = vector.broadcast %13 : vector<1x384xf32> to vector<2x384xf32>
    %358 = arith.addf %356, %357 : vector<2x384xf32>
    %359 = math.tanh %358 : vector<2x384xf32>
    %c0_138 = arith.constant 0 : index
    %c0_139 = arith.constant 0 : index
    %360 = vector.load %arg18[%c0_138, %c0_139] : memref<384x30xf32, #tpu.memory_space<vmem>>, vector<384x30xf32>
    %cst_140 = arith.constant dense<0.000000e+00> : vector<2x30xf32>
    %361 = tpu.matmul %359, %360, %cst_140 {dimension_numbers = #tpu.dot_dimension_numbers<[1], [0], [0], [1], [0, 0, 1, 1], [], []>} : vector<2x384xf32>, vector<384x30xf32>, vector<2x30xf32> -> vector<2x30xf32>
    %362 = vector.broadcast %14 : vector<1x30xf32> to vector<2x30xf32>
    %363 = arith.addf %361, %362 : vector<2x30xf32>
    %364 = vector.extract_strided_slice %355 {offsets = [0, 384], sizes = [2, 30], strides = [1, 1]} : vector<2x512xf32> to vector<2x30xf32>
    %365 = arith.maximumf %243, %363 : vector<2x30xf32>
    %366 = arith.subf %243, %365 : vector<2x30xf32>
    %367 = math.exp %366 : vector<2x30xf32>
    %368 = arith.subf %363, %365 : vector<2x30xf32>
    %369 = math.exp %368 : vector<2x30xf32>
    %370 = arith.mulf %250, %367 : vector<2x30xf32>
    %371 = arith.mulf %369, %364 : vector<2x30xf32>
    %372 = arith.addf %370, %371 : vector<2x30xf32>
    %373 = arith.mulf %252, %367 : vector<2x30xf32>
    %374 = arith.addf %373, %369 : vector<2x30xf32>
    %c9 = arith.constant 9 : index
    %c0_141 = arith.constant 0 : index
    %c0_142 = arith.constant 0 : index
    %375 = vector.load %arg0[%c9, %c0_141, %c0_142] : memref<24x2x8xf32, #tpu.memory_space<vmem>>, vector<1x2x8xf32>
    %376 = vector.shape_cast %375 : vector<1x2x8xf32> to vector<2x8xf32>
    %c10 = arith.constant 10 : index
    %c0_143 = arith.constant 0 : index
    %c0_144 = arith.constant 0 : index
    %377 = vector.load %arg0[%c10, %c0_143, %c0_144] : memref<24x2x8xf32, #tpu.memory_space<vmem>>, vector<1x2x8xf32>
    %378 = vector.shape_cast %377 : vector<1x2x8xf32> to vector<2x8xf32>
    %c11 = arith.constant 11 : index
    %c0_145 = arith.constant 0 : index
    %c0_146 = arith.constant 0 : index
    %379 = vector.load %arg0[%c11, %c0_145, %c0_146] : memref<24x2x8xf32, #tpu.memory_space<vmem>>, vector<1x2x8xf32>
    %380 = vector.shape_cast %379 : vector<1x2x8xf32> to vector<2x8xf32>
    %cst_147 = arith.constant dense<0.000000e+00> : vector<2x32xf32>
    %381 = tpu.matmul %380, %0, %cst_147 {dimension_numbers = #tpu.dot_dimension_numbers<[1], [0], [0], [1], [0, 0, 1, 1], [], []>} : vector<2x8xf32>, vector<8x32xf32>, vector<2x32xf32> -> vector<2x32xf32>
    %382 = vector.broadcast %1 : vector<1x32xf32> to vector<2x32xf32>
    %383 = arith.addf %381, %382 : vector<2x32xf32>
    %cst_148 = arith.constant 0.000000e+00 : f32
    %384 = vector.broadcast %cst_148 : f32 to vector<2x32xf32>
    %385 = arith.maximumf %383, %384 : vector<2x32xf32>
    %cst_149 = arith.constant 0.000000e+00 : f32
    %386 = vector.broadcast %cst_149 : f32 to vector<2x32xf32>
    %387 = arith.subf %386, %385 : vector<2x32xf32>
    %388 = math.exp %387 : vector<2x32xf32>
    %389 = vector.broadcast %2 : vector<1x8xf32> to vector<2x8xf32>
    %390 = arith.mulf %380, %389 : vector<2x8xf32>
    %391 = vector.broadcast %3 : vector<1x8xf32> to vector<2x8xf32>
    %392 = arith.addf %390, %391 : vector<2x8xf32>
    %cst_150 = arith.constant 0.000000e+00 : f32
    %393 = vector.broadcast %cst_150 : f32 to vector<2x8xf32>
    %394 = arith.maximumf %392, %393 : vector<2x8xf32>
    %cst_151 = arith.constant 0.000000e+00 : f32
    %395 = vector.broadcast %cst_151 : f32 to vector<2x8xf32>
    %396 = arith.subf %395, %394 : vector<2x8xf32>
    %397 = math.exp %396 : vector<2x8xf32>
    %cst_152 = arith.constant dense<0.000000e+00> : vector<2x256xf32>
    %398 = tpu.matmul %378, %11, %cst_152 {dimension_numbers = #tpu.dot_dimension_numbers<[1], [0], [0], [1], [0, 0, 1, 1], [], []>} : vector<2x8xf32>, vector<8x256xf32>, vector<2x256xf32> -> vector<2x256xf32>
    %399 = vector.extract_strided_slice %398 {offsets = [0, 0], sizes = [2, 128], strides = [1, 1]} : vector<2x256xf32> to vector<2x128xf32>
    %cst_153 = arith.constant dense<0.000000e+00> : vector<2x8xf32>
    %400 = tpu.matmul %397, %4, %cst_153 {dimension_numbers = #tpu.dot_dimension_numbers<[1], [0], [0], [1], [0, 0, 1, 1], [], []>} : vector<2x8xf32>, vector<8x8xf32>, vector<2x8xf32> -> vector<2x8xf32>
    %401 = vector.extract_strided_slice %398 {offsets = [0, 128], sizes = [2, 8], strides = [1, 1]} : vector<2x256xf32> to vector<2x8xf32>
    %402 = arith.addf %400, %401 : vector<2x8xf32>
    %403 = vector.broadcast %5 : vector<1x8xf32> to vector<2x8xf32>
    %404 = arith.addf %402, %403 : vector<2x8xf32>
    %cst_154 = arith.constant dense<0.000000e+00> : vector<2xf32>
    %405 = vector.multi_reduction <add>, %378, %cst_154 [1] : vector<2x8xf32> to vector<2xf32>
    %406 = vector.shape_cast %405 : vector<2xf32> to vector<2x1xf32>
    %cst_155 = arith.constant dense<0.000000e+00> : vector<1xf32>
    %407 = vector.multi_reduction <add>, %406, %cst_155 [0] : vector<2x1xf32> to vector<1xf32>
    %408 = vector.shape_cast %407 : vector<1xf32> to vector<1x1xf32>
    %409 = arith.mulf %353, %388 : vector<2x32xf32>
    %cst_156 = arith.constant dense<0.000000e+00> : vector<2x256xf32>
    %410 = tpu.matmul %409, %6, %cst_156 {dimension_numbers = #tpu.dot_dimension_numbers<[1], [0], [0], [1], [0, 0, 1, 1], [], []>} : vector<2x32xf32>, vector<32x256xf32>, vector<2x256xf32> -> vector<2x256xf32>
    %411 = vector.extract_strided_slice %410 {offsets = [0, 0], sizes = [2, 128], strides = [1, 1]} : vector<2x256xf32> to vector<2x128xf32>
    %412 = vector.extract_strided_slice %410 {offsets = [0, 128], sizes = [2, 8], strides = [1, 1]} : vector<2x256xf32> to vector<2x8xf32>
    %413 = vector.broadcast %7 : vector<1x8xf32> to vector<2x8xf32>
    %414 = arith.addf %412, %413 : vector<2x8xf32>
    %415 = arith.mulf %378, %376 : vector<2x8xf32>
    %cst_157 = arith.constant 1.000000e+00 : f32
    %416 = vector.broadcast %cst_157 : f32 to vector<2x8xf32>
    %417 = arith.subf %416, %378 : vector<2x8xf32>
    %418 = arith.mulf %417, %414 : vector<2x8xf32>
    %419 = arith.addf %415, %418 : vector<2x8xf32>
    %cst_158 = arith.constant dense<0.000000e+00> : vector<2x8xf32>
    %420 = tpu.matmul %419, %8, %cst_158 {dimension_numbers = #tpu.dot_dimension_numbers<[1], [0], [0], [1], [0, 0, 1, 1], [], []>} : vector<2x8xf32>, vector<8x8xf32>, vector<2x8xf32> -> vector<2x8xf32>
    %421 = vector.broadcast %9 : vector<1x8xf32> to vector<2x8xf32>
    %422 = arith.addf %420, %421 : vector<2x8xf32>
    %423 = arith.mulf %404, %422 : vector<2x8xf32>
    %cst_159 = arith.constant 1.000000e+00 : f32
    %424 = vector.broadcast %cst_159 : f32 to vector<2x8xf32>
    %425 = arith.subf %424, %404 : vector<2x8xf32>
    %426 = arith.mulf %425, %414 : vector<2x8xf32>
    %427 = arith.addf %423, %426 : vector<2x8xf32>
    %428 = arith.mulf %378, %376 : vector<2x8xf32>
    %cst_160 = arith.constant 1.000000e+00 : f32
    %429 = vector.broadcast %cst_160 : f32 to vector<2x8xf32>
    %430 = arith.subf %429, %378 : vector<2x8xf32>
    %431 = arith.mulf %430, %427 : vector<2x8xf32>
    %432 = arith.addf %428, %431 : vector<2x8xf32>
    %c3_161 = arith.constant 3 : index
    %c0_162 = arith.constant 0 : index
    %c0_163 = arith.constant 0 : index
    %433 = vector.load %arg21[%c3_161, %c0_162, %c0_163] : memref<8x2x8xf32, #tpu.memory_space<vmem>>, vector<1x2x8xf32>
    %434 = vector.shape_cast %433 : vector<1x2x8xf32> to vector<2x8xf32>
    %435 = vector.shape_cast %432 : vector<2x8xf32> to vector<1x2x8xf32>
    tpu.vector_store %arg21[%c3_161, %c0_162, %c0_163], %435 {strides = array<i32>} : memref<8x2x8xf32, #tpu.memory_space<vmem>>, vector<1x2x8xf32>,
    %436 = arith.subf %376, %414 : vector<2x8xf32>
    %437 = math.absf %436 : vector<2x8xf32>
    %438 = arith.subf %376, %422 : vector<2x8xf32>
    %439 = math.absf %438 : vector<2x8xf32>
    %440 = arith.addf %437, %439 : vector<2x8xf32>
    %441 = arith.subf %376, %427 : vector<2x8xf32>
    %442 = math.absf %441 : vector<2x8xf32>
    %443 = arith.addf %440, %442 : vector<2x8xf32>
    %444 = arith.mulf %443, %378 : vector<2x8xf32>
    %cst_164 = arith.constant dense<0.000000e+00> : vector<2xf32>
    %445 = vector.multi_reduction <add>, %444, %cst_164 [1] : vector<2x8xf32> to vector<2xf32>
    %446 = vector.shape_cast %445 : vector<2xf32> to vector<2x1xf32>
    %cst_165 = arith.constant dense<0.000000e+00> : vector<1xf32>
    %447 = vector.multi_reduction <add>, %446, %cst_165 [0] : vector<2x1xf32> to vector<1xf32>
    %448 = vector.shape_cast %447 : vector<1xf32> to vector<1x1xf32>
    %cst_166 = arith.constant 9.99999974E-6 : f32
    %449 = vector.broadcast %cst_166 : f32 to vector<1x1xf32>
    %450 = arith.addf %408, %449 : vector<1x1xf32>
    %451 = arith.divf %448, %450 : vector<1x1xf32>
    %452 = arith.addf %330, %451 : vector<1x1xf32>
    %cst_167 = arith.constant dense<0.000000e+00> : vector<2x128xf32>
    %453 = tpu.matmul %432, %10, %cst_167 {dimension_numbers = #tpu.dot_dimension_numbers<[1], [0], [0], [1], [0, 0, 1, 1], [], []>} : vector<2x8xf32>, vector<8x128xf32>, vector<2x128xf32> -> vector<2x128xf32>
    %454 = arith.addf %453, %411 : vector<2x128xf32>
    %455 = arith.addf %454, %399 : vector<2x128xf32>
    %456 = vector.broadcast %12 : vector<1x128xf32> to vector<2x128xf32>
    %457 = arith.addf %455, %456 : vector<2x128xf32>
    %458 = arith.negf %457 : vector<2x128xf32>
    %459 = math.exp %458 : vector<2x128xf32>
    %cst_168 = arith.constant 1.000000e+00 : f32
    %460 = vector.broadcast %cst_168 : f32 to vector<2x128xf32>
    %461 = arith.addf %460, %459 : vector<2x128xf32>
    %462 = arith.divf %460, %461 : vector<2x128xf32>
    %463 = math.tanh %457 : vector<2x128xf32>
    %464 = vector.extract_strided_slice %462 {offsets = [0, 0], sizes = [2, 32], strides = [1, 1]} : vector<2x128xf32> to vector<2x32xf32>
    %c96_i32_169 = arith.constant 96 : i32
    %465 = tpu.dynamic_rotate %462 by %c96_i32_169 dim 1 : vector<2x128xf32>, i32 -> vector<2x128xf32>
    %466 = vector.extract_strided_slice %465 {offsets = [0, 0], sizes = [2, 32], strides = [1, 1]} : vector<2x128xf32> to vector<2x32xf32>
    %c64_i32_170 = arith.constant 64 : i32
    %467 = tpu.dynamic_rotate %463 by %c64_i32_170 dim 1 : vector<2x128xf32>, i32 -> vector<2x128xf32>
    %468 = vector.extract_strided_slice %467 {offsets = [0, 0], sizes = [2, 32], strides = [1, 1]} : vector<2x128xf32> to vector<2x32xf32>
    %c32_i32_171 = arith.constant 32 : i32
    %469 = tpu.dynamic_rotate %462 by %c32_i32_171 dim 1 : vector<2x128xf32>, i32 -> vector<2x128xf32>
    %470 = vector.extract_strided_slice %469 {offsets = [0, 0], sizes = [2, 32], strides = [1, 1]} : vector<2x128xf32> to vector<2x32xf32>
    %471 = arith.mulf %466, %351 : vector<2x32xf32>
    %472 = arith.mulf %464, %468 : vector<2x32xf32>
    %473 = arith.addf %471, %472 : vector<2x32xf32>
    %474 = math.tanh %473 : vector<2x32xf32>
    %475 = arith.mulf %470, %474 : vector<2x32xf32>
    %c0_172 = arith.constant 0 : index
    %c0_173 = arith.constant 0 : index
    %476 = vector.load %arg16[%c0_172, %c0_173] : memref<32x512xf32, #tpu.memory_space<vmem>>, vector<32x512xf32>
    %cst_174 = arith.constant dense<0.000000e+00> : vector<2x512xf32>
    %477 = tpu.matmul %475, %476, %cst_174 {dimension_numbers = #tpu.dot_dimension_numbers<[1], [0], [0], [1], [0, 0, 1, 1], [], []>} : vector<2x32xf32>, vector<32x512xf32>, vector<2x512xf32> -> vector<2x512xf32>
    %478 = vector.extract_strided_slice %477 {offsets = [0, 0], sizes = [2, 384], strides = [1, 1]} : vector<2x512xf32> to vector<2x384xf32>
    %479 = vector.broadcast %13 : vector<1x384xf32> to vector<2x384xf32>
    %480 = arith.addf %478, %479 : vector<2x384xf32>
    %481 = math.tanh %480 : vector<2x384xf32>
    %c0_175 = arith.constant 0 : index
    %c0_176 = arith.constant 0 : index
    %482 = vector.load %arg18[%c0_175, %c0_176] : memref<384x30xf32, #tpu.memory_space<vmem>>, vector<384x30xf32>
    %cst_177 = arith.constant dense<0.000000e+00> : vector<2x30xf32>
    %483 = tpu.matmul %481, %482, %cst_177 {dimension_numbers = #tpu.dot_dimension_numbers<[1], [0], [0], [1], [0, 0, 1, 1], [], []>} : vector<2x384xf32>, vector<384x30xf32>, vector<2x30xf32> -> vector<2x30xf32>
    %484 = vector.broadcast %14 : vector<1x30xf32> to vector<2x30xf32>
    %485 = arith.addf %483, %484 : vector<2x30xf32>
    %486 = vector.extract_strided_slice %477 {offsets = [0, 384], sizes = [2, 30], strides = [1, 1]} : vector<2x512xf32> to vector<2x30xf32>
    %487 = arith.maximumf %365, %485 : vector<2x30xf32>
    %488 = arith.subf %365, %487 : vector<2x30xf32>
    %489 = math.exp %488 : vector<2x30xf32>
    %490 = arith.subf %485, %487 : vector<2x30xf32>
    %491 = math.exp %490 : vector<2x30xf32>
    %492 = arith.mulf %372, %489 : vector<2x30xf32>
    %493 = arith.mulf %491, %486 : vector<2x30xf32>
    %494 = arith.addf %492, %493 : vector<2x30xf32>
    %495 = arith.mulf %374, %489 : vector<2x30xf32>
    %496 = arith.addf %495, %491 : vector<2x30xf32>
    %c12 = arith.constant 12 : index
    %c0_178 = arith.constant 0 : index
    %c0_179 = arith.constant 0 : index
    %497 = vector.load %arg0[%c12, %c0_178, %c0_179] : memref<24x2x8xf32, #tpu.memory_space<vmem>>, vector<1x2x8xf32>
    %498 = vector.shape_cast %497 : vector<1x2x8xf32> to vector<2x8xf32>
    %c13 = arith.constant 13 : index
    %c0_180 = arith.constant 0 : index
    %c0_181 = arith.constant 0 : index
    %499 = vector.load %arg0[%c13, %c0_180, %c0_181] : memref<24x2x8xf32, #tpu.memory_space<vmem>>, vector<1x2x8xf32>
    %500 = vector.shape_cast %499 : vector<1x2x8xf32> to vector<2x8xf32>
    %c14 = arith.constant 14 : index
    %c0_182 = arith.constant 0 : index
    %c0_183 = arith.constant 0 : index
    %501 = vector.load %arg0[%c14, %c0_182, %c0_183] : memref<24x2x8xf32, #tpu.memory_space<vmem>>, vector<1x2x8xf32>
    %502 = vector.shape_cast %501 : vector<1x2x8xf32> to vector<2x8xf32>
    %cst_184 = arith.constant dense<0.000000e+00> : vector<2x32xf32>
    %503 = tpu.matmul %502, %0, %cst_184 {dimension_numbers = #tpu.dot_dimension_numbers<[1], [0], [0], [1], [0, 0, 1, 1], [], []>} : vector<2x8xf32>, vector<8x32xf32>, vector<2x32xf32> -> vector<2x32xf32>
    %504 = vector.broadcast %1 : vector<1x32xf32> to vector<2x32xf32>
    %505 = arith.addf %503, %504 : vector<2x32xf32>
    %cst_185 = arith.constant 0.000000e+00 : f32
    %506 = vector.broadcast %cst_185 : f32 to vector<2x32xf32>
    %507 = arith.maximumf %505, %506 : vector<2x32xf32>
    %cst_186 = arith.constant 0.000000e+00 : f32
    %508 = vector.broadcast %cst_186 : f32 to vector<2x32xf32>
    %509 = arith.subf %508, %507 : vector<2x32xf32>
    %510 = math.exp %509 : vector<2x32xf32>
    %511 = vector.broadcast %2 : vector<1x8xf32> to vector<2x8xf32>
    %512 = arith.mulf %502, %511 : vector<2x8xf32>
    %513 = vector.broadcast %3 : vector<1x8xf32> to vector<2x8xf32>
    %514 = arith.addf %512, %513 : vector<2x8xf32>
    %cst_187 = arith.constant 0.000000e+00 : f32
    %515 = vector.broadcast %cst_187 : f32 to vector<2x8xf32>
    %516 = arith.maximumf %514, %515 : vector<2x8xf32>
    %cst_188 = arith.constant 0.000000e+00 : f32
    %517 = vector.broadcast %cst_188 : f32 to vector<2x8xf32>
    %518 = arith.subf %517, %516 : vector<2x8xf32>
    %519 = math.exp %518 : vector<2x8xf32>
    %cst_189 = arith.constant dense<0.000000e+00> : vector<2x256xf32>
    %520 = tpu.matmul %500, %11, %cst_189 {dimension_numbers = #tpu.dot_dimension_numbers<[1], [0], [0], [1], [0, 0, 1, 1], [], []>} : vector<2x8xf32>, vector<8x256xf32>, vector<2x256xf32> -> vector<2x256xf32>
    %521 = vector.extract_strided_slice %520 {offsets = [0, 0], sizes = [2, 128], strides = [1, 1]} : vector<2x256xf32> to vector<2x128xf32>
    %cst_190 = arith.constant dense<0.000000e+00> : vector<2x8xf32>
    %522 = tpu.matmul %519, %4, %cst_190 {dimension_numbers = #tpu.dot_dimension_numbers<[1], [0], [0], [1], [0, 0, 1, 1], [], []>} : vector<2x8xf32>, vector<8x8xf32>, vector<2x8xf32> -> vector<2x8xf32>
    %523 = vector.extract_strided_slice %520 {offsets = [0, 128], sizes = [2, 8], strides = [1, 1]} : vector<2x256xf32> to vector<2x8xf32>
    %524 = arith.addf %522, %523 : vector<2x8xf32>
    %525 = vector.broadcast %5 : vector<1x8xf32> to vector<2x8xf32>
    %526 = arith.addf %524, %525 : vector<2x8xf32>
    %cst_191 = arith.constant dense<0.000000e+00> : vector<2xf32>
    %527 = vector.multi_reduction <add>, %500, %cst_191 [1] : vector<2x8xf32> to vector<2xf32>
    %528 = vector.shape_cast %527 : vector<2xf32> to vector<2x1xf32>
    %cst_192 = arith.constant dense<0.000000e+00> : vector<1xf32>
    %529 = vector.multi_reduction <add>, %528, %cst_192 [0] : vector<2x1xf32> to vector<1xf32>
    %530 = vector.shape_cast %529 : vector<1xf32> to vector<1x1xf32>
    %531 = arith.mulf %475, %510 : vector<2x32xf32>
    %cst_193 = arith.constant dense<0.000000e+00> : vector<2x256xf32>
    %532 = tpu.matmul %531, %6, %cst_193 {dimension_numbers = #tpu.dot_dimension_numbers<[1], [0], [0], [1], [0, 0, 1, 1], [], []>} : vector<2x32xf32>, vector<32x256xf32>, vector<2x256xf32> -> vector<2x256xf32>
    %533 = vector.extract_strided_slice %532 {offsets = [0, 0], sizes = [2, 128], strides = [1, 1]} : vector<2x256xf32> to vector<2x128xf32>
    %534 = vector.extract_strided_slice %532 {offsets = [0, 128], sizes = [2, 8], strides = [1, 1]} : vector<2x256xf32> to vector<2x8xf32>
    %535 = vector.broadcast %7 : vector<1x8xf32> to vector<2x8xf32>
    %536 = arith.addf %534, %535 : vector<2x8xf32>
    %537 = arith.mulf %500, %498 : vector<2x8xf32>
    %cst_194 = arith.constant 1.000000e+00 : f32
    %538 = vector.broadcast %cst_194 : f32 to vector<2x8xf32>
    %539 = arith.subf %538, %500 : vector<2x8xf32>
    %540 = arith.mulf %539, %536 : vector<2x8xf32>
    %541 = arith.addf %537, %540 : vector<2x8xf32>
    %cst_195 = arith.constant dense<0.000000e+00> : vector<2x8xf32>
    %542 = tpu.matmul %541, %8, %cst_195 {dimension_numbers = #tpu.dot_dimension_numbers<[1], [0], [0], [1], [0, 0, 1, 1], [], []>} : vector<2x8xf32>, vector<8x8xf32>, vector<2x8xf32> -> vector<2x8xf32>
    %543 = vector.broadcast %9 : vector<1x8xf32> to vector<2x8xf32>
    %544 = arith.addf %542, %543 : vector<2x8xf32>
    %545 = arith.mulf %526, %544 : vector<2x8xf32>
    %cst_196 = arith.constant 1.000000e+00 : f32
    %546 = vector.broadcast %cst_196 : f32 to vector<2x8xf32>
    %547 = arith.subf %546, %526 : vector<2x8xf32>
    %548 = arith.mulf %547, %536 : vector<2x8xf32>
    %549 = arith.addf %545, %548 : vector<2x8xf32>
    %550 = arith.mulf %500, %498 : vector<2x8xf32>
    %cst_197 = arith.constant 1.000000e+00 : f32
    %551 = vector.broadcast %cst_197 : f32 to vector<2x8xf32>
    %552 = arith.subf %551, %500 : vector<2x8xf32>
    %553 = arith.mulf %552, %549 : vector<2x8xf32>
    %554 = arith.addf %550, %553 : vector<2x8xf32>
    %c4_198 = arith.constant 4 : index
    %c0_199 = arith.constant 0 : index
    %c0_200 = arith.constant 0 : index
    %555 = vector.load %arg21[%c4_198, %c0_199, %c0_200] : memref<8x2x8xf32, #tpu.memory_space<vmem>>, vector<1x2x8xf32>
    %556 = vector.shape_cast %555 : vector<1x2x8xf32> to vector<2x8xf32>
    %557 = vector.shape_cast %554 : vector<2x8xf32> to vector<1x2x8xf32>
    tpu.vector_store %arg21[%c4_198, %c0_199, %c0_200], %557 {strides = array<i32>} : memref<8x2x8xf32, #tpu.memory_space<vmem>>, vector<1x2x8xf32>,
    %558 = arith.subf %498, %536 : vector<2x8xf32>
    %559 = math.absf %558 : vector<2x8xf32>
    %560 = arith.subf %498, %544 : vector<2x8xf32>
    %561 = math.absf %560 : vector<2x8xf32>
    %562 = arith.addf %559, %561 : vector<2x8xf32>
    %563 = arith.subf %498, %549 : vector<2x8xf32>
    %564 = math.absf %563 : vector<2x8xf32>
    %565 = arith.addf %562, %564 : vector<2x8xf32>
    %566 = arith.mulf %565, %500 : vector<2x8xf32>
    %cst_201 = arith.constant dense<0.000000e+00> : vector<2xf32>
    %567 = vector.multi_reduction <add>, %566, %cst_201 [1] : vector<2x8xf32> to vector<2xf32>
    %568 = vector.shape_cast %567 : vector<2xf32> to vector<2x1xf32>
    %cst_202 = arith.constant dense<0.000000e+00> : vector<1xf32>
    %569 = vector.multi_reduction <add>, %568, %cst_202 [0] : vector<2x1xf32> to vector<1xf32>
    %570 = vector.shape_cast %569 : vector<1xf32> to vector<1x1xf32>
    %cst_203 = arith.constant 9.99999974E-6 : f32
    %571 = vector.broadcast %cst_203 : f32 to vector<1x1xf32>
    %572 = arith.addf %530, %571 : vector<1x1xf32>
    %573 = arith.divf %570, %572 : vector<1x1xf32>
    %574 = arith.addf %452, %573 : vector<1x1xf32>
    %cst_204 = arith.constant dense<0.000000e+00> : vector<2x128xf32>
    %575 = tpu.matmul %554, %10, %cst_204 {dimension_numbers = #tpu.dot_dimension_numbers<[1], [0], [0], [1], [0, 0, 1, 1], [], []>} : vector<2x8xf32>, vector<8x128xf32>, vector<2x128xf32> -> vector<2x128xf32>
    %576 = arith.addf %575, %533 : vector<2x128xf32>
    %577 = arith.addf %576, %521 : vector<2x128xf32>
    %578 = vector.broadcast %12 : vector<1x128xf32> to vector<2x128xf32>
    %579 = arith.addf %577, %578 : vector<2x128xf32>
    %580 = arith.negf %579 : vector<2x128xf32>
    %581 = math.exp %580 : vector<2x128xf32>
    %cst_205 = arith.constant 1.000000e+00 : f32
    %582 = vector.broadcast %cst_205 : f32 to vector<2x128xf32>
    %583 = arith.addf %582, %581 : vector<2x128xf32>
    %584 = arith.divf %582, %583 : vector<2x128xf32>
    %585 = math.tanh %579 : vector<2x128xf32>
    %586 = vector.extract_strided_slice %584 {offsets = [0, 0], sizes = [2, 32], strides = [1, 1]} : vector<2x128xf32> to vector<2x32xf32>
    %c96_i32_206 = arith.constant 96 : i32
    %587 = tpu.dynamic_rotate %584 by %c96_i32_206 dim 1 : vector<2x128xf32>, i32 -> vector<2x128xf32>
    %588 = vector.extract_strided_slice %587 {offsets = [0, 0], sizes = [2, 32], strides = [1, 1]} : vector<2x128xf32> to vector<2x32xf32>
    %c64_i32_207 = arith.constant 64 : i32
    %589 = tpu.dynamic_rotate %585 by %c64_i32_207 dim 1 : vector<2x128xf32>, i32 -> vector<2x128xf32>
    %590 = vector.extract_strided_slice %589 {offsets = [0, 0], sizes = [2, 32], strides = [1, 1]} : vector<2x128xf32> to vector<2x32xf32>
    %c32_i32_208 = arith.constant 32 : i32
    %591 = tpu.dynamic_rotate %584 by %c32_i32_208 dim 1 : vector<2x128xf32>, i32 -> vector<2x128xf32>
    %592 = vector.extract_strided_slice %591 {offsets = [0, 0], sizes = [2, 32], strides = [1, 1]} : vector<2x128xf32> to vector<2x32xf32>
    %593 = arith.mulf %588, %473 : vector<2x32xf32>
    %594 = arith.mulf %586, %590 : vector<2x32xf32>
    %595 = arith.addf %593, %594 : vector<2x32xf32>
    %596 = math.tanh %595 : vector<2x32xf32>
    %597 = arith.mulf %592, %596 : vector<2x32xf32>
    %c0_209 = arith.constant 0 : index
    %c0_210 = arith.constant 0 : index
    %598 = vector.load %arg16[%c0_209, %c0_210] : memref<32x512xf32, #tpu.memory_space<vmem>>, vector<32x512xf32>
    %cst_211 = arith.constant dense<0.000000e+00> : vector<2x512xf32>
    %599 = tpu.matmul %597, %598, %cst_211 {dimension_numbers = #tpu.dot_dimension_numbers<[1], [0], [0], [1], [0, 0, 1, 1], [], []>} : vector<2x32xf32>, vector<32x512xf32>, vector<2x512xf32> -> vector<2x512xf32>
    %600 = vector.extract_strided_slice %599 {offsets = [0, 0], sizes = [2, 384], strides = [1, 1]} : vector<2x512xf32> to vector<2x384xf32>
    %601 = vector.broadcast %13 : vector<1x384xf32> to vector<2x384xf32>
    %602 = arith.addf %600, %601 : vector<2x384xf32>
    %603 = math.tanh %602 : vector<2x384xf32>
    %c0_212 = arith.constant 0 : index
    %c0_213 = arith.constant 0 : index
    %604 = vector.load %arg18[%c0_212, %c0_213] : memref<384x30xf32, #tpu.memory_space<vmem>>, vector<384x30xf32>
    %cst_214 = arith.constant dense<0.000000e+00> : vector<2x30xf32>
    %605 = tpu.matmul %603, %604, %cst_214 {dimension_numbers = #tpu.dot_dimension_numbers<[1], [0], [0], [1], [0, 0, 1, 1], [], []>} : vector<2x384xf32>, vector<384x30xf32>, vector<2x30xf32> -> vector<2x30xf32>
    %606 = vector.broadcast %14 : vector<1x30xf32> to vector<2x30xf32>
    %607 = arith.addf %605, %606 : vector<2x30xf32>
    %608 = vector.extract_strided_slice %599 {offsets = [0, 384], sizes = [2, 30], strides = [1, 1]} : vector<2x512xf32> to vector<2x30xf32>
    %609 = arith.maximumf %487, %607 : vector<2x30xf32>
    %610 = arith.subf %487, %609 : vector<2x30xf32>
    %611 = math.exp %610 : vector<2x30xf32>
    %612 = arith.subf %607, %609 : vector<2x30xf32>
    %613 = math.exp %612 : vector<2x30xf32>
    %614 = arith.mulf %494, %611 : vector<2x30xf32>
    %615 = arith.mulf %613, %608 : vector<2x30xf32>
    %616 = arith.addf %614, %615 : vector<2x30xf32>
    %617 = arith.mulf %496, %611 : vector<2x30xf32>
    %618 = arith.addf %617, %613 : vector<2x30xf32>
    %c15 = arith.constant 15 : index
    %c0_215 = arith.constant 0 : index
    %c0_216 = arith.constant 0 : index
    %619 = vector.load %arg0[%c15, %c0_215, %c0_216] : memref<24x2x8xf32, #tpu.memory_space<vmem>>, vector<1x2x8xf32>
    %620 = vector.shape_cast %619 : vector<1x2x8xf32> to vector<2x8xf32>
    %c16 = arith.constant 16 : index
    %c0_217 = arith.constant 0 : index
    %c0_218 = arith.constant 0 : index
    %621 = vector.load %arg0[%c16, %c0_217, %c0_218] : memref<24x2x8xf32, #tpu.memory_space<vmem>>, vector<1x2x8xf32>
    %622 = vector.shape_cast %621 : vector<1x2x8xf32> to vector<2x8xf32>
    %c17 = arith.constant 17 : index
    %c0_219 = arith.constant 0 : index
    %c0_220 = arith.constant 0 : index
    %623 = vector.load %arg0[%c17, %c0_219, %c0_220] : memref<24x2x8xf32, #tpu.memory_space<vmem>>, vector<1x2x8xf32>
    %624 = vector.shape_cast %623 : vector<1x2x8xf32> to vector<2x8xf32>
    %cst_221 = arith.constant dense<0.000000e+00> : vector<2x32xf32>
    %625 = tpu.matmul %624, %0, %cst_221 {dimension_numbers = #tpu.dot_dimension_numbers<[1], [0], [0], [1], [0, 0, 1, 1], [], []>} : vector<2x8xf32>, vector<8x32xf32>, vector<2x32xf32> -> vector<2x32xf32>
    %626 = vector.broadcast %1 : vector<1x32xf32> to vector<2x32xf32>
    %627 = arith.addf %625, %626 : vector<2x32xf32>
    %cst_222 = arith.constant 0.000000e+00 : f32
    %628 = vector.broadcast %cst_222 : f32 to vector<2x32xf32>
    %629 = arith.maximumf %627, %628 : vector<2x32xf32>
    %cst_223 = arith.constant 0.000000e+00 : f32
    %630 = vector.broadcast %cst_223 : f32 to vector<2x32xf32>
    %631 = arith.subf %630, %629 : vector<2x32xf32>
    %632 = math.exp %631 : vector<2x32xf32>
    %633 = vector.broadcast %2 : vector<1x8xf32> to vector<2x8xf32>
    %634 = arith.mulf %624, %633 : vector<2x8xf32>
    %635 = vector.broadcast %3 : vector<1x8xf32> to vector<2x8xf32>
    %636 = arith.addf %634, %635 : vector<2x8xf32>
    %cst_224 = arith.constant 0.000000e+00 : f32
    %637 = vector.broadcast %cst_224 : f32 to vector<2x8xf32>
    %638 = arith.maximumf %636, %637 : vector<2x8xf32>
    %cst_225 = arith.constant 0.000000e+00 : f32
    %639 = vector.broadcast %cst_225 : f32 to vector<2x8xf32>
    %640 = arith.subf %639, %638 : vector<2x8xf32>
    %641 = math.exp %640 : vector<2x8xf32>
    %cst_226 = arith.constant dense<0.000000e+00> : vector<2x256xf32>
    %642 = tpu.matmul %622, %11, %cst_226 {dimension_numbers = #tpu.dot_dimension_numbers<[1], [0], [0], [1], [0, 0, 1, 1], [], []>} : vector<2x8xf32>, vector<8x256xf32>, vector<2x256xf32> -> vector<2x256xf32>
    %643 = vector.extract_strided_slice %642 {offsets = [0, 0], sizes = [2, 128], strides = [1, 1]} : vector<2x256xf32> to vector<2x128xf32>
    %cst_227 = arith.constant dense<0.000000e+00> : vector<2x8xf32>
    %644 = tpu.matmul %641, %4, %cst_227 {dimension_numbers = #tpu.dot_dimension_numbers<[1], [0], [0], [1], [0, 0, 1, 1], [], []>} : vector<2x8xf32>, vector<8x8xf32>, vector<2x8xf32> -> vector<2x8xf32>
    %645 = vector.extract_strided_slice %642 {offsets = [0, 128], sizes = [2, 8], strides = [1, 1]} : vector<2x256xf32> to vector<2x8xf32>
    %646 = arith.addf %644, %645 : vector<2x8xf32>
    %647 = vector.broadcast %5 : vector<1x8xf32> to vector<2x8xf32>
    %648 = arith.addf %646, %647 : vector<2x8xf32>
    %cst_228 = arith.constant dense<0.000000e+00> : vector<2xf32>
    %649 = vector.multi_reduction <add>, %622, %cst_228 [1] : vector<2x8xf32> to vector<2xf32>
    %650 = vector.shape_cast %649 : vector<2xf32> to vector<2x1xf32>
    %cst_229 = arith.constant dense<0.000000e+00> : vector<1xf32>
    %651 = vector.multi_reduction <add>, %650, %cst_229 [0] : vector<2x1xf32> to vector<1xf32>
    %652 = vector.shape_cast %651 : vector<1xf32> to vector<1x1xf32>
    %653 = arith.mulf %597, %632 : vector<2x32xf32>
    %cst_230 = arith.constant dense<0.000000e+00> : vector<2x256xf32>
    %654 = tpu.matmul %653, %6, %cst_230 {dimension_numbers = #tpu.dot_dimension_numbers<[1], [0], [0], [1], [0, 0, 1, 1], [], []>} : vector<2x32xf32>, vector<32x256xf32>, vector<2x256xf32> -> vector<2x256xf32>
    %655 = vector.extract_strided_slice %654 {offsets = [0, 0], sizes = [2, 128], strides = [1, 1]} : vector<2x256xf32> to vector<2x128xf32>
    %656 = vector.extract_strided_slice %654 {offsets = [0, 128], sizes = [2, 8], strides = [1, 1]} : vector<2x256xf32> to vector<2x8xf32>
    %657 = vector.broadcast %7 : vector<1x8xf32> to vector<2x8xf32>
    %658 = arith.addf %656, %657 : vector<2x8xf32>
    %659 = arith.mulf %622, %620 : vector<2x8xf32>
    %cst_231 = arith.constant 1.000000e+00 : f32
    %660 = vector.broadcast %cst_231 : f32 to vector<2x8xf32>
    %661 = arith.subf %660, %622 : vector<2x8xf32>
    %662 = arith.mulf %661, %658 : vector<2x8xf32>
    %663 = arith.addf %659, %662 : vector<2x8xf32>
    %cst_232 = arith.constant dense<0.000000e+00> : vector<2x8xf32>
    %664 = tpu.matmul %663, %8, %cst_232 {dimension_numbers = #tpu.dot_dimension_numbers<[1], [0], [0], [1], [0, 0, 1, 1], [], []>} : vector<2x8xf32>, vector<8x8xf32>, vector<2x8xf32> -> vector<2x8xf32>
    %665 = vector.broadcast %9 : vector<1x8xf32> to vector<2x8xf32>
    %666 = arith.addf %664, %665 : vector<2x8xf32>
    %667 = arith.mulf %648, %666 : vector<2x8xf32>
    %cst_233 = arith.constant 1.000000e+00 : f32
    %668 = vector.broadcast %cst_233 : f32 to vector<2x8xf32>
    %669 = arith.subf %668, %648 : vector<2x8xf32>
    %670 = arith.mulf %669, %658 : vector<2x8xf32>
    %671 = arith.addf %667, %670 : vector<2x8xf32>
    %672 = arith.mulf %622, %620 : vector<2x8xf32>
    %cst_234 = arith.constant 1.000000e+00 : f32
    %673 = vector.broadcast %cst_234 : f32 to vector<2x8xf32>
    %674 = arith.subf %673, %622 : vector<2x8xf32>
    %675 = arith.mulf %674, %671 : vector<2x8xf32>
    %676 = arith.addf %672, %675 : vector<2x8xf32>
    %c5_235 = arith.constant 5 : index
    %c0_236 = arith.constant 0 : index
    %c0_237 = arith.constant 0 : index
    %677 = vector.load %arg21[%c5_235, %c0_236, %c0_237] : memref<8x2x8xf32, #tpu.memory_space<vmem>>, vector<1x2x8xf32>
    %678 = vector.shape_cast %677 : vector<1x2x8xf32> to vector<2x8xf32>
    %679 = vector.shape_cast %676 : vector<2x8xf32> to vector<1x2x8xf32>
    tpu.vector_store %arg21[%c5_235, %c0_236, %c0_237], %679 {strides = array<i32>} : memref<8x2x8xf32, #tpu.memory_space<vmem>>, vector<1x2x8xf32>,
    %680 = arith.subf %620, %658 : vector<2x8xf32>
    %681 = math.absf %680 : vector<2x8xf32>
    %682 = arith.subf %620, %666 : vector<2x8xf32>
    %683 = math.absf %682 : vector<2x8xf32>
    %684 = arith.addf %681, %683 : vector<2x8xf32>
    %685 = arith.subf %620, %671 : vector<2x8xf32>
    %686 = math.absf %685 : vector<2x8xf32>
    %687 = arith.addf %684, %686 : vector<2x8xf32>
    %688 = arith.mulf %687, %622 : vector<2x8xf32>
    %cst_238 = arith.constant dense<0.000000e+00> : vector<2xf32>
    %689 = vector.multi_reduction <add>, %688, %cst_238 [1] : vector<2x8xf32> to vector<2xf32>
    %690 = vector.shape_cast %689 : vector<2xf32> to vector<2x1xf32>
    %cst_239 = arith.constant dense<0.000000e+00> : vector<1xf32>
    %691 = vector.multi_reduction <add>, %690, %cst_239 [0] : vector<2x1xf32> to vector<1xf32>
    %692 = vector.shape_cast %691 : vector<1xf32> to vector<1x1xf32>
    %cst_240 = arith.constant 9.99999974E-6 : f32
    %693 = vector.broadcast %cst_240 : f32 to vector<1x1xf32>
    %694 = arith.addf %652, %693 : vector<1x1xf32>
    %695 = arith.divf %692, %694 : vector<1x1xf32>
    %696 = arith.addf %574, %695 : vector<1x1xf32>
    %cst_241 = arith.constant dense<0.000000e+00> : vector<2x128xf32>
    %697 = tpu.matmul %676, %10, %cst_241 {dimension_numbers = #tpu.dot_dimension_numbers<[1], [0], [0], [1], [0, 0, 1, 1], [], []>} : vector<2x8xf32>, vector<8x128xf32>, vector<2x128xf32> -> vector<2x128xf32>
    %698 = arith.addf %697, %655 : vector<2x128xf32>
    %699 = arith.addf %698, %643 : vector<2x128xf32>
    %700 = vector.broadcast %12 : vector<1x128xf32> to vector<2x128xf32>
    %701 = arith.addf %699, %700 : vector<2x128xf32>
    %702 = arith.negf %701 : vector<2x128xf32>
    %703 = math.exp %702 : vector<2x128xf32>
    %cst_242 = arith.constant 1.000000e+00 : f32
    %704 = vector.broadcast %cst_242 : f32 to vector<2x128xf32>
    %705 = arith.addf %704, %703 : vector<2x128xf32>
    %706 = arith.divf %704, %705 : vector<2x128xf32>
    %707 = math.tanh %701 : vector<2x128xf32>
    %708 = vector.extract_strided_slice %706 {offsets = [0, 0], sizes = [2, 32], strides = [1, 1]} : vector<2x128xf32> to vector<2x32xf32>
    %c96_i32_243 = arith.constant 96 : i32
    %709 = tpu.dynamic_rotate %706 by %c96_i32_243 dim 1 : vector<2x128xf32>, i32 -> vector<2x128xf32>
    %710 = vector.extract_strided_slice %709 {offsets = [0, 0], sizes = [2, 32], strides = [1, 1]} : vector<2x128xf32> to vector<2x32xf32>
    %c64_i32_244 = arith.constant 64 : i32
    %711 = tpu.dynamic_rotate %707 by %c64_i32_244 dim 1 : vector<2x128xf32>, i32 -> vector<2x128xf32>
    %712 = vector.extract_strided_slice %711 {offsets = [0, 0], sizes = [2, 32], strides = [1, 1]} : vector<2x128xf32> to vector<2x32xf32>
    %c32_i32_245 = arith.constant 32 : i32
    %713 = tpu.dynamic_rotate %706 by %c32_i32_245 dim 1 : vector<2x128xf32>, i32 -> vector<2x128xf32>
    %714 = vector.extract_strided_slice %713 {offsets = [0, 0], sizes = [2, 32], strides = [1, 1]} : vector<2x128xf32> to vector<2x32xf32>
    %715 = arith.mulf %710, %595 : vector<2x32xf32>
    %716 = arith.mulf %708, %712 : vector<2x32xf32>
    %717 = arith.addf %715, %716 : vector<2x32xf32>
    %718 = math.tanh %717 : vector<2x32xf32>
    %719 = arith.mulf %714, %718 : vector<2x32xf32>
    %c0_246 = arith.constant 0 : index
    %c0_247 = arith.constant 0 : index
    %720 = vector.load %arg16[%c0_246, %c0_247] : memref<32x512xf32, #tpu.memory_space<vmem>>, vector<32x512xf32>
    %cst_248 = arith.constant dense<0.000000e+00> : vector<2x512xf32>
    %721 = tpu.matmul %719, %720, %cst_248 {dimension_numbers = #tpu.dot_dimension_numbers<[1], [0], [0], [1], [0, 0, 1, 1], [], []>} : vector<2x32xf32>, vector<32x512xf32>, vector<2x512xf32> -> vector<2x512xf32>
    %722 = vector.extract_strided_slice %721 {offsets = [0, 0], sizes = [2, 384], strides = [1, 1]} : vector<2x512xf32> to vector<2x384xf32>
    %723 = vector.broadcast %13 : vector<1x384xf32> to vector<2x384xf32>
    %724 = arith.addf %722, %723 : vector<2x384xf32>
    %725 = math.tanh %724 : vector<2x384xf32>
    %c0_249 = arith.constant 0 : index
    %c0_250 = arith.constant 0 : index
    %726 = vector.load %arg18[%c0_249, %c0_250] : memref<384x30xf32, #tpu.memory_space<vmem>>, vector<384x30xf32>
    %cst_251 = arith.constant dense<0.000000e+00> : vector<2x30xf32>
    %727 = tpu.matmul %725, %726, %cst_251 {dimension_numbers = #tpu.dot_dimension_numbers<[1], [0], [0], [1], [0, 0, 1, 1], [], []>} : vector<2x384xf32>, vector<384x30xf32>, vector<2x30xf32> -> vector<2x30xf32>
    %728 = vector.broadcast %14 : vector<1x30xf32> to vector<2x30xf32>
    %729 = arith.addf %727, %728 : vector<2x30xf32>
    %730 = vector.extract_strided_slice %721 {offsets = [0, 384], sizes = [2, 30], strides = [1, 1]} : vector<2x512xf32> to vector<2x30xf32>
    %731 = arith.maximumf %609, %729 : vector<2x30xf32>
    %732 = arith.subf %609, %731 : vector<2x30xf32>
    %733 = math.exp %732 : vector<2x30xf32>
    %734 = arith.subf %729, %731 : vector<2x30xf32>
    %735 = math.exp %734 : vector<2x30xf32>
    %736 = arith.mulf %616, %733 : vector<2x30xf32>
    %737 = arith.mulf %735, %730 : vector<2x30xf32>
    %738 = arith.addf %736, %737 : vector<2x30xf32>
    %739 = arith.mulf %618, %733 : vector<2x30xf32>
    %740 = arith.addf %739, %735 : vector<2x30xf32>
    %c18 = arith.constant 18 : index
    %c0_252 = arith.constant 0 : index
    %c0_253 = arith.constant 0 : index
    %741 = vector.load %arg0[%c18, %c0_252, %c0_253] : memref<24x2x8xf32, #tpu.memory_space<vmem>>, vector<1x2x8xf32>
    %742 = vector.shape_cast %741 : vector<1x2x8xf32> to vector<2x8xf32>
    %c19 = arith.constant 19 : index
    %c0_254 = arith.constant 0 : index
    %c0_255 = arith.constant 0 : index
    %743 = vector.load %arg0[%c19, %c0_254, %c0_255] : memref<24x2x8xf32, #tpu.memory_space<vmem>>, vector<1x2x8xf32>
    %744 = vector.shape_cast %743 : vector<1x2x8xf32> to vector<2x8xf32>
    %c20 = arith.constant 20 : index
    %c0_256 = arith.constant 0 : index
    %c0_257 = arith.constant 0 : index
    %745 = vector.load %arg0[%c20, %c0_256, %c0_257] : memref<24x2x8xf32, #tpu.memory_space<vmem>>, vector<1x2x8xf32>
    %746 = vector.shape_cast %745 : vector<1x2x8xf32> to vector<2x8xf32>
    %cst_258 = arith.constant dense<0.000000e+00> : vector<2x32xf32>
    %747 = tpu.matmul %746, %0, %cst_258 {dimension_numbers = #tpu.dot_dimension_numbers<[1], [0], [0], [1], [0, 0, 1, 1], [], []>} : vector<2x8xf32>, vector<8x32xf32>, vector<2x32xf32> -> vector<2x32xf32>
    %748 = vector.broadcast %1 : vector<1x32xf32> to vector<2x32xf32>
    %749 = arith.addf %747, %748 : vector<2x32xf32>
    %cst_259 = arith.constant 0.000000e+00 : f32
    %750 = vector.broadcast %cst_259 : f32 to vector<2x32xf32>
    %751 = arith.maximumf %749, %750 : vector<2x32xf32>
    %cst_260 = arith.constant 0.000000e+00 : f32
    %752 = vector.broadcast %cst_260 : f32 to vector<2x32xf32>
    %753 = arith.subf %752, %751 : vector<2x32xf32>
    %754 = math.exp %753 : vector<2x32xf32>
    %755 = vector.broadcast %2 : vector<1x8xf32> to vector<2x8xf32>
    %756 = arith.mulf %746, %755 : vector<2x8xf32>
    %757 = vector.broadcast %3 : vector<1x8xf32> to vector<2x8xf32>
    %758 = arith.addf %756, %757 : vector<2x8xf32>
    %cst_261 = arith.constant 0.000000e+00 : f32
    %759 = vector.broadcast %cst_261 : f32 to vector<2x8xf32>
    %760 = arith.maximumf %758, %759 : vector<2x8xf32>
    %cst_262 = arith.constant 0.000000e+00 : f32
    %761 = vector.broadcast %cst_262 : f32 to vector<2x8xf32>
    %762 = arith.subf %761, %760 : vector<2x8xf32>
    %763 = math.exp %762 : vector<2x8xf32>
    %cst_263 = arith.constant dense<0.000000e+00> : vector<2x256xf32>
    %764 = tpu.matmul %744, %11, %cst_263 {dimension_numbers = #tpu.dot_dimension_numbers<[1], [0], [0], [1], [0, 0, 1, 1], [], []>} : vector<2x8xf32>, vector<8x256xf32>, vector<2x256xf32> -> vector<2x256xf32>
    %765 = vector.extract_strided_slice %764 {offsets = [0, 0], sizes = [2, 128], strides = [1, 1]} : vector<2x256xf32> to vector<2x128xf32>
    %cst_264 = arith.constant dense<0.000000e+00> : vector<2x8xf32>
    %766 = tpu.matmul %763, %4, %cst_264 {dimension_numbers = #tpu.dot_dimension_numbers<[1], [0], [0], [1], [0, 0, 1, 1], [], []>} : vector<2x8xf32>, vector<8x8xf32>, vector<2x8xf32> -> vector<2x8xf32>
    %767 = vector.extract_strided_slice %764 {offsets = [0, 128], sizes = [2, 8], strides = [1, 1]} : vector<2x256xf32> to vector<2x8xf32>
    %768 = arith.addf %766, %767 : vector<2x8xf32>
    %769 = vector.broadcast %5 : vector<1x8xf32> to vector<2x8xf32>
    %770 = arith.addf %768, %769 : vector<2x8xf32>
    %cst_265 = arith.constant dense<0.000000e+00> : vector<2xf32>
    %771 = vector.multi_reduction <add>, %744, %cst_265 [1] : vector<2x8xf32> to vector<2xf32>
    %772 = vector.shape_cast %771 : vector<2xf32> to vector<2x1xf32>
    %cst_266 = arith.constant dense<0.000000e+00> : vector<1xf32>
    %773 = vector.multi_reduction <add>, %772, %cst_266 [0] : vector<2x1xf32> to vector<1xf32>
    %774 = vector.shape_cast %773 : vector<1xf32> to vector<1x1xf32>
    %775 = arith.mulf %719, %754 : vector<2x32xf32>
    %cst_267 = arith.constant dense<0.000000e+00> : vector<2x256xf32>
    %776 = tpu.matmul %775, %6, %cst_267 {dimension_numbers = #tpu.dot_dimension_numbers<[1], [0], [0], [1], [0, 0, 1, 1], [], []>} : vector<2x32xf32>, vector<32x256xf32>, vector<2x256xf32> -> vector<2x256xf32>
    %777 = vector.extract_strided_slice %776 {offsets = [0, 0], sizes = [2, 128], strides = [1, 1]} : vector<2x256xf32> to vector<2x128xf32>
    %778 = vector.extract_strided_slice %776 {offsets = [0, 128], sizes = [2, 8], strides = [1, 1]} : vector<2x256xf32> to vector<2x8xf32>
    %779 = vector.broadcast %7 : vector<1x8xf32> to vector<2x8xf32>
    %780 = arith.addf %778, %779 : vector<2x8xf32>
    %781 = arith.mulf %744, %742 : vector<2x8xf32>
    %cst_268 = arith.constant 1.000000e+00 : f32
    %782 = vector.broadcast %cst_268 : f32 to vector<2x8xf32>
    %783 = arith.subf %782, %744 : vector<2x8xf32>
    %784 = arith.mulf %783, %780 : vector<2x8xf32>
    %785 = arith.addf %781, %784 : vector<2x8xf32>
    %cst_269 = arith.constant dense<0.000000e+00> : vector<2x8xf32>
    %786 = tpu.matmul %785, %8, %cst_269 {dimension_numbers = #tpu.dot_dimension_numbers<[1], [0], [0], [1], [0, 0, 1, 1], [], []>} : vector<2x8xf32>, vector<8x8xf32>, vector<2x8xf32> -> vector<2x8xf32>
    %787 = vector.broadcast %9 : vector<1x8xf32> to vector<2x8xf32>
    %788 = arith.addf %786, %787 : vector<2x8xf32>
    %789 = arith.mulf %770, %788 : vector<2x8xf32>
    %cst_270 = arith.constant 1.000000e+00 : f32
    %790 = vector.broadcast %cst_270 : f32 to vector<2x8xf32>
    %791 = arith.subf %790, %770 : vector<2x8xf32>
    %792 = arith.mulf %791, %780 : vector<2x8xf32>
    %793 = arith.addf %789, %792 : vector<2x8xf32>
    %794 = arith.mulf %744, %742 : vector<2x8xf32>
    %cst_271 = arith.constant 1.000000e+00 : f32
    %795 = vector.broadcast %cst_271 : f32 to vector<2x8xf32>
    %796 = arith.subf %795, %744 : vector<2x8xf32>
    %797 = arith.mulf %796, %793 : vector<2x8xf32>
    %798 = arith.addf %794, %797 : vector<2x8xf32>
    %c6_272 = arith.constant 6 : index
    %c0_273 = arith.constant 0 : index
    %c0_274 = arith.constant 0 : index
    %799 = vector.load %arg21[%c6_272, %c0_273, %c0_274] : memref<8x2x8xf32, #tpu.memory_space<vmem>>, vector<1x2x8xf32>
    %800 = vector.shape_cast %799 : vector<1x2x8xf32> to vector<2x8xf32>
    %801 = vector.shape_cast %798 : vector<2x8xf32> to vector<1x2x8xf32>
    tpu.vector_store %arg21[%c6_272, %c0_273, %c0_274], %801 {strides = array<i32>} : memref<8x2x8xf32, #tpu.memory_space<vmem>>, vector<1x2x8xf32>,
    %802 = arith.subf %742, %780 : vector<2x8xf32>
    %803 = math.absf %802 : vector<2x8xf32>
    %804 = arith.subf %742, %788 : vector<2x8xf32>
    %805 = math.absf %804 : vector<2x8xf32>
    %806 = arith.addf %803, %805 : vector<2x8xf32>
    %807 = arith.subf %742, %793 : vector<2x8xf32>
    %808 = math.absf %807 : vector<2x8xf32>
    %809 = arith.addf %806, %808 : vector<2x8xf32>
    %810 = arith.mulf %809, %744 : vector<2x8xf32>
    %cst_275 = arith.constant dense<0.000000e+00> : vector<2xf32>
    %811 = vector.multi_reduction <add>, %810, %cst_275 [1] : vector<2x8xf32> to vector<2xf32>
    %812 = vector.shape_cast %811 : vector<2xf32> to vector<2x1xf32>
    %cst_276 = arith.constant dense<0.000000e+00> : vector<1xf32>
    %813 = vector.multi_reduction <add>, %812, %cst_276 [0] : vector<2x1xf32> to vector<1xf32>
    %814 = vector.shape_cast %813 : vector<1xf32> to vector<1x1xf32>
    %cst_277 = arith.constant 9.99999974E-6 : f32
    %815 = vector.broadcast %cst_277 : f32 to vector<1x1xf32>
    %816 = arith.addf %774, %815 : vector<1x1xf32>
    %817 = arith.divf %814, %816 : vector<1x1xf32>
    %818 = arith.addf %696, %817 : vector<1x1xf32>
    %cst_278 = arith.constant dense<0.000000e+00> : vector<2x128xf32>
    %819 = tpu.matmul %798, %10, %cst_278 {dimension_numbers = #tpu.dot_dimension_numbers<[1], [0], [0], [1], [0, 0, 1, 1], [], []>} : vector<2x8xf32>, vector<8x128xf32>, vector<2x128xf32> -> vector<2x128xf32>
    %820 = arith.addf %819, %777 : vector<2x128xf32>
    %821 = arith.addf %820, %765 : vector<2x128xf32>
    %822 = vector.broadcast %12 : vector<1x128xf32> to vector<2x128xf32>
    %823 = arith.addf %821, %822 : vector<2x128xf32>
    %824 = arith.negf %823 : vector<2x128xf32>
    %825 = math.exp %824 : vector<2x128xf32>
    %cst_279 = arith.constant 1.000000e+00 : f32
    %826 = vector.broadcast %cst_279 : f32 to vector<2x128xf32>
    %827 = arith.addf %826, %825 : vector<2x128xf32>
    %828 = arith.divf %826, %827 : vector<2x128xf32>
    %829 = math.tanh %823 : vector<2x128xf32>
    %830 = vector.extract_strided_slice %828 {offsets = [0, 0], sizes = [2, 32], strides = [1, 1]} : vector<2x128xf32> to vector<2x32xf32>
    %c96_i32_280 = arith.constant 96 : i32
    %831 = tpu.dynamic_rotate %828 by %c96_i32_280 dim 1 : vector<2x128xf32>, i32 -> vector<2x128xf32>
    %832 = vector.extract_strided_slice %831 {offsets = [0, 0], sizes = [2, 32], strides = [1, 1]} : vector<2x128xf32> to vector<2x32xf32>
    %c64_i32_281 = arith.constant 64 : i32
    %833 = tpu.dynamic_rotate %829 by %c64_i32_281 dim 1 : vector<2x128xf32>, i32 -> vector<2x128xf32>
    %834 = vector.extract_strided_slice %833 {offsets = [0, 0], sizes = [2, 32], strides = [1, 1]} : vector<2x128xf32> to vector<2x32xf32>
    %c32_i32_282 = arith.constant 32 : i32
    %835 = tpu.dynamic_rotate %828 by %c32_i32_282 dim 1 : vector<2x128xf32>, i32 -> vector<2x128xf32>
    %836 = vector.extract_strided_slice %835 {offsets = [0, 0], sizes = [2, 32], strides = [1, 1]} : vector<2x128xf32> to vector<2x32xf32>
    %837 = arith.mulf %832, %717 : vector<2x32xf32>
    %838 = arith.mulf %830, %834 : vector<2x32xf32>
    %839 = arith.addf %837, %838 : vector<2x32xf32>
    %840 = math.tanh %839 : vector<2x32xf32>
    %841 = arith.mulf %836, %840 : vector<2x32xf32>
    %c0_283 = arith.constant 0 : index
    %c0_284 = arith.constant 0 : index
    %842 = vector.load %arg16[%c0_283, %c0_284] : memref<32x512xf32, #tpu.memory_space<vmem>>, vector<32x512xf32>
    %cst_285 = arith.constant dense<0.000000e+00> : vector<2x512xf32>
    %843 = tpu.matmul %841, %842, %cst_285 {dimension_numbers = #tpu.dot_dimension_numbers<[1], [0], [0], [1], [0, 0, 1, 1], [], []>} : vector<2x32xf32>, vector<32x512xf32>, vector<2x512xf32> -> vector<2x512xf32>
    %844 = vector.extract_strided_slice %843 {offsets = [0, 0], sizes = [2, 384], strides = [1, 1]} : vector<2x512xf32> to vector<2x384xf32>
    %845 = vector.broadcast %13 : vector<1x384xf32> to vector<2x384xf32>
    %846 = arith.addf %844, %845 : vector<2x384xf32>
    %847 = math.tanh %846 : vector<2x384xf32>
    %c0_286 = arith.constant 0 : index
    %c0_287 = arith.constant 0 : index
    %848 = vector.load %arg18[%c0_286, %c0_287] : memref<384x30xf32, #tpu.memory_space<vmem>>, vector<384x30xf32>
    %cst_288 = arith.constant dense<0.000000e+00> : vector<2x30xf32>
    %849 = tpu.matmul %847, %848, %cst_288 {dimension_numbers = #tpu.dot_dimension_numbers<[1], [0], [0], [1], [0, 0, 1, 1], [], []>} : vector<2x384xf32>, vector<384x30xf32>, vector<2x30xf32> -> vector<2x30xf32>
    %850 = vector.broadcast %14 : vector<1x30xf32> to vector<2x30xf32>
    %851 = arith.addf %849, %850 : vector<2x30xf32>
    %852 = vector.extract_strided_slice %843 {offsets = [0, 384], sizes = [2, 30], strides = [1, 1]} : vector<2x512xf32> to vector<2x30xf32>
    %853 = arith.maximumf %731, %851 : vector<2x30xf32>
    %854 = arith.subf %731, %853 : vector<2x30xf32>
    %855 = math.exp %854 : vector<2x30xf32>
    %856 = arith.subf %851, %853 : vector<2x30xf32>
    %857 = math.exp %856 : vector<2x30xf32>
    %858 = arith.mulf %738, %855 : vector<2x30xf32>
    %859 = arith.mulf %857, %852 : vector<2x30xf32>
    %860 = arith.addf %858, %859 : vector<2x30xf32>
    %861 = arith.mulf %740, %855 : vector<2x30xf32>
    %862 = arith.addf %861, %857 : vector<2x30xf32>
    %c21 = arith.constant 21 : index
    %c0_289 = arith.constant 0 : index
    %c0_290 = arith.constant 0 : index
    %863 = vector.load %arg0[%c21, %c0_289, %c0_290] : memref<24x2x8xf32, #tpu.memory_space<vmem>>, vector<1x2x8xf32>
    %864 = vector.shape_cast %863 : vector<1x2x8xf32> to vector<2x8xf32>
    %c22 = arith.constant 22 : index
    %c0_291 = arith.constant 0 : index
    %c0_292 = arith.constant 0 : index
    %865 = vector.load %arg0[%c22, %c0_291, %c0_292] : memref<24x2x8xf32, #tpu.memory_space<vmem>>, vector<1x2x8xf32>
    %866 = vector.shape_cast %865 : vector<1x2x8xf32> to vector<2x8xf32>
    %c23 = arith.constant 23 : index
    %c0_293 = arith.constant 0 : index
    %c0_294 = arith.constant 0 : index
    %867 = vector.load %arg0[%c23, %c0_293, %c0_294] : memref<24x2x8xf32, #tpu.memory_space<vmem>>, vector<1x2x8xf32>
    %868 = vector.shape_cast %867 : vector<1x2x8xf32> to vector<2x8xf32>
    %cst_295 = arith.constant dense<0.000000e+00> : vector<2x32xf32>
    %869 = tpu.matmul %868, %0, %cst_295 {dimension_numbers = #tpu.dot_dimension_numbers<[1], [0], [0], [1], [0, 0, 1, 1], [], []>} : vector<2x8xf32>, vector<8x32xf32>, vector<2x32xf32> -> vector<2x32xf32>
    %870 = vector.broadcast %1 : vector<1x32xf32> to vector<2x32xf32>
    %871 = arith.addf %869, %870 : vector<2x32xf32>
    %cst_296 = arith.constant 0.000000e+00 : f32
    %872 = vector.broadcast %cst_296 : f32 to vector<2x32xf32>
    %873 = arith.maximumf %871, %872 : vector<2x32xf32>
    %cst_297 = arith.constant 0.000000e+00 : f32
    %874 = vector.broadcast %cst_297 : f32 to vector<2x32xf32>
    %875 = arith.subf %874, %873 : vector<2x32xf32>
    %876 = math.exp %875 : vector<2x32xf32>
    %877 = vector.broadcast %2 : vector<1x8xf32> to vector<2x8xf32>
    %878 = arith.mulf %868, %877 : vector<2x8xf32>
    %879 = vector.broadcast %3 : vector<1x8xf32> to vector<2x8xf32>
    %880 = arith.addf %878, %879 : vector<2x8xf32>
    %cst_298 = arith.constant 0.000000e+00 : f32
    %881 = vector.broadcast %cst_298 : f32 to vector<2x8xf32>
    %882 = arith.maximumf %880, %881 : vector<2x8xf32>
    %cst_299 = arith.constant 0.000000e+00 : f32
    %883 = vector.broadcast %cst_299 : f32 to vector<2x8xf32>
    %884 = arith.subf %883, %882 : vector<2x8xf32>
    %885 = math.exp %884 : vector<2x8xf32>
    %cst_300 = arith.constant dense<0.000000e+00> : vector<2x256xf32>
    %886 = tpu.matmul %866, %11, %cst_300 {dimension_numbers = #tpu.dot_dimension_numbers<[1], [0], [0], [1], [0, 0, 1, 1], [], []>} : vector<2x8xf32>, vector<8x256xf32>, vector<2x256xf32> -> vector<2x256xf32>
    %887 = vector.extract_strided_slice %886 {offsets = [0, 0], sizes = [2, 128], strides = [1, 1]} : vector<2x256xf32> to vector<2x128xf32>
    %cst_301 = arith.constant dense<0.000000e+00> : vector<2x8xf32>
    %888 = tpu.matmul %885, %4, %cst_301 {dimension_numbers = #tpu.dot_dimension_numbers<[1], [0], [0], [1], [0, 0, 1, 1], [], []>} : vector<2x8xf32>, vector<8x8xf32>, vector<2x8xf32> -> vector<2x8xf32>
    %889 = vector.extract_strided_slice %886 {offsets = [0, 128], sizes = [2, 8], strides = [1, 1]} : vector<2x256xf32> to vector<2x8xf32>
    %890 = arith.addf %888, %889 : vector<2x8xf32>
    %891 = vector.broadcast %5 : vector<1x8xf32> to vector<2x8xf32>
    %892 = arith.addf %890, %891 : vector<2x8xf32>
    %cst_302 = arith.constant dense<0.000000e+00> : vector<2xf32>
    %893 = vector.multi_reduction <add>, %866, %cst_302 [1] : vector<2x8xf32> to vector<2xf32>
    %894 = vector.shape_cast %893 : vector<2xf32> to vector<2x1xf32>
    %cst_303 = arith.constant dense<0.000000e+00> : vector<1xf32>
    %895 = vector.multi_reduction <add>, %894, %cst_303 [0] : vector<2x1xf32> to vector<1xf32>
    %896 = vector.shape_cast %895 : vector<1xf32> to vector<1x1xf32>
    %897 = arith.mulf %841, %876 : vector<2x32xf32>
    %cst_304 = arith.constant dense<0.000000e+00> : vector<2x256xf32>
    %898 = tpu.matmul %897, %6, %cst_304 {dimension_numbers = #tpu.dot_dimension_numbers<[1], [0], [0], [1], [0, 0, 1, 1], [], []>} : vector<2x32xf32>, vector<32x256xf32>, vector<2x256xf32> -> vector<2x256xf32>
    %899 = vector.extract_strided_slice %898 {offsets = [0, 0], sizes = [2, 128], strides = [1, 1]} : vector<2x256xf32> to vector<2x128xf32>
    %900 = vector.extract_strided_slice %898 {offsets = [0, 128], sizes = [2, 8], strides = [1, 1]} : vector<2x256xf32> to vector<2x8xf32>
    %901 = vector.broadcast %7 : vector<1x8xf32> to vector<2x8xf32>
    %902 = arith.addf %900, %901 : vector<2x8xf32>
    %903 = arith.mulf %866, %864 : vector<2x8xf32>
    %cst_305 = arith.constant 1.000000e+00 : f32
    %904 = vector.broadcast %cst_305 : f32 to vector<2x8xf32>
    %905 = arith.subf %904, %866 : vector<2x8xf32>
    %906 = arith.mulf %905, %902 : vector<2x8xf32>
    %907 = arith.addf %903, %906 : vector<2x8xf32>
    %cst_306 = arith.constant dense<0.000000e+00> : vector<2x8xf32>
    %908 = tpu.matmul %907, %8, %cst_306 {dimension_numbers = #tpu.dot_dimension_numbers<[1], [0], [0], [1], [0, 0, 1, 1], [], []>} : vector<2x8xf32>, vector<8x8xf32>, vector<2x8xf32> -> vector<2x8xf32>
    %909 = vector.broadcast %9 : vector<1x8xf32> to vector<2x8xf32>
    %910 = arith.addf %908, %909 : vector<2x8xf32>
    %911 = arith.mulf %892, %910 : vector<2x8xf32>
    %cst_307 = arith.constant 1.000000e+00 : f32
    %912 = vector.broadcast %cst_307 : f32 to vector<2x8xf32>
    %913 = arith.subf %912, %892 : vector<2x8xf32>
    %914 = arith.mulf %913, %902 : vector<2x8xf32>
    %915 = arith.addf %911, %914 : vector<2x8xf32>
    %916 = arith.mulf %866, %864 : vector<2x8xf32>
    %cst_308 = arith.constant 1.000000e+00 : f32
    %917 = vector.broadcast %cst_308 : f32 to vector<2x8xf32>
    %918 = arith.subf %917, %866 : vector<2x8xf32>
    %919 = arith.mulf %918, %915 : vector<2x8xf32>
    %920 = arith.addf %916, %919 : vector<2x8xf32>
    %c7_309 = arith.constant 7 : index
    %c0_310 = arith.constant 0 : index
    %c0_311 = arith.constant 0 : index
    %921 = vector.load %arg21[%c7_309, %c0_310, %c0_311] : memref<8x2x8xf32, #tpu.memory_space<vmem>>, vector<1x2x8xf32>
    %922 = vector.shape_cast %921 : vector<1x2x8xf32> to vector<2x8xf32>
    %923 = vector.shape_cast %920 : vector<2x8xf32> to vector<1x2x8xf32>
    tpu.vector_store %arg21[%c7_309, %c0_310, %c0_311], %923 {strides = array<i32>} : memref<8x2x8xf32, #tpu.memory_space<vmem>>, vector<1x2x8xf32>,
    %924 = arith.subf %864, %902 : vector<2x8xf32>
    %925 = math.absf %924 : vector<2x8xf32>
    %926 = arith.subf %864, %910 : vector<2x8xf32>
    %927 = math.absf %926 : vector<2x8xf32>
    %928 = arith.addf %925, %927 : vector<2x8xf32>
    %929 = arith.subf %864, %915 : vector<2x8xf32>
    %930 = math.absf %929 : vector<2x8xf32>
    %931 = arith.addf %928, %930 : vector<2x8xf32>
    %932 = arith.mulf %931, %866 : vector<2x8xf32>
    %cst_312 = arith.constant dense<0.000000e+00> : vector<2xf32>
    %933 = vector.multi_reduction <add>, %932, %cst_312 [1] : vector<2x8xf32> to vector<2xf32>
    %934 = vector.shape_cast %933 : vector<2xf32> to vector<2x1xf32>
    %cst_313 = arith.constant dense<0.000000e+00> : vector<1xf32>
    %935 = vector.multi_reduction <add>, %934, %cst_313 [0] : vector<2x1xf32> to vector<1xf32>
    %936 = vector.shape_cast %935 : vector<1xf32> to vector<1x1xf32>
    %cst_314 = arith.constant 9.99999974E-6 : f32
    %937 = vector.broadcast %cst_314 : f32 to vector<1x1xf32>
    %938 = arith.addf %896, %937 : vector<1x1xf32>
    %939 = arith.divf %936, %938 : vector<1x1xf32>
    %940 = arith.addf %818, %939 : vector<1x1xf32>
    %cst_315 = arith.constant dense<0.000000e+00> : vector<2x128xf32>
    %941 = tpu.matmul %920, %10, %cst_315 {dimension_numbers = #tpu.dot_dimension_numbers<[1], [0], [0], [1], [0, 0, 1, 1], [], []>} : vector<2x8xf32>, vector<8x128xf32>, vector<2x128xf32> -> vector<2x128xf32>
    %942 = arith.addf %941, %899 : vector<2x128xf32>
    %943 = arith.addf %942, %887 : vector<2x128xf32>
    %944 = vector.broadcast %12 : vector<1x128xf32> to vector<2x128xf32>
    %945 = arith.addf %943, %944 : vector<2x128xf32>
    %946 = arith.negf %945 : vector<2x128xf32>
    %947 = math.exp %946 : vector<2x128xf32>
    %cst_316 = arith.constant 1.000000e+00 : f32
    %948 = vector.broadcast %cst_316 : f32 to vector<2x128xf32>
    %949 = arith.addf %948, %947 : vector<2x128xf32>
    %950 = arith.divf %948, %949 : vector<2x128xf32>
    %951 = math.tanh %945 : vector<2x128xf32>
    %952 = vector.extract_strided_slice %950 {offsets = [0, 0], sizes = [2, 32], strides = [1, 1]} : vector<2x128xf32> to vector<2x32xf32>
    %c96_i32_317 = arith.constant 96 : i32
    %953 = tpu.dynamic_rotate %950 by %c96_i32_317 dim 1 : vector<2x128xf32>, i32 -> vector<2x128xf32>
    %954 = vector.extract_strided_slice %953 {offsets = [0, 0], sizes = [2, 32], strides = [1, 1]} : vector<2x128xf32> to vector<2x32xf32>
    %c64_i32_318 = arith.constant 64 : i32
    %955 = tpu.dynamic_rotate %951 by %c64_i32_318 dim 1 : vector<2x128xf32>, i32 -> vector<2x128xf32>
    %956 = vector.extract_strided_slice %955 {offsets = [0, 0], sizes = [2, 32], strides = [1, 1]} : vector<2x128xf32> to vector<2x32xf32>
    %c32_i32_319 = arith.constant 32 : i32
    %957 = tpu.dynamic_rotate %950 by %c32_i32_319 dim 1 : vector<2x128xf32>, i32 -> vector<2x128xf32>
    %958 = vector.extract_strided_slice %957 {offsets = [0, 0], sizes = [2, 32], strides = [1, 1]} : vector<2x128xf32> to vector<2x32xf32>
    %959 = arith.mulf %954, %839 : vector<2x32xf32>
    %960 = arith.mulf %952, %956 : vector<2x32xf32>
    %961 = arith.addf %959, %960 : vector<2x32xf32>
    %962 = math.tanh %961 : vector<2x32xf32>
    %963 = arith.mulf %958, %962 : vector<2x32xf32>
    %c0_320 = arith.constant 0 : index
    %c0_321 = arith.constant 0 : index
    %964 = vector.load %arg16[%c0_320, %c0_321] : memref<32x512xf32, #tpu.memory_space<vmem>>, vector<32x512xf32>
    %cst_322 = arith.constant dense<0.000000e+00> : vector<2x512xf32>
    %965 = tpu.matmul %963, %964, %cst_322 {dimension_numbers = #tpu.dot_dimension_numbers<[1], [0], [0], [1], [0, 0, 1, 1], [], []>} : vector<2x32xf32>, vector<32x512xf32>, vector<2x512xf32> -> vector<2x512xf32>
    %966 = vector.extract_strided_slice %965 {offsets = [0, 0], sizes = [2, 384], strides = [1, 1]} : vector<2x512xf32> to vector<2x384xf32>
    %967 = vector.broadcast %13 : vector<1x384xf32> to vector<2x384xf32>
    %968 = arith.addf %966, %967 : vector<2x384xf32>
    %969 = math.tanh %968 : vector<2x384xf32>
    %c0_323 = arith.constant 0 : index
    %c0_324 = arith.constant 0 : index
    %970 = vector.load %arg18[%c0_323, %c0_324] : memref<384x30xf32, #tpu.memory_space<vmem>>, vector<384x30xf32>
    %cst_325 = arith.constant dense<0.000000e+00> : vector<2x30xf32>
    %971 = tpu.matmul %969, %970, %cst_325 {dimension_numbers = #tpu.dot_dimension_numbers<[1], [0], [0], [1], [0, 0, 1, 1], [], []>} : vector<2x384xf32>, vector<384x30xf32>, vector<2x30xf32> -> vector<2x30xf32>
    %972 = vector.broadcast %14 : vector<1x30xf32> to vector<2x30xf32>
    %973 = arith.addf %971, %972 : vector<2x30xf32>
    %974 = vector.extract_strided_slice %965 {offsets = [0, 384], sizes = [2, 30], strides = [1, 1]} : vector<2x512xf32> to vector<2x30xf32>
    %975 = arith.maximumf %853, %973 : vector<2x30xf32>
    %976 = arith.subf %853, %975 : vector<2x30xf32>
    %977 = math.exp %976 : vector<2x30xf32>
    %978 = arith.subf %973, %975 : vector<2x30xf32>
    %979 = math.exp %978 : vector<2x30xf32>
    %980 = arith.mulf %860, %977 : vector<2x30xf32>
    %981 = arith.mulf %979, %974 : vector<2x30xf32>
    %982 = arith.addf %980, %981 : vector<2x30xf32>
    %983 = arith.mulf %862, %977 : vector<2x30xf32>
    %984 = arith.addf %983, %979 : vector<2x30xf32>
    %985 = tpu.reciprocal %984 {approx = true} : vector<2x30xf32> -> vector<2x30xf32>
    %986 = arith.mulf %982, %985 : vector<2x30xf32>
    %cst_326 = arith.constant dense<0.000000e+00> : vector<2xf32>
    %987 = vector.multi_reduction <add>, %986, %cst_326 [1] : vector<2x30xf32> to vector<2xf32>
    %988 = vector.shape_cast %987 : vector<2xf32> to vector<2x1xf32>
    %c0_327 = arith.constant 0 : index
    %c0_328 = arith.constant 0 : index
    %989 = vector.load %arg20[%c0_327, %c0_328] : memref<1x1xf32, #tpu.memory_space<vmem>>, vector<1x1xf32>
    %990 = vector.broadcast %989 : vector<1x1xf32> to vector<2x1xf32>
    %991 = arith.addf %988, %990 : vector<2x1xf32>
    %992 = arith.negf %991 : vector<2x1xf32>
    %993 = math.exp %992 : vector<2x1xf32>
    %cst_329 = arith.constant 1.000000e+00 : f32
    %994 = vector.broadcast %cst_329 : f32 to vector<2x1xf32>
    %995 = arith.addf %994, %993 : vector<2x1xf32>
    %996 = arith.divf %994, %995 : vector<2x1xf32>
    %c0_330 = arith.constant 0 : index
    %c0_331 = arith.constant 0 : index
    %997 = vector.load %arg22[%c0_330, %c0_331] : memref<2x1xf32, #tpu.memory_space<vmem>>, vector<2x1xf32>
    tpu.vector_store %arg22[%c0_330, %c0_331], %996 {strides = array<i32>} : memref<2x1xf32, #tpu.memory_space<vmem>>, vector<2x1xf32>,
    %c0_332 = arith.constant 0 : index
    %c0_333 = arith.constant 0 : index
    %998 = vector.load %arg1[%c0_332, %c0_333] : memref<2x1xf32, #tpu.memory_space<vmem>>, vector<2x1xf32>
    %c0_334 = arith.constant 0 : index
    %c0_335 = arith.constant 0 : index
    %999 = vector.load %arg2[%c0_334, %c0_335] : memref<2x1xf32, #tpu.memory_space<vmem>>, vector<2x1xf32>
    %cst_336 = arith.constant 0.000000e+00 : f32
    %1000 = vector.broadcast %cst_336 : f32 to vector<2x1xf32>
    %1001 = arith.subf %1000, %991 : vector<2x1xf32>
    %cst_337 = arith.constant 0.000000e+00 : f32
    %1002 = vector.broadcast %cst_337 : f32 to vector<2x1xf32>
    %1003 = arith.maximumf %1001, %1002 : vector<2x1xf32>
    %1004 = arith.mulf %991, %998 : vector<2x1xf32>
    %1005 = arith.subf %991, %1004 : vector<2x1xf32>
    %1006 = arith.addf %1005, %1003 : vector<2x1xf32>
    %cst_338 = arith.constant 0.000000e+00 : f32
    %1007 = vector.broadcast %cst_338 : f32 to vector<2x1xf32>
    %1008 = arith.subf %1007, %1003 : vector<2x1xf32>
    %1009 = math.exp %1008 : vector<2x1xf32>
    %cst_339 = arith.constant 0.000000e+00 : f32
    %1010 = vector.broadcast %cst_339 : f32 to vector<2x1xf32>
    %1011 = arith.subf %1010, %991 : vector<2x1xf32>
    %1012 = arith.subf %1011, %1003 : vector<2x1xf32>
    %1013 = math.exp %1012 : vector<2x1xf32>
    %1014 = arith.addf %1009, %1013 : vector<2x1xf32>
    %1015 = math.log %1014 : vector<2x1xf32>
    %1016 = arith.addf %1006, %1015 : vector<2x1xf32>
    %1017 = arith.mulf %1016, %999 : vector<2x1xf32>
    %cst_340 = arith.constant dense<0.000000e+00> : vector<2xf32>
    %1018 = vector.multi_reduction <add>, %1017, %cst_340 [1] : vector<2x1xf32> to vector<2xf32>
    %1019 = vector.shape_cast %1018 : vector<2xf32> to vector<2x1xf32>
    %cst_341 = arith.constant dense<0.000000e+00> : vector<1xf32>
    %1020 = vector.multi_reduction <add>, %1019, %cst_341 [0] : vector<2x1xf32> to vector<1xf32>
    %1021 = vector.shape_cast %1020 : vector<1xf32> to vector<1x1xf32>
    %cst_342 = arith.constant dense<0.000000e+00> : vector<2xf32>
    %1022 = vector.multi_reduction <add>, %999, %cst_342 [1] : vector<2x1xf32> to vector<2xf32>
    %1023 = vector.shape_cast %1022 : vector<2xf32> to vector<2x1xf32>
    %cst_343 = arith.constant dense<0.000000e+00> : vector<1xf32>
    %1024 = vector.multi_reduction <add>, %1023, %cst_343 [0] : vector<2x1xf32> to vector<1xf32>
    %1025 = vector.shape_cast %1024 : vector<1xf32> to vector<1x1xf32>
    %cst_344 = arith.constant 9.99999974E-6 : f32
    %1026 = vector.broadcast %cst_344 : f32 to vector<1x1xf32>
    %1027 = arith.addf %1025, %1026 : vector<1x1xf32>
    %1028 = arith.divf %1021, %1027 : vector<1x1xf32>
    %cst_345 = arith.constant 1.250000e-01 : f32
    %1029 = vector.broadcast %cst_345 : f32 to vector<1x1xf32>
    %1030 = arith.mulf %940, %1029 : vector<1x1xf32>
    %cst_346 = arith.constant 1.000000e-01 : f32
    %1031 = vector.broadcast %cst_346 : f32 to vector<1x1xf32>
    %1032 = arith.mulf %1028, %1031 : vector<1x1xf32>
    %c0_347 = arith.constant 0 : index
    %c0_348 = arith.constant 0 : index
    %1033 = vector.load %arg23[%c0_347, %c0_348] : memref<1x1xf32, #tpu.memory_space<vmem>>, vector<1x1xf32>
    tpu.vector_store %arg23[%c0_347, %c0_348], %1030 {strides = array<i32>} : memref<1x1xf32, #tpu.memory_space<vmem>>, vector<1x1xf32>,
    %c0_349 = arith.constant 0 : index
    %c0_350 = arith.constant 0 : index
    %1034 = vector.load %arg24[%c0_349, %c0_350] : memref<1x1xf32, #tpu.memory_space<vmem>>, vector<1x1xf32>
    tpu.vector_store %arg24[%c0_349, %c0_350], %1032 {strides = array<i32>} : memref<1x1xf32, #tpu.memory_space<vmem>>, vector<1x1xf32>,
    %1035 = arith.addf %1030, %1032 : vector<1x1xf32>
    %c0_351 = arith.constant 0 : index
    %c0_352 = arith.constant 0 : index
    %1036 = vector.load %arg25[%c0_351, %c0_352] : memref<1x1xf32, #tpu.memory_space<vmem>>, vector<1x1xf32>
    tpu.vector_store %arg25[%c0_351, %c0_352], %1035 {strides = array<i32>} : memref<1x1xf32, #tpu.memory_space<vmem>>, vector<1x1xf32>,
    return
  }
}

</mosaic_0001>

<bundles_post_ra>
// kernel: model_forward.1
= control target key start
LH: loop header
LB: loop body
LE: loop exit
PB: predicated region body
PF: predicated region fallthrough
CT: control target
= control target key end

     0   :  { %s11707_s0 = inlined_call_operand.vmem [shape: f32[24,2,8], index: 0, kind: input, shape index: {}]   ;;  %s11708_s1 = inlined_call_operand.vmem [shape: f32[2,1], index: 1, kind: input, shape index: {}]   ;;  %s11709_s2 = inlined_call_operand.vmem [shape: f32[2,1], index: 2, kind: input, shape index: {}]   ;;  %s11710_s3 = inlined_call_operand.vmem [shape: f32[8,32], index: 3, kind: input, shape index: {}]   ;;  %s11711_s4 = inlined_call_operand.vmem [shape: f32[1,32], index: 4, kind: input, shape index: {}]   ;;  %s11712_s5 = inlined_call_operand.vmem [shape: f32[1,8], index: 5, kind: input, shape index: {}]   ;;  %s11713_s6 = inlined_call_operand.vmem [shape: f32[1,8], index: 6, kind: input, shape index: {}]   ;;  %s11714_s7 = inlined_call_operand.vmem [shape: f32[8,8], index: 7, kind: input, shape index: {}]   ;;  %s11715_s8 = inlined_call_operand.vmem [shape: f32[1,8], index: 8, kind: input, shape index: {}]   ;;  %s11716_s9 = inlined_call_operand.vmem [shape: f32[32,256], index: 9, kind: input, shape index: {}]   ;;  %s11717_s10 = inlined_call_operand.hbm [shape: f32[1,8], index: 10, kind: input, shape index: {}]   ;;  %s11718_s11 = inlined_call_operand.vmem [shape: f32[8,8], index: 11, kind: input, shape index: {}]   ;;  %s11719_s12 = inlined_call_operand.hbm [shape: f32[1,8], index: 12, kind: input, shape index: {}]   ;;  %s11720_s13 = inlined_call_operand.hbm [shape: f32[8,128], index: 13, kind: input, shape index: {}]   ;;  %s11721_s14 = inlined_call_operand.vmem [shape: f32[8,256], index: 14, kind: input, shape index: {}]   ;;  %s11722_s15 = inlined_call_operand.hbm [shape: f32[1,128], index: 15, kind: input, shape index: {}]   ;;  %s11723_s16 = inlined_call_operand.vmem [shape: f32[32,512], index: 16, kind: input, shape index: {}]   ;;  %s11724_s17 = inlined_call_operand.hbm [shape: f32[1,384], index: 17, kind: input, shape index: {}]   ;;  %s11725_s18 = inlined_call_operand.hbm [shape: f32[384,30], index: 18, kind: input, shape index: {}]   ;;  %s11726_s19 = inlined_call_operand.hbm [shape: f32[1,30], index: 19, kind: input, shape index: {}]   ;;  %s11727_s20 = inlined_call_operand.<no memory space> [shape: f32[1,1], index: 20, kind: input, shape index: {}]   ;;  %s11728_s21 = inlined_call_operand.vmem [shape: f32[8,2,8], index: 21, kind: output, shape index: {0}]   ;;  %s11729_s22 = inlined_call_operand.vmem [shape: f32[2,1], index: 22, kind: output, shape index: {1}]   ;;  %s11730_s23 = inlined_call_operand.hbm [shape: f32[1,1], index: 23, kind: output, shape index: {2}]   ;;  %s11731_s24 = inlined_call_operand.hbm [shape: f32[1,1], index: 24, kind: output, shape index: {3}]   ;;  %s11732_s25 = inlined_call_operand.hbm [shape: f32[1,1], index: 25, kind: output, shape index: {4}]  }
   0x1   :  { %11911 = sst [smem:[#allocation74_spill]] %s11707_s0  ;;  %v31_v0 = vstv %s11727_s20 }
   0x2   :  { %11912 = sst [smem:[#allocation75_spill]] %s11708_s1  ;;  %32 = vst [vmem:[#allocation2] sm:$0x1] %v31_v0 }
   0x3   :  { %11913 = sst [smem:[#allocation76_spill]] %s11709_s2 }
   0x4   :  { %11914 = sst [smem:[#allocation77_spill]] %s11710_s3 }
   0x5   :  { %11915 = sst [smem:[#allocation78_spill]] %s11711_s4 }
   0x6   :  { %11916 = sst [smem:[#allocation79_spill]] %s11712_s5 }
   0x7   :  { %11917 = sst [smem:[#allocation80_spill]] %s11713_s6 }
   0x8   :  { %11918 = sst [smem:[#allocation81_spill]] %s11714_s7 }
   0x9   :  { %11919 = sst [smem:[#allocation82_spill]] %s11715_s8 }
   0xa   :  { %11920 = sst [smem:[#allocation83_spill]] %s11716_s9 }
   0xb   :  { %33 = vsyncpa [#allocation4], 0 }
   0xc   :  { %34 = vsyncpa [#allocation7], 0 }
   0xd   :  { %35 = vsyncpa [#allocation10], 0 }
   0xe   :  { %36 = vsyncpa [#allocation13], 0 }
   0xf   :  { %37 = vsyncpa [#allocation5], 0 }
  0x10   :  { %38 = vsyncpa [#allocation17], 0  ;;  %s9018_s6 = smov [#allocation6]   ;;  %s9019_s7 = smov [#allocation9]  }
  0x11   :  { %s77_s30 = sshll.u32 %s9018_s6, 4  ;;  %s99_s3 = sshll.u32 %s9019_s7, 4  ;;  %s78_s30 = int_to_ptr.vmem [resolvable:$true] %s77_s30  ;;  %s100_s3 = int_to_ptr.vmem [resolvable:$true] %s99_s3 }
  0x12   :  { %s8814_s26 = scalar_lea.vmem %s78_s30, 16  ;;  %s8818_s1 = scalar_lea.vmem %s78_s30, 32 }
  0x13   :  { %p8815_p0 = scmp.ne.s32.totalorder %s78_s30, %s8814_s26  ;;  %p8819_p1 = scmp.lt.s32.totalorder %s78_s30, %s78_s30 }
  0x14   :  { %p8820_p2 = scmp.lt.s32.totalorder %s8818_s1, %s8814_s26 }
  0x16   :  { %p8821_p3 = por %p8820_p2, %p8819_p1 }
  0x18   :  { %p8822_p4 = pnand %p8821_p3, %p8815_p0 }
  0x1a   :  { %8825 = shalt.err (!%p8822_p4)
}
  0x1b   :  { %80 = dma.hbm_to_vmem [thread:$0]  %s11719_s12, 16, %s78_s30, [#allocation7]  }
  0x1c   :  { %s8834_s27 = scalar_lea.vmem %s100_s3, 16  ;;  %s8838_s4 = scalar_lea.vmem %s100_s3, 32 }
  0x1d   :  { %p8835_p5 = scmp.ne.s32.totalorder %s100_s3, %s8834_s27  ;;  %p8839_p6 = scmp.lt.s32.totalorder %s100_s3, %s100_s3 }
  0x1e   :  { %p8840_p7 = scmp.lt.s32.totalorder %s8838_s4, %s8834_s27 }
  0x20   :  { %p8841_p8 = por %p8840_p7, %p8839_p6 }
  0x22   :  { %p8842_p9 = pnand %p8841_p8, %p8835_p5 }
  0x24   :  { %8845 = shalt.err (!%p8842_p9)
}
  0x25   :  { %102 = dma.hbm_to_vmem [thread:$0]  %s11722_s15, 16, %s100_s3, [#allocation10]  }
  0x26   :  { %s9020_s5 = smov [#allocation12]  }
  0x27   :  { %s120_s0 = sshll.u32 %s9020_s5, 4  ;;  %s121_s0 = int_to_ptr.vmem [resolvable:$true] %s120_s0 }
  0x28   :  { %s8854_s29 = scalar_lea.vmem %s121_s0, 6144  ;;  %p8859_p11 = scmp.lt.s32.totalorder %s121_s0, %s121_s0 }
  0x29   :  { %p8855_p10 = scmp.ne.s32.totalorder %s121_s0, %s8854_s29  ;;  %p8860_p12 = scmp.lt.s32.totalorder %s8854_s29, %s8854_s29 }
  0x2b   :  { %p8861_p13 = por %p8860_p12, %p8859_p11 }
  0x2d   :  { %p8862_p0 = pnand %p8861_p13, %p8855_p10 }
  0x2f   :  { %8865 = shalt.err (!%p8862_p0)
}
  0x30   :  { %s9021_s12 = smov 128   ;;  %s9022_s2 = smov 8  }
  0x31   :  { %126 = dma.hbm_to_vmem [thread:$0]  %s11725_s18, 6144, %s121_s0, [#allocation13], %s9021_s12, %s9021_s12, %s9022_s2  }
  0x32   :  { %s9023_s7 = smov [#allocation3]   ;;  %s9024_s15 = smov [#allocation8]  }
  0x33   :  { %s65_s26 = sshll.u32 %s9023_s7, 4  ;;  %s87_s3 = sshll.u32 %s9024_s15, 4  ;;  %s66_s26 = int_to_ptr.vmem [resolvable:$true] %s65_s26  ;;  %s88_s3 = int_to_ptr.vmem [resolvable:$true] %s87_s3 }
  0x34   :  { %s8874_s1 = scalar_lea.vmem %s66_s26, 16  ;;  %s8878_s20 = scalar_lea.vmem %s66_s26, 32 }
  0x35   :  { %p8875_p1 = scmp.ne.s32.totalorder %s66_s26, %s8874_s1  ;;  %p8879_p2 = scmp.lt.s32.totalorder %s66_s26, %s66_s26 }
  0x36   :  { %p8880_p3 = scmp.lt.s32.totalorder %s8878_s20, %s8874_s1 }
  0x38   :  { %p8881_p4 = por %p8880_p3, %p8879_p2 }
  0x3a   :  { %p8882_p5 = pnand %p8881_p4, %p8875_p1 }
  0x3c   :  { %8885 = shalt.err (!%p8882_p5)
}
  0x3d   :  { %68 = dma.hbm_to_vmem [thread:$0]  %s11717_s10, 16, %s66_s26, [#allocation4]  }
  0x3e   :  { %s8894_s4 = scalar_lea.vmem %s88_s3, 128  ;;  %p8899_p7 = scmp.lt.s32.totalorder %s88_s3, %s88_s3 }
  0x3f   :  { %p8895_p6 = scmp.ne.s32.totalorder %s88_s3, %s8894_s4  ;;  %p8900_p8 = scmp.lt.s32.totalorder %s8894_s4, %s8894_s4 }
  0x41   :  { %p8901_p9 = por %p8900_p8, %p8899_p7 }
  0x43   :  { %p8902_p10 = pnand %p8901_p9, %p8895_p6 }
  0x45   :  { %8905 = shalt.err (!%p8902_p10)
}
  0x46   :  { %90 = dma.hbm_to_vmem [thread:$0]  %s11720_s13, 128, %s88_s3, [#allocation7]  }
  0x47   :  { %s9025_s9 = smov [#allocation11]   ;;  %s9026_s0 = smov [#allocation14]  }
  0x48   :  { %s111_s5 = sshll.u32 %s9025_s9, 4  ;;  %s133_s29 = sshll.u32 %s9026_s0, 4  ;;  %s112_s5 = int_to_ptr.vmem [resolvable:$true] %s111_s5  ;;  %s134_s29 = int_to_ptr.vmem [resolvable:$true] %s133_s29 }
  0x49   :  { %s8914_s12 = scalar_lea.vmem %s112_s5, 48  ;;  %s8918_s10 = scalar_lea.vmem %s112_s5, 64 }
  0x4a   :  { %p8915_p11 = scmp.ne.s32.totalorder %s112_s5, %s8914_s12  ;;  %p8919_p12 = scmp.lt.s32.totalorder %s112_s5, %s112_s5 }
  0x4b   :  { %p8920_p13 = scmp.lt.s32.totalorder %s8918_s10, %s8914_s12 }
  0x4d   :  { %p8921_p0 = por %p8920_p13, %p8919_p12 }
  0x4f   :  { %p8922_p1 = pnand %p8921_p0, %p8915_p11 }
  0x51   :  { %8925 = shalt.err (!%p8922_p1)
}
  0x52   :  { %114 = dma.hbm_to_vmem [thread:$0]  %s11724_s17, 48, %s112_s5, [#allocation10]  }
  0x53   :  { %s8934_s30 = scalar_lea.vmem %s134_s29, 16  ;;  %s8938_s13 = scalar_lea.vmem %s134_s29, 32 }
  0x54   :  { %p8935_p2 = scmp.ne.s32.totalorder %s134_s29, %s8934_s30  ;;  %p8939_p3 = scmp.lt.s32.totalorder %s134_s29, %s134_s29 }
  0x55   :  { %p8940_p4 = scmp.lt.s32.totalorder %s8938_s13, %s8934_s30 }
  0x57   :  { %p8941_p5 = por %p8940_p4, %p8939_p3 }
  0x59   :  { %p8942_p6 = pnand %p8941_p5, %p8935_p2 }
  0x5b   :  { %8945 = shalt.err (!%p8942_p6)
}
  0x5c   :  { %136 = dma.hbm_to_vmem [thread:$0]  %s11726_s19, 16, %s134_s29, [#allocation13]  }
  0x5d   :  { %9006 = dma.done.wait [#allocation4], 16  }
  0x5e   :  { %9007 = vsyncadd [#allocation4], 4294967280 }
  0x5f   :  { %9008 = dma.done.wait [#allocation7], 144  }
  0x60   :  { %9009 = vsyncadd [#allocation7], 4294967152 }
  0x61   :  { %9010 = dma.done.wait [#allocation10], 64  }
  0x62   :  { %9011 = vsyncadd [#allocation10], 4294967232 }
  0x63   :  { %9012 = dma.done.wait [#allocation13], 6160  }
  0x64   :  { %9013 = vsyncadd [#allocation13], 4294961136  ;;  %v11777_v1 = vmov 0.0   ;;  %vm9028_vm0 = vmmov 0   ;;  %vm194_vm1 = vcmask 64512   ;;  %s11921_s15 = sld [smem:[#allocation77_spill]] }
  0x65   :  { %8075 = vmatprep.subr.mxu0 %v11777_v1  ;;  %8077 = vmatprep.mubr.msk.f32.mxu0 %vm9028_vm0, %v11777_v1  ;;  %s11922_s20 = sld [smem:[#allocation74_spill]]  ;;  %v9221_v11 = vld [vmem:[%s11721_s14 + $0x8] sm:$0xff]  ;;  %v9227_v12 = vld [vmem:[%s11721_s14] sm:$0xff]  ;;  %vm457_vm2 = vcmask 261120   ;;  %vm444_vm3 = vcmask 58368   ;;  %s9029_s1 = smov 32  }
  0x66   :  { %357 = vmatprep.mubr.f32.mxu1 %v11777_v1  ;;  %s11923_s4 = sld [smem:[#allocation79_spill]]  ;;  %11926 = vst [vmem:[#allocation26_spill] sm:$0xff] %v9221_v11  ;;  %323 = vmatprep.subr.mxu1 %v9221_v11  ;;  %v9307_v35 = vld [vmem:[%s11718_s11] sm:$0xff]  ;;  %s9030_s8 = smov 96   ;;  %vm448_vm4 = vcmask 1041408   ;;  %vm7425_vm5 = vcmask 0  }
  0x67   :  { %s11925_s9 = sld [smem:[#allocation80_spill]]  ;;  %324 = vmatpush1.msra.mxu1 %v9227_v12  ;;  %v9317_v42 = vld [vmem:[#allocation3] ss:$0 sm:$0xff]  ;;  %v9328_v52 = vld [vmem:[#allocation8] sm:$0xff]  ;;  %v9331_v53 = vld [vmem:[#allocation6] ss:$0 sm:$0xff] }
  0x68   :  { %s11927_s13 = sld [smem:[#allocation81_spill]]  ;;  %s9031_s6 = smov 64   ;;  %vm7366_vm6 = vcmask 238592  }
  0x69   :  { %s11928_s17 = sld [smem:[#allocation83_spill]] }
  0x6a   :  { %v9196_v2 = vld [vmem:[%s11921_s15] sm:$0xff]  ;;  %s11929_s26 = sld [smem:[#allocation78_spill]] }
  0x6b   :  { %8076 = vmatpush3.msra.mxu0 %v9196_v2  ;;  %v7484_v3 = vld [vmem:[%s11922_s20 + $0x4] sm:$0x3]  ;;  %v9233_v14 = vld [vmem:[%s11922_s20 + $0x2] sm:$0x3]  ;;  %s11930_s27 = sld [smem:[#allocation82_spill]] }
  0x6c   :  { %8078 = vmatmul.mubr.msk.f32.vlgmr.msra.gmra.mxu0 %vm194_vm1, %v7484_v3  ;;  %8080 = vmatprep.subr.mxu0 %v11777_v1  ;;  %v9209_v4 = vld [vmem:[%s11923_s4] ss:$0 sm:$0xff]  ;;  %v540_v44 = vsub.f32 1.0, %v9233_v14 }
  0x6d   :  { %8082 = vmatprep.mubr.msk.f32.mxu0 %vm9028_vm0, %v11777_v1  ;;  %11924 = vst [vmem:[#allocation25_spill] sm:$0xff] %v9209_v4  ;;  %v278_v5 = vmul.f32 %v9209_v4, %v7484_v3  ;;  %v9215_v6 = vld [vmem:[%s11925_s9] ss:$0 sm:$0xff]  ;;  %7489 = vmatmul.mubr.msk.f32.vlgmr.msra.gmra.mxu1 %vm194_vm1, %v9233_v14 }
  0x6e   :  { %v9240_v15 = vld [vmem:[%s11927_s13] sm:$0xff]  ;;  %525 = vmatprep.mubr.f32.mxu1 %v11777_v1 }
  0x6f   :  { %v285_v7 = vadd.f32 %v9215_v6, %v278_v5  ;;  %v9245_v16 = vld [vmem:[%s11928_s17 + $0x38] sm:$0xff]  ;;  %8081 = vmatpush3.msra.mxu0 %v9240_v15  ;;  %v9252_v17 = vld [vmem:[%s11928_s17 + $0x30] sm:$0xff]  ;;  %v9259_v18 = vld [vmem:[%s11928_s17 + $0x28] sm:$0xff] }
  0x70   :  { %485 = vmatprep.subr.mxu1 %v9245_v16  ;;  %v9265_v19 = vld [vmem:[%s11928_s17 + $0x20] sm:$0xff]  ;;  %v9272_v20 = vld [vmem:[%s11928_s17 + $0x18] sm:$0xff]  ;;  %8085 = vmatprep.subr.mxu0 %v11777_v1  ;;  %v9279_v21 = vld [vmem:[%s11928_s17 + $0x10] sm:$0xff] }
  0x71   :  { %v286_v8 = vmax.f32 %v285_v7, 0.0  ;;  %486 = vmatpush1.msra.mxu1 %v9252_v17  ;;  %v9287_v22 = vld [vmem:[%s11928_s17 + $0x8] sm:$0xff]  ;;  %v9293_v23 = vld [vmem:[%s11928_s17] sm:$0xff] }
  0x72   :  { %487 = vmatprep.subr.mxu1 %v9259_v18  ;;  %v9299_v24 = vld [vmem:[%s11929_s26] ss:$0 sm:$0xff] }
  0x73   :  { %v287_v9 = vsub.f32 0.0, %v286_v8  ;;  %488 = vmatpush1.msra.mxu1 %v9265_v19  ;;  %v9314_v39 = vld [vmem:[%s11930_s27] ss:$0 sm:$0xff] }
  0x74   :  { %489 = vmatprep.subr.mxu1 %v9272_v20  ;;  %v183_v43 = vld [vmem:[%s11922_s20] sm:$0x3] }
  0x75   :  { %v288_v10 = vmul.f32 1.442695, %v287_v9  ;;  %490 = vmatpush1.msra.mxu1 %v9279_v21  ;;  %v539_v48 = vmul.f32 %v9233_v14, %v183_v43 }
  0x76   :  { %491 = vmatprep.subr.mxu1 %v9287_v22 }
  0x77   :  { %8532 = vpow2.f32 %v288_v10  ;;  %492 = vmatpush1.msra.mxu1 %v9293_v23 }
  0x84   :  { %v8533_v13 = vpop.eup %8532 }
  0x85   :  { %8083 = vmatmul.mubr.msk.f32.vlgmr.msra.gmra.mxu0 %vm194_vm1, %v8533_v13  ;;  %v9342_v13 = vld [vmem:[#allocation9] ss:$0 sm:$0xff] }
  0x86   :  { %8087 = vmatprep.mubr.msk.f32.mxu0 %vm9028_vm0, %v11777_v1  ;;  %8086 = vmatpush3.msra.mxu0 %v9307_v35 }
  0x87   :  { %8090 = vmatprep.subr.mxu0 %v11777_v1 }
 0x12c   :  { %v264_v25 = vpop.f32.mrf.mxu0 }
 0x12d   :  { %v265_v26 = vadd.f32 %v9299_v24, %v264_v25  ;;  %v359_v36 = vpop.f32.mrf.mxu1 }
 0x12e   :  { %v8079_v27 = vpop.f32.mrf.mxu0 }
 0x12f   :  { %v268_v28 = vmax.f32 %v265_v26, 0.0  ;;  %v361_v37 = vpop.f32.mrf.mxu1 }
 0x131   :  { %v269_v29 = vsub.f32 0.0, %v268_v28 }
 0x133   :  { %v270_v30 = vmul.f32 1.442695, %v269_v29 }
 0x135   :  { %8534 = vpow2.f32 %v270_v30  ;;  %v9348_v30 = vld [vmem:[%s11723_s16 + $0x68] sm:$0xff] }
 0x136   :  { %794 = vmatprep.subr.mxu1 %v9348_v30 }
 0x142   :  { %v8535_v31 = vpop.eup %8534 }
 0x143   :  { %v456_v32 = vmul.f32 0.0, %v8535_v31  ;;  %v9353_v31 = vld [vmem:[%s11723_s16 + $0x78] sm:$0xff] }
 0x145   :  { %7492 = vmatmul.mubr.msk.f32.vlgmr.msra.gmra.mxu1 %vm457_vm2, %v456_v32  ;;  %v433_v33 = vpop.f32.mrf.mxu0  ;;  %v9358_v32 = vld [vmem:[%s11723_s16 + $0x60] sm:$0xff] }
 0x146   :  { %834 = vmatprep.mubr.f32.mxu1 %v11777_v1  ;;  %v434_v38 = vadd.f32 %v433_v33, %v361_v37  ;;  %v9365_v33 = vld [vmem:[%s11723_s16 + $0x70] sm:$0xff]  ;;  %795 = vmatpush1.msra.mxu1 %v9358_v32  ;;  %v9382_v37 = vld [vmem:[%s11723_s16 + $0x40] sm:$0xff] }
 0x147   :  { %v8084_v34 = vpop.f32.mrf.mxu0 }
 0x148   :  { %v443_v40 = vadd.f32 %v9314_v39, %v434_v38  ;;  %v9370_v34 = vld [vmem:[%s11723_s16 + $0x48] sm:$0xff]  ;;  %v9387_v38 = vld [vmem:[%s11723_s16 + $0x50] sm:$0xff] }
 0x149   :  { %796 = vmatprep.subr.mxu1 %v9370_v34 }
 0x14a   :  { %v623_v46 = vsub.f32 1.0, %v443_v40  ;;  %797 = vmatpush1.msra.mxu1 %v9382_v37 }
 0x205   :  { %v527_v41 = vpop.f32.mrf.mxu1 }
 0x207   :  { %v529_v45 = vpop.f32.mrf.mxu1 }
 0x208   :  { %v538_v47 = vadd.f32 %v9317_v42, %v529_v45  ;;  %v9411_v45 = vld [vmem:[%s11723_s16 + $0x30] sm:$0xff] }
 0x20a   :  { %v541_v49 = vmul.f32 %v540_v44, %v538_v47  ;;  %v624_v50 = vmul.f32 %v623_v46, %v538_v47  ;;  %v629_v55 = vsub.f32 %v183_v43, %v538_v47  ;;  %v9418_v46 = vld [vmem:[%s11723_s16 + $0x8] sm:$0xff]  ;;  %v9423_v47 = vld [vmem:[%s11723_s16 + $0x18] sm:$0xff] }
 0x20c   :  { %v542_v51 = vadd.f32 %v541_v49, %v539_v48  ;;  %v630_v60 = vand.u32 2147483647, %v629_v55  ;;  %v9437_v49 = vld [vmem:[%s11723_s16 + $0x10] sm:$0xff] }
 0x20e   :  { %8088 = vmatmul.mubr.msk.f32.vlgmr.msra.gmra.mxu0 %vm194_vm1, %v542_v51  ;;  %v9445_v51 = vld [vmem:[#allocation12 + $0xf8] sm:$0xff] }
 0x20f   :  { %8092 = vmatprep.mubr.msk.f32.mxu0 %vm9028_vm0, %v11777_v1  ;;  %8091 = vmatpush3.msra.mxu0 %v9328_v52 }
 0x210   :  { %865 = vmatprep.subr.mxu0 %v9353_v31 }
 0x2ce   :  { %v618_v54 = vpop.f32.mrf.mxu0 }
 0x2cf   :  { %v619_v56 = vadd.f32 %v9331_v53, %v618_v54 }
 0x2d0   :  { %v8089_v57 = vpop.f32.mrf.mxu0 }
 0x2d1   :  { %v622_v58 = vmul.f32 %v619_v56, %v443_v40  ;;  %v631_v59 = vsub.f32 %v183_v43, %v619_v56  ;;  %v9394_v40 = vld [vmem:[%s11723_s16 + $0x28] sm:$0xff] }
 0x2d2   :  { %798 = vmatprep.subr.mxu1 %v9394_v40 }
 0x2d3   :  { %v625_v61 = vadd.f32 %v624_v50, %v622_v58  ;;  %v632_v62 = vand.u32 2147483647, %v631_v59 }
 0x2d5   :  { %v626_v63 = vmul.f32 %v625_v61, %v540_v44  ;;  %v633_v0 = vadd.f32 %v632_v62, %v630_v60  ;;  %v634_v3 = vsub.f32 %v183_v43, %v625_v61  ;;  %v9406_v44 = vld [vmem:[%s11723_s16 + $0x20] sm:$0xff]  ;;  %v9453_v62 = vld [vmem:[#allocation12 + $0x178] sm:$0xff] }
 0x2d6   :  { %799 = vmatpush1.msra.mxu1 %v9406_v44 }
 0x2d7   :  { %v627_v5 = vadd.f32 %v626_v63, %v539_v48  ;;  %v635_v7 = vand.u32 2147483647, %v634_v3  ;;  %v9430_v48 = vld [vmem:[%s11723_s16] sm:$0xff]  ;;  %800 = vmatprep.subr.mxu1 %v9418_v46  ;;  %v9455_v63 = vld [vmem:[#allocation12 + $0x78] sm:$0xff] }
 0x2d8   :  { %801 = vmatpush1.msra.mxu1 %v9430_v48  ;;  %v9463_v3 = vld [vmem:[#allocation12 + $0x170] sm:$0xff] }
 0x2d9   :  { %628 = vst.msk [vmem:[%s11728_s21] sm:$0x3] %vm444_vm3, %v627_v5  ;;  %8093 = vmatmul.mubr.msk.f32.vlgmr.msra.gmra.mxu0 %vm194_vm1, %v627_v5  ;;  %v9339_v8 = vadd.f32 %v635_v7, %v633_v0  ;;  %7603 = vmatprep.subr.mxu1 %v9445_v51  ;;  %v9457_v0 = vld [vmem:[#allocation12 + $0xf0] sm:$0xff]  ;;  %v9469_v7 = vld [vmem:[#allocation12 + $0xe8] sm:$0xff] }
 0x2da   :  { %905 = vmatprep.mubr.f32.mxu0 %v11777_v1  ;;  %866 = vmatpush1.msra.mxu0 %v9365_v33  ;;  %v9465_v5 = vld [vmem:[#allocation12 + $0x70] sm:$0xff] }
 0x2db   :  { %11931 = vst [vmem:[#allocation27_spill] sm:$0xff] %v9339_v8  ;;  %v9532_v8 = vld [vmem:[#allocation12 + $0x138] sm:$0xff] }
 0x2dc   :  { %11946 = vst [vmem:[#allocation42_spill] sm:$0xff] %v9532_v8 }
 0x399   :  { %v721_v9 = vpop.f32.mrf.mxu0 }
 0x39a   :  { %v722_v10 = vadd.f32 %v721_v9, %v527_v41  ;;  %v9399_v41 = vld [vmem:[%s11723_s16 + $0x38] sm:$0xff] }
 0x39b   :  { %v8094_v14 = vpop.f32.mrf.mxu0  ;;  %v9473_v9 = vld [vmem:[#allocation12 + $0x168] sm:$0xff] }
 0x39c   :  { %v725_v25 = vadd.f32 %v722_v10, %v359_v36  ;;  %v9375_v36 = vld [vmem:[%s11723_s16 + $0x58] sm:$0xff] }
 0x39d   :  { %867 = vmatprep.subr.mxu0 %v9375_v36  ;;  %v9475_v10 = vld [vmem:[#allocation12 + $0x68] sm:$0xff]  ;;  %v9479_v14 = vld [vmem:[#allocation12 + $0xe0] sm:$0xff] }
 0x39e   :  { %v732_v26 = vadd.f32 %v9342_v13, %v725_v25  ;;  %868 = vmatpush1.msra.mxu0 %v9387_v38  ;;  %11932 = vst [vmem:[#allocation28_spill] sm:$0xff] %v9479_v14  ;;  %v9483_v25 = vld [vmem:[#allocation12 + $0x160] sm:$0xff] }
 0x39f   :  { %869 = vmatprep.subr.mxu0 %v9399_v41  ;;  %11933 = vst [vmem:[#allocation29_spill] sm:$0xff] %v9483_v25 }
 0x3a0   :  { %v7498_v27 = vmul.f32 -1.442695, %v732_v26  ;;  %870 = vmatpush1.msra.mxu0 %v9411_v45 }
 0x3a1   :  { %871 = vmatprep.subr.mxu0 %v9423_v47 }
 0x3a2   :  { %8536 = vpow2.f32 %v7498_v27  ;;  %872 = vmatpush1.msra.mxu0 %v9437_v49  ;;  %v9489_v27 = vld [vmem:[#allocation12 + $0xd8] sm:$0xff] }
 0x3a3   :  { %8095 = vmatprep.subr.mxu0 %v11777_v1  ;;  %11935 = vst [vmem:[#allocation31_spill] sm:$0xff] %v9489_v27 }
 0x3af   :  { %v8537_v28 = vpop.eup %8536 }
 0x3b0   :  { %v736_v29 = vadd.f32 1.0, %v8537_v28  ;;  %v9493_v28 = vld [vmem:[#allocation12 + $0x158] sm:$0xff] }
 0x3b1   :  { %11936 = vst [vmem:[#allocation32_spill] sm:$0xff] %v9493_v28 }
 0x3b2   :  { %8538 = vrcp.f32 %v736_v29  ;;  %v9495_v29 = vld [vmem:[#allocation12 + $0x58] sm:$0xff] }
 0x3b3   :  { %8540 = vtanh.f32 %v732_v26  ;;  %v9485_v26 = vld [vmem:[#allocation12 + $0x60] sm:$0xff]  ;;  %11937 = vst [vmem:[#allocation33_spill] sm:$0xff] %v9495_v29 }
 0x3b4   :  { %11934 = vst [vmem:[#allocation30_spill] sm:$0xff] %v9485_v26 }
 0x3bf   :  { %v8539_v43 = vpop.eup %8538 }
 0x3c0   :  { %744 = vrot.lane.b32.xlu1 %v8539_v43, %s9029_s1  ;;  %740 = vrot.lane.b32.xlu0 %v8539_v43, %s9030_s8  ;;  %v8541_v50 = vpop.eup %8540 }
 0x3c4   :  { %742 = vrot.lane.b32.xlu0 %v8541_v50, %s9031_s6  ;;  %v9503_v50 = vld [vmem:[#allocation12 + $0x150] sm:$0xff] }
 0x3c5   :  { %11939 = vst [vmem:[#allocation35_spill] sm:$0xff] %v9503_v50 }
 0x432   :  { %v741_v54 = vpop.permute.xlu0 %740  ;;  %v745_v60 = vpop.permute.xlu1 %744 }
 0x433   :  { %v746_v56 = vmul.f32 0.0, %v741_v54  ;;  %v9505_v54 = vld [vmem:[#allocation12 + $0x50] sm:$0xff] }
 0x434   :  { %11940 = vst [vmem:[#allocation36_spill] sm:$0xff] %v9505_v54 }
 0x436   :  { %v743_v55 = vpop.permute.xlu0 %742 }
 0x437   :  { %v747_v57 = vmul.f32 %v8539_v43, %v743_v55  ;;  %v9499_v43 = vld [vmem:[#allocation12 + $0xd0] sm:$0xff]  ;;  %v9509_v55 = vld [vmem:[#allocation12 + $0xc8] sm:$0xff] }
 0x438   :  { %11938 = vst [vmem:[#allocation34_spill] sm:$0xff] %v9499_v43  ;;  %11941 = vst [vmem:[#allocation37_spill] sm:$0xff] %v9509_v55 }
 0x439   :  { %v9448_v58 = vadd.f32 %v747_v57, %v746_v56  ;;  %v9513_v56 = vld [vmem:[#allocation12 + $0x148] sm:$0xff]  ;;  %v9523_v57 = vld [vmem:[#allocation12 + $0x140] sm:$0xff] }
 0x43a   :  { %11942 = vst [vmem:[#allocation38_spill] sm:$0xff] %v9513_v56  ;;  %11943 = vst [vmem:[#allocation39_spill] sm:$0xff] %v9523_v57 }
 0x43b   :  { %8542 = vtanh.f32 %v9448_v58 }
 0x448   :  { %v8543_v59 = vpop.eup %8542 }
 0x449   :  { %v9451_v61 = vmul.f32 %v8543_v59, %v745_v60  ;;  %v9525_v59 = vld [vmem:[#allocation12 + $0x48] sm:$0xff]  ;;  %v9529_v60 = vld [vmem:[#allocation12 + $0xc0] sm:$0xff] }
 0x44a   :  { %11944 = vst [vmem:[#allocation40_spill] sm:$0xff] %v9525_v59  ;;  %11945 = vst [vmem:[#allocation41_spill] sm:$0xff] %v9529_v60 }
 0x44b   :  { %7499 = vmatmul.mubr.msk.f32.vlgmr.msra.gmra.mxu1 %vm457_vm2, %v9451_v61  ;;  %7500 = vmatmul.mubr.msk.f32.vlgmr.msra.gmra.mxu0 %vm457_vm2, %v9451_v61 }
 0x44c   :  { %8096 = vmatpush3.msra.mxu0 %v9453_v62  ;;  %7604 = vmatpush3.msra.mxu1 %v9455_v63 }
 0x44d   :  { %8097 = vmatprep.subr.mxu0 %v11777_v1  ;;  %7605 = vmatprep.subr.mxu1 %v9457_v0 }
 0x44e   :  { %8098 = vmatpush3.msra.mxu0 %v9463_v3  ;;  %7606 = vmatpush3.msra.mxu1 %v9465_v5 }
 0x44f   :  { %8099 = vmatprep.subr.mxu0 %v11777_v1  ;;  %7607 = vmatprep.subr.mxu1 %v9469_v7 }
 0x450   :  { %8100 = vmatpush3.msra.mxu0 %v9473_v9  ;;  %7608 = vmatpush3.msra.mxu1 %v9475_v10 }
 0x451   :  { %8101 = vmatprep.subr.mxu0 %v11777_v1  ;;  %7609 = vmatprep.subr.mxu1 %v9479_v14 }
 0x452   :  { %8102 = vmatpush3.msra.mxu0 %v9483_v25  ;;  %7610 = vmatpush3.msra.mxu1 %v9485_v26 }
 0x453   :  { %8103 = vmatprep.subr.mxu0 %v11777_v1  ;;  %7611 = vmatprep.subr.mxu1 %v9489_v27 }
 0x454   :  { %8104 = vmatpush3.msra.mxu0 %v9493_v28  ;;  %7612 = vmatpush3.msra.mxu1 %v9495_v29 }
 0x455   :  { %8105 = vmatprep.subr.mxu0 %v11777_v1  ;;  %7613 = vmatprep.subr.mxu1 %v9499_v43  ;;  %v9572_v43 = vld [vmem:[#allocation12 + $0x20] sm:$0xff] }
 0x456   :  { %8106 = vmatpush3.msra.mxu0 %v9503_v50  ;;  %7614 = vmatpush3.msra.mxu1 %v9505_v54  ;;  %v9548_v54 = vld [vmem:[#allocation12 + $0xb0] sm:$0xff]  ;;  %v9562_v50 = vld [vmem:[#allocation12 + $0x120] sm:$0xff]  ;;  %11959 = vst [vmem:[#allocation55_spill] sm:$0xff] %v9572_v43 }
 0x457   :  { %8107 = vmatprep.subr.mxu0 %v11777_v1  ;;  %7615 = vmatprep.subr.mxu1 %v9509_v55  ;;  %v9539_v55 = vld [vmem:[#allocation12 + $0xb8] sm:$0xff]  ;;  %11951 = vst [vmem:[#allocation47_spill] sm:$0xff] %v9548_v54  ;;  %11956 = vst [vmem:[#allocation52_spill] sm:$0xff] %v9562_v50 }
 0x458   :  { %8108 = vmatpush3.msra.mxu0 %v9513_v56  ;;  %8127 = vmatprep.mubr.msk.f32.mxu0 %vm9028_vm0, %v11777_v1  ;;  %v9535_v56 = vld [vmem:[#allocation12 + $0x40] sm:$0xff]  ;;  %11948 = vst [vmem:[#allocation44_spill] sm:$0xff] %v9539_v55 }
 0x459   :  { %8109 = vmatprep.subr.mxu0 %v11777_v1  ;;  %7616 = vmatpush3.msra.mxu1 %v9525_v59  ;;  %11947 = vst [vmem:[#allocation43_spill] sm:$0xff] %v9535_v56  ;;  %v9545_v59 = vld [vmem:[#allocation12 + $0x38] sm:$0xff] }
 0x45a   :  { %8110 = vmatpush3.msra.mxu0 %v9523_v57  ;;  %7617 = vmatprep.subr.mxu1 %v9529_v60  ;;  %v9542_v57 = vld [vmem:[#allocation12 + $0x130] sm:$0xff]  ;;  %11950 = vst [vmem:[#allocation46_spill] sm:$0xff] %v9545_v59 }
 0x45b   :  { %8111 = vmatprep.subr.mxu0 %v11777_v1  ;;  %7618 = vmatpush3.msra.mxu1 %v9535_v56  ;;  %11949 = vst [vmem:[#allocation45_spill] sm:$0xff] %v9542_v57  ;;  %v9550_v60 = vld [vmem:[#allocation12 + $0x30] sm:$0xff]  ;;  %v9556_v56 = vld [vmem:[#allocation12 + $0xa8] sm:$0xff] }
 0x45c   :  { %8112 = vmatpush3.msra.mxu0 %v9532_v8  ;;  %7619 = vmatprep.subr.mxu1 %v9539_v55  ;;  %11952 = vst [vmem:[#allocation48_spill] sm:$0xff] %v9550_v60  ;;  %v9554_v8 = vld [vmem:[#allocation12 + $0x128] sm:$0xff]  ;;  %11954 = vst [vmem:[#allocation50_spill] sm:$0xff] %v9556_v56 }
 0x45d   :  { %8113 = vmatprep.subr.mxu0 %v11777_v1  ;;  %7620 = vmatpush3.msra.mxu1 %v9545_v59  ;;  %11953 = vst [vmem:[#allocation49_spill] sm:$0xff] %v9554_v8  ;;  %v9560_v55 = vld [vmem:[#allocation12 + $0x28] sm:$0xff]  ;;  %v9568_v59 = vld [vmem:[#allocation12 + $0x118] sm:$0xff] }
 0x45e   :  { %8114 = vmatpush3.msra.mxu0 %v9542_v57  ;;  %7621 = vmatprep.subr.mxu1 %v9548_v54  ;;  %11955 = vst [vmem:[#allocation51_spill] sm:$0xff] %v9560_v55  ;;  %v9566_v57 = vld [vmem:[#allocation12 + $0xa0] sm:$0xff]  ;;  %11958 = vst [vmem:[#allocation54_spill] sm:$0xff] %v9568_v59  ;;  %v9578_v54 = vld [vmem:[#allocation12 + $0x110] sm:$0xff] }
 0x45f   :  { %8115 = vmatprep.subr.mxu0 %v11777_v1  ;;  %7622 = vmatpush3.msra.mxu1 %v9550_v60  ;;  %11957 = vst [vmem:[#allocation53_spill] sm:$0xff] %v9566_v57  ;;  %11961 = vst [vmem:[#allocation57_spill] sm:$0xff] %v9578_v54  ;;  %v9582_v60 = vld [vmem:[#allocation12 + $0x18] sm:$0xff] }
 0x460   :  { %8116 = vmatpush3.msra.mxu0 %v9554_v8  ;;  %7623 = vmatprep.subr.mxu1 %v9556_v56  ;;  %v9576_v8 = vld [vmem:[#allocation12 + $0x98] sm:$0xff]  ;;  %11962 = vst [vmem:[#allocation58_spill] sm:$0xff] %v9582_v60  ;;  %v9588_v56 = vld [vmem:[#allocation12 + $0x108] sm:$0xff] }
 0x461   :  { %8117 = vmatprep.subr.mxu0 %v11777_v1  ;;  %7624 = vmatpush3.msra.mxu1 %v9560_v55  ;;  %11960 = vst [vmem:[#allocation56_spill] sm:$0xff] %v9576_v8  ;;  %11964 = vst [vmem:[#allocation60_spill] sm:$0xff] %v9588_v56  ;;  %v9592_v55 = vld [vmem:[#allocation12 + $0x10] sm:$0xff] }
 0x462   :  { %8118 = vmatpush3.msra.mxu0 %v9562_v50  ;;  %7625 = vmatprep.subr.mxu1 %v9566_v57  ;;  %v9586_v50 = vld [vmem:[#allocation12 + $0x90] sm:$0xff]  ;;  %11965 = vst [vmem:[#allocation61_spill] sm:$0xff] %v9592_v55  ;;  %v9598_v57 = vld [vmem:[#allocation12 + $0x100] sm:$0xff] }
 0x463   :  { %8119 = vmatprep.subr.mxu0 %v11777_v1  ;;  %7626 = vmatpush3.msra.mxu1 %v9572_v43  ;;  %11963 = vst [vmem:[#allocation59_spill] sm:$0xff] %v9586_v50  ;;  %11967 = vst [vmem:[#allocation63_spill] sm:$0xff] %v9598_v57  ;;  %v9602_v43 = vld [vmem:[#allocation12 + $0x8] sm:$0xff] }
 0x464   :  { %8120 = vmatpush3.msra.mxu0 %v9568_v59  ;;  %7627 = vmatprep.subr.mxu1 %v9576_v8  ;;  %v9596_v59 = vld [vmem:[#allocation12 + $0x88] sm:$0xff]  ;;  %11968 = vst [vmem:[#allocation64_spill] sm:$0xff] %v9602_v43 }
 0x465   :  { %8121 = vmatprep.subr.mxu0 %v11777_v1  ;;  %7628 = vmatpush3.msra.mxu1 %v9582_v60  ;;  %11966 = vst [vmem:[#allocation62_spill] sm:$0xff] %v9596_v59  ;;  %v9611_v60 = vld [vmem:[#allocation12] sm:$0xff] }
 0x466   :  { %8122 = vmatpush3.msra.mxu0 %v9578_v54  ;;  %7629 = vmatprep.subr.mxu1 %v9586_v50  ;;  %v9606_v54 = vld [vmem:[#allocation12 + $0x80] sm:$0xff]  ;;  %11970 = vst [vmem:[#allocation66_spill] sm:$0xff] %v9611_v60 }
 0x467   :  { %8123 = vmatprep.subr.mxu0 %v11777_v1  ;;  %7630 = vmatpush3.msra.mxu1 %v9592_v55  ;;  %11969 = vst [vmem:[#allocation65_spill] sm:$0xff] %v9606_v54 }
 0x468   :  { %8124 = vmatpush3.msra.mxu0 %v9588_v56  ;;  %7631 = vmatprep.subr.mxu1 %v9596_v59  ;;  %v913_v56 = vlaneseq  ;;  %v7504_v59 = vld [vmem:[%s11922_s20 + $0xa] sm:$0x3] }
 0x469   :  { %8125 = vmatprep.subr.mxu0 %v11777_v1  ;;  %7632 = vmatpush3.msra.mxu1 %v9602_v43  ;;  %v181_v43 = vld [vmem:[#allocation11] sm:$0x7] }
 0x46a   :  { %8126 = vmatpush3.msra.mxu0 %v9598_v57  ;;  %7633 = vmatprep.subr.mxu1 %v9606_v54  ;;  %v914_v55 = vshrl.u32 %v913_v56, 7  ;;  %v1211_v57 = vmul.f32 %v7504_v59, %v9209_v4 }
 0x46b   :  { %1250 = vmatprep.subr.mxu0 %v9221_v11  ;;  %7634 = vmatpush3.msra.mxu1 %v9611_v60 }
 0x46c   :  { %8130 = vmatprep.subr.mxu1 %v11777_v1  ;;  %v923_v50 = vsub.s32 2, %v914_v55  ;;  %v915_v8 = vsub.s32 0, %v914_v55  ;;  %v919_v29 = vsub.s32 1, %v914_v55  ;;  %v1212_v11 = vadd.f32 %v9215_v6, %v1211_v57 }
 0x46e   :  { %v9622_v28 = vrot.slane %v181_v43, %v923_v50  ;;  %v9624_v54 = vrot.slane %v181_v43, %v915_v8  ;;  %v9626_v60 = vrot.slane %v181_v43, %v919_v29  ;;  %v1213_v27 = vmax.f32 %v1212_v11, 0.0 }
 0x46f   :  { %v11971_v11 = vmov 0.0  }
 0x470   :  { %v1214_v55 = vsub.f32 0.0, %v1213_v27 }
 0x472   :  { %v1215_v50 = vmul.f32 1.442695, %v1214_v55 }
 0x50b   :  { %v836_v1 = vpop.f32.mrf.mxu1  ;;  %v907_v56 = vpop.f32.mrf.mxu0 }
 0x50c   :  { %v930_v26 = vadd.f32 %v9622_v28, %v907_v56  ;;  %v928_v25 = vadd.f32 %v9624_v54, %v836_v1 }
 0x50d   :  { %v838_v4 = vpop.f32.mrf.mxu1 }
 0x50e   :  { %v929_v14 = vadd.f32 %v9626_v60, %v838_v4  ;;  %8544 = vtanh.f32 %v930_v26  ;;  %v9664_v4 = vpop.f32.mrf.mxu0  ;;  %v9666_v26 = vld [vmem:[#allocation14] ss:$0 sm:$0xff] }
 0x510   :  { %8546 = vtanh.f32 %v929_v14 }
 0x511   :  { %8548 = vtanh.f32 %v928_v25 }
 0x512   :  { %8550 = vpow2.f32 %v1215_v50 }
 0x51b   :  { %v8545_v8 = vpop.eup %8544 }
 0x51c   :  { %8128 = vmatmul.mubr.f32.vlgmr.msra.gmra.mxu0 %v8545_v8 }
 0x51d   :  { %v8547_v57 = vpop.eup %8546  ;;  %1251 = vmatpush1.msra.mxu0 %v9227_v12  ;;  %1284 = vmatprep.mubr.f32.mxu0 %v11971_v11 }
 0x51e   :  { %v8549_v29 = vpop.eup %8548  ;;  %1052 = vmatprep.mubr.f32.mxu1 %v8547_v57  ;;  %1403 = vmatprep.subr.mxu0 %v9245_v16 }
 0x51f   :  { %1053 = vmatmul.mubr.f32.vlgmr.msra.gmra.mxu1 %v8549_v29  ;;  %v8551_v1 = vpop.eup %8550 }
 0x520   :  { %8131 = vmatpush3.msra.mxu1 %v9196_v2  ;;  %8132 = vmatprep.mubr.msk.f32.mxu1 %vm9028_vm0, %v11971_v11  ;;  %v9651_v2 = vld [vmem:[%s11922_s20 + $0x8] sm:$0x3] }
 0x521   :  { %8135 = vmatprep.subr.mxu1 %v11971_v11  ;;  %7506 = vmatmul.mubr.msk.f32.vlgmr.msra.gmra.mxu0 %vm194_vm1, %v9651_v2 }
 0x522   :  { %1404 = vmatpush1.msra.mxu0 %v9252_v17  ;;  %1443 = vmatprep.mubr.f32.mxu0 %v11971_v11 }
 0x523   :  { %8133 = vmatmul.mubr.msk.f32.vlgmr.msra.gmra.mxu1 %vm194_vm1, %v7504_v59  ;;  %1405 = vmatprep.subr.mxu0 %v9259_v18 }
 0x524   :  { %8136 = vmatpush3.msra.mxu1 %v9240_v15  ;;  %8137 = vmatprep.mubr.msk.f32.mxu1 %vm9028_vm0, %v11971_v11 }
 0x525   :  { %8140 = vmatprep.subr.mxu1 %v11971_v11  ;;  %1406 = vmatpush1.msra.mxu0 %v9265_v19 }
 0x526   :  { %1407 = vmatprep.subr.mxu0 %v9272_v20 }
 0x527   :  { %8138 = vmatmul.mubr.msk.f32.vlgmr.msra.gmra.mxu1 %vm194_vm1, %v8551_v1  ;;  %1408 = vmatpush1.msra.mxu0 %v9279_v21 }
 0x528   :  { %8141 = vmatpush3.msra.mxu1 %v9307_v35  ;;  %8142 = vmatprep.mubr.msk.f32.mxu1 %vm9028_vm0, %v11971_v11 }
 0x529   :  { %8145 = vmatprep.subr.mxu1 %v11971_v11  ;;  %1409 = vmatprep.subr.mxu0 %v9287_v22 }
 0x52a   :  { %1410 = vmatpush1.msra.mxu0 %v9293_v23 }
 0x52b   :  { %1695 = vmatprep.subr.mxu0 %v9348_v30 }
 0x5dc   :  { %v1124_v14 = vpop.f32.mrf.mxu0 }
 0x5de   :  { %v8129_v17 = vpop.f32.mrf.mxu0 }
 0x5df   :  { %v7635_v25 = vpop.f32.mrf.mxu1 }
 0x5e1   :  { %v7636_v18 = vpop.f32.mrf.mxu1 }
 0x5e2   :  { %v7637_v27 = vadd.f32 %v7636_v18, %v7635_v25 }
 0x5e3   :  { %v1203_v19 = vpop.f32.mrf.mxu1 }
 0x5e4   :  { %v1055_v20 = vadd.f32 %v7637_v27, %v9666_v26  ;;  %v1204_v43 = vadd.f32 %v9299_v24, %v1203_v19  ;;  %v1286_v24 = vpop.f32.mrf.mxu0 }
 0x5e5   :  { %v8134_v59 = vpop.f32.mrf.mxu1 }
 0x5e6   :  { %v9670_v56 = vadd.f32 %v1124_v14, %v1055_v20  ;;  %v1207_v55 = vmax.f32 %v1204_v43, 0.0 }
 0x5e7   :  { %v1360_v50 = vpop.f32.mrf.mxu1 }
 0x5e8   :  { %v1208_v30 = vsub.f32 0.0, %v1207_v55 }
 0x5e9   :  { %v8139_v8 = vpop.f32.mrf.mxu1 }
 0x5ea   :  { %v1209_v57 = vmul.f32 1.442695, %v1208_v30 }
 0x5ec   :  { %8552 = vpow2.f32 %v1209_v57 }
 0x5f9   :  { %v8553_v29 = vpop.eup %8552 }
 0x5fa   :  { %v1375_v1 = vmul.f32 %v8553_v29, %v9451_v61  ;;  %v1288_v61 = vpop.f32.mrf.mxu0 }
 0x5fc   :  { %7508 = vmatmul.mubr.msk.f32.vlgmr.msra.gmra.mxu0 %vm457_vm2, %v1375_v1 }
 0x5fd   :  { %1696 = vmatpush1.msra.mxu0 %v9358_v32  ;;  %1735 = vmatprep.mubr.f32.mxu0 %v11971_v11  ;;  %v7502_v32 = vld [vmem:[%s11922_s20 + $0x6] sm:$0x3] }
 0x5fe   :  { %1697 = vmatprep.subr.mxu0 %v9370_v34  ;;  %v1452_v34 = vsub.f32 1.0, %v9651_v2 }
 0x5ff   :  { %1698 = vmatpush1.msra.mxu0 %v9382_v37 }
 0x600   :  { %1699 = vmatprep.subr.mxu0 %v9394_v40 }
 0x601   :  { %1700 = vmatpush1.msra.mxu0 %v9406_v44  ;;  %v1451_v44 = vmul.f32 %v9651_v2, %v7502_v32 }
 0x602   :  { %1701 = vmatprep.subr.mxu0 %v9418_v46 }
 0x603   :  { %1702 = vmatpush1.msra.mxu0 %v9430_v48  ;;  %v1361_v48 = vadd.f32 %v1360_v50, %v1288_v61 }
 0x604   :  { %7663 = vmatprep.subr.mxu0 %v9445_v51 }
 0x605   :  { %v1364_v51 = vadd.f32 %v9314_v39, %v1361_v48  ;;  %v11985_v48 = vld [vmem:[#allocation41_spill] sm:$0xff] }
 0x607   :  { %v1529_v18 = vsub.f32 1.0, %v1364_v51 }
 0x6bc   :  { %v1445_v14 = vpop.f32.mrf.mxu0 }
 0x6be   :  { %v1447_v37 = vpop.f32.mrf.mxu0 }
 0x6bf   :  { %v1450_v40 = vadd.f32 %v9317_v42, %v1447_v37 }
 0x6c1   :  { %v1453_v17 = vmul.f32 %v1452_v34, %v1450_v40  ;;  %v1536_v27 = vsub.f32 %v7502_v32, %v1450_v40  ;;  %v1530_v19 = vmul.f32 %v1529_v18, %v1450_v40  ;;  %v11988_v18 = vld [vmem:[#allocation44_spill] sm:$0xff] }
 0x6c3   :  { %v1454_v46 = vadd.f32 %v1453_v17, %v1451_v44  ;;  %v1537_v59 = vand.u32 2147483647, %v1536_v27  ;;  %v11983_v17 = vld [vmem:[#allocation38_spill] sm:$0xff] }
 0x6c4   :  { %v11989_v27 = vld [vmem:[#allocation42_spill] sm:$0xff] }
 0x6c5   :  { %8143 = vmatmul.mubr.msk.f32.vlgmr.msra.gmra.mxu1 %vm194_vm1, %v1454_v46  ;;  %v11984_v46 = vld [vmem:[#allocation40_spill] sm:$0xff] }
 0x6c6   :  { %8146 = vmatpush3.msra.mxu1 %v9328_v52  ;;  %8147 = vmatprep.mubr.msk.f32.mxu1 %vm9028_vm0, %v11971_v11 }
 0x6c7   :  { %1766 = vmatprep.subr.mxu1 %v9353_v31 }
 0x785   :  { %v1524_v25 = vpop.f32.mrf.mxu1 }
 0x786   :  { %v1525_v42 = vadd.f32 %v9331_v53, %v1524_v25  ;;  %v11987_v25 = vld [vmem:[#allocation43_spill] sm:$0xff] }
 0x787   :  { %v8144_v2 = vpop.f32.mrf.mxu1 }
 0x788   :  { %v1528_v20 = vmul.f32 %v1525_v42, %v1364_v51  ;;  %v1538_v43 = vsub.f32 %v7502_v32, %v1525_v42  ;;  %v11986_v51 = vld [vmem:[#allocation39_spill] sm:$0xff]  ;;  %v11990_v42 = vld [vmem:[#allocation46_spill] sm:$0xff] }
 0x789   :  { %v11991_v2 = vld [vmem:[#allocation47_spill] sm:$0xff] }
 0x78a   :  { %v1531_v55 = vadd.f32 %v1530_v19, %v1528_v20  ;;  %v1539_v52 = vand.u32 2147483647, %v1538_v43  ;;  %v11992_v19 = vld [vmem:[#allocation45_spill] sm:$0xff]  ;;  %v11993_v20 = vld [vmem:[#allocation48_spill] sm:$0xff]  ;;  %v11994_v43 = vld [vmem:[#allocation50_spill] sm:$0xff] }
 0x78c   :  { %v1532_v30 = vmul.f32 %v1531_v55, %v1452_v34  ;;  %v1540_v8 = vadd.f32 %v1539_v52, %v1537_v59  ;;  %v1541_v57 = vsub.f32 %v7502_v32, %v1531_v55  ;;  %v11995_v59 = vld [vmem:[#allocation49_spill] sm:$0xff]  ;;  %v11996_v55 = vld [vmem:[#allocation51_spill] sm:$0xff] }
 0x78d   :  { %v11997_v52 = vld [vmem:[#allocation53_spill] sm:$0xff] }
 0x78e   :  { %v1533_v29 = vadd.f32 %v1532_v30, %v1451_v44  ;;  %v1542_v31 = vand.u32 2147483647, %v1541_v57  ;;  %v11982_v44 = vld [vmem:[#allocation37_spill] sm:$0xff]  ;;  %v11998_v30 = vld [vmem:[#allocation52_spill] sm:$0xff] }
 0x78f   :  { %v12000_v57 = vld [vmem:[#allocation56_spill] sm:$0xff] }
 0x790   :  { %7510 = vst.msk [vmem:[%s11728_s21 + $0x2] sm:$0x3] %vm444_vm3, %v1533_v29  ;;  %8148 = vmatmul.mubr.msk.f32.vlgmr.msra.gmra.mxu1 %vm194_vm1, %v1533_v29  ;;  %v9701_v39 = vadd.f32 %v1542_v31, %v1540_v8  ;;  %v11999_v8 = vld [vmem:[#allocation55_spill] sm:$0xff]  ;;  %v12001_v29 = vld [vmem:[#allocation54_spill] sm:$0xff] }
 0x791   :  { %1767 = vmatpush1.msra.mxu1 %v9365_v33  ;;  %1806 = vmatprep.mubr.f32.mxu1 %v11971_v11  ;;  %v12002_v31 = vld [vmem:[#allocation58_spill] sm:$0xff] }
 0x792   :  { %11972 = vst [vmem:[#allocation67_spill] sm:$0xff] %v9701_v39  ;;  %1768 = vmatprep.subr.mxu1 %v9375_v36  ;;  %v10110_v39 = vld [vmem:[#allocation12 + $0x130] sm:$0xff] }
 0x793   :  { %1769 = vmatpush1.msra.mxu1 %v9387_v38  ;;  %12029 = vst [vmem:[#allocation44_spill] sm:$0xff] %v10110_v39 }
 0x794   :  { %1770 = vmatprep.subr.mxu1 %v9399_v41 }
 0x795   :  { %1771 = vmatpush1.msra.mxu1 %v9411_v45 }
 0x796   :  { %1772 = vmatprep.subr.mxu1 %v9423_v47 }
 0x797   :  { %1773 = vmatpush1.msra.mxu1 %v9437_v49 }
 0x798   :  { %8150 = vmatprep.subr.mxu1 %v11971_v11 }
 0x850   :  { %v1628_v53 = vpop.f32.mrf.mxu1 }
 0x851   :  { %v1629_v50 = vadd.f32 %v1628_v53, %v1445_v14  ;;  %v12003_v53 = vld [vmem:[#allocation59_spill] sm:$0xff] }
 0x852   :  { %v8149_v1 = vpop.f32.mrf.mxu1 }
 0x853   :  { %v1632_v33 = vadd.f32 %v1629_v50, %v1286_v24  ;;  %v12004_v50 = vld [vmem:[#allocation57_spill] sm:$0xff] }
 0x854   :  { %v12005_v1 = vld [vmem:[#allocation61_spill] sm:$0xff] }
 0x855   :  { %v1633_v61 = vadd.f32 %v9342_v13, %v1632_v33  ;;  %v12006_v33 = vld [vmem:[#allocation62_spill] sm:$0xff] }
 0x857   :  { %v7512_v32 = vmul.f32 -1.442695, %v1633_v61  ;;  %8554 = vtanh.f32 %v1633_v61  ;;  %v12007_v61 = vld [vmem:[#allocation60_spill] sm:$0xff] }
 0x859   :  { %8556 = vpow2.f32 %v7512_v32  ;;  %v12008_v32 = vld [vmem:[#allocation64_spill] sm:$0xff] }
 0x864   :  { %v8555_v36 = vpop.eup %8554 }
 0x865   :  { %1643 = vrot.lane.b32.xlu0 %v8555_v36, %s9031_s6  ;;  %v12009_v36 = vld [vmem:[#allocation63_spill] sm:$0xff] }
 0x866   :  { %v8557_v38 = vpop.eup %8556 }
 0x867   :  { %v1637_v41 = vadd.f32 1.0, %v8557_v38  ;;  %v12010_v38 = vld [vmem:[#allocation65_spill] sm:$0xff] }
 0x869   :  { %8558 = vrcp.f32 %v1637_v41  ;;  %v12011_v41 = vld [vmem:[#allocation66_spill] sm:$0xff] }
 0x876   :  { %v8559_v45 = vpop.eup %8558 }
 0x877   :  { %1641 = vrot.lane.b32.xlu1 %v8559_v45, %s9030_s8 }
 0x87b   :  { %1645 = vrot.lane.b32.xlu1 %v8559_v45, %s9029_s1 }
 0x8d7   :  { %v1644_v47 = vpop.permute.xlu0 %1643 }
 0x8d8   :  { %v1648_v14 = vmul.f32 %v8559_v45, %v1644_v47  ;;  %v12012_v45 = vld [vmem:[#allocation26_spill] sm:$0xff]  ;;  %v7517_v47 = vld [vmem:[%s11922_s20 + $0x10] sm:$0x3] }
 0x8e9   :  { %v1642_v49 = vpop.permute.xlu1 %1641 }
 0x8ea   :  { %v1647_v24 = vmul.f32 %v1642_v49, %v9448_v58  ;;  %v11973_v58 = vld [vmem:[#allocation28_spill] sm:$0xff]  ;;  %v12013_v49 = vld [vmem:[#allocation25_spill] sm:$0xff] }
 0x8ec   :  { %v9717_v13 = vadd.f32 %v1648_v14, %v1647_v24  ;;  %v2101_v14 = vmul.f32 %v7517_v47, %v12013_v49 }
 0x8ed   :  { %v1646_v37 = vpop.permute.xlu1 %1645 }
 0x8ee   :  { %8560 = vtanh.f32 %v9717_v13  ;;  %v2102_v24 = vadd.f32 %v9215_v6, %v2101_v14 }
 0x8fb   :  { %v8561_v34 = vpop.eup %8560 }
 0x8fc   :  { %v9720_v40 = vmul.f32 %v8561_v34, %v1646_v37 }
 0x8fe   :  { %7513 = vmatmul.mubr.msk.f32.vlgmr.msra.gmra.mxu0 %vm457_vm2, %v9720_v40  ;;  %7514 = vmatmul.mubr.msk.f32.vlgmr.msra.gmra.mxu1 %vm457_vm2, %v9720_v40 }
 0x8ff   :  { %8151 = vmatpush3.msra.mxu1 %v9453_v62  ;;  %7664 = vmatpush3.msra.mxu0 %v9455_v63  ;;  %v11974_v62 = vld [vmem:[#allocation29_spill] sm:$0xff]  ;;  %v11975_v63 = vld [vmem:[#allocation30_spill] sm:$0xff] }
 0x900   :  { %8152 = vmatprep.subr.mxu1 %v11971_v11  ;;  %7665 = vmatprep.subr.mxu0 %v9457_v0  ;;  %v11976_v0 = vld [vmem:[#allocation31_spill] sm:$0xff] }
 0x901   :  { %8153 = vmatpush3.msra.mxu1 %v9463_v3  ;;  %7666 = vmatpush3.msra.mxu0 %v9465_v5  ;;  %v11977_v3 = vld [vmem:[#allocation32_spill] sm:$0xff]  ;;  %v11978_v5 = vld [vmem:[#allocation33_spill] sm:$0xff] }
 0x902   :  { %8154 = vmatprep.subr.mxu1 %v11971_v11  ;;  %7667 = vmatprep.subr.mxu0 %v9469_v7  ;;  %v11979_v7 = vld [vmem:[#allocation34_spill] sm:$0xff] }
 0x903   :  { %8155 = vmatpush3.msra.mxu1 %v9473_v9  ;;  %7668 = vmatpush3.msra.mxu0 %v9475_v10  ;;  %v11980_v9 = vld [vmem:[#allocation35_spill] sm:$0xff]  ;;  %v11981_v10 = vld [vmem:[#allocation36_spill] sm:$0xff] }
 0x904   :  { %8156 = vmatprep.subr.mxu1 %v11971_v11  ;;  %7669 = vmatprep.subr.mxu0 %v11973_v58  ;;  %v2103_v58 = vmax.f32 %v2102_v24, 0.0 }
 0x905   :  { %8157 = vmatpush3.msra.mxu1 %v11974_v62  ;;  %7670 = vmatpush3.msra.mxu0 %v11975_v63 }
 0x906   :  { %8158 = vmatprep.subr.mxu1 %v11971_v11  ;;  %7671 = vmatprep.subr.mxu0 %v11976_v0 }
 0x907   :  { %8159 = vmatpush3.msra.mxu1 %v11977_v3  ;;  %7672 = vmatpush3.msra.mxu0 %v11978_v5  ;;  %v2104_v5 = vsub.f32 0.0, %v2103_v58 }
 0x908   :  { %8160 = vmatprep.subr.mxu1 %v11971_v11  ;;  %7673 = vmatprep.subr.mxu0 %v11979_v7 }
 0x909   :  { %8161 = vmatpush3.msra.mxu1 %v11980_v9  ;;  %7674 = vmatpush3.msra.mxu0 %v11981_v10  ;;  %v2105_v7 = vmul.f32 1.442695, %v2104_v5 }
 0x90a   :  { %8162 = vmatprep.subr.mxu1 %v11971_v11  ;;  %7675 = vmatprep.subr.mxu0 %v11982_v44  ;;  %v9805_v44 = vld [vmem:[%s11921_s15] sm:$0xff] }
 0x90b   :  { %8163 = vmatpush3.msra.mxu1 %v11983_v17  ;;  %7676 = vmatpush3.msra.mxu0 %v11984_v46  ;;  %v9845_v17 = vld [vmem:[%s11928_s17 + $0x20] sm:$0xff]  ;;  %v9851_v46 = vld [vmem:[%s11928_s17 + $0x18] sm:$0xff] }
 0x90c   :  { %8164 = vmatprep.subr.mxu1 %v11971_v11  ;;  %7677 = vmatprep.subr.mxu0 %v11985_v48 }
 0x90d   :  { %8165 = vmatpush3.msra.mxu1 %v11986_v51  ;;  %7678 = vmatpush3.msra.mxu0 %v11987_v25 }
 0x90e   :  { %8166 = vmatprep.subr.mxu1 %v11971_v11  ;;  %7679 = vmatprep.subr.mxu0 %v11988_v18 }
 0x90f   :  { %8167 = vmatpush3.msra.mxu1 %v11989_v27  ;;  %7680 = vmatpush3.msra.mxu0 %v11990_v42 }
 0x910   :  { %8168 = vmatprep.subr.mxu1 %v11971_v11  ;;  %7681 = vmatprep.subr.mxu0 %v11991_v2 }
 0x911   :  { %8169 = vmatpush3.msra.mxu1 %v11992_v19  ;;  %7682 = vmatpush3.msra.mxu0 %v11993_v20  ;;  %v9861_v20 = vld [vmem:[%s11929_s26] ss:$0 sm:$0xff] }
 0x912   :  { %8170 = vmatprep.subr.mxu1 %v11971_v11  ;;  %7683 = vmatprep.subr.mxu0 %v11994_v43 }
 0x913   :  { %8171 = vmatpush3.msra.mxu1 %v11995_v59  ;;  %7684 = vmatpush3.msra.mxu0 %v11996_v55 }
 0x914   :  { %8172 = vmatprep.subr.mxu1 %v11971_v11  ;;  %7685 = vmatprep.subr.mxu0 %v11997_v52 }
 0x915   :  { %8173 = vmatpush3.msra.mxu1 %v11998_v30  ;;  %7686 = vmatpush3.msra.mxu0 %v11999_v8 }
 0x916   :  { %8174 = vmatprep.subr.mxu1 %v11971_v11  ;;  %7687 = vmatprep.subr.mxu0 %v12000_v57 }
 0x917   :  { %8175 = vmatpush3.msra.mxu1 %v12001_v29  ;;  %7688 = vmatpush3.msra.mxu0 %v12002_v31 }
 0x918   :  { %8176 = vmatprep.subr.mxu1 %v11971_v11  ;;  %7689 = vmatprep.subr.mxu0 %v12003_v53 }
 0x919   :  { %8177 = vmatpush3.msra.mxu1 %v12004_v50  ;;  %7690 = vmatpush3.msra.mxu0 %v12005_v1 }
 0x91a   :  { %8178 = vmatprep.subr.mxu1 %v11971_v11  ;;  %7691 = vmatprep.subr.mxu0 %v12006_v33 }
 0x91b   :  { %8179 = vmatpush3.msra.mxu1 %v12007_v61  ;;  %7692 = vmatpush3.msra.mxu0 %v12008_v32 }
 0x91c   :  { %8180 = vmatprep.subr.mxu1 %v11971_v11  ;;  %8182 = vmatprep.mubr.msk.f32.mxu1 %vm9028_vm0, %v11971_v11 }
 0x91d   :  { %8181 = vmatpush3.msra.mxu1 %v12009_v36  ;;  %7693 = vmatprep.subr.mxu0 %v12010_v38 }
 0x91e   :  { %7694 = vmatpush3.msra.mxu0 %v12011_v41  ;;  %2140 = vmatprep.subr.mxu1 %v12012_v45 }
 0x91f   :  { %8185 = vmatprep.subr.mxu0 %v11971_v11 }
 0x9be   :  { %v1737_v34 = vpop.f32.mrf.mxu0  ;;  %v1808_v37 = vpop.f32.mrf.mxu1 }
 0x9bf   :  { %v1815_v62 = vadd.f32 %v1808_v37, %v9622_v28  ;;  %v1813_v63 = vadd.f32 %v1737_v34, %v9624_v54 }
 0x9c0   :  { %v1739_v0 = vpop.f32.mrf.mxu0  ;;  %v1810_v48 = vpop.f32.mrf.mxu1 }
 0x9c1   :  { %v1814_v3 = vadd.f32 %v1739_v0, %v9626_v60  ;;  %8562 = vtanh.f32 %v1815_v62  ;;  %v9887_v62 = vld [vmem:[#allocation8] sm:$0xff]  ;;  %v9895_v0 = vld [vmem:[%s11930_s27] ss:$0 sm:$0xff] }
 0x9c3   :  { %8564 = vtanh.f32 %v1814_v3 }
 0x9c4   :  { %8566 = vtanh.f32 %v1813_v63 }
 0x9c5   :  { %8568 = vpow2.f32 %v2105_v7 }
 0x9ce   :  { %v8563_v9 = vpop.eup %8562 }
 0x9cf   :  { %8183 = vmatmul.mubr.f32.vlgmr.msra.gmra.mxu1 %v8563_v9 }
 0x9d0   :  { %v8565_v10 = vpop.eup %8564  ;;  %2141 = vmatpush1.msra.mxu1 %v9227_v12  ;;  %2174 = vmatprep.mubr.f32.mxu1 %v11971_v11 }
 0x9d1   :  { %v8567_v6 = vpop.eup %8566  ;;  %1931 = vmatprep.mubr.f32.mxu0 %v8565_v10  ;;  %2293 = vmatprep.subr.mxu1 %v9245_v16  ;;  %v9825_v16 = vld [vmem:[%s11922_s20 + $0xe] sm:$0x3]  ;;  %v9898_v10 = vld [vmem:[#allocation6] ss:$0 sm:$0xff] }
 0x9d2   :  { %1932 = vmatmul.mubr.f32.vlgmr.msra.gmra.mxu0 %v8567_v6  ;;  %v8569_v12 = vpop.eup %8568  ;;  %v2342_v49 = vsub.f32 1.0, %v9825_v16 }
 0x9d3   :  { %8186 = vmatpush3.msra.mxu0 %v9805_v44  ;;  %8187 = vmatprep.mubr.msk.f32.mxu0 %vm9028_vm0, %v11971_v11 }
 0x9d4   :  { %8190 = vmatprep.subr.mxu0 %v11971_v11  ;;  %7519 = vmatmul.mubr.msk.f32.vlgmr.msra.gmra.mxu1 %vm194_vm1, %v9825_v16 }
 0x9d5   :  { %2333 = vmatprep.mubr.f32.mxu1 %v11971_v11 }
 0x9d6   :  { %8188 = vmatmul.mubr.msk.f32.vlgmr.msra.gmra.mxu0 %vm194_vm1, %v7517_v47 }
 0x9d7   :  { %8191 = vmatpush3.msra.mxu0 %v9240_v15  ;;  %8192 = vmatprep.mubr.msk.f32.mxu0 %vm9028_vm0, %v11971_v11  ;;  %v9832_v15 = vld [vmem:[%s11928_s17 + $0x30] sm:$0xff] }
 0x9d8   :  { %8195 = vmatprep.subr.mxu0 %v11971_v11  ;;  %2294 = vmatpush1.msra.mxu1 %v9832_v15 }
 0x9da   :  { %8193 = vmatmul.mubr.msk.f32.vlgmr.msra.gmra.mxu0 %vm194_vm1, %v8569_v12 }
 0x9db   :  { %8196 = vmatpush3.msra.mxu0 %v9307_v35  ;;  %8197 = vmatprep.mubr.msk.f32.mxu0 %vm9028_vm0, %v11971_v11  ;;  %v9839_v35 = vld [vmem:[%s11928_s17 + $0x28] sm:$0xff] }
 0x9dc   :  { %8200 = vmatprep.subr.mxu0 %v11971_v11  ;;  %2295 = vmatprep.subr.mxu1 %v9839_v35 }
 0x9dd   :  { %2296 = vmatpush1.msra.mxu1 %v9845_v17 }
 0x9de   :  { %2297 = vmatprep.subr.mxu1 %v9851_v46 }
 0x9df   :  { %2298 = vmatpush1.msra.mxu1 %v9279_v21 }
 0x9e0   :  { %2299 = vmatprep.subr.mxu1 %v9287_v22 }
 0x9e1   :  { %2300 = vmatpush1.msra.mxu1 %v9293_v23 }
 0xa8f   :  { %v2003_v51 = vpop.f32.mrf.mxu1 }
 0xa91   :  { %v8184_v25 = vpop.f32.mrf.mxu1 }
 0xa92   :  { %v7695_v18 = vpop.f32.mrf.mxu0 }
 0xa94   :  { %v7696_v27 = vpop.f32.mrf.mxu0  ;;  %v2176_v41 = vpop.f32.mrf.mxu1 }
 0xa95   :  { %v7697_v42 = vadd.f32 %v7696_v27, %v7695_v18 }
 0xa96   :  { %v2093_v2 = vpop.f32.mrf.mxu0  ;;  %v2178_v45 = vpop.f32.mrf.mxu1 }
 0xa97   :  { %v1934_v19 = vadd.f32 %v7697_v42, %v9666_v26  ;;  %v2094_v21 = vadd.f32 %v9861_v20, %v2093_v2 }
 0xa98   :  { %v8189_v43 = vpop.f32.mrf.mxu0 }
 0xa99   :  { %v2004_v22 = vadd.f32 %v2003_v51, %v1934_v19  ;;  %v2097_v59 = vmax.f32 %v2094_v21, 0.0 }
 0xa9a   :  { %v2250_v23 = vpop.f32.mrf.mxu0 }
 0xa9b   :  { %v9865_v55 = vmax.f32 %v9670_v56, %v2004_v22  ;;  %v2098_v52 = vsub.f32 0.0, %v2097_v59  ;;  %v2251_v63 = vadd.f32 %v2250_v23, %v2178_v45  ;;  %v9945_v45 = vld [vmem:[%s11723_s16 + $0x58] sm:$0xff] }
 0xa9c   :  { %v8194_v30 = vpop.f32.mrf.mxu0 }
 0xa9d   :  { %v2008_v8 = vsub.f32 %v9670_v56, %v9865_v55  ;;  %v2011_v57 = vsub.f32 %v2004_v22, %v9865_v55  ;;  %v2099_v29 = vmul.f32 1.442695, %v2098_v52  ;;  %v2254_v3 = vadd.f32 %v9895_v0, %v2251_v63  ;;  %v9998_v63 = vld [vmem:[%s11723_s16] sm:$0xff] }
 0xa9f   :  { %v2009_v31 = vmul.f32 1.442695, %v2008_v8  ;;  %v2012_v53 = vmul.f32 1.442695, %v2011_v57  ;;  %8570 = vpow2.f32 %v2099_v29  ;;  %v2419_v7 = vsub.f32 1.0, %v2254_v3 }
 0xaa0   :  { %v9909_v8 = vld [vmem:[#allocation9] ss:$0 sm:$0xff] }
 0xaa1   :  { %8572 = vpow2.f32 %v2009_v31 }
 0xaa2   :  { %8574 = vpow2.f32 %v2012_v53 }
 0xaac   :  { %v8571_v50 = vpop.eup %8570 }
 0xaad   :  { %v2265_v1 = vmul.f32 %v8571_v50, %v9720_v40  ;;  %v7515_v40 = vld [vmem:[%s11922_s20 + $0xc] sm:$0x3] }
 0xaae   :  { %v8573_v33 = vpop.eup %8572  ;;  %v2341_v34 = vmul.f32 %v9825_v16, %v7515_v40 }
 0xaaf   :  { %v8575_v61 = vpop.eup %8574  ;;  %v2014_v32 = vmul.f32 %v8573_v33, %v9664_v4  ;;  %7521 = vmatmul.mubr.msk.f32.vlgmr.msra.gmra.mxu1 %vm457_vm2, %v2265_v1  ;;  %v9882_v4 = vld [vmem:[#allocation3] ss:$0 sm:$0xff] }
 0xab0   :  { %v2015_v36 = vmul.f32 %v8575_v61, %v1810_v48  ;;  %v9873_v38 = vadd.f32 %v8575_v61, %v8573_v33  ;;  %2625 = vmatprep.mubr.f32.mxu1 %v11971_v11  ;;  %v9916_v33 = vld [vmem:[%s11723_s16 + $0x68] sm:$0xff]  ;;  %v9921_v61 = vld [vmem:[%s11723_s16 + $0x78] sm:$0xff] }
 0xab1   :  { %2585 = vmatprep.subr.mxu1 %v9916_v33 }
 0xab2   :  { %v9876_v56 = vadd.f32 %v2015_v36, %v2014_v32  ;;  %v9928_v32 = vld [vmem:[%s11723_s16 + $0x60] sm:$0xff]  ;;  %v9933_v36 = vld [vmem:[%s11723_s16 + $0x70] sm:$0xff] }
 0xab3   :  { %2586 = vmatpush1.msra.mxu1 %v9928_v32 }
 0xb6f   :  { %v2335_v47 = vpop.f32.mrf.mxu1 }
 0xb71   :  { %v2337_v14 = vpop.f32.mrf.mxu1 }
 0xb72   :  { %v2340_v24 = vadd.f32 %v9882_v4, %v2337_v14  ;;  %v9969_v14 = vld [vmem:[%s11723_s16 + $0x38] sm:$0xff] }
 0xb74   :  { %v2343_v37 = vmul.f32 %v2342_v49, %v2340_v24  ;;  %v2426_v9 = vsub.f32 %v7515_v40, %v2340_v24  ;;  %v2420_v16 = vmul.f32 %v2419_v7, %v2340_v24  ;;  %v9976_v24 = vld [vmem:[%s11723_s16 + $0x20] sm:$0xff] }
 0xb76   :  { %v2344_v58 = vadd.f32 %v2343_v37, %v2341_v34  ;;  %v2427_v25 = vand.u32 2147483647, %v2426_v9  ;;  %v9988_v37 = vld [vmem:[%s11723_s16 + $0x8] sm:$0xff] }
 0xb78   :  { %8198 = vmatmul.mubr.msk.f32.vlgmr.msra.gmra.mxu0 %vm194_vm1, %v2344_v58  ;;  %v9993_v58 = vld [vmem:[%s11723_s16 + $0x18] sm:$0xff] }
 0xb79   :  { %8201 = vmatpush3.msra.mxu0 %v9887_v62  ;;  %8202 = vmatprep.mubr.msk.f32.mxu0 %vm9028_vm0, %v11971_v11 }
 0xb7a   :  { %2656 = vmatprep.subr.mxu0 %v9921_v61 }
 0xc38   :  { %v2414_v5 = vpop.f32.mrf.mxu0 }
 0xc39   :  { %v2415_v6 = vadd.f32 %v9898_v10, %v2414_v5  ;;  %v10011_v5 = vld [vmem:[#allocation12 + $0xf8] sm:$0xff] }
 0xc3a   :  { %v8199_v12 = vpop.f32.mrf.mxu0 }
 0xc3b   :  { %v2418_v48 = vmul.f32 %v2415_v6, %v2254_v3  ;;  %v2428_v51 = vsub.f32 %v7515_v40, %v2415_v6  ;;  %v10005_v3 = vld [vmem:[%s11723_s16 + $0x10] sm:$0xff] }
 0xc3d   :  { %v2421_v18 = vadd.f32 %v2420_v16, %v2418_v48  ;;  %v2429_v27 = vand.u32 2147483647, %v2428_v51 }
 0xc3f   :  { %v2422_v42 = vmul.f32 %v2421_v18, %v2342_v49  ;;  %v2430_v2 = vadd.f32 %v2429_v27, %v2427_v25  ;;  %v2431_v19 = vsub.f32 %v7515_v40, %v2421_v18  ;;  %v9957_v40 = vld [vmem:[%s11723_s16 + $0x50] sm:$0xff]  ;;  %v9964_v49 = vld [vmem:[%s11723_s16 + $0x28] sm:$0xff] }
 0xc40   :  { %v10021_v18 = vld [vmem:[#allocation12 + $0x178] sm:$0xff] }
 0xc41   :  { %v2423_v21 = vadd.f32 %v2422_v42, %v2341_v34  ;;  %v2432_v43 = vand.u32 2147483647, %v2431_v19  ;;  %v9981_v34 = vld [vmem:[%s11723_s16 + $0x30] sm:$0xff]  ;;  %v10025_v42 = vld [vmem:[#allocation12 + $0xf0] sm:$0xff]  ;;  %v10037_v19 = vld [vmem:[#allocation12 + $0xe8] sm:$0xff] }
 0xc42   :  { %v10023_v27 = vld [vmem:[#allocation12 + $0x78] sm:$0xff] }
 0xc43   :  { %7523 = vst.msk [vmem:[%s11728_s21 + $0x4] sm:$0x3] %vm444_vm3, %v2423_v21  ;;  %8203 = vmatmul.mubr.msk.f32.vlgmr.msra.gmra.mxu0 %vm194_vm1, %v2423_v21  ;;  %v9906_v22 = vadd.f32 %v2432_v43, %v2430_v2  ;;  %v10033_v2 = vld [vmem:[#allocation12 + $0x70] sm:$0xff]  ;;  %v10041_v21 = vld [vmem:[#allocation12 + $0x168] sm:$0xff] }
 0xc44   :  { %2696 = vmatprep.mubr.f32.mxu0 %v11971_v11  ;;  %2657 = vmatpush1.msra.mxu0 %v9933_v36  ;;  %v10043_v43 = vld [vmem:[#allocation12 + $0x68] sm:$0xff] }
 0xc45   :  { %12014 = vst [vmem:[#allocation28_spill] sm:$0xff] %v9906_v22  ;;  %2658 = vmatprep.subr.mxu0 %v9945_v45  ;;  %v10107_v22 = vld [vmem:[#allocation12 + $0xb8] sm:$0xff] }
 0xc46   :  { %2659 = vmatpush1.msra.mxu0 %v9957_v40  ;;  %12028 = vst [vmem:[#allocation43_spill] sm:$0xff] %v10107_v22 }
 0xc47   :  { %2660 = vmatprep.subr.mxu0 %v9969_v14 }
 0xc48   :  { %2661 = vmatpush1.msra.mxu0 %v9981_v34 }
 0xc49   :  { %2662 = vmatprep.subr.mxu0 %v9993_v58 }
 0xc4a   :  { %2663 = vmatpush1.msra.mxu0 %v10005_v3 }
 0xc4b   :  { %8205 = vmatprep.subr.mxu0 %v11971_v11 }
 0xd03   :  { %v2518_v59 = vpop.f32.mrf.mxu0 }
 0xd04   :  { %v2519_v23 = vadd.f32 %v2518_v59, %v2335_v47  ;;  %v9952_v47 = vld [vmem:[%s11723_s16 + $0x40] sm:$0xff]  ;;  %v10047_v59 = vld [vmem:[#allocation12 + $0xe0] sm:$0xff] }
 0xd05   :  { %v8204_v52 = vpop.f32.mrf.mxu0 }
 0xd06   :  { %v2522_v30 = vadd.f32 %v2519_v23, %v2176_v41  ;;  %v9940_v41 = vld [vmem:[%s11723_s16 + $0x48] sm:$0xff]  ;;  %v10051_v23 = vld [vmem:[#allocation12 + $0x160] sm:$0xff] }
 0xd07   :  { %2587 = vmatprep.subr.mxu1 %v9940_v41  ;;  %v10053_v52 = vld [vmem:[#allocation12 + $0x60] sm:$0xff] }
 0xd08   :  { %v2523_v57 = vadd.f32 %v9909_v8, %v2522_v30  ;;  %2588 = vmatpush1.msra.mxu1 %v9952_v47  ;;  %v10057_v30 = vld [vmem:[#allocation12 + $0xd8] sm:$0xff] }
 0xd09   :  { %2589 = vmatprep.subr.mxu1 %v9964_v49  ;;  %12015 = vst [vmem:[#allocation29_spill] sm:$0xff] %v10057_v30 }
 0xd0a   :  { %v7525_v29 = vmul.f32 -1.442695, %v2523_v57  ;;  %8576 = vtanh.f32 %v2523_v57  ;;  %2590 = vmatpush1.msra.mxu1 %v9976_v24  ;;  %v10061_v57 = vld [vmem:[#allocation12 + $0x158] sm:$0xff] }
 0xd0b   :  { %2591 = vmatprep.subr.mxu1 %v9988_v37  ;;  %12016 = vst [vmem:[#allocation30_spill] sm:$0xff] %v10061_v57 }
 0xd0c   :  { %8578 = vpow2.f32 %v7525_v29  ;;  %2592 = vmatpush1.msra.mxu1 %v9998_v63  ;;  %v10063_v29 = vld [vmem:[#allocation12 + $0x58] sm:$0xff] }
 0xd0d   :  { %7723 = vmatprep.subr.mxu1 %v10011_v5  ;;  %12017 = vst [vmem:[#allocation31_spill] sm:$0xff] %v10063_v29 }
 0xd17   :  { %v8577_v31 = vpop.eup %8576 }
 0xd18   :  { %2533 = vrot.lane.b32.xlu1 %v8577_v31, %s9031_s6  ;;  %v10067_v31 = vld [vmem:[#allocation12 + $0xd0] sm:$0xff] }
 0xd19   :  { %v8579_v53 = vpop.eup %8578  ;;  %12018 = vst [vmem:[#allocation32_spill] sm:$0xff] %v10067_v31 }
 0xd1a   :  { %v2527_v50 = vadd.f32 1.0, %v8579_v53  ;;  %v10071_v53 = vld [vmem:[#allocation12 + $0x150] sm:$0xff] }
 0xd1b   :  { %12019 = vst [vmem:[#allocation33_spill] sm:$0xff] %v10071_v53 }
 0xd1c   :  { %8580 = vrcp.f32 %v2527_v50  ;;  %v10073_v50 = vld [vmem:[#allocation12 + $0x50] sm:$0xff] }
 0xd1d   :  { %12020 = vst [vmem:[#allocation34_spill] sm:$0xff] %v10073_v50 }
 0xd29   :  { %v8581_v1 = vpop.eup %8580 }
 0xd2a   :  { %2531 = vrot.lane.b32.xlu0 %v8581_v1, %s9030_s8 }
 0xd2e   :  { %2535 = vrot.lane.b32.xlu0 %v8581_v1, %s9029_s1 }
 0xd8a   :  { %v2534_v7 = vpop.permute.xlu1 %2533 }
 0xd8b   :  { %v2538_v6 = vmul.f32 %v8581_v1, %v2534_v7  ;;  %v10077_v1 = vld [vmem:[#allocation12 + $0xc8] sm:$0xff] }
 0xd8c   :  { %12021 = vst [vmem:[#allocation35_spill] sm:$0xff] %v10077_v1  ;;  %v10081_v7 = vld [vmem:[#allocation12 + $0x148] sm:$0xff] }
 0xd8d   :  { %12022 = vst [vmem:[#allocation36_spill] sm:$0xff] %v10081_v7 }
 0xd9c   :  { %v2532_v9 = vpop.permute.xlu0 %2531 }
 0xd9d   :  { %v2537_v12 = vmul.f32 %v2532_v9, %v9717_v13  ;;  %v10031_v13 = vld [vmem:[#allocation12 + $0x170] sm:$0xff]  ;;  %v10091_v9 = vld [vmem:[#allocation12 + $0x140] sm:$0xff] }
 0xd9e   :  { %12023 = vst [vmem:[#allocation37_spill] sm:$0xff] %v10091_v9 }
 0xd9f   :  { %v10016_v16 = vadd.f32 %v2538_v6, %v2537_v12  ;;  %v10093_v6 = vld [vmem:[#allocation12 + $0x48] sm:$0xff]  ;;  %v10097_v12 = vld [vmem:[#allocation12 + $0xc0] sm:$0xff] }
 0xda0   :  { %v2536_v51 = vpop.permute.xlu0 %2535  ;;  %12024 = vst [vmem:[#allocation38_spill] sm:$0xff] %v10093_v6  ;;  %12025 = vst [vmem:[#allocation40_spill] sm:$0xff] %v10097_v12 }
 0xda1   :  { %8582 = vtanh.f32 %v10016_v16 }
 0xdae   :  { %v8583_v48 = vpop.eup %8582 }
 0xdaf   :  { %v10019_v25 = vmul.f32 %v8583_v48, %v2536_v51  ;;  %v10100_v48 = vld [vmem:[#allocation12 + $0x138] sm:$0xff]  ;;  %v10103_v51 = vld [vmem:[#allocation12 + $0x40] sm:$0xff] }
 0xdb0   :  { %12026 = vst [vmem:[#allocation41_spill] sm:$0xff] %v10100_v48  ;;  %12027 = vst [vmem:[#allocation39_spill] sm:$0xff] %v10103_v51 }
 0xdb1   :  { %7526 = vmatmul.mubr.msk.f32.vlgmr.msra.gmra.mxu1 %vm457_vm2, %v10019_v25  ;;  %7527 = vmatmul.mubr.msk.f32.vlgmr.msra.gmra.mxu0 %vm457_vm2, %v10019_v25 }
 0xdb2   :  { %8206 = vmatpush3.msra.mxu0 %v10021_v18  ;;  %7724 = vmatpush3.msra.mxu1 %v10023_v27 }
 0xdb3   :  { %8207 = vmatprep.subr.mxu0 %v11971_v11  ;;  %7725 = vmatprep.subr.mxu1 %v10025_v42 }
 0xdb4   :  { %8208 = vmatpush3.msra.mxu0 %v10031_v13  ;;  %7726 = vmatpush3.msra.mxu1 %v10033_v2 }
 0xdb5   :  { %8209 = vmatprep.subr.mxu0 %v11971_v11  ;;  %7727 = vmatprep.subr.mxu1 %v10037_v19 }
 0xdb6   :  { %8210 = vmatpush3.msra.mxu0 %v10041_v21  ;;  %7728 = vmatpush3.msra.mxu1 %v10043_v43 }
 0xdb7   :  { %8211 = vmatprep.subr.mxu0 %v11971_v11  ;;  %7729 = vmatprep.subr.mxu1 %v10047_v59 }
 0xdb8   :  { %8212 = vmatpush3.msra.mxu0 %v10051_v23  ;;  %7730 = vmatpush3.msra.mxu1 %v10053_v52 }
 0xdb9   :  { %8213 = vmatprep.subr.mxu0 %v11971_v11  ;;  %7731 = vmatprep.subr.mxu1 %v10057_v30 }
 0xdba   :  { %8214 = vmatpush3.msra.mxu0 %v10061_v57  ;;  %7732 = vmatpush3.msra.mxu1 %v10063_v29 }
 0xdbb   :  { %8215 = vmatprep.subr.mxu0 %v11971_v11  ;;  %7733 = vmatprep.subr.mxu1 %v10067_v31 }
 0xdbc   :  { %8216 = vmatpush3.msra.mxu0 %v10071_v53  ;;  %7734 = vmatpush3.msra.mxu1 %v10073_v50 }
 0xdbd   :  { %8217 = vmatprep.subr.mxu0 %v11971_v11  ;;  %7735 = vmatprep.subr.mxu1 %v10077_v1  ;;  %v10140_v1 = vld [vmem:[#allocation12 + $0x20] sm:$0xff] }
 0xdbe   :  { %8218 = vmatpush3.msra.mxu0 %v10081_v7  ;;  %8237 = vmatprep.mubr.msk.f32.mxu0 %vm9028_vm0, %v11971_v11  ;;  %v10130_v7 = vld [vmem:[#allocation12 + $0x120] sm:$0xff]  ;;  %12039 = vst [vmem:[#allocation52_spill] sm:$0xff] %v10140_v1 }
 0xdbf   :  { %8219 = vmatprep.subr.mxu0 %v11971_v11  ;;  %7736 = vmatpush3.msra.mxu1 %v10093_v6  ;;  %v10116_v6 = vld [vmem:[#allocation12 + $0xb0] sm:$0xff]  ;;  %12036 = vst [vmem:[#allocation49_spill] sm:$0xff] %v10130_v7 }
 0xdc0   :  { %8220 = vmatpush3.msra.mxu0 %v10091_v9  ;;  %7737 = vmatprep.subr.mxu1 %v10097_v12  ;;  %v10113_v9 = vld [vmem:[#allocation12 + $0x38] sm:$0xff]  ;;  %12031 = vst [vmem:[#allocation46_spill] sm:$0xff] %v10116_v6  ;;  %v10118_v12 = vld [vmem:[#allocation12 + $0x30] sm:$0xff] }
 0xdc1   :  { %8221 = vmatprep.subr.mxu0 %v11971_v11  ;;  %7738 = vmatpush3.msra.mxu1 %v10103_v51  ;;  %12030 = vst [vmem:[#allocation42_spill] sm:$0xff] %v10113_v9  ;;  %12032 = vst [vmem:[#allocation47_spill] sm:$0xff] %v10118_v12  ;;  %v10124_v51 = vld [vmem:[#allocation12 + $0xa8] sm:$0xff] }
 0xdc2   :  { %8222 = vmatpush3.msra.mxu0 %v10100_v48  ;;  %7739 = vmatprep.subr.mxu1 %v10107_v22  ;;  %v10122_v48 = vld [vmem:[#allocation12 + $0x128] sm:$0xff]  ;;  %12034 = vst [vmem:[#allocation48_spill] sm:$0xff] %v10124_v51 }
 0xdc3   :  { %8223 = vmatprep.subr.mxu0 %v11971_v11  ;;  %7740 = vmatpush3.msra.mxu1 %v10113_v9  ;;  %12033 = vst [vmem:[#allocation45_spill] sm:$0xff] %v10122_v48  ;;  %v10128_v22 = vld [vmem:[#allocation12 + $0x28] sm:$0xff]  ;;  %v10136_v9 = vld [vmem:[#allocation12 + $0x118] sm:$0xff] }
 0xdc4   :  { %8224 = vmatpush3.msra.mxu0 %v10110_v39  ;;  %7741 = vmatprep.subr.mxu1 %v10116_v6  ;;  %12035 = vst [vmem:[#allocation50_spill] sm:$0xff] %v10128_v22  ;;  %v10134_v39 = vld [vmem:[#allocation12 + $0xa0] sm:$0xff]  ;;  %12038 = vst [vmem:[#allocation53_spill] sm:$0xff] %v10136_v9  ;;  %v10146_v6 = vld [vmem:[#allocation12 + $0x110] sm:$0xff] }
 0xdc5   :  { %8225 = vmatprep.subr.mxu0 %v11971_v11  ;;  %7742 = vmatpush3.msra.mxu1 %v10118_v12  ;;  %12037 = vst [vmem:[#allocation51_spill] sm:$0xff] %v10134_v39  ;;  %12041 = vst [vmem:[#allocation56_spill] sm:$0xff] %v10146_v6  ;;  %v10150_v12 = vld [vmem:[#allocation12 + $0x18] sm:$0xff] }
 0xdc6   :  { %8226 = vmatpush3.msra.mxu0 %v10122_v48  ;;  %7743 = vmatprep.subr.mxu1 %v10124_v51  ;;  %v10144_v48 = vld [vmem:[#allocation12 + $0x98] sm:$0xff]  ;;  %12042 = vst [vmem:[#allocation54_spill] sm:$0xff] %v10150_v12  ;;  %v10156_v51 = vld [vmem:[#allocation12 + $0x108] sm:$0xff] }
 0xdc7   :  { %8227 = vmatprep.subr.mxu0 %v11971_v11  ;;  %7744 = vmatpush3.msra.mxu1 %v10128_v22  ;;  %12040 = vst [vmem:[#allocation55_spill] sm:$0xff] %v10144_v48  ;;  %12044 = vst [vmem:[#allocation59_spill] sm:$0xff] %v10156_v51  ;;  %v10160_v22 = vld [vmem:[#allocation12 + $0x10] sm:$0xff] }
 0xdc8   :  { %8228 = vmatpush3.msra.mxu0 %v10130_v7  ;;  %7745 = vmatprep.subr.mxu1 %v10134_v39  ;;  %v10154_v7 = vld [vmem:[#allocation12 + $0x90] sm:$0xff]  ;;  %12045 = vst [vmem:[#allocation57_spill] sm:$0xff] %v10160_v22  ;;  %v10166_v39 = vld [vmem:[#allocation12 + $0x100] sm:$0xff] }
 0xdc9   :  { %8229 = vmatprep.subr.mxu0 %v11971_v11  ;;  %7746 = vmatpush3.msra.mxu1 %v10140_v1  ;;  %12043 = vst [vmem:[#allocation58_spill] sm:$0xff] %v10154_v7  ;;  %12047 = vst [vmem:[#allocation62_spill] sm:$0xff] %v10166_v39  ;;  %v10170_v1 = vld [vmem:[#allocation12 + $0x8] sm:$0xff] }
 0xdca   :  { %8230 = vmatpush3.msra.mxu0 %v10136_v9  ;;  %7747 = vmatprep.subr.mxu1 %v10144_v48  ;;  %v10164_v9 = vld [vmem:[#allocation12 + $0x88] sm:$0xff]  ;;  %12048 = vst [vmem:[#allocation60_spill] sm:$0xff] %v10170_v1 }
 0xdcb   :  { %8231 = vmatprep.subr.mxu0 %v11971_v11  ;;  %7748 = vmatpush3.msra.mxu1 %v10150_v12  ;;  %12046 = vst [vmem:[#allocation61_spill] sm:$0xff] %v10164_v9  ;;  %v10179_v12 = vld [vmem:[#allocation12] sm:$0xff] }
 0xdcc   :  { %8232 = vmatpush3.msra.mxu0 %v10146_v6  ;;  %7749 = vmatprep.subr.mxu1 %v10154_v7  ;;  %v10174_v6 = vld [vmem:[#allocation12 + $0x80] sm:$0xff]  ;;  %12050 = vst [vmem:[#allocation63_spill] sm:$0xff] %v10179_v12 }
 0xdcd   :  { %8233 = vmatprep.subr.mxu0 %v11971_v11  ;;  %7750 = vmatpush3.msra.mxu1 %v10160_v22  ;;  %12049 = vst [vmem:[#allocation64_spill] sm:$0xff] %v10174_v6 }
 0xdce   :  { %8234 = vmatpush3.msra.mxu0 %v10156_v51  ;;  %7751 = vmatprep.subr.mxu1 %v10164_v9  ;;  %v10184_v51 = vld [vmem:[%s11721_s14 + $0x8] sm:$0xff] }
 0xdcf   :  { %8235 = vmatprep.subr.mxu0 %v11971_v11  ;;  %7752 = vmatpush3.msra.mxu1 %v10170_v1  ;;  %12051 = vst [vmem:[#allocation65_spill] sm:$0xff] %v10184_v51  ;;  %v10196_v1 = vld [vmem:[%s11923_s4] ss:$0 sm:$0xff] }
 0xdd0   :  { %8236 = vmatpush3.msra.mxu0 %v10166_v39  ;;  %7753 = vmatprep.subr.mxu1 %v10174_v6  ;;  %v7530_v39 = vld [vmem:[%s11922_s20 + $0x16] sm:$0x3]  ;;  %12052 = vst [vmem:[#allocation66_spill] sm:$0xff] %v10196_v1 }
 0xdd1   :  { %3031 = vmatprep.subr.mxu0 %v10184_v51  ;;  %7754 = vmatpush3.msra.mxu1 %v10179_v12  ;;  %v2992_v9 = vmul.f32 %v10196_v1, %v7530_v39  ;;  %v10202_v51 = vld [vmem:[%s11925_s9] ss:$0 sm:$0xff] }
 0xdd2   :  { %8240 = vmatprep.subr.mxu1 %v11971_v11 }
 0xdd3   :  { %v2993_v12 = vadd.f32 %v10202_v51, %v2992_v9 }
 0xdd5   :  { %v2994_v7 = vmax.f32 %v2993_v12, 0.0 }
 0xdd7   :  { %v2995_v29 = vsub.f32 0.0, %v2994_v7 }
 0xdd9   :  { %v2996_v1 = vmul.f32 1.442695, %v2995_v29  ;;  %v10229_v29 = vld [vmem:[%s11927_s13] sm:$0xff] }
 0xdda   :  { %12054 = vst [vmem:[#allocation25_spill] sm:$0xff] %v10229_v29 }
 0xe71   :  { %v2627_v6 = vpop.f32.mrf.mxu1  ;;  %v2698_v22 = vpop.f32.mrf.mxu0 }
 0xe72   :  { %v2705_v48 = vadd.f32 %v2698_v22, %v9622_v28  ;;  %v2703_v50 = vadd.f32 %v2627_v6, %v9624_v54  ;;  %v10211_v22 = vld [vmem:[%s11721_s14] sm:$0xff] }
 0xe73   :  { %v2629_v53 = vpop.f32.mrf.mxu1 }
 0xe74   :  { %v2704_v31 = vadd.f32 %v2629_v53, %v9626_v60  ;;  %8584 = vtanh.f32 %v2705_v48  ;;  %v10266_v53 = vld [vmem:[%s11928_s17 + $0x8] sm:$0xff] }
 0xe75   :  { %12057 = vst [vmem:[#allocation70_spill] sm:$0xff] %v10266_v53 }
 0xe76   :  { %8586 = vtanh.f32 %v2704_v31  ;;  %v10260_v31 = vld [vmem:[%s11928_s17 + $0x10] sm:$0xff] }
 0xe77   :  { %8588 = vtanh.f32 %v2703_v50  ;;  %12056 = vst [vmem:[#allocation69_spill] sm:$0xff] %v10260_v31 }
 0xe78   :  { %8590 = vpow2.f32 %v2996_v1 }
 0xe81   :  { %v8585_v57 = vpop.eup %8584 }
 0xe82   :  { %8238 = vmatmul.mubr.f32.vlgmr.msra.gmra.mxu0 %v8585_v57 }
 0xe83   :  { %v8587_v30 = vpop.eup %8586  ;;  %3032 = vmatpush1.msra.mxu0 %v10211_v22  ;;  %3065 = vmatprep.mubr.f32.mxu0 %v11971_v11 }
 0xe84   :  { %v8589_v9 = vpop.eup %8588  ;;  %2821 = vmatprep.mubr.f32.mxu1 %v8587_v30  ;;  %v10222_v30 = vld [vmem:[%s11928_s17 + $0x38] sm:$0xff] }
 0xe85   :  { %2822 = vmatmul.mubr.f32.vlgmr.msra.gmra.mxu1 %v8589_v9  ;;  %12053 = vst [vmem:[#allocation26_spill] sm:$0xff] %v10222_v30  ;;  %3184 = vmatprep.subr.mxu0 %v10222_v30  ;;  %v8591_v57 = vpop.eup %8590 }
 0xe86   :  { %8241 = vmatpush3.msra.mxu1 %v9805_v44  ;;  %8242 = vmatprep.mubr.msk.f32.mxu1 %vm9028_vm0, %v11971_v11  ;;  %v10239_v44 = vld [vmem:[%s11718_s11] sm:$0xff] }
 0xe87   :  { %8245 = vmatprep.subr.mxu1 %v11971_v11  ;;  %12055 = vst [vmem:[#allocation68_spill] sm:$0xff] %v10239_v44 }
 0xe89   :  { %8243 = vmatmul.mubr.msk.f32.vlgmr.msra.gmra.mxu1 %vm194_vm1, %v7530_v39  ;;  %v10248_v39 = vld [vmem:[%s11922_s20 + $0x14] sm:$0x3] }
 0xe8a   :  { %8246 = vmatpush3.msra.mxu1 %v10229_v29  ;;  %8247 = vmatprep.mubr.msk.f32.mxu1 %vm9028_vm0, %v11971_v11 }
 0xe8b   :  { %8250 = vmatprep.subr.mxu1 %v11971_v11  ;;  %7532 = vmatmul.mubr.msk.f32.vlgmr.msra.gmra.mxu0 %vm194_vm1, %v10248_v39 }
 0xe8c   :  { %3185 = vmatpush1.msra.mxu0 %v9832_v15  ;;  %3224 = vmatprep.mubr.f32.mxu0 %v11971_v11  ;;  %v10272_v15 = vld [vmem:[%s11928_s17] sm:$0xff] }
 0xe8d   :  { %8248 = vmatmul.mubr.msk.f32.vlgmr.msra.gmra.mxu1 %vm194_vm1, %v8591_v57  ;;  %3186 = vmatprep.subr.mxu0 %v9839_v35  ;;  %12058 = vst [vmem:[#allocation71_spill] sm:$0xff] %v10272_v15  ;;  %v2700_v35 = vpop.f32.mrf.mxu0 }
 0xe8e   :  { %8251 = vmatpush3.msra.mxu1 %v10239_v44  ;;  %8252 = vmatprep.mubr.msk.f32.mxu1 %vm9028_vm0, %v11971_v11 }
 0xe8f   :  { %8255 = vmatprep.subr.mxu1 %v11971_v11  ;;  %3187 = vmatpush1.msra.mxu0 %v9845_v17 }
 0xe90   :  { %3188 = vmatprep.subr.mxu0 %v9851_v46 }
 0xe91   :  { %3189 = vmatpush1.msra.mxu0 %v10260_v31 }
 0xe92   :  { %3190 = vmatprep.subr.mxu0 %v10266_v53 }
 0xe93   :  { %3191 = vmatpush1.msra.mxu0 %v10272_v15 }
 0xe94   :  { %3476 = vmatprep.subr.mxu0 %v9916_v33 }
 0xf42   :  { %v2893_v17 = vpop.f32.mrf.mxu0 }
 0xf44   :  { %v8239_v46 = vpop.f32.mrf.mxu0 }
 0xf45   :  { %v7755_v50 = vpop.f32.mrf.mxu1 }
 0xf47   :  { %v7756_v1 = vpop.f32.mrf.mxu1 }
 0xf48   :  { %v7757_v7 = vadd.f32 %v7756_v1, %v7755_v50 }
 0xf49   :  { %v2984_v6 = vpop.f32.mrf.mxu1 }
 0xf4a   :  { %v2824_v12 = vadd.f32 %v7757_v7, %v9666_v26  ;;  %v2985_v48 = vadd.f32 %v9861_v20, %v2984_v6 }
 0xf4b   :  { %v8244_v9 = vpop.f32.mrf.mxu1 }
 0xf4c   :  { %v2894_v57 = vadd.f32 %v2893_v17, %v2824_v12  ;;  %v2988_v53 = vmax.f32 %v2985_v48, 0.0 }
 0xf4d   :  { %v3141_v31 = vpop.f32.mrf.mxu1 }
 0xf4e   :  { %v10279_v44 = vmax.f32 %v9865_v55, %v2894_v57  ;;  %v2989_v15 = vsub.f32 0.0, %v2988_v53 }
 0xf4f   :  { %v8249_v33 = vpop.f32.mrf.mxu1 }
 0xf50   :  { %v2898_v46 = vsub.f32 %v9865_v55, %v10279_v44  ;;  %v2901_v29 = vsub.f32 %v2894_v57, %v10279_v44  ;;  %v2990_v50 = vmul.f32 1.442695, %v2989_v15 }
 0xf52   :  { %v2899_v1 = vmul.f32 1.442695, %v2898_v46  ;;  %v2902_v30 = vmul.f32 1.442695, %v2901_v29  ;;  %8592 = vpow2.f32 %v2990_v50 }
 0xf54   :  { %8594 = vpow2.f32 %v2899_v1 }
 0xf55   :  { %8596 = vpow2.f32 %v2902_v30 }
 0xf5f   :  { %v8593_v26 = vpop.eup %8592 }
 0xf60   :  { %v3156_v20 = vmul.f32 %v8593_v26, %v10019_v25  ;;  %v3233_v25 = vsub.f32 1.0, %v10248_v39 }
 0xf61   :  { %v8595_v17 = vpop.eup %8594 }
 0xf62   :  { %v8597_v7 = vpop.eup %8596  ;;  %v2904_v6 = vmul.f32 %v8595_v17, %v9876_v56  ;;  %v2907_v53 = vmul.f32 %v8595_v17, %v9873_v38  ;;  %7534 = vmatmul.mubr.msk.f32.vlgmr.msra.gmra.mxu0 %vm457_vm2, %v3156_v20  ;;  %v3067_v38 = vpop.f32.mrf.mxu0 }
 0xf63   :  { %v2905_v55 = vmul.f32 %v8597_v7, %v2700_v35  ;;  %3477 = vmatpush1.msra.mxu0 %v9928_v32  ;;  %3516 = vmatprep.mubr.f32.mxu0 %v11971_v11 }
 0xf64   :  { %v10290_v29 = vadd.f32 %v8597_v7, %v2907_v53  ;;  %3478 = vmatprep.subr.mxu0 %v9940_v41  ;;  %v3069_v56 = vpop.f32.mrf.mxu0  ;;  %v7528_v41 = vld [vmem:[%s11922_s20 + $0x12] sm:$0x3] }
 0xf65   :  { %v10293_v30 = vadd.f32 %v2905_v55, %v2904_v6  ;;  %3479 = vmatpush1.msra.mxu0 %v9952_v47 }
 0xf66   :  { %3480 = vmatprep.subr.mxu0 %v9964_v49 }
 0xf67   :  { %3481 = vmatpush1.msra.mxu0 %v9976_v24  ;;  %v3232_v24 = vmul.f32 %v10248_v39, %v7528_v41 }
 0xf68   :  { %3482 = vmatprep.subr.mxu0 %v9988_v37 }
 0xf69   :  { %3483 = vmatpush1.msra.mxu0 %v9998_v63  ;;  %v3142_v63 = vadd.f32 %v3141_v31, %v3069_v56 }
 0xf6a   :  { %7783 = vmatprep.subr.mxu0 %v10011_v5 }
 0xf6b   :  { %v3145_v5 = vadd.f32 %v9895_v0, %v3142_v63  ;;  %v12078_v63 = vld [vmem:[#allocation48_spill] sm:$0xff] }
 0xf6d   :  { %v3310_v12 = vsub.f32 1.0, %v3145_v5 }
0x1022   :  { %v3226_v32 = vpop.f32.mrf.mxu0 }
0x1024   :  { %v3228_v47 = vpop.f32.mrf.mxu0 }
0x1025   :  { %v3231_v49 = vadd.f32 %v9882_v4, %v3228_v47  ;;  %v12073_v47 = vld [vmem:[#allocation41_spill] sm:$0xff] }
0x1027   :  { %v3234_v15 = vmul.f32 %v3233_v25, %v3231_v49  ;;  %v3317_v48 = vsub.f32 %v7528_v41, %v3231_v49  ;;  %v3311_v9 = vmul.f32 %v3310_v12, %v3231_v49  ;;  %v12074_v49 = vld [vmem:[#allocation42_spill] sm:$0xff]  ;;  %v12081_v12 = vld [vmem:[#allocation51_spill] sm:$0xff] }
0x1029   :  { %v3235_v37 = vadd.f32 %v3234_v15, %v3232_v24  ;;  %v3318_v46 = vand.u32 2147483647, %v3317_v48  ;;  %v12076_v15 = vld [vmem:[#allocation44_spill] sm:$0xff]  ;;  %v12082_v48 = vld [vmem:[#allocation49_spill] sm:$0xff] }
0x102b   :  { %8253 = vmatmul.mubr.msk.f32.vlgmr.msra.gmra.mxu1 %vm194_vm1, %v3235_v37  ;;  %v12077_v37 = vld [vmem:[#allocation47_spill] sm:$0xff] }
0x102c   :  { %8256 = vmatpush3.msra.mxu1 %v9887_v62  ;;  %8257 = vmatprep.mubr.msk.f32.mxu1 %vm9028_vm0, %v11971_v11 }
0x102d   :  { %3547 = vmatprep.subr.mxu1 %v9921_v61 }
0x10eb   :  { %v3305_v35 = vpop.f32.mrf.mxu1 }
0x10ec   :  { %v3306_v4 = vadd.f32 %v9898_v10, %v3305_v35  ;;  %v12080_v35 = vld [vmem:[#allocation50_spill] sm:$0xff] }
0x10ed   :  { %v8254_v39 = vpop.f32.mrf.mxu1 }
0x10ee   :  { %v3309_v57 = vmul.f32 %v3306_v4, %v3145_v5  ;;  %v3319_v33 = vsub.f32 %v7528_v41, %v3306_v4  ;;  %v12079_v5 = vld [vmem:[#allocation45_spill] sm:$0xff]  ;;  %v12083_v4 = vld [vmem:[#allocation52_spill] sm:$0xff]  ;;  %v12084_v39 = vld [vmem:[#allocation55_spill] sm:$0xff] }
0x10f0   :  { %v3312_v50 = vadd.f32 %v3311_v9, %v3309_v57  ;;  %v3320_v62 = vand.u32 2147483647, %v3319_v33  ;;  %v12085_v9 = vld [vmem:[#allocation53_spill] sm:$0xff]  ;;  %v12086_v57 = vld [vmem:[#allocation54_spill] sm:$0xff] }
0x10f1   :  { %v12087_v33 = vld [vmem:[#allocation58_spill] sm:$0xff] }
0x10f2   :  { %v3313_v1 = vmul.f32 %v3312_v50, %v3233_v25  ;;  %v3321_v26 = vadd.f32 %v3320_v62, %v3318_v46  ;;  %v3322_v20 = vsub.f32 %v7528_v41, %v3312_v50  ;;  %v12072_v25 = vld [vmem:[#allocation43_spill] sm:$0xff]  ;;  %v12088_v46 = vld [vmem:[#allocation56_spill] sm:$0xff]  ;;  %v12089_v50 = vld [vmem:[#allocation57_spill] sm:$0xff] }
0x10f3   :  { %v12090_v62 = vld [vmem:[#allocation61_spill] sm:$0xff] }
0x10f4   :  { %v3314_v17 = vadd.f32 %v3313_v1, %v3232_v24  ;;  %v3323_v61 = vand.u32 2147483647, %v3322_v20  ;;  %v12075_v24 = vld [vmem:[#allocation46_spill] sm:$0xff]  ;;  %v12091_v1 = vld [vmem:[#allocation59_spill] sm:$0xff] }
0x10f5   :  { %v12093_v20 = vld [vmem:[#allocation62_spill] sm:$0xff] }
0x10f6   :  { %7536 = vst.msk [vmem:[%s11728_s21 + $0x6] sm:$0x3] %vm444_vm3, %v3314_v17  ;;  %8258 = vmatmul.mubr.msk.f32.vlgmr.msra.gmra.mxu1 %vm194_vm1, %v3314_v17  ;;  %v10319_v0 = vadd.f32 %v3323_v61, %v3321_v26  ;;  %v12092_v26 = vld [vmem:[#allocation60_spill] sm:$0xff]  ;;  %v12095_v61 = vld [vmem:[#allocation63_spill] sm:$0xff] }
0x10f7   :  { %3548 = vmatpush1.msra.mxu1 %v9933_v36  ;;  %3587 = vmatprep.mubr.f32.mxu1 %v11971_v11  ;;  %v12094_v17 = vld [vmem:[#allocation64_spill] sm:$0xff] }
0x10f8   :  { %12059 = vst [vmem:[#allocation72_spill] sm:$0xff] %v10319_v0  ;;  %3549 = vmatprep.subr.mxu1 %v9945_v45  ;;  %v10731_v0 = vld [vmem:[#allocation12 + $0x130] sm:$0xff] }
0x10f9   :  { %3550 = vmatpush1.msra.mxu1 %v9957_v40  ;;  %12119 = vst [vmem:[#allocation46_spill] sm:$0xff] %v10731_v0 }
0x10fa   :  { %3551 = vmatprep.subr.mxu1 %v9969_v14 }
0x10fb   :  { %3552 = vmatpush1.msra.mxu1 %v9981_v34 }
0x10fc   :  { %3553 = vmatprep.subr.mxu1 %v9993_v58 }
0x10fd   :  { %3554 = vmatpush1.msra.mxu1 %v10005_v3 }
0x10fe   :  { %8260 = vmatprep.subr.mxu1 %v11971_v11 }
0x11b6   :  { %v3409_v10 = vpop.f32.mrf.mxu1 }
0x11b7   :  { %v3410_v31 = vadd.f32 %v3409_v10, %v3226_v32  ;;  %v12096_v10 = vld [vmem:[#allocation65_spill] sm:$0xff] }
0x11b8   :  { %v8259_v7 = vpop.f32.mrf.mxu1 }
0x11b9   :  { %v3413_v36 = vadd.f32 %v3410_v31, %v3067_v38  ;;  %v7543_v31 = vld [vmem:[%s11922_s20 + $0x1c] sm:$0x3]  ;;  %v12097_v7 = vld [vmem:[#allocation66_spill] sm:$0xff] }
0x11bb   :  { %v3414_v6 = vadd.f32 %v9909_v8, %v3413_v36  ;;  %v3883_v36 = vmul.f32 %v12097_v7, %v7543_v31 }
0x11bd   :  { %v7538_v53 = vmul.f32 -1.442695, %v3414_v6  ;;  %8598 = vtanh.f32 %v3414_v6  ;;  %v3884_v6 = vadd.f32 %v10202_v51, %v3883_v36 }
0x11bf   :  { %8600 = vpow2.f32 %v7538_v53 }
0x11ca   :  { %v8599_v45 = vpop.eup %8598 }
0x11cb   :  { %3424 = vrot.lane.b32.xlu0 %v8599_v45, %s9031_s6 }
0x11cc   :  { %v8601_v40 = vpop.eup %8600 }
0x11cd   :  { %v3418_v14 = vadd.f32 1.0, %v8601_v40  ;;  %v3885_v40 = vmax.f32 %v3884_v6, 0.0 }
0x11cf   :  { %8602 = vrcp.f32 %v3418_v14 }
0x11dc   :  { %v8603_v34 = vpop.eup %8602 }
0x11dd   :  { %3422 = vrot.lane.b32.xlu1 %v8603_v34, %s9030_s8 }
0x11e1   :  { %3426 = vrot.lane.b32.xlu1 %v8603_v34, %s9029_s1 }
0x123d   :  { %v3425_v58 = vpop.permute.xlu0 %3424 }
0x123e   :  { %v3429_v55 = vmul.f32 %v8603_v34, %v3425_v58 }
0x124f   :  { %v3423_v3 = vpop.permute.xlu1 %3422 }
0x1250   :  { %v3428_v38 = vmul.f32 %v3423_v3, %v10016_v16  ;;  %v12060_v16 = vld [vmem:[#allocation29_spill] sm:$0xff] }
0x1252   :  { %v10335_v8 = vadd.f32 %v3429_v55, %v3428_v38  ;;  %v3886_v55 = vsub.f32 0.0, %v3885_v40 }
0x1253   :  { %v3427_v32 = vpop.permute.xlu1 %3426 }
0x1254   :  { %8604 = vtanh.f32 %v10335_v8  ;;  %v3887_v38 = vmul.f32 1.442695, %v3886_v55 }
0x1261   :  { %v8605_v56 = vpop.eup %8604 }
0x1262   :  { %v10338_v41 = vmul.f32 %v8605_v56, %v3427_v32 }
0x1264   :  { %7539 = vmatmul.mubr.msk.f32.vlgmr.msra.gmra.mxu0 %vm457_vm2, %v10338_v41  ;;  %7540 = vmatmul.mubr.msk.f32.vlgmr.msra.gmra.mxu1 %vm457_vm2, %v10338_v41 }
0x1265   :  { %8261 = vmatpush3.msra.mxu1 %v10021_v18  ;;  %7784 = vmatpush3.msra.mxu0 %v10023_v27  ;;  %v12061_v18 = vld [vmem:[#allocation30_spill] sm:$0xff]  ;;  %v12062_v27 = vld [vmem:[#allocation31_spill] sm:$0xff] }
0x1266   :  { %8262 = vmatprep.subr.mxu1 %v11971_v11  ;;  %7785 = vmatprep.subr.mxu0 %v10025_v42  ;;  %v12063_v42 = vld [vmem:[#allocation32_spill] sm:$0xff] }
0x1267   :  { %8263 = vmatpush3.msra.mxu1 %v10031_v13  ;;  %7786 = vmatpush3.msra.mxu0 %v10033_v2  ;;  %v12064_v13 = vld [vmem:[#allocation33_spill] sm:$0xff]  ;;  %v12065_v2 = vld [vmem:[#allocation34_spill] sm:$0xff] }
0x1268   :  { %8264 = vmatprep.subr.mxu1 %v11971_v11  ;;  %7787 = vmatprep.subr.mxu0 %v10037_v19  ;;  %v12066_v19 = vld [vmem:[#allocation35_spill] sm:$0xff] }
0x1269   :  { %8265 = vmatpush3.msra.mxu1 %v10041_v21  ;;  %7788 = vmatpush3.msra.mxu0 %v10043_v43  ;;  %v12067_v21 = vld [vmem:[#allocation36_spill] sm:$0xff]  ;;  %v12068_v43 = vld [vmem:[#allocation38_spill] sm:$0xff] }
0x126a   :  { %8266 = vmatprep.subr.mxu1 %v11971_v11  ;;  %7789 = vmatprep.subr.mxu0 %v10047_v59  ;;  %v12069_v59 = vld [vmem:[#allocation40_spill] sm:$0xff] }
0x126b   :  { %8267 = vmatpush3.msra.mxu1 %v10051_v23  ;;  %7790 = vmatpush3.msra.mxu0 %v10053_v52  ;;  %v12070_v23 = vld [vmem:[#allocation37_spill] sm:$0xff]  ;;  %v12071_v52 = vld [vmem:[#allocation39_spill] sm:$0xff] }
0x126c   :  { %8268 = vmatprep.subr.mxu1 %v11971_v11  ;;  %7791 = vmatprep.subr.mxu0 %v12060_v16  ;;  %v10423_v16 = vld [vmem:[%s11921_s15] sm:$0xff] }
0x126d   :  { %8269 = vmatpush3.msra.mxu1 %v12061_v18  ;;  %7792 = vmatpush3.msra.mxu0 %v12062_v27  ;;  %v12098_v18 = vld [vmem:[#allocation26_spill] sm:$0xff]  ;;  %v12099_v27 = vld [vmem:[#allocation25_spill] sm:$0xff] }
0x126e   :  { %8270 = vmatprep.subr.mxu1 %v11971_v11  ;;  %7793 = vmatprep.subr.mxu0 %v12063_v42  ;;  %v12100_v42 = vld [vmem:[#allocation68_spill] sm:$0xff] }
0x126f   :  { %8271 = vmatpush3.msra.mxu1 %v12064_v13  ;;  %7794 = vmatpush3.msra.mxu0 %v12065_v2  ;;  %v10443_v13 = vld [vmem:[%s11922_s20 + $0x1a] sm:$0x3]  ;;  %v10450_v2 = vld [vmem:[%s11928_s17 + $0x30] sm:$0xff] }
0x1270   :  { %8272 = vmatprep.subr.mxu1 %v11971_v11  ;;  %7795 = vmatprep.subr.mxu0 %v12066_v19  ;;  %v10457_v19 = vld [vmem:[%s11928_s17 + $0x28] sm:$0xff] }
0x1271   :  { %8273 = vmatpush3.msra.mxu1 %v12067_v21  ;;  %7796 = vmatpush3.msra.mxu0 %v12068_v43  ;;  %v10463_v21 = vld [vmem:[%s11928_s17 + $0x20] sm:$0xff]  ;;  %v10469_v43 = vld [vmem:[%s11928_s17 + $0x18] sm:$0xff] }
0x1272   :  { %8274 = vmatprep.subr.mxu1 %v11971_v11  ;;  %7797 = vmatprep.subr.mxu0 %v12069_v59  ;;  %v12101_v59 = vld [vmem:[#allocation69_spill] sm:$0xff] }
0x1273   :  { %8275 = vmatpush3.msra.mxu1 %v12070_v23  ;;  %7798 = vmatpush3.msra.mxu0 %v12071_v52  ;;  %v12102_v23 = vld [vmem:[#allocation70_spill] sm:$0xff]  ;;  %v12103_v52 = vld [vmem:[#allocation71_spill] sm:$0xff] }
0x1274   :  { %8276 = vmatprep.subr.mxu1 %v11971_v11  ;;  %7799 = vmatprep.subr.mxu0 %v12072_v25 }
0x1275   :  { %8277 = vmatpush3.msra.mxu1 %v12073_v47  ;;  %7800 = vmatpush3.msra.mxu0 %v12074_v49 }
0x1276   :  { %8278 = vmatprep.subr.mxu1 %v11971_v11  ;;  %7801 = vmatprep.subr.mxu0 %v12075_v24 }
0x1277   :  { %8279 = vmatpush3.msra.mxu1 %v12076_v15  ;;  %7802 = vmatpush3.msra.mxu0 %v12077_v37 }
0x1278   :  { %8280 = vmatprep.subr.mxu1 %v11971_v11  ;;  %7803 = vmatprep.subr.mxu0 %v12078_v63 }
0x1279   :  { %8281 = vmatpush3.msra.mxu1 %v12079_v5  ;;  %7804 = vmatpush3.msra.mxu0 %v12080_v35  ;;  %v10475_v5 = vld [vmem:[#allocation14] ss:$0 sm:$0xff] }
0x127a   :  { %8282 = vmatprep.subr.mxu1 %v11971_v11  ;;  %7805 = vmatprep.subr.mxu0 %v12081_v12  ;;  %v10481_v12 = vld [vmem:[%s11929_s26] ss:$0 sm:$0xff] }
0x127b   :  { %8283 = vmatpush3.msra.mxu1 %v12082_v48  ;;  %7806 = vmatpush3.msra.mxu0 %v12083_v4 }
0x127c   :  { %8284 = vmatprep.subr.mxu1 %v11971_v11  ;;  %7807 = vmatprep.subr.mxu0 %v12084_v39 }
0x127d   :  { %8285 = vmatpush3.msra.mxu1 %v12085_v9  ;;  %7808 = vmatpush3.msra.mxu0 %v12086_v57 }
0x127e   :  { %8286 = vmatprep.subr.mxu1 %v11971_v11  ;;  %7809 = vmatprep.subr.mxu0 %v12087_v33 }
0x127f   :  { %8287 = vmatpush3.msra.mxu1 %v12088_v46  ;;  %7810 = vmatpush3.msra.mxu0 %v12089_v50 }
0x1280   :  { %8288 = vmatprep.subr.mxu1 %v11971_v11  ;;  %7811 = vmatprep.subr.mxu0 %v12090_v62 }
0x1281   :  { %8289 = vmatpush3.msra.mxu1 %v12091_v1  ;;  %7812 = vmatpush3.msra.mxu0 %v12092_v26 }
0x1282   :  { %8290 = vmatprep.subr.mxu1 %v11971_v11  ;;  %8292 = vmatprep.mubr.msk.f32.mxu1 %vm9028_vm0, %v11971_v11 }
0x1283   :  { %8291 = vmatpush3.msra.mxu1 %v12093_v20  ;;  %7813 = vmatprep.subr.mxu0 %v12094_v17 }
0x1284   :  { %7814 = vmatpush3.msra.mxu0 %v12095_v61  ;;  %3922 = vmatprep.subr.mxu1 %v12096_v10 }
0x1285   :  { %8295 = vmatprep.subr.mxu0 %v11971_v11 }
0x1324   :  { %v3518_v53 = vpop.f32.mrf.mxu0  ;;  %v3589_v45 = vpop.f32.mrf.mxu1 }
0x1325   :  { %v3596_v14 = vadd.f32 %v3589_v45, %v9622_v28  ;;  %v3594_v34 = vadd.f32 %v3518_v53, %v9624_v54 }
0x1326   :  { %v3520_v58 = vpop.f32.mrf.mxu0  ;;  %v3591_v25 = vpop.f32.mrf.mxu1 }
0x1327   :  { %v3595_v3 = vadd.f32 %v3520_v58, %v9626_v60  ;;  %8606 = vtanh.f32 %v3596_v14 }
0x1329   :  { %8608 = vtanh.f32 %v3595_v3  ;;  %v10503_v3 = vld [vmem:[#allocation3] ss:$0 sm:$0xff] }
0x132a   :  { %8610 = vtanh.f32 %v3594_v34 }
0x132b   :  { %8612 = vpow2.f32 %v3887_v38 }
0x1334   :  { %v8607_v56 = vpop.eup %8606 }
0x1335   :  { %8293 = vmatmul.mubr.f32.vlgmr.msra.gmra.mxu1 %v8607_v56 }
0x1336   :  { %v8609_v32 = vpop.eup %8608  ;;  %3923 = vmatpush1.msra.mxu1 %v10211_v22  ;;  %3956 = vmatprep.mubr.f32.mxu1 %v11971_v11 }
0x1337   :  { %v8611_v51 = vpop.eup %8610  ;;  %3712 = vmatprep.mubr.f32.mxu0 %v8609_v32  ;;  %4075 = vmatprep.subr.mxu1 %v12098_v18  ;;  %v10508_v32 = vld [vmem:[#allocation8] sm:$0xff]  ;;  %v10516_v18 = vld [vmem:[%s11930_s27] ss:$0 sm:$0xff] }
0x1338   :  { %3713 = vmatmul.mubr.f32.vlgmr.msra.gmra.mxu0 %v8611_v51  ;;  %v8613_v22 = vpop.eup %8612 }
0x1339   :  { %8296 = vmatpush3.msra.mxu0 %v10423_v16  ;;  %8297 = vmatprep.mubr.msk.f32.mxu0 %vm9028_vm0, %v11971_v11 }
0x133a   :  { %8300 = vmatprep.subr.mxu0 %v11971_v11  ;;  %7545 = vmatmul.mubr.msk.f32.vlgmr.msra.gmra.mxu1 %vm194_vm1, %v10443_v13 }
0x133b   :  { %4076 = vmatpush1.msra.mxu1 %v10450_v2  ;;  %4115 = vmatprep.mubr.f32.mxu1 %v11971_v11 }
0x133c   :  { %8298 = vmatmul.mubr.msk.f32.vlgmr.msra.gmra.mxu0 %vm194_vm1, %v7543_v31  ;;  %4077 = vmatprep.subr.mxu1 %v10457_v19 }
0x133d   :  { %8301 = vmatpush3.msra.mxu0 %v12099_v27  ;;  %8302 = vmatprep.mubr.msk.f32.mxu0 %vm9028_vm0, %v11971_v11 }
0x133e   :  { %8305 = vmatprep.subr.mxu0 %v11971_v11  ;;  %4078 = vmatpush1.msra.mxu1 %v10463_v21 }
0x133f   :  { %4079 = vmatprep.subr.mxu1 %v10469_v43 }
0x1340   :  { %8303 = vmatmul.mubr.msk.f32.vlgmr.msra.gmra.mxu0 %vm194_vm1, %v8613_v22  ;;  %4080 = vmatpush1.msra.mxu1 %v12101_v59  ;;  %v10519_v59 = vld [vmem:[#allocation6] ss:$0 sm:$0xff] }
0x1341   :  { %8306 = vmatpush3.msra.mxu0 %v12100_v42  ;;  %8307 = vmatprep.mubr.msk.f32.mxu0 %vm9028_vm0, %v11971_v11 }
0x1342   :  { %8310 = vmatprep.subr.mxu0 %v11971_v11  ;;  %4081 = vmatprep.subr.mxu1 %v12102_v23 }
0x1343   :  { %4082 = vmatpush1.msra.mxu1 %v12103_v52 }
0x13f5   :  { %v3784_v47 = vpop.f32.mrf.mxu1 }
0x13f7   :  { %v8294_v49 = vpop.f32.mrf.mxu1 }
0x13f8   :  { %v7815_v24 = vpop.f32.mrf.mxu0 }
0x13fa   :  { %v7816_v15 = vpop.f32.mrf.mxu0  ;;  %v3958_v40 = vpop.f32.mrf.mxu1 }
0x13fb   :  { %v7817_v37 = vadd.f32 %v7816_v15, %v7815_v24 }
0x13fc   :  { %v3875_v63 = vpop.f32.mrf.mxu0  ;;  %v3960_v14 = vpop.f32.mrf.mxu1 }
0x13fd   :  { %v3715_v35 = vadd.f32 %v10475_v5, %v7817_v37  ;;  %v3876_v48 = vadd.f32 %v10481_v12, %v3875_v63 }
0x13fe   :  { %v8299_v4 = vpop.f32.mrf.mxu0 }
0x13ff   :  { %v3785_v39 = vadd.f32 %v3784_v47, %v3715_v35  ;;  %v3879_v9 = vmax.f32 %v3876_v48, 0.0 }
0x1400   :  { %v4032_v57 = vpop.f32.mrf.mxu0 }
0x1401   :  { %v10485_v33 = vmax.f32 %v10279_v44, %v3785_v39  ;;  %v3880_v46 = vsub.f32 0.0, %v3879_v9  ;;  %v4033_v51 = vadd.f32 %v4032_v57, %v3960_v14  ;;  %v10566_v14 = vld [vmem:[%s11723_s16 + $0x58] sm:$0xff] }
0x1402   :  { %v8304_v50 = vpop.f32.mrf.mxu0 }
0x1403   :  { %v3789_v62 = vsub.f32 %v10279_v44, %v10485_v33  ;;  %v3792_v1 = vsub.f32 %v3785_v39, %v10485_v33  ;;  %v3881_v26 = vmul.f32 1.442695, %v3880_v46  ;;  %v4036_v22 = vadd.f32 %v10516_v18, %v4033_v51  ;;  %v10619_v51 = vld [vmem:[%s11723_s16] sm:$0xff] }
0x1405   :  { %v3790_v20 = vmul.f32 1.442695, %v3789_v62  ;;  %v3793_v17 = vmul.f32 1.442695, %v3792_v1  ;;  %8614 = vpow2.f32 %v3881_v26  ;;  %v4201_v42 = vsub.f32 1.0, %v4036_v22 }
0x1406   :  { %v10530_v1 = vld [vmem:[#allocation9] ss:$0 sm:$0xff] }
0x1407   :  { %8616 = vpow2.f32 %v3790_v20 }
0x1408   :  { %8618 = vpow2.f32 %v3793_v17 }
0x1412   :  { %v8615_v61 = vpop.eup %8614 }
0x1413   :  { %v4047_v10 = vmul.f32 %v8615_v61, %v10338_v41  ;;  %v7541_v41 = vld [vmem:[%s11922_s20 + $0x18] sm:$0x3] }
0x1414   :  { %v8617_v31 = vpop.eup %8616  ;;  %v4123_v55 = vmul.f32 %v10443_v13, %v7541_v41 }
0x1415   :  { %v8619_v7 = vpop.eup %8618  ;;  %v3798_v36 = vmul.f32 %v8617_v31, %v10290_v29  ;;  %7547 = vmatmul.mubr.msk.f32.vlgmr.msra.gmra.mxu1 %vm457_vm2, %v4047_v10  ;;  %v3795_v6 = vmul.f32 %v8617_v31, %v10293_v30  ;;  %v4124_v29 = vsub.f32 1.0, %v10443_v13 }
0x1416   :  { %v3796_v44 = vmul.f32 %v8619_v7, %v3591_v25  ;;  %4407 = vmatprep.mubr.f32.mxu1 %v11971_v11 }
0x1417   :  { %v10495_v53 = vadd.f32 %v8619_v7, %v3798_v36  ;;  %v10537_v7 = vld [vmem:[%s11723_s16 + $0x68] sm:$0xff]  ;;  %v10542_v36 = vld [vmem:[%s11723_s16 + $0x78] sm:$0xff] }
0x1418   :  { %v10497_v45 = vadd.f32 %v3796_v44, %v3795_v6  ;;  %4367 = vmatprep.subr.mxu1 %v10537_v7  ;;  %v10549_v6 = vld [vmem:[%s11723_s16 + $0x60] sm:$0xff]  ;;  %v10554_v44 = vld [vmem:[%s11723_s16 + $0x70] sm:$0xff] }
0x1419   :  { %4368 = vmatpush1.msra.mxu1 %v10549_v6 }
0x14d5   :  { %v4117_v34 = vpop.f32.mrf.mxu1 }
0x14d7   :  { %v4119_v58 = vpop.f32.mrf.mxu1 }
0x14d8   :  { %v4122_v30 = vadd.f32 %v10503_v3, %v4119_v58  ;;  %v10590_v58 = vld [vmem:[%s11723_s16 + $0x38] sm:$0xff] }
0x14da   :  { %v4125_v38 = vmul.f32 %v4124_v29, %v4122_v30  ;;  %v4208_v13 = vsub.f32 %v7541_v41, %v4122_v30  ;;  %v4202_v25 = vmul.f32 %v4201_v42, %v4122_v30  ;;  %v10597_v30 = vld [vmem:[%s11723_s16 + $0x20] sm:$0xff] }
0x14dc   :  { %v4126_v56 = vadd.f32 %v4125_v38, %v4123_v55  ;;  %v4209_v24 = vand.u32 2147483647, %v4208_v13  ;;  %v10609_v38 = vld [vmem:[%s11723_s16 + $0x8] sm:$0xff] }
0x14de   :  { %8308 = vmatmul.mubr.msk.f32.vlgmr.msra.gmra.mxu0 %vm194_vm1, %v4126_v56  ;;  %v10614_v56 = vld [vmem:[%s11723_s16 + $0x18] sm:$0xff] }
0x14df   :  { %8311 = vmatpush3.msra.mxu0 %v10508_v32  ;;  %8312 = vmatprep.mubr.msk.f32.mxu0 %vm9028_vm0, %v11971_v11 }
0x14e0   :  { %4438 = vmatprep.subr.mxu0 %v10542_v36 }
0x159e   :  { %v4196_v27 = vpop.f32.mrf.mxu0 }
0x159f   :  { %v4197_v23 = vadd.f32 %v10519_v59, %v4196_v27  ;;  %v10632_v27 = vld [vmem:[#allocation12 + $0xf8] sm:$0xff] }
0x15a0   :  { %v8309_v52 = vpop.f32.mrf.mxu0 }
0x15a1   :  { %v4200_v47 = vmul.f32 %v4197_v23, %v4036_v22  ;;  %v4210_v49 = vsub.f32 %v7541_v41, %v4197_v23  ;;  %v10626_v22 = vld [vmem:[%s11723_s16 + $0x10] sm:$0xff] }
0x15a3   :  { %v4203_v15 = vadd.f32 %v4202_v25, %v4200_v47  ;;  %v4211_v37 = vand.u32 2147483647, %v4210_v49 }
0x15a5   :  { %v4204_v63 = vmul.f32 %v4203_v15, %v4124_v29  ;;  %v4212_v35 = vadd.f32 %v4211_v37, %v4209_v24  ;;  %v4213_v48 = vsub.f32 %v7541_v41, %v4203_v15  ;;  %v10578_v41 = vld [vmem:[%s11723_s16 + $0x50] sm:$0xff]  ;;  %v10585_v29 = vld [vmem:[%s11723_s16 + $0x28] sm:$0xff] }
0x15a6   :  { %v10642_v15 = vld [vmem:[#allocation12 + $0x178] sm:$0xff] }
0x15a7   :  { %v4205_v4 = vadd.f32 %v4204_v63, %v4123_v55  ;;  %v4214_v39 = vand.u32 2147483647, %v4213_v48  ;;  %v10602_v55 = vld [vmem:[%s11723_s16 + $0x30] sm:$0xff]  ;;  %v10646_v63 = vld [vmem:[#allocation12 + $0xf0] sm:$0xff]  ;;  %v10658_v48 = vld [vmem:[#allocation12 + $0xe8] sm:$0xff] }
0x15a8   :  { %v10644_v37 = vld [vmem:[#allocation12 + $0x78] sm:$0xff] }
0x15a9   :  { %7549 = vst.msk [vmem:[%s11728_s21 + $0x8] sm:$0x3] %vm444_vm3, %v4205_v4  ;;  %8313 = vmatmul.mubr.msk.f32.vlgmr.msra.gmra.mxu0 %vm194_vm1, %v4205_v4  ;;  %v10527_v9 = vadd.f32 %v4214_v39, %v4212_v35  ;;  %v10654_v35 = vld [vmem:[#allocation12 + $0x70] sm:$0xff]  ;;  %v10662_v4 = vld [vmem:[#allocation12 + $0x168] sm:$0xff] }
0x15aa   :  { %4478 = vmatprep.mubr.f32.mxu0 %v11971_v11  ;;  %4439 = vmatpush1.msra.mxu0 %v10554_v44  ;;  %v10664_v39 = vld [vmem:[#allocation12 + $0x68] sm:$0xff] }
0x15ab   :  { %12104 = vst [vmem:[#allocation29_spill] sm:$0xff] %v10527_v9  ;;  %4440 = vmatprep.subr.mxu0 %v10566_v14  ;;  %v10728_v9 = vld [vmem:[#allocation12 + $0xb8] sm:$0xff] }
0x15ac   :  { %4441 = vmatpush1.msra.mxu0 %v10578_v41  ;;  %12118 = vst [vmem:[#allocation42_spill] sm:$0xff] %v10728_v9 }
0x15ad   :  { %4442 = vmatprep.subr.mxu0 %v10590_v58 }
0x15ae   :  { %4443 = vmatpush1.msra.mxu0 %v10602_v55 }
0x15af   :  { %4444 = vmatprep.subr.mxu0 %v10614_v56 }
0x15b0   :  { %4445 = vmatpush1.msra.mxu0 %v10626_v22 }
0x15b1   :  { %8315 = vmatprep.subr.mxu0 %v11971_v11 }
0x1669   :  { %v4300_v57 = vpop.f32.mrf.mxu0 }
0x166a   :  { %v4301_v46 = vadd.f32 %v4300_v57, %v4117_v34  ;;  %v10573_v34 = vld [vmem:[%s11723_s16 + $0x40] sm:$0xff]  ;;  %v10668_v57 = vld [vmem:[#allocation12 + $0xe0] sm:$0xff] }
0x166b   :  { %v8314_v50 = vpop.f32.mrf.mxu0 }
0x166c   :  { %v4304_v62 = vadd.f32 %v4301_v46, %v3958_v40  ;;  %v10561_v40 = vld [vmem:[%s11723_s16 + $0x48] sm:$0xff]  ;;  %v10672_v46 = vld [vmem:[#allocation12 + $0x160] sm:$0xff] }
0x166d   :  { %4369 = vmatprep.subr.mxu1 %v10561_v40  ;;  %v10674_v50 = vld [vmem:[#allocation12 + $0x60] sm:$0xff] }
0x166e   :  { %v4305_v26 = vadd.f32 %v10530_v1, %v4304_v62  ;;  %4370 = vmatpush1.msra.mxu1 %v10573_v34  ;;  %v10678_v62 = vld [vmem:[#allocation12 + $0xd8] sm:$0xff] }
0x166f   :  { %4371 = vmatprep.subr.mxu1 %v10585_v29  ;;  %12105 = vst [vmem:[#allocation30_spill] sm:$0xff] %v10678_v62 }
0x1670   :  { %v7551_v20 = vmul.f32 -1.442695, %v4305_v26  ;;  %8620 = vtanh.f32 %v4305_v26  ;;  %4372 = vmatpush1.msra.mxu1 %v10597_v30  ;;  %v10682_v26 = vld [vmem:[#allocation12 + $0x158] sm:$0xff] }
0x1671   :  { %4373 = vmatprep.subr.mxu1 %v10609_v38  ;;  %12106 = vst [vmem:[#allocation31_spill] sm:$0xff] %v10682_v26 }
0x1672   :  { %8622 = vpow2.f32 %v7551_v20  ;;  %4374 = vmatpush1.msra.mxu1 %v10619_v51  ;;  %v10684_v20 = vld [vmem:[#allocation12 + $0x58] sm:$0xff] }
0x1673   :  { %7843 = vmatprep.subr.mxu1 %v10632_v27  ;;  %12107 = vst [vmem:[#allocation32_spill] sm:$0xff] %v10684_v20 }
0x167d   :  { %v8621_v17 = vpop.eup %8620 }
0x167e   :  { %4315 = vrot.lane.b32.xlu1 %v8621_v17, %s9031_s6  ;;  %v10688_v17 = vld [vmem:[#allocation12 + $0xd0] sm:$0xff] }
0x167f   :  { %v8623_v61 = vpop.eup %8622  ;;  %12108 = vst [vmem:[#allocation33_spill] sm:$0xff] %v10688_v17 }
0x1680   :  { %v4309_v10 = vadd.f32 1.0, %v8623_v61  ;;  %v10692_v61 = vld [vmem:[#allocation12 + $0x150] sm:$0xff] }
0x1681   :  { %12109 = vst [vmem:[#allocation34_spill] sm:$0xff] %v10692_v61 }
0x1682   :  { %8624 = vrcp.f32 %v4309_v10  ;;  %v10694_v10 = vld [vmem:[#allocation12 + $0x50] sm:$0xff] }
0x1683   :  { %12110 = vst [vmem:[#allocation35_spill] sm:$0xff] %v10694_v10 }
0x168f   :  { %v8625_v31 = vpop.eup %8624 }
0x1690   :  { %4313 = vrot.lane.b32.xlu0 %v8625_v31, %s9030_s8 }
0x1694   :  { %4317 = vrot.lane.b32.xlu0 %v8625_v31, %s9029_s1 }
0x16f0   :  { %v4316_v42 = vpop.permute.xlu1 %4315 }
0x16f1   :  { %v4320_v23 = vmul.f32 %v8625_v31, %v4316_v42  ;;  %v10698_v31 = vld [vmem:[#allocation12 + $0xc8] sm:$0xff] }
0x16f2   :  { %12111 = vst [vmem:[#allocation36_spill] sm:$0xff] %v10698_v31  ;;  %v10702_v42 = vld [vmem:[#allocation12 + $0x148] sm:$0xff] }
0x16f3   :  { %12112 = vst [vmem:[#allocation38_spill] sm:$0xff] %v10702_v42 }
0x1702   :  { %v4314_v13 = vpop.permute.xlu0 %4313 }
0x1703   :  { %v4319_v52 = vmul.f32 %v4314_v13, %v10335_v8  ;;  %v10652_v8 = vld [vmem:[#allocation12 + $0x170] sm:$0xff]  ;;  %v10712_v13 = vld [vmem:[#allocation12 + $0x140] sm:$0xff] }
0x1704   :  { %12113 = vst [vmem:[#allocation40_spill] sm:$0xff] %v10712_v13 }
0x1705   :  { %v10637_v25 = vadd.f32 %v4320_v23, %v4319_v52  ;;  %v10714_v23 = vld [vmem:[#allocation12 + $0x48] sm:$0xff]  ;;  %v10718_v52 = vld [vmem:[#allocation12 + $0xc0] sm:$0xff] }
0x1706   :  { %v4318_v49 = vpop.permute.xlu0 %4317  ;;  %12114 = vst [vmem:[#allocation37_spill] sm:$0xff] %v10714_v23  ;;  %12115 = vst [vmem:[#allocation39_spill] sm:$0xff] %v10718_v52 }
0x1707   :  { %8626 = vtanh.f32 %v10637_v25 }
0x1714   :  { %v8627_v47 = vpop.eup %8626 }
0x1715   :  { %v10640_v24 = vmul.f32 %v8627_v47, %v4318_v49  ;;  %v10721_v47 = vld [vmem:[#allocation12 + $0x138] sm:$0xff]  ;;  %v10724_v49 = vld [vmem:[#allocation12 + $0x40] sm:$0xff] }
0x1716   :  { %12116 = vst [vmem:[#allocation43_spill] sm:$0xff] %v10721_v47  ;;  %12117 = vst [vmem:[#allocation41_spill] sm:$0xff] %v10724_v49 }
0x1717   :  { %7552 = vmatmul.mubr.msk.f32.vlgmr.msra.gmra.mxu1 %vm457_vm2, %v10640_v24  ;;  %7553 = vmatmul.mubr.msk.f32.vlgmr.msra.gmra.mxu0 %vm457_vm2, %v10640_v24 }
0x1718   :  { %8316 = vmatpush3.msra.mxu0 %v10642_v15  ;;  %7844 = vmatpush3.msra.mxu1 %v10644_v37 }
0x1719   :  { %8317 = vmatprep.subr.mxu0 %v11971_v11  ;;  %7845 = vmatprep.subr.mxu1 %v10646_v63 }
0x171a   :  { %8318 = vmatpush3.msra.mxu0 %v10652_v8  ;;  %7846 = vmatpush3.msra.mxu1 %v10654_v35 }
0x171b   :  { %8319 = vmatprep.subr.mxu0 %v11971_v11  ;;  %7847 = vmatprep.subr.mxu1 %v10658_v48 }
0x171c   :  { %8320 = vmatpush3.msra.mxu0 %v10662_v4  ;;  %7848 = vmatpush3.msra.mxu1 %v10664_v39 }
0x171d   :  { %8321 = vmatprep.subr.mxu0 %v11971_v11  ;;  %7849 = vmatprep.subr.mxu1 %v10668_v57 }
0x171e   :  { %8322 = vmatpush3.msra.mxu0 %v10672_v46  ;;  %7850 = vmatpush3.msra.mxu1 %v10674_v50 }
0x171f   :  { %8323 = vmatprep.subr.mxu0 %v11971_v11  ;;  %7851 = vmatprep.subr.mxu1 %v10678_v62 }
0x1720   :  { %8324 = vmatpush3.msra.mxu0 %v10682_v26  ;;  %7852 = vmatpush3.msra.mxu1 %v10684_v20 }
0x1721   :  { %8325 = vmatprep.subr.mxu0 %v11971_v11  ;;  %7853 = vmatprep.subr.mxu1 %v10688_v17 }
0x1722   :  { %8326 = vmatpush3.msra.mxu0 %v10692_v61  ;;  %7854 = vmatpush3.msra.mxu1 %v10694_v10 }
0x1723   :  { %8327 = vmatprep.subr.mxu0 %v11971_v11  ;;  %7855 = vmatprep.subr.mxu1 %v10698_v31  ;;  %v10761_v31 = vld [vmem:[#allocation12 + $0x20] sm:$0xff] }
0x1724   :  { %8328 = vmatpush3.msra.mxu0 %v10702_v42  ;;  %8347 = vmatprep.mubr.msk.f32.mxu0 %vm9028_vm0, %v11971_v11  ;;  %v10751_v42 = vld [vmem:[#allocation12 + $0x120] sm:$0xff]  ;;  %12129 = vst [vmem:[#allocation53_spill] sm:$0xff] %v10761_v31 }
0x1725   :  { %8329 = vmatprep.subr.mxu0 %v11971_v11  ;;  %7856 = vmatpush3.msra.mxu1 %v10714_v23  ;;  %v10737_v23 = vld [vmem:[#allocation12 + $0xb0] sm:$0xff]  ;;  %12126 = vst [vmem:[#allocation49_spill] sm:$0xff] %v10751_v42 }
0x1726   :  { %8330 = vmatpush3.msra.mxu0 %v10712_v13  ;;  %7857 = vmatprep.subr.mxu1 %v10718_v52  ;;  %v10734_v13 = vld [vmem:[#allocation12 + $0x38] sm:$0xff]  ;;  %12121 = vst [vmem:[#allocation47_spill] sm:$0xff] %v10737_v23  ;;  %v10739_v52 = vld [vmem:[#allocation12 + $0x30] sm:$0xff] }
0x1727   :  { %8331 = vmatprep.subr.mxu0 %v11971_v11  ;;  %7858 = vmatpush3.msra.mxu1 %v10724_v49  ;;  %12120 = vst [vmem:[#allocation44_spill] sm:$0xff] %v10734_v13  ;;  %12122 = vst [vmem:[#allocation48_spill] sm:$0xff] %v10739_v52  ;;  %v10745_v49 = vld [vmem:[#allocation12 + $0xa8] sm:$0xff] }
0x1728   :  { %8332 = vmatpush3.msra.mxu0 %v10721_v47  ;;  %7859 = vmatprep.subr.mxu1 %v10728_v9  ;;  %v10743_v47 = vld [vmem:[#allocation12 + $0x128] sm:$0xff]  ;;  %12124 = vst [vmem:[#allocation50_spill] sm:$0xff] %v10745_v49 }
0x1729   :  { %8333 = vmatprep.subr.mxu0 %v11971_v11  ;;  %7860 = vmatpush3.msra.mxu1 %v10734_v13  ;;  %12123 = vst [vmem:[#allocation45_spill] sm:$0xff] %v10743_v47  ;;  %v10749_v9 = vld [vmem:[#allocation12 + $0x28] sm:$0xff]  ;;  %v10757_v13 = vld [vmem:[#allocation12 + $0x118] sm:$0xff] }
0x172a   :  { %8334 = vmatpush3.msra.mxu0 %v10731_v0  ;;  %7861 = vmatprep.subr.mxu1 %v10737_v23  ;;  %12125 = vst [vmem:[#allocation51_spill] sm:$0xff] %v10749_v9  ;;  %v10755_v0 = vld [vmem:[#allocation12 + $0xa0] sm:$0xff]  ;;  %12128 = vst [vmem:[#allocation55_spill] sm:$0xff] %v10757_v13  ;;  %v10767_v23 = vld [vmem:[#allocation12 + $0x110] sm:$0xff] }
0x172b   :  { %8335 = vmatprep.subr.mxu0 %v11971_v11  ;;  %7862 = vmatpush3.msra.mxu1 %v10739_v52  ;;  %12127 = vst [vmem:[#allocation52_spill] sm:$0xff] %v10755_v0  ;;  %12131 = vst [vmem:[#allocation58_spill] sm:$0xff] %v10767_v23  ;;  %v10771_v52 = vld [vmem:[#allocation12 + $0x18] sm:$0xff] }
0x172c   :  { %8336 = vmatpush3.msra.mxu0 %v10743_v47  ;;  %7863 = vmatprep.subr.mxu1 %v10745_v49  ;;  %v10765_v47 = vld [vmem:[#allocation12 + $0x98] sm:$0xff]  ;;  %12132 = vst [vmem:[#allocation56_spill] sm:$0xff] %v10771_v52  ;;  %v10777_v49 = vld [vmem:[#allocation12 + $0x108] sm:$0xff] }
0x172d   :  { %8337 = vmatprep.subr.mxu0 %v11971_v11  ;;  %7864 = vmatpush3.msra.mxu1 %v10749_v9  ;;  %12130 = vst [vmem:[#allocation54_spill] sm:$0xff] %v10765_v47  ;;  %12134 = vst [vmem:[#allocation61_spill] sm:$0xff] %v10777_v49  ;;  %v10781_v9 = vld [vmem:[#allocation12 + $0x10] sm:$0xff] }
0x172e   :  { %8338 = vmatpush3.msra.mxu0 %v10751_v42  ;;  %7865 = vmatprep.subr.mxu1 %v10755_v0  ;;  %v10775_v42 = vld [vmem:[#allocation12 + $0x90] sm:$0xff]  ;;  %12135 = vst [vmem:[#allocation59_spill] sm:$0xff] %v10781_v9  ;;  %v10787_v0 = vld [vmem:[#allocation12 + $0x100] sm:$0xff] }
0x172f   :  { %8339 = vmatprep.subr.mxu0 %v11971_v11  ;;  %7866 = vmatpush3.msra.mxu1 %v10761_v31  ;;  %12133 = vst [vmem:[#allocation57_spill] sm:$0xff] %v10775_v42  ;;  %12137 = vst [vmem:[#allocation62_spill] sm:$0xff] %v10787_v0  ;;  %v10791_v31 = vld [vmem:[#allocation12 + $0x8] sm:$0xff] }
0x1730   :  { %8340 = vmatpush3.msra.mxu0 %v10757_v13  ;;  %7867 = vmatprep.subr.mxu1 %v10765_v47  ;;  %v10785_v13 = vld [vmem:[#allocation12 + $0x88] sm:$0xff]  ;;  %12138 = vst [vmem:[#allocation64_spill] sm:$0xff] %v10791_v31 }
0x1731   :  { %8341 = vmatprep.subr.mxu0 %v11971_v11  ;;  %7868 = vmatpush3.msra.mxu1 %v10771_v52  ;;  %12136 = vst [vmem:[#allocation60_spill] sm:$0xff] %v10785_v13  ;;  %v10800_v52 = vld [vmem:[#allocation12] sm:$0xff] }
0x1732   :  { %8342 = vmatpush3.msra.mxu0 %v10767_v23  ;;  %7869 = vmatprep.subr.mxu1 %v10775_v42  ;;  %v10795_v23 = vld [vmem:[#allocation12 + $0x80] sm:$0xff]  ;;  %12140 = vst [vmem:[#allocation65_spill] sm:$0xff] %v10800_v52 }
0x1733   :  { %8343 = vmatprep.subr.mxu0 %v11971_v11  ;;  %7870 = vmatpush3.msra.mxu1 %v10781_v9  ;;  %12139 = vst [vmem:[#allocation63_spill] sm:$0xff] %v10795_v23 }
0x1734   :  { %8344 = vmatpush3.msra.mxu0 %v10777_v49  ;;  %7871 = vmatprep.subr.mxu1 %v10785_v13  ;;  %v10805_v49 = vld [vmem:[%s11721_s14 + $0x8] sm:$0xff] }
0x1735   :  { %8345 = vmatprep.subr.mxu0 %v11971_v11  ;;  %7872 = vmatpush3.msra.mxu1 %v10791_v31  ;;  %12141 = vst [vmem:[#allocation66_spill] sm:$0xff] %v10805_v49  ;;  %v10817_v31 = vld [vmem:[%s11923_s4] ss:$0 sm:$0xff] }
0x1736   :  { %8346 = vmatpush3.msra.mxu0 %v10787_v0  ;;  %7873 = vmatprep.subr.mxu1 %v10795_v23  ;;  %v7556_v0 = vld [vmem:[%s11922_s20 + $0x22] sm:$0x3]  ;;  %12142 = vst [vmem:[#allocation26_spill] sm:$0xff] %v10817_v31 }
0x1737   :  { %4813 = vmatprep.subr.mxu0 %v10805_v49  ;;  %7874 = vmatpush3.msra.mxu1 %v10800_v52  ;;  %v4774_v13 = vmul.f32 %v10817_v31, %v7556_v0  ;;  %v10823_v49 = vld [vmem:[%s11925_s9] ss:$0 sm:$0xff] }
0x1738   :  { %8350 = vmatprep.subr.mxu1 %v11971_v11 }
0x1739   :  { %v4775_v52 = vadd.f32 %v10823_v49, %v4774_v13 }
0x173b   :  { %v4776_v42 = vmax.f32 %v4775_v52, 0.0 }
0x173d   :  { %v4777_v20 = vsub.f32 0.0, %v4776_v42 }
0x173f   :  { %v4778_v31 = vmul.f32 1.442695, %v4777_v20  ;;  %v10850_v20 = vld [vmem:[%s11927_s13] sm:$0xff] }
0x1740   :  { %12144 = vst [vmem:[#allocation68_spill] sm:$0xff] %v10850_v20 }
0x17d7   :  { %v4409_v23 = vpop.f32.mrf.mxu1  ;;  %v4480_v9 = vpop.f32.mrf.mxu0 }
0x17d8   :  { %v4487_v47 = vadd.f32 %v4480_v9, %v9622_v28  ;;  %v4485_v10 = vadd.f32 %v4409_v23, %v9624_v54  ;;  %v10832_v9 = vld [vmem:[%s11721_s14] sm:$0xff] }
0x17d9   :  { %v4411_v61 = vpop.f32.mrf.mxu1 }
0x17da   :  { %v4486_v17 = vadd.f32 %v4411_v61, %v9626_v60  ;;  %8628 = vtanh.f32 %v4487_v47  ;;  %v10887_v61 = vld [vmem:[%s11928_s17 + $0x8] sm:$0xff] }
0x17db   :  { %12147 = vst [vmem:[#allocation71_spill] sm:$0xff] %v10887_v61 }
0x17dc   :  { %8630 = vtanh.f32 %v4486_v17  ;;  %v10881_v17 = vld [vmem:[%s11928_s17 + $0x10] sm:$0xff] }
0x17dd   :  { %8632 = vtanh.f32 %v4485_v10  ;;  %12146 = vst [vmem:[#allocation70_spill] sm:$0xff] %v10881_v17 }
0x17de   :  { %8634 = vpow2.f32 %v4778_v31 }
0x17e7   :  { %v8629_v26 = vpop.eup %8628 }
0x17e8   :  { %8348 = vmatmul.mubr.f32.vlgmr.msra.gmra.mxu0 %v8629_v26 }
0x17e9   :  { %v8631_v62 = vpop.eup %8630  ;;  %4814 = vmatpush1.msra.mxu0 %v10832_v9  ;;  %4847 = vmatprep.mubr.f32.mxu0 %v11971_v11 }
0x17ea   :  { %v8633_v13 = vpop.eup %8632  ;;  %4603 = vmatprep.mubr.f32.mxu1 %v8631_v62  ;;  %v10843_v62 = vld [vmem:[%s11928_s17 + $0x38] sm:$0xff] }
0x17eb   :  { %4604 = vmatmul.mubr.f32.vlgmr.msra.gmra.mxu1 %v8633_v13  ;;  %12143 = vst [vmem:[#allocation25_spill] sm:$0xff] %v10843_v62  ;;  %4966 = vmatprep.subr.mxu0 %v10843_v62  ;;  %v8635_v26 = vpop.eup %8634 }
0x17ec   :  { %8351 = vmatpush3.msra.mxu1 %v10423_v16  ;;  %8352 = vmatprep.mubr.msk.f32.mxu1 %vm9028_vm0, %v11971_v11  ;;  %v10860_v16 = vld [vmem:[%s11718_s11] sm:$0xff] }
0x17ed   :  { %8355 = vmatprep.subr.mxu1 %v11971_v11  ;;  %12145 = vst [vmem:[#allocation69_spill] sm:$0xff] %v10860_v16 }
0x17ef   :  { %8353 = vmatmul.mubr.msk.f32.vlgmr.msra.gmra.mxu1 %vm194_vm1, %v7556_v0  ;;  %v10869_v0 = vld [vmem:[%s11922_s20 + $0x20] sm:$0x3] }
0x17f0   :  { %8356 = vmatpush3.msra.mxu1 %v10850_v20  ;;  %8357 = vmatprep.mubr.msk.f32.mxu1 %vm9028_vm0, %v11971_v11 }
0x17f1   :  { %8360 = vmatprep.subr.mxu1 %v11971_v11  ;;  %7558 = vmatmul.mubr.msk.f32.vlgmr.msra.gmra.mxu0 %vm194_vm1, %v10869_v0 }
0x17f2   :  { %4967 = vmatpush1.msra.mxu0 %v10450_v2  ;;  %5006 = vmatprep.mubr.f32.mxu0 %v11971_v11  ;;  %v10893_v2 = vld [vmem:[%s11928_s17] sm:$0xff] }
0x17f3   :  { %8358 = vmatmul.mubr.msk.f32.vlgmr.msra.gmra.mxu1 %vm194_vm1, %v8635_v26  ;;  %4968 = vmatprep.subr.mxu0 %v10457_v19  ;;  %12148 = vst [vmem:[#allocation73_spill] sm:$0xff] %v10893_v2  ;;  %v4482_v19 = vpop.f32.mrf.mxu0 }
0x17f4   :  { %8361 = vmatpush3.msra.mxu1 %v10860_v16  ;;  %8362 = vmatprep.mubr.msk.f32.mxu1 %vm9028_vm0, %v11971_v11 }
0x17f5   :  { %8365 = vmatprep.subr.mxu1 %v11971_v11  ;;  %4969 = vmatpush1.msra.mxu0 %v10463_v21 }
0x17f6   :  { %4970 = vmatprep.subr.mxu0 %v10469_v43 }
0x17f7   :  { %4971 = vmatpush1.msra.mxu0 %v10881_v17 }
0x17f8   :  { %4972 = vmatprep.subr.mxu0 %v10887_v61 }
0x17f9   :  { %4973 = vmatpush1.msra.mxu0 %v10893_v2 }
0x17fa   :  { %5258 = vmatprep.subr.mxu0 %v10537_v7 }
0x18a8   :  { %v4675_v21 = vpop.f32.mrf.mxu0 }
0x18aa   :  { %v8349_v43 = vpop.f32.mrf.mxu0 }
0x18ab   :  { %v7875_v10 = vpop.f32.mrf.mxu1 }
0x18ad   :  { %v7876_v31 = vpop.f32.mrf.mxu1 }
0x18ae   :  { %v7877_v42 = vadd.f32 %v7876_v31, %v7875_v10 }
0x18af   :  { %v4766_v23 = vpop.f32.mrf.mxu1 }
0x18b0   :  { %v4606_v52 = vadd.f32 %v10475_v5, %v7877_v42  ;;  %v4767_v47 = vadd.f32 %v10481_v12, %v4766_v23 }
0x18b1   :  { %v8354_v13 = vpop.f32.mrf.mxu1 }
0x18b2   :  { %v4676_v26 = vadd.f32 %v4675_v21, %v4606_v52  ;;  %v4770_v61 = vmax.f32 %v4767_v47, 0.0 }
0x18b3   :  { %v4923_v17 = vpop.f32.mrf.mxu1 }
0x18b4   :  { %v10900_v16 = vmax.f32 %v10485_v33, %v4676_v26  ;;  %v4771_v2 = vsub.f32 0.0, %v4770_v61 }
0x18b5   :  { %v8359_v7 = vpop.f32.mrf.mxu1 }
0x18b6   :  { %v4680_v43 = vsub.f32 %v10485_v33, %v10900_v16  ;;  %v4683_v20 = vsub.f32 %v4676_v26, %v10900_v16  ;;  %v4772_v10 = vmul.f32 1.442695, %v4771_v2 }
0x18b8   :  { %v4681_v31 = vmul.f32 1.442695, %v4680_v43  ;;  %v4684_v62 = vmul.f32 1.442695, %v4683_v20  ;;  %8636 = vpow2.f32 %v4772_v10 }
0x18ba   :  { %8638 = vpow2.f32 %v4681_v31 }
0x18bb   :  { %8640 = vpow2.f32 %v4684_v62 }
0x18c5   :  { %v8637_v5 = vpop.eup %8636 }
0x18c6   :  { %v4938_v12 = vmul.f32 %v8637_v5, %v10640_v24 }
0x18c7   :  { %v8639_v21 = vpop.eup %8638 }
0x18c8   :  { %v8641_v42 = vpop.eup %8640  ;;  %v4689_v23 = vmul.f32 %v8639_v21, %v10495_v53  ;;  %7560 = vmatmul.mubr.msk.f32.vlgmr.msra.gmra.mxu0 %vm457_vm2, %v4938_v12  ;;  %v4686_v61 = vmul.f32 %v8639_v21, %v10497_v45  ;;  %v4849_v53 = vpop.f32.mrf.mxu0 }
0x18c9   :  { %5259 = vmatpush1.msra.mxu0 %v10549_v6  ;;  %5298 = vmatprep.mubr.f32.mxu0 %v11971_v11  ;;  %v4687_v33 = vmul.f32 %v8641_v42, %v4482_v19 }
0x18ca   :  { %v10911_v20 = vadd.f32 %v8641_v42, %v4689_v23  ;;  %5260 = vmatprep.subr.mxu0 %v10561_v40  ;;  %v4851_v45 = vpop.f32.mrf.mxu0  ;;  %v7554_v40 = vld [vmem:[%s11922_s20 + $0x1e] sm:$0x3] }
0x18cb   :  { %5261 = vmatpush1.msra.mxu0 %v10573_v34  ;;  %v10915_v24 = vadd.f32 %v4687_v33, %v4686_v61  ;;  %v5015_v34 = vsub.f32 1.0, %v10869_v0 }
0x18cc   :  { %5262 = vmatprep.subr.mxu0 %v10585_v29 }
0x18cd   :  { %5263 = vmatpush1.msra.mxu0 %v10597_v30  ;;  %v5014_v30 = vmul.f32 %v10869_v0, %v7554_v40 }
0x18ce   :  { %5264 = vmatprep.subr.mxu0 %v10609_v38 }
0x18cf   :  { %5265 = vmatpush1.msra.mxu0 %v10619_v51  ;;  %v4924_v51 = vadd.f32 %v4923_v17, %v4851_v45 }
0x18d0   :  { %7903 = vmatprep.subr.mxu0 %v10632_v27 }
0x18d1   :  { %v4927_v27 = vadd.f32 %v10516_v18, %v4924_v51  ;;  %v12167_v51 = vld [vmem:[#allocation50_spill] sm:$0xff] }
0x18d3   :  { %v5092_v52 = vsub.f32 1.0, %v4927_v27 }
0x1988   :  { %v5008_v6 = vpop.f32.mrf.mxu0 }
0x198a   :  { %v5010_v62 = vpop.f32.mrf.mxu0 }
0x198b   :  { %v5013_v29 = vadd.f32 %v10503_v3, %v5010_v62  ;;  %v12162_v62 = vld [vmem:[#allocation43_spill] sm:$0xff] }
0x198d   :  { %v5016_v2 = vmul.f32 %v5015_v34, %v5013_v29  ;;  %v5099_v47 = vsub.f32 %v7554_v40, %v5013_v29  ;;  %v5093_v13 = vmul.f32 %v5092_v52, %v5013_v29  ;;  %v12163_v29 = vld [vmem:[#allocation44_spill] sm:$0xff] }
0x198e   :  { %v12170_v52 = vld [vmem:[#allocation52_spill] sm:$0xff] }
0x198f   :  { %v5017_v38 = vadd.f32 %v5016_v2, %v5014_v30  ;;  %v5100_v43 = vand.u32 2147483647, %v5099_v47  ;;  %v12165_v2 = vld [vmem:[#allocation46_spill] sm:$0xff]  ;;  %v12171_v47 = vld [vmem:[#allocation49_spill] sm:$0xff] }
0x1991   :  { %8363 = vmatmul.mubr.msk.f32.vlgmr.msra.gmra.mxu1 %vm194_vm1, %v5017_v38  ;;  %v12166_v38 = vld [vmem:[#allocation48_spill] sm:$0xff] }
0x1992   :  { %8366 = vmatpush3.msra.mxu1 %v10508_v32  ;;  %8367 = vmatprep.mubr.msk.f32.mxu1 %vm9028_vm0, %v11971_v11 }
0x1993   :  { %5329 = vmatprep.subr.mxu1 %v10542_v36 }
0x1a51   :  { %v5087_v19 = vpop.f32.mrf.mxu1 }
0x1a52   :  { %v5088_v3 = vadd.f32 %v10519_v59, %v5087_v19  ;;  %v12169_v19 = vld [vmem:[#allocation51_spill] sm:$0xff] }
0x1a53   :  { %v8364_v0 = vpop.f32.mrf.mxu1 }
0x1a54   :  { %v5091_v26 = vmul.f32 %v5088_v3, %v4927_v27  ;;  %v5101_v7 = vsub.f32 %v7554_v40, %v5088_v3  ;;  %v12168_v27 = vld [vmem:[#allocation45_spill] sm:$0xff]  ;;  %v12173_v0 = vld [vmem:[#allocation54_spill] sm:$0xff] }
0x1a55   :  { %v12172_v3 = vld [vmem:[#allocation53_spill] sm:$0xff] }
0x1a56   :  { %v5094_v10 = vadd.f32 %v5093_v13, %v5091_v26  ;;  %v5102_v32 = vand.u32 2147483647, %v5101_v7  ;;  %v12174_v13 = vld [vmem:[#allocation55_spill] sm:$0xff]  ;;  %v12175_v26 = vld [vmem:[#allocation56_spill] sm:$0xff]  ;;  %v12176_v7 = vld [vmem:[#allocation57_spill] sm:$0xff] }
0x1a58   :  { %v5095_v31 = vmul.f32 %v5094_v10, %v5015_v34  ;;  %v5103_v5 = vadd.f32 %v5102_v32, %v5100_v43  ;;  %v5104_v12 = vsub.f32 %v7554_v40, %v5094_v10  ;;  %v12161_v34 = vld [vmem:[#allocation42_spill] sm:$0xff]  ;;  %v12178_v10 = vld [vmem:[#allocation59_spill] sm:$0xff]  ;;  %v12179_v32 = vld [vmem:[#allocation60_spill] sm:$0xff] }
0x1a59   :  { %v12177_v43 = vld [vmem:[#allocation58_spill] sm:$0xff] }
0x1a5a   :  { %v5096_v21 = vadd.f32 %v5095_v31, %v5014_v30  ;;  %v5105_v36 = vand.u32 2147483647, %v5104_v12  ;;  %v12164_v30 = vld [vmem:[#allocation47_spill] sm:$0xff]  ;;  %v12180_v31 = vld [vmem:[#allocation61_spill] sm:$0xff]  ;;  %v12182_v12 = vld [vmem:[#allocation62_spill] sm:$0xff] }
0x1a5c   :  { %7562 = vst.msk [vmem:[%s11728_s21 + $0xa] sm:$0x3] %vm444_vm3, %v5096_v21  ;;  %8368 = vmatmul.mubr.msk.f32.vlgmr.msra.gmra.mxu1 %vm194_vm1, %v5096_v21  ;;  %v10940_v18 = vadd.f32 %v5105_v36, %v5103_v5  ;;  %v12181_v5 = vld [vmem:[#allocation64_spill] sm:$0xff]  ;;  %v12183_v21 = vld [vmem:[#allocation63_spill] sm:$0xff]  ;;  %v12184_v36 = vld [vmem:[#allocation65_spill] sm:$0xff] }
0x1a5d   :  { %5330 = vmatpush1.msra.mxu1 %v10554_v44  ;;  %5369 = vmatprep.mubr.f32.mxu1 %v11971_v11 }
0x1a5e   :  { %5331 = vmatprep.subr.mxu1 %v10566_v14 }
0x1a5f   :  { %5332 = vmatpush1.msra.mxu1 %v10578_v41 }
0x1a60   :  { %5333 = vmatprep.subr.mxu1 %v10590_v58 }
0x1a61   :  { %5334 = vmatpush1.msra.mxu1 %v10602_v55 }
0x1a62   :  { %5335 = vmatprep.subr.mxu1 %v10614_v56 }
0x1a63   :  { %5336 = vmatpush1.msra.mxu1 %v10626_v22 }
0x1a64   :  { %8370 = vmatprep.subr.mxu1 %v11971_v11 }
0x1b1c   :  { %v5191_v59 = vpop.f32.mrf.mxu1 }
0x1b1d   :  { %v5192_v17 = vadd.f32 %v5191_v59, %v5008_v6  ;;  %v12185_v59 = vld [vmem:[#allocation66_spill] sm:$0xff] }
0x1b1e   :  { %v8369_v42 = vpop.f32.mrf.mxu1 }
0x1b1f   :  { %v5195_v44 = vadd.f32 %v5192_v17, %v4849_v53  ;;  %v7569_v17 = vld [vmem:[%s11922_s20 + $0x28] sm:$0x3] }
0x1b20   :  { %v12186_v42 = vld [vmem:[#allocation26_spill] sm:$0xff] }
0x1b21   :  { %v5196_v23 = vadd.f32 %v10530_v1, %v5195_v44  ;;  %v5665_v44 = vmul.f32 %v12186_v42, %v7569_v17 }
0x1b23   :  { %v7564_v61 = vmul.f32 -1.442695, %v5196_v23  ;;  %8642 = vtanh.f32 %v5196_v23  ;;  %v5666_v23 = vadd.f32 %v10823_v49, %v5665_v44 }
0x1b25   :  { %8644 = vpow2.f32 %v7564_v61 }
0x1b30   :  { %v8643_v14 = vpop.eup %8642 }
0x1b31   :  { %5206 = vrot.lane.b32.xlu0 %v8643_v14, %s9031_s6 }
0x1b32   :  { %v8645_v41 = vpop.eup %8644 }
0x1b33   :  { %v5200_v58 = vadd.f32 1.0, %v8645_v41  ;;  %v5667_v41 = vmax.f32 %v5666_v23, 0.0 }
0x1b35   :  { %8646 = vrcp.f32 %v5200_v58 }
0x1b42   :  { %v8647_v55 = vpop.eup %8646 }
0x1b43   :  { %5204 = vrot.lane.b32.xlu1 %v8647_v55, %s9030_s8 }
0x1b47   :  { %5208 = vrot.lane.b32.xlu1 %v8647_v55, %s9029_s1 }
0x1ba3   :  { %v5207_v56 = vpop.permute.xlu0 %5206 }
0x1ba4   :  { %v5211_v33 = vmul.f32 %v8647_v55, %v5207_v56 }
0x1bb5   :  { %v5205_v22 = vpop.permute.xlu1 %5204 }
0x1bb6   :  { %v5210_v53 = vmul.f32 %v5205_v22, %v10637_v25  ;;  %v12149_v25 = vld [vmem:[#allocation30_spill] sm:$0xff] }
0x1bb8   :  { %v10956_v1 = vadd.f32 %v5211_v33, %v5210_v53  ;;  %v5668_v33 = vsub.f32 0.0, %v5667_v41 }
0x1bb9   :  { %v5209_v6 = vpop.permute.xlu1 %5208 }
0x1bba   :  { %8648 = vtanh.f32 %v10956_v1  ;;  %v5669_v53 = vmul.f32 1.442695, %v5668_v33 }
0x1bc7   :  { %v8649_v45 = vpop.eup %8648 }
0x1bc8   :  { %v10959_v40 = vmul.f32 %v8649_v45, %v5209_v6 }
0x1bca   :  { %7565 = vmatmul.mubr.msk.f32.vlgmr.msra.gmra.mxu0 %vm457_vm2, %v10959_v40  ;;  %7566 = vmatmul.mubr.msk.f32.vlgmr.msra.gmra.mxu1 %vm457_vm2, %v10959_v40 }
0x1bcb   :  { %8371 = vmatpush3.msra.mxu1 %v10642_v15  ;;  %7904 = vmatpush3.msra.mxu0 %v10644_v37  ;;  %v12150_v15 = vld [vmem:[#allocation31_spill] sm:$0xff]  ;;  %v12151_v37 = vld [vmem:[#allocation32_spill] sm:$0xff] }
0x1bcc   :  { %8372 = vmatprep.subr.mxu1 %v11971_v11  ;;  %7905 = vmatprep.subr.mxu0 %v10646_v63  ;;  %v12152_v63 = vld [vmem:[#allocation33_spill] sm:$0xff] }
0x1bcd   :  { %8373 = vmatpush3.msra.mxu1 %v10652_v8  ;;  %7906 = vmatpush3.msra.mxu0 %v10654_v35  ;;  %v12153_v8 = vld [vmem:[#allocation34_spill] sm:$0xff]  ;;  %v12154_v35 = vld [vmem:[#allocation35_spill] sm:$0xff] }
0x1bce   :  { %8374 = vmatprep.subr.mxu1 %v11971_v11  ;;  %7907 = vmatprep.subr.mxu0 %v10658_v48  ;;  %v12155_v48 = vld [vmem:[#allocation36_spill] sm:$0xff] }
0x1bcf   :  { %8375 = vmatpush3.msra.mxu1 %v10662_v4  ;;  %7908 = vmatpush3.msra.mxu0 %v10664_v39  ;;  %v12156_v4 = vld [vmem:[#allocation38_spill] sm:$0xff]  ;;  %v12157_v39 = vld [vmem:[#allocation37_spill] sm:$0xff] }
0x1bd0   :  { %8376 = vmatprep.subr.mxu1 %v11971_v11  ;;  %7909 = vmatprep.subr.mxu0 %v10668_v57  ;;  %v12158_v57 = vld [vmem:[#allocation39_spill] sm:$0xff] }
0x1bd1   :  { %8377 = vmatpush3.msra.mxu1 %v10672_v46  ;;  %7910 = vmatpush3.msra.mxu0 %v10674_v50  ;;  %v12159_v46 = vld [vmem:[#allocation40_spill] sm:$0xff]  ;;  %v12160_v50 = vld [vmem:[#allocation41_spill] sm:$0xff] }
0x1bd2   :  { %8378 = vmatprep.subr.mxu1 %v11971_v11  ;;  %7911 = vmatprep.subr.mxu0 %v12149_v25  ;;  %v11044_v25 = vld [vmem:[%s11921_s15] sm:$0xff] }
0x1bd3   :  { %8379 = vmatpush3.msra.mxu1 %v12150_v15  ;;  %7912 = vmatpush3.msra.mxu0 %v12151_v37  ;;  %v12187_v15 = vld [vmem:[#allocation25_spill] sm:$0xff]  ;;  %v12188_v37 = vld [vmem:[#allocation68_spill] sm:$0xff] }
0x1bd4   :  { %8380 = vmatprep.subr.mxu1 %v11971_v11  ;;  %7913 = vmatprep.subr.mxu0 %v12152_v63  ;;  %v12189_v63 = vld [vmem:[#allocation69_spill] sm:$0xff] }
0x1bd5   :  { %8381 = vmatpush3.msra.mxu1 %v12153_v8  ;;  %7914 = vmatpush3.msra.mxu0 %v12154_v35  ;;  %v11064_v8 = vld [vmem:[%s11922_s20 + $0x26] sm:$0x3]  ;;  %v11071_v35 = vld [vmem:[%s11928_s17 + $0x30] sm:$0xff] }
0x1bd6   :  { %8382 = vmatprep.subr.mxu1 %v11971_v11  ;;  %7915 = vmatprep.subr.mxu0 %v12155_v48  ;;  %v11078_v48 = vld [vmem:[%s11928_s17 + $0x28] sm:$0xff] }
0x1bd7   :  { %8383 = vmatpush3.msra.mxu1 %v12156_v4  ;;  %7916 = vmatpush3.msra.mxu0 %v12157_v39  ;;  %v11084_v4 = vld [vmem:[%s11928_s17 + $0x20] sm:$0xff]  ;;  %v11090_v39 = vld [vmem:[%s11928_s17 + $0x18] sm:$0xff] }
0x1bd8   :  { %8384 = vmatprep.subr.mxu1 %v11971_v11  ;;  %7917 = vmatprep.subr.mxu0 %v12158_v57  ;;  %v12190_v57 = vld [vmem:[#allocation70_spill] sm:$0xff] }
0x1bd9   :  { %8385 = vmatpush3.msra.mxu1 %v12159_v46  ;;  %7918 = vmatpush3.msra.mxu0 %v12160_v50  ;;  %v12191_v46 = vld [vmem:[#allocation71_spill] sm:$0xff]  ;;  %v12192_v50 = vld [vmem:[#allocation73_spill] sm:$0xff] }
0x1bda   :  { %8386 = vmatprep.subr.mxu1 %v11971_v11  ;;  %7919 = vmatprep.subr.mxu0 %v12161_v34 }
0x1bdb   :  { %8387 = vmatpush3.msra.mxu1 %v12162_v62  ;;  %7920 = vmatpush3.msra.mxu0 %v12163_v29 }
0x1bdc   :  { %8388 = vmatprep.subr.mxu1 %v11971_v11  ;;  %7921 = vmatprep.subr.mxu0 %v12164_v30 }
0x1bdd   :  { %8389 = vmatpush3.msra.mxu1 %v12165_v2  ;;  %7922 = vmatpush3.msra.mxu0 %v12166_v38 }
0x1bde   :  { %8390 = vmatprep.subr.mxu1 %v11971_v11  ;;  %7923 = vmatprep.subr.mxu0 %v12167_v51 }
0x1bdf   :  { %8391 = vmatpush3.msra.mxu1 %v12168_v27  ;;  %7924 = vmatpush3.msra.mxu0 %v12169_v19  ;;  %v11096_v27 = vld [vmem:[#allocation14] ss:$0 sm:$0xff] }
0x1be0   :  { %8392 = vmatprep.subr.mxu1 %v11971_v11  ;;  %7925 = vmatprep.subr.mxu0 %v12170_v52  ;;  %v11102_v52 = vld [vmem:[%s11929_s26] ss:$0 sm:$0xff] }
0x1be1   :  { %8393 = vmatpush3.msra.mxu1 %v12171_v47  ;;  %7926 = vmatpush3.msra.mxu0 %v12172_v3 }
0x1be2   :  { %8394 = vmatprep.subr.mxu1 %v11971_v11  ;;  %7927 = vmatprep.subr.mxu0 %v12173_v0 }
0x1be3   :  { %8395 = vmatpush3.msra.mxu1 %v12174_v13  ;;  %7928 = vmatpush3.msra.mxu0 %v12175_v26 }
0x1be4   :  { %8396 = vmatprep.subr.mxu1 %v11971_v11  ;;  %7929 = vmatprep.subr.mxu0 %v12176_v7 }
0x1be5   :  { %8397 = vmatpush3.msra.mxu1 %v12177_v43  ;;  %7930 = vmatpush3.msra.mxu0 %v12178_v10 }
0x1be6   :  { %8398 = vmatprep.subr.mxu1 %v11971_v11  ;;  %7931 = vmatprep.subr.mxu0 %v12179_v32 }
0x1be7   :  { %8399 = vmatpush3.msra.mxu1 %v12180_v31  ;;  %7932 = vmatpush3.msra.mxu0 %v12181_v5 }
0x1be8   :  { %8400 = vmatprep.subr.mxu1 %v11971_v11  ;;  %8402 = vmatprep.mubr.msk.f32.mxu1 %vm9028_vm0, %v11971_v11 }
0x1be9   :  { %8401 = vmatpush3.msra.mxu1 %v12182_v12  ;;  %7933 = vmatprep.subr.mxu0 %v12183_v21 }
0x1bea   :  { %7934 = vmatpush3.msra.mxu0 %v12184_v36  ;;  %5704 = vmatprep.subr.mxu1 %v12185_v59 }
0x1beb   :  { %8405 = vmatprep.subr.mxu0 %v11971_v11 }
0x1c8a   :  { %v5300_v61 = vpop.f32.mrf.mxu0  ;;  %v5371_v14 = vpop.f32.mrf.mxu1 }
0x1c8b   :  { %v5378_v58 = vadd.f32 %v5371_v14, %v9622_v28  ;;  %v5376_v55 = vadd.f32 %v5300_v61, %v9624_v54 }
0x1c8c   :  { %v5302_v56 = vpop.f32.mrf.mxu0  ;;  %v5373_v34 = vpop.f32.mrf.mxu1 }
0x1c8d   :  { %v5377_v22 = vadd.f32 %v5302_v56, %v9626_v60  ;;  %8650 = vtanh.f32 %v5378_v58 }
0x1c8f   :  { %8652 = vtanh.f32 %v5377_v22  ;;  %v11124_v22 = vld [vmem:[#allocation3] ss:$0 sm:$0xff] }
0x1c90   :  { %8654 = vtanh.f32 %v5376_v55 }
0x1c91   :  { %8656 = vpow2.f32 %v5669_v53 }
0x1c9a   :  { %v8651_v45 = vpop.eup %8650 }
0x1c9b   :  { %8403 = vmatmul.mubr.f32.vlgmr.msra.gmra.mxu1 %v8651_v45 }
0x1c9c   :  { %v8653_v6 = vpop.eup %8652  ;;  %5705 = vmatpush1.msra.mxu1 %v10832_v9  ;;  %5738 = vmatprep.mubr.f32.mxu1 %v11971_v11 }
0x1c9d   :  { %v8655_v49 = vpop.eup %8654  ;;  %5494 = vmatprep.mubr.f32.mxu0 %v8653_v6  ;;  %5857 = vmatprep.subr.mxu1 %v12187_v15  ;;  %v11129_v6 = vld [vmem:[#allocation8] sm:$0xff]  ;;  %v11137_v15 = vld [vmem:[%s11930_s27] ss:$0 sm:$0xff] }
0x1c9e   :  { %5495 = vmatmul.mubr.f32.vlgmr.msra.gmra.mxu0 %v8655_v49  ;;  %v8657_v9 = vpop.eup %8656 }
0x1c9f   :  { %8406 = vmatpush3.msra.mxu0 %v11044_v25  ;;  %8407 = vmatprep.mubr.msk.f32.mxu0 %vm9028_vm0, %v11971_v11 }
0x1ca0   :  { %8410 = vmatprep.subr.mxu0 %v11971_v11  ;;  %7571 = vmatmul.mubr.msk.f32.vlgmr.msra.gmra.mxu1 %vm194_vm1, %v11064_v8 }
0x1ca1   :  { %5858 = vmatpush1.msra.mxu1 %v11071_v35  ;;  %5897 = vmatprep.mubr.f32.mxu1 %v11971_v11 }
0x1ca2   :  { %8408 = vmatmul.mubr.msk.f32.vlgmr.msra.gmra.mxu0 %vm194_vm1, %v7569_v17  ;;  %5859 = vmatprep.subr.mxu1 %v11078_v48 }
0x1ca3   :  { %8411 = vmatpush3.msra.mxu0 %v12188_v37  ;;  %8412 = vmatprep.mubr.msk.f32.mxu0 %vm9028_vm0, %v11971_v11 }
0x1ca4   :  { %8415 = vmatprep.subr.mxu0 %v11971_v11  ;;  %5860 = vmatpush1.msra.mxu1 %v11084_v4 }
0x1ca5   :  { %5861 = vmatprep.subr.mxu1 %v11090_v39 }
0x1ca6   :  { %8413 = vmatmul.mubr.msk.f32.vlgmr.msra.gmra.mxu0 %vm194_vm1, %v8657_v9  ;;  %5862 = vmatpush1.msra.mxu1 %v12190_v57 }
0x1ca7   :  { %8416 = vmatpush3.msra.mxu0 %v12189_v63  ;;  %8417 = vmatprep.mubr.msk.f32.mxu0 %vm9028_vm0, %v11971_v11 }
0x1ca8   :  { %8420 = vmatprep.subr.mxu0 %v11971_v11  ;;  %5863 = vmatprep.subr.mxu1 %v12191_v46  ;;  %v11140_v46 = vld [vmem:[#allocation6] ss:$0 sm:$0xff] }
0x1ca9   :  { %5864 = vmatpush1.msra.mxu1 %v12192_v50 }
0x1d5b   :  { %v5566_v62 = vpop.f32.mrf.mxu1 }
0x1d5d   :  { %v8404_v29 = vpop.f32.mrf.mxu1 }
0x1d5e   :  { %v7935_v30 = vpop.f32.mrf.mxu0 }
0x1d60   :  { %v7936_v2 = vpop.f32.mrf.mxu0  ;;  %v5740_v41 = vpop.f32.mrf.mxu1 }
0x1d61   :  { %v7937_v38 = vadd.f32 %v7936_v2, %v7935_v30 }
0x1d62   :  { %v5657_v51 = vpop.f32.mrf.mxu0  ;;  %v5742_v58 = vpop.f32.mrf.mxu1 }
0x1d63   :  { %v5497_v19 = vadd.f32 %v11096_v27, %v7937_v38  ;;  %v5658_v47 = vadd.f32 %v11102_v52, %v5657_v51 }
0x1d64   :  { %v8409_v3 = vpop.f32.mrf.mxu0 }
0x1d65   :  { %v5567_v0 = vadd.f32 %v5566_v62, %v5497_v19  ;;  %v5661_v13 = vmax.f32 %v5658_v47, 0.0 }
0x1d66   :  { %v5814_v26 = vpop.f32.mrf.mxu0 }
0x1d67   :  { %v11106_v7 = vmax.f32 %v10900_v16, %v5567_v0  ;;  %v5662_v43 = vsub.f32 0.0, %v5661_v13  ;;  %v5815_v49 = vadd.f32 %v5814_v26, %v5742_v58  ;;  %v11182_v58 = vld [vmem:[%s11723_s16 + $0x48] sm:$0xff] }
0x1d68   :  { %v8414_v10 = vpop.f32.mrf.mxu0 }
0x1d69   :  { %v5571_v32 = vsub.f32 %v10900_v16, %v11106_v7  ;;  %v5574_v31 = vsub.f32 %v5567_v0, %v11106_v7  ;;  %v5663_v5 = vmul.f32 1.442695, %v5662_v43  ;;  %v5818_v9 = vadd.f32 %v11137_v15, %v5815_v49  ;;  %v11235_v49 = vld [vmem:[%s11723_s16 + $0x18] sm:$0xff] }
0x1d6b   :  { %v5572_v12 = vmul.f32 1.442695, %v5571_v32  ;;  %v5575_v21 = vmul.f32 1.442695, %v5574_v31  ;;  %8658 = vpow2.f32 %v5663_v5  ;;  %v5983_v63 = vsub.f32 1.0, %v5818_v9 }
0x1d6c   :  { %v11151_v5 = vld [vmem:[#allocation9] ss:$0 sm:$0xff] }
0x1d6d   :  { %8660 = vpow2.f32 %v5572_v12 }
0x1d6e   :  { %8662 = vpow2.f32 %v5575_v21 }
0x1d78   :  { %v8659_v36 = vpop.eup %8658 }
0x1d79   :  { %v5829_v59 = vmul.f32 %v8659_v36, %v10959_v40  ;;  %v7567_v40 = vld [vmem:[%s11922_s20 + $0x24] sm:$0x3] }
0x1d7a   :  { %v8661_v17 = vpop.eup %8660  ;;  %v5905_v33 = vmul.f32 %v11064_v8, %v7567_v40 }
0x1d7b   :  { %v8663_v42 = vpop.eup %8662  ;;  %v5580_v44 = vmul.f32 %v8661_v17, %v10911_v20  ;;  %7573 = vmatmul.mubr.msk.f32.vlgmr.msra.gmra.mxu1 %vm457_vm2, %v5829_v59  ;;  %v5577_v23 = vmul.f32 %v8661_v17, %v10915_v24  ;;  %v5906_v20 = vsub.f32 1.0, %v11064_v8 }
0x1d7c   :  { %6189 = vmatprep.mubr.f32.mxu1 %v11971_v11  ;;  %v5578_v16 = vmul.f32 %v8663_v42, %v5373_v34 }
0x1d7d   :  { %v11116_v61 = vadd.f32 %v8663_v42, %v5580_v44  ;;  %v11158_v44 = vld [vmem:[%s11723_s16 + $0x68] sm:$0xff] }
0x1d7e   :  { %v11118_v14 = vadd.f32 %v5578_v16, %v5577_v23  ;;  %v11163_v23 = vld [vmem:[%s11723_s16 + $0x78] sm:$0xff]  ;;  %6149 = vmatprep.subr.mxu1 %v11158_v44  ;;  %v11170_v16 = vld [vmem:[%s11723_s16 + $0x60] sm:$0xff] }
0x1d7f   :  { %6150 = vmatpush1.msra.mxu1 %v11170_v16 }
0x1d80   :  { %6151 = vmatprep.subr.mxu1 %v11182_v58 }
0x1e3b   :  { %v5899_v55 = vpop.f32.mrf.mxu1 }
0x1e3d   :  { %v5901_v56 = vpop.f32.mrf.mxu1 }
0x1e3e   :  { %v5904_v24 = vadd.f32 %v11124_v22, %v5901_v56  ;;  %v11206_v56 = vld [vmem:[%s11723_s16 + $0x28] sm:$0xff] }
0x1e40   :  { %v5907_v53 = vmul.f32 %v5906_v20, %v5904_v24  ;;  %v5990_v57 = vsub.f32 %v7567_v40, %v5904_v24  ;;  %v5984_v62 = vmul.f32 %v5983_v63, %v5904_v24  ;;  %v11211_v24 = vld [vmem:[%s11723_s16 + $0x38] sm:$0xff]  ;;  %v11253_v63 = vld [vmem:[#allocation12 + $0xf8] sm:$0xff] }
0x1e42   :  { %v5908_v45 = vadd.f32 %v5907_v53, %v5905_v33  ;;  %v5991_v2 = vand.u32 2147483647, %v5990_v57  ;;  %v11223_v53 = vld [vmem:[%s11723_s16 + $0x30] sm:$0xff] }
0x1e44   :  { %8418 = vmatmul.mubr.msk.f32.vlgmr.msra.gmra.mxu0 %vm194_vm1, %v5908_v45  ;;  %v11230_v45 = vld [vmem:[%s11723_s16 + $0x8] sm:$0xff] }
0x1e45   :  { %8421 = vmatpush3.msra.mxu0 %v11129_v6  ;;  %8422 = vmatprep.mubr.msk.f32.mxu0 %vm9028_vm0, %v11971_v11 }
0x1e46   :  { %6220 = vmatprep.subr.mxu0 %v11163_v23 }
0x1f04   :  { %v5978_v37 = vpop.f32.mrf.mxu0 }
0x1f05   :  { %v5979_v50 = vadd.f32 %v11140_v46, %v5978_v37  ;;  %v11247_v37 = vld [vmem:[%s11723_s16 + $0x10] sm:$0xff] }
0x1f06   :  { %v8419_v34 = vpop.f32.mrf.mxu0 }
0x1f07   :  { %v5982_v29 = vmul.f32 %v5979_v50, %v5818_v9  ;;  %v5992_v30 = vsub.f32 %v7567_v40, %v5979_v50  ;;  %v11240_v9 = vld [vmem:[%s11723_s16] sm:$0xff] }
0x1f09   :  { %v5985_v38 = vadd.f32 %v5984_v62, %v5982_v29  ;;  %v5993_v51 = vand.u32 2147483647, %v5992_v30 }
0x1f0b   :  { %v5986_v19 = vmul.f32 %v5985_v38, %v5906_v20  ;;  %v5994_v47 = vadd.f32 %v5993_v51, %v5991_v2  ;;  %v5995_v3 = vsub.f32 %v7567_v40, %v5985_v38  ;;  %v11194_v40 = vld [vmem:[%s11723_s16 + $0x40] sm:$0xff]  ;;  %v11199_v20 = vld [vmem:[%s11723_s16 + $0x50] sm:$0xff] }
0x1f0c   :  { %6152 = vmatpush1.msra.mxu1 %v11194_v40  ;;  %v11263_v51 = vld [vmem:[#allocation12 + $0x178] sm:$0xff] }
0x1f0d   :  { %v5987_v0 = vadd.f32 %v5986_v19, %v5905_v33  ;;  %v5996_v13 = vand.u32 2147483647, %v5995_v3  ;;  %v11218_v33 = vld [vmem:[%s11723_s16 + $0x20] sm:$0xff]  ;;  %6153 = vmatprep.subr.mxu1 %v11206_v56  ;;  %v11265_v19 = vld [vmem:[#allocation12 + $0x78] sm:$0xff] }
0x1f0e   :  { %6154 = vmatpush1.msra.mxu1 %v11218_v33  ;;  %v11275_v3 = vld [vmem:[#allocation12 + $0x70] sm:$0xff] }
0x1f0f   :  { %7575 = vst.msk [vmem:[%s11728_s21 + $0xc] sm:$0x3] %vm444_vm3, %v5987_v0  ;;  %8423 = vmatmul.mubr.msk.f32.vlgmr.msra.gmra.mxu0 %vm194_vm1, %v5987_v0  ;;  %v11148_v26 = vadd.f32 %v5996_v13, %v5994_v47  ;;  %6155 = vmatprep.subr.mxu1 %v11230_v45  ;;  %v11267_v47 = vld [vmem:[#allocation12 + $0xf0] sm:$0xff]  ;;  %v11279_v0 = vld [vmem:[#allocation12 + $0xe8] sm:$0xff] }
0x1f10   :  { %6260 = vmatprep.mubr.f32.mxu0 %v11971_v11  ;;  %6156 = vmatpush1.msra.mxu1 %v11240_v9  ;;  %v11283_v13 = vld [vmem:[#allocation12 + $0x168] sm:$0xff] }
0x1f11   :  { %7963 = vmatprep.subr.mxu1 %v11253_v63 }
0x1fcf   :  { %v6082_v43 = vpop.f32.mrf.mxu0 }
0x1fd0   :  { %v6083_v10 = vadd.f32 %v6082_v43, %v5899_v55  ;;  %v11187_v55 = vld [vmem:[%s11723_s16 + $0x58] sm:$0xff] }
0x1fd1   :  { %v8424_v32 = vpop.f32.mrf.mxu0  ;;  %v11285_v43 = vld [vmem:[#allocation12 + $0x68] sm:$0xff] }
0x1fd2   :  { %v6086_v31 = vadd.f32 %v6083_v10, %v5740_v41  ;;  %v11175_v41 = vld [vmem:[%s11723_s16 + $0x70] sm:$0xff] }
0x1fd3   :  { %6221 = vmatpush1.msra.mxu0 %v11175_v41  ;;  %v11289_v10 = vld [vmem:[#allocation12 + $0xe0] sm:$0xff] }
0x1fd4   :  { %v6087_v12 = vadd.f32 %v11151_v5, %v6086_v31  ;;  %6222 = vmatprep.subr.mxu0 %v11187_v55  ;;  %12193 = vst [vmem:[#allocation30_spill] sm:$0xff] %v11289_v10  ;;  %v11293_v32 = vld [vmem:[#allocation12 + $0x160] sm:$0xff] }
0x1fd5   :  { %6223 = vmatpush1.msra.mxu0 %v11199_v20  ;;  %12194 = vst [vmem:[#allocation31_spill] sm:$0xff] %v11293_v32  ;;  %v11295_v31 = vld [vmem:[#allocation12 + $0x60] sm:$0xff] }
0x1fd6   :  { %v7577_v21 = vmul.f32 -1.442695, %v6087_v12  ;;  %8664 = vtanh.f32 %v6087_v12  ;;  %6224 = vmatprep.subr.mxu0 %v11211_v24  ;;  %12195 = vst [vmem:[#allocation32_spill] sm:$0xff] %v11295_v31  ;;  %v11299_v12 = vld [vmem:[#allocation12 + $0xd8] sm:$0xff] }
0x1fd7   :  { %6225 = vmatpush1.msra.mxu0 %v11223_v53  ;;  %12196 = vst [vmem:[#allocation33_spill] sm:$0xff] %v11299_v12 }
0x1fd8   :  { %8666 = vpow2.f32 %v7577_v21  ;;  %6226 = vmatprep.subr.mxu0 %v11235_v49  ;;  %v11303_v21 = vld [vmem:[#allocation12 + $0x158] sm:$0xff] }
0x1fd9   :  { %6227 = vmatpush1.msra.mxu0 %v11247_v37  ;;  %12197 = vst [vmem:[#allocation34_spill] sm:$0xff] %v11303_v21 }
0x1fda   :  { %8425 = vmatprep.subr.mxu0 %v11971_v11 }
0x1fe3   :  { %v8665_v36 = vpop.eup %8664 }
0x1fe4   :  { %6097 = vrot.lane.b32.xlu1 %v8665_v36, %s9031_s6  ;;  %v11305_v36 = vld [vmem:[#allocation12 + $0x58] sm:$0xff] }
0x1fe5   :  { %v8667_v59 = vpop.eup %8666  ;;  %12198 = vst [vmem:[#allocation35_spill] sm:$0xff] %v11305_v36 }
0x1fe6   :  { %v6091_v17 = vadd.f32 1.0, %v8667_v59  ;;  %v11309_v59 = vld [vmem:[#allocation12 + $0xd0] sm:$0xff] }
0x1fe7   :  { %12199 = vst [vmem:[#allocation36_spill] sm:$0xff] %v11309_v59 }
0x1fe8   :  { %8668 = vrcp.f32 %v6091_v17  ;;  %v11313_v17 = vld [vmem:[#allocation12 + $0x150] sm:$0xff] }
0x1fe9   :  { %12200 = vst [vmem:[#allocation38_spill] sm:$0xff] %v11313_v17 }
0x1ff5   :  { %v8669_v42 = vpop.eup %8668 }
0x1ff6   :  { %6095 = vrot.lane.b32.xlu0 %v8669_v42, %s9030_s8 }
0x1ffa   :  { %6099 = vrot.lane.b32.xlu0 %v8669_v42, %s9029_s1 }
0x2056   :  { %v6098_v57 = vpop.permute.xlu1 %6097 }
0x2057   :  { %v6102_v34 = vmul.f32 %v8669_v42, %v6098_v57  ;;  %v11315_v42 = vld [vmem:[#allocation12 + $0x50] sm:$0xff]  ;;  %v11319_v57 = vld [vmem:[#allocation12 + $0xc8] sm:$0xff] }
0x2058   :  { %12201 = vst [vmem:[#allocation37_spill] sm:$0xff] %v11315_v42  ;;  %12202 = vst [vmem:[#allocation39_spill] sm:$0xff] %v11319_v57 }
0x2068   :  { %v6096_v50 = vpop.permute.xlu0 %6095 }
0x2069   :  { %v6101_v62 = vmul.f32 %v6096_v50, %v10956_v1  ;;  %v11273_v1 = vld [vmem:[#allocation12 + $0x170] sm:$0xff]  ;;  %v11323_v50 = vld [vmem:[#allocation12 + $0x148] sm:$0xff] }
0x206a   :  { %12203 = vst [vmem:[#allocation40_spill] sm:$0xff] %v11323_v50 }
0x206b   :  { %v11258_v29 = vadd.f32 %v6102_v34, %v6101_v62  ;;  %v11333_v34 = vld [vmem:[#allocation12 + $0x140] sm:$0xff]  ;;  %v11335_v62 = vld [vmem:[#allocation12 + $0x48] sm:$0xff] }
0x206c   :  { %v6100_v2 = vpop.permute.xlu0 %6099  ;;  %12204 = vst [vmem:[#allocation41_spill] sm:$0xff] %v11333_v34  ;;  %12205 = vst [vmem:[#allocation42_spill] sm:$0xff] %v11335_v62 }
0x206d   :  { %8670 = vtanh.f32 %v11258_v29 }
0x207a   :  { %v8671_v30 = vpop.eup %8670 }
0x207b   :  { %v11261_v38 = vmul.f32 %v8671_v30, %v6100_v2  ;;  %v11339_v30 = vld [vmem:[#allocation12 + $0xc0] sm:$0xff]  ;;  %v11342_v2 = vld [vmem:[#allocation12 + $0x138] sm:$0xff] }
0x207c   :  { %12206 = vst [vmem:[#allocation43_spill] sm:$0xff] %v11339_v30  ;;  %12207 = vst [vmem:[#allocation44_spill] sm:$0xff] %v11342_v2 }
0x207d   :  { %7578 = vmatmul.mubr.msk.f32.vlgmr.msra.gmra.mxu1 %vm457_vm2, %v11261_v38  ;;  %7579 = vmatmul.mubr.msk.f32.vlgmr.msra.gmra.mxu0 %vm457_vm2, %v11261_v38 }
0x207e   :  { %8426 = vmatpush3.msra.mxu0 %v11263_v51  ;;  %7964 = vmatpush3.msra.mxu1 %v11265_v19 }
0x207f   :  { %8427 = vmatprep.subr.mxu0 %v11971_v11  ;;  %7965 = vmatprep.subr.mxu1 %v11267_v47 }
0x2080   :  { %8428 = vmatpush3.msra.mxu0 %v11273_v1  ;;  %7966 = vmatpush3.msra.mxu1 %v11275_v3 }
0x2081   :  { %8429 = vmatprep.subr.mxu0 %v11971_v11  ;;  %7967 = vmatprep.subr.mxu1 %v11279_v0 }
0x2082   :  { %8430 = vmatpush3.msra.mxu0 %v11283_v13  ;;  %7968 = vmatpush3.msra.mxu1 %v11285_v43 }
0x2083   :  { %8431 = vmatprep.subr.mxu0 %v11971_v11  ;;  %7969 = vmatprep.subr.mxu1 %v11289_v10 }
0x2084   :  { %8432 = vmatpush3.msra.mxu0 %v11293_v32  ;;  %7970 = vmatpush3.msra.mxu1 %v11295_v31 }
0x2085   :  { %8433 = vmatprep.subr.mxu0 %v11971_v11  ;;  %7971 = vmatprep.subr.mxu1 %v11299_v12 }
0x2086   :  { %8434 = vmatpush3.msra.mxu0 %v11303_v21  ;;  %7972 = vmatpush3.msra.mxu1 %v11305_v36 }
0x2087   :  { %8435 = vmatprep.subr.mxu0 %v11971_v11  ;;  %7973 = vmatprep.subr.mxu1 %v11309_v59  ;;  %v11382_v59 = vld [vmem:[#allocation12 + $0x20] sm:$0xff] }
0x2088   :  { %8436 = vmatpush3.msra.mxu0 %v11313_v17  ;;  %7974 = vmatpush3.msra.mxu1 %v11315_v42  ;;  %v11358_v42 = vld [vmem:[#allocation12 + $0xb0] sm:$0xff]  ;;  %v11372_v17 = vld [vmem:[#allocation12 + $0x120] sm:$0xff]  ;;  %12220 = vst [vmem:[#allocation57_spill] sm:$0xff] %v11382_v59 }
0x2089   :  { %8437 = vmatprep.subr.mxu0 %v11971_v11  ;;  %7975 = vmatprep.subr.mxu1 %v11319_v57  ;;  %v11349_v57 = vld [vmem:[#allocation12 + $0xb8] sm:$0xff]  ;;  %12212 = vst [vmem:[#allocation45_spill] sm:$0xff] %v11358_v42  ;;  %12217 = vst [vmem:[#allocation54_spill] sm:$0xff] %v11372_v17 }
0x208a   :  { %8438 = vmatpush3.msra.mxu0 %v11323_v50  ;;  %8457 = vmatprep.mubr.msk.f32.mxu0 %vm9028_vm0, %v11971_v11  ;;  %v11345_v50 = vld [vmem:[#allocation12 + $0x40] sm:$0xff]  ;;  %12209 = vst [vmem:[#allocation46_spill] sm:$0xff] %v11349_v57 }
0x208b   :  { %8439 = vmatprep.subr.mxu0 %v11971_v11  ;;  %7976 = vmatpush3.msra.mxu1 %v11335_v62  ;;  %12208 = vst [vmem:[#allocation47_spill] sm:$0xff] %v11345_v50  ;;  %v11355_v62 = vld [vmem:[#allocation12 + $0x38] sm:$0xff] }
0x208c   :  { %8440 = vmatpush3.msra.mxu0 %v11333_v34  ;;  %7977 = vmatprep.subr.mxu1 %v11339_v30  ;;  %v11352_v34 = vld [vmem:[#allocation12 + $0x130] sm:$0xff]  ;;  %12211 = vst [vmem:[#allocation50_spill] sm:$0xff] %v11355_v62 }
0x208d   :  { %8441 = vmatprep.subr.mxu0 %v11971_v11  ;;  %7978 = vmatpush3.msra.mxu1 %v11345_v50  ;;  %12210 = vst [vmem:[#allocation48_spill] sm:$0xff] %v11352_v34  ;;  %v11360_v30 = vld [vmem:[#allocation12 + $0x30] sm:$0xff]  ;;  %v11366_v50 = vld [vmem:[#allocation12 + $0xa8] sm:$0xff] }
0x208e   :  { %8442 = vmatpush3.msra.mxu0 %v11342_v2  ;;  %7979 = vmatprep.subr.mxu1 %v11349_v57  ;;  %12213 = vst [vmem:[#allocation51_spill] sm:$0xff] %v11360_v30  ;;  %v11364_v2 = vld [vmem:[#allocation12 + $0x128] sm:$0xff]  ;;  %12215 = vst [vmem:[#allocation49_spill] sm:$0xff] %v11366_v50 }
0x208f   :  { %8443 = vmatprep.subr.mxu0 %v11971_v11  ;;  %7980 = vmatpush3.msra.mxu1 %v11355_v62  ;;  %12214 = vst [vmem:[#allocation52_spill] sm:$0xff] %v11364_v2  ;;  %v11370_v57 = vld [vmem:[#allocation12 + $0x28] sm:$0xff]  ;;  %v11378_v62 = vld [vmem:[#allocation12 + $0x118] sm:$0xff] }
0x2090   :  { %8444 = vmatpush3.msra.mxu0 %v11352_v34  ;;  %7981 = vmatprep.subr.mxu1 %v11358_v42  ;;  %12216 = vst [vmem:[#allocation53_spill] sm:$0xff] %v11370_v57  ;;  %v11376_v34 = vld [vmem:[#allocation12 + $0xa0] sm:$0xff]  ;;  %12219 = vst [vmem:[#allocation56_spill] sm:$0xff] %v11378_v62  ;;  %v11388_v42 = vld [vmem:[#allocation12 + $0x110] sm:$0xff] }
0x2091   :  { %8445 = vmatprep.subr.mxu0 %v11971_v11  ;;  %7982 = vmatpush3.msra.mxu1 %v11360_v30  ;;  %12218 = vst [vmem:[#allocation55_spill] sm:$0xff] %v11376_v34  ;;  %12222 = vst [vmem:[#allocation59_spill] sm:$0xff] %v11388_v42  ;;  %v11392_v30 = vld [vmem:[#allocation12 + $0x18] sm:$0xff] }
0x2092   :  { %8446 = vmatpush3.msra.mxu0 %v11364_v2  ;;  %7983 = vmatprep.subr.mxu1 %v11366_v50  ;;  %v11386_v2 = vld [vmem:[#allocation12 + $0x98] sm:$0xff]  ;;  %12223 = vst [vmem:[#allocation60_spill] sm:$0xff] %v11392_v30  ;;  %v11398_v50 = vld [vmem:[#allocation12 + $0x108] sm:$0xff] }
0x2093   :  { %8447 = vmatprep.subr.mxu0 %v11971_v11  ;;  %7984 = vmatpush3.msra.mxu1 %v11370_v57  ;;  %12221 = vst [vmem:[#allocation58_spill] sm:$0xff] %v11386_v2  ;;  %12225 = vst [vmem:[#allocation64_spill] sm:$0xff] %v11398_v50  ;;  %v11402_v57 = vld [vmem:[#allocation12 + $0x10] sm:$0xff] }
0x2094   :  { %8448 = vmatpush3.msra.mxu0 %v11372_v17  ;;  %7985 = vmatprep.subr.mxu1 %v11376_v34  ;;  %v11396_v17 = vld [vmem:[#allocation12 + $0x90] sm:$0xff]  ;;  %12226 = vst [vmem:[#allocation62_spill] sm:$0xff] %v11402_v57  ;;  %v11408_v34 = vld [vmem:[#allocation12 + $0x100] sm:$0xff] }
0x2095   :  { %8449 = vmatprep.subr.mxu0 %v11971_v11  ;;  %7986 = vmatpush3.msra.mxu1 %v11382_v59  ;;  %12224 = vst [vmem:[#allocation61_spill] sm:$0xff] %v11396_v17  ;;  %12228 = vst [vmem:[#allocation65_spill] sm:$0xff] %v11408_v34  ;;  %v11412_v59 = vld [vmem:[#allocation12 + $0x8] sm:$0xff] }
0x2096   :  { %8450 = vmatpush3.msra.mxu0 %v11378_v62  ;;  %7987 = vmatprep.subr.mxu1 %v11386_v2  ;;  %v11406_v62 = vld [vmem:[#allocation12 + $0x88] sm:$0xff]  ;;  %12229 = vst [vmem:[#allocation66_spill] sm:$0xff] %v11412_v59 }
0x2097   :  { %8451 = vmatprep.subr.mxu0 %v11971_v11  ;;  %7988 = vmatpush3.msra.mxu1 %v11392_v30  ;;  %12227 = vst [vmem:[#allocation63_spill] sm:$0xff] %v11406_v62  ;;  %v11421_v30 = vld [vmem:[#allocation12] sm:$0xff] }
0x2098   :  { %8452 = vmatpush3.msra.mxu0 %v11388_v42  ;;  %7989 = vmatprep.subr.mxu1 %v11396_v17  ;;  %v11416_v42 = vld [vmem:[#allocation12 + $0x80] sm:$0xff]  ;;  %12231 = vst [vmem:[#allocation25_spill] sm:$0xff] %v11421_v30 }
0x2099   :  { %8453 = vmatprep.subr.mxu0 %v11971_v11  ;;  %7990 = vmatpush3.msra.mxu1 %v11402_v57  ;;  %12230 = vst [vmem:[#allocation26_spill] sm:$0xff] %v11416_v42  ;;  %v8791_v57 = vld [vmem:[%s11925_s9] ss:$0 sm:$0xff] }
0x209a   :  { %8454 = vmatpush3.msra.mxu0 %v11398_v50  ;;  %7991 = vmatprep.subr.mxu1 %v11406_v62  ;;  %v8789_v50 = vld [vmem:[%s11721_s14 + $0x8] sm:$0xff] }
0x209b   :  { %8455 = vmatprep.subr.mxu0 %v11971_v11  ;;  %7992 = vmatpush3.msra.mxu1 %v11412_v59  ;;  %v7582_v62 = vld [vmem:[%s11922_s20 + $0x2e] sm:$0x3] }
0x209c   :  { %8456 = vmatpush3.msra.mxu0 %v11408_v34  ;;  %7993 = vmatprep.subr.mxu1 %v11416_v42  ;;  %v8790_v34 = vld [vmem:[%s11923_s4] ss:$0 sm:$0xff] }
0x209d   :  { %6595 = vmatprep.subr.mxu0 %v8789_v50  ;;  %7994 = vmatpush3.msra.mxu1 %v11421_v30  ;;  %v6556_v59 = vmul.f32 %v8790_v34, %v7582_v62 }
0x209e   :  { %8460 = vmatprep.subr.mxu1 %v11971_v11 }
0x209f   :  { %v6557_v50 = vadd.f32 %v8791_v57, %v6556_v59 }
0x20a1   :  { %v6558_v2 = vmax.f32 %v6557_v50, 0.0 }
0x20a3   :  { %v6559_v31 = vsub.f32 0.0, %v6558_v2 }
0x20a5   :  { %v6560_v34 = vmul.f32 1.442695, %v6559_v31  ;;  %v8794_v31 = vld [vmem:[%s11927_s13] sm:$0xff] }
0x213d   :  { %v6191_v17 = vpop.f32.mrf.mxu1  ;;  %v6262_v42 = vpop.f32.mrf.mxu0 }
0x213e   :  { %v6269_v30 = vadd.f32 %v6262_v42, %v9622_v28  ;;  %v6267_v36 = vadd.f32 %v6191_v17, %v9624_v54  ;;  %v8792_v42 = vld [vmem:[%s11721_s14] sm:$0xff] }
0x213f   :  { %v6193_v21 = vpop.f32.mrf.mxu1 }
0x2140   :  { %v6268_v12 = vadd.f32 %v6193_v21, %v9626_v60  ;;  %8672 = vtanh.f32 %v6269_v30  ;;  %v8796_v21 = vld [vmem:[%s11928_s17 + $0x10] sm:$0xff] }
0x2142   :  { %8674 = vtanh.f32 %v6268_v12  ;;  %v11469_v12 = vld [vmem:[%s11922_s20 + $0x2c] sm:$0x3] }
0x2143   :  { %8676 = vtanh.f32 %v6267_v36  ;;  %v8797_v36 = vld [vmem:[%s11928_s17 + $0x8] sm:$0xff] }
0x2144   :  { %8678 = vpow2.f32 %v6560_v34 }
0x214d   :  { %v8673_v32 = vpop.eup %8672 }
0x214e   :  { %8458 = vmatmul.mubr.f32.vlgmr.msra.gmra.mxu0 %v8673_v32  ;;  %v8793_v32 = vld [vmem:[%s11928_s17 + $0x38] sm:$0xff] }
0x214f   :  { %v8675_v10 = vpop.eup %8674  ;;  %6596 = vmatpush1.msra.mxu0 %v8792_v42  ;;  %6629 = vmatprep.mubr.f32.mxu0 %v11971_v11 }
0x2150   :  { %v8677_v59 = vpop.eup %8676  ;;  %6385 = vmatprep.mubr.f32.mxu1 %v8675_v10  ;;  %6748 = vmatprep.subr.mxu0 %v8793_v32 }
0x2151   :  { %6386 = vmatmul.mubr.f32.vlgmr.msra.gmra.mxu1 %v8677_v59  ;;  %v8679_v10 = vpop.eup %8678 }
0x2152   :  { %8461 = vmatpush3.msra.mxu1 %v11044_v25  ;;  %8462 = vmatprep.mubr.msk.f32.mxu1 %vm9028_vm0, %v11971_v11  ;;  %v8795_v25 = vld [vmem:[%s11718_s11] sm:$0xff] }
0x2153   :  { %8465 = vmatprep.subr.mxu1 %v11971_v11  ;;  %7584 = vmatmul.mubr.msk.f32.vlgmr.msra.gmra.mxu0 %vm194_vm1, %v11469_v12 }
0x2154   :  { %6749 = vmatpush1.msra.mxu0 %v11071_v35  ;;  %6788 = vmatprep.mubr.f32.mxu0 %v11971_v11  ;;  %v8798_v35 = vld [vmem:[%s11928_s17] sm:$0xff] }
0x2155   :  { %8463 = vmatmul.mubr.msk.f32.vlgmr.msra.gmra.mxu1 %vm194_vm1, %v7582_v62  ;;  %6750 = vmatprep.subr.mxu0 %v11078_v48  ;;  %v6264_v48 = vpop.f32.mrf.mxu0 }
0x2156   :  { %8466 = vmatpush3.msra.mxu1 %v8794_v31  ;;  %8467 = vmatprep.mubr.msk.f32.mxu1 %vm9028_vm0, %v11971_v11 }
0x2157   :  { %8470 = vmatprep.subr.mxu1 %v11971_v11  ;;  %6751 = vmatpush1.msra.mxu0 %v11084_v4 }
0x2158   :  { %6752 = vmatprep.subr.mxu0 %v11090_v39 }
0x2159   :  { %8468 = vmatmul.mubr.msk.f32.vlgmr.msra.gmra.mxu1 %vm194_vm1, %v8679_v10  ;;  %6753 = vmatpush1.msra.mxu0 %v8796_v21 }
0x215a   :  { %8471 = vmatpush3.msra.mxu1 %v8795_v25  ;;  %8472 = vmatprep.mubr.msk.f32.mxu1 %vm9028_vm0, %v11971_v11 }
0x215b   :  { %8475 = vmatprep.subr.mxu1 %v11971_v11  ;;  %6754 = vmatprep.subr.mxu0 %v8797_v36 }
0x215c   :  { %6755 = vmatpush1.msra.mxu0 %v8798_v35 }
0x215d   :  { %7040 = vmatprep.subr.mxu0 %v11158_v44 }
0x220e   :  { %v6457_v4 = vpop.f32.mrf.mxu0 }
0x2210   :  { %v8459_v39 = vpop.f32.mrf.mxu0 }
0x2211   :  { %v7995_v17 = vpop.f32.mrf.mxu1 }
0x2213   :  { %v7996_v57 = vpop.f32.mrf.mxu1 }
0x2214   :  { %v7997_v62 = vadd.f32 %v7996_v57, %v7995_v17 }
0x2215   :  { %v6548_v30 = vpop.f32.mrf.mxu1 }
0x2216   :  { %v6388_v2 = vadd.f32 %v11096_v27, %v7997_v62  ;;  %v6549_v50 = vadd.f32 %v11102_v52, %v6548_v30 }
0x2217   :  { %v8464_v34 = vpop.f32.mrf.mxu1 }
0x2218   :  { %v6458_v59 = vadd.f32 %v6457_v4, %v6388_v2  ;;  %v6552_v42 = vmax.f32 %v6549_v50, 0.0 }
0x2219   :  { %v6705_v32 = vpop.f32.mrf.mxu1 }
0x221a   :  { %v11491_v10 = vmax.f32 %v11106_v7, %v6458_v59  ;;  %v6553_v31 = vsub.f32 0.0, %v6552_v42 }
0x221b   :  { %v8469_v44 = vpop.f32.mrf.mxu1 }
0x221c   :  { %v6462_v25 = vsub.f32 %v11106_v7, %v11491_v10  ;;  %v6465_v21 = vsub.f32 %v6458_v59, %v11491_v10  ;;  %v6554_v36 = vmul.f32 1.442695, %v6553_v31 }
0x221e   :  { %v6463_v35 = vmul.f32 1.442695, %v6462_v25  ;;  %v6466_v39 = vmul.f32 1.442695, %v6465_v21  ;;  %8680 = vpow2.f32 %v6554_v36 }
0x2220   :  { %8682 = vpow2.f32 %v6463_v35 }
0x2221   :  { %8684 = vpow2.f32 %v6466_v39 }
0x222b   :  { %v8681_v27 = vpop.eup %8680 }
0x222c   :  { %v6720_v52 = vmul.f32 %v8681_v27, %v11261_v38 }
0x222d   :  { %v8683_v4 = vpop.eup %8682 }
0x222e   :  { %v8685_v17 = vpop.eup %8684  ;;  %7586 = vmatmul.mubr.msk.f32.vlgmr.msra.gmra.mxu0 %vm457_vm2, %v6720_v52  ;;  %v6468_v57 = vmul.f32 %v8683_v4, %v11118_v14  ;;  %v6471_v62 = vmul.f32 %v8683_v4, %v11116_v61  ;;  %v6631_v61 = vpop.f32.mrf.mxu0 }
0x222f   :  { %7041 = vmatpush1.msra.mxu0 %v11170_v16  ;;  %7080 = vmatprep.mubr.f32.mxu0 %v11971_v11  ;;  %v6469_v7 = vmul.f32 %v8685_v17, %v6264_v48 }
0x2230   :  { %7042 = vmatprep.subr.mxu0 %v11182_v58  ;;  %v11503_v30 = vadd.f32 %v8685_v17, %v6471_v62  ;;  %v6633_v14 = vpop.f32.mrf.mxu0  ;;  %v7580_v58 = vld [vmem:[%s11922_s20 + $0x2a] sm:$0x3] }
0x2231   :  { %7043 = vmatpush1.msra.mxu0 %v11194_v40  ;;  %v11506_v38 = vadd.f32 %v6469_v7, %v6468_v57  ;;  %v6797_v40 = vsub.f32 1.0, %v11469_v12  ;;  %v12232_v7 = vld [vmem:[#allocation67_spill] sm:$0xff] }
0x2232   :  { %7044 = vmatprep.subr.mxu0 %v11206_v56 }
0x2233   :  { %7045 = vmatpush1.msra.mxu0 %v11218_v33  ;;  %v6796_v33 = vmul.f32 %v11469_v12, %v7580_v58 }
0x2234   :  { %7046 = vmatprep.subr.mxu0 %v11230_v45 }
0x2235   :  { %7047 = vmatpush1.msra.mxu0 %v11240_v9  ;;  %v6706_v9 = vadd.f32 %v6705_v32, %v6633_v14 }
0x2236   :  { %8023 = vmatprep.subr.mxu0 %v11253_v63 }
0x2237   :  { %v6709_v63 = vadd.f32 %v11137_v15, %v6706_v9  ;;  %v8803_v9 = vld [vmem:[%s11922_s20 + $0x1a] sm:$0x3] }
0x2239   :  { %v6874_v34 = vsub.f32 1.0, %v6709_v63 }
0x22ee   :  { %v6790_v16 = vpop.f32.mrf.mxu0 }
0x22f0   :  { %v6792_v48 = vpop.f32.mrf.mxu0 }
0x22f1   :  { %v6795_v56 = vadd.f32 %v11124_v22, %v6792_v48 }
0x22f3   :  { %v6798_v2 = vmul.f32 %v6797_v40, %v6795_v56  ;;  %v6881_v59 = vsub.f32 %v7580_v58, %v6795_v56  ;;  %v6875_v31 = vmul.f32 %v6874_v34, %v6795_v56  ;;  %v8802_v56 = vld [vmem:[%s11922_s20 + $0x14] sm:$0x3] }
0x22f5   :  { %v6799_v45 = vadd.f32 %v6798_v2, %v6796_v33  ;;  %v6882_v21 = vand.u32 2147483647, %v6881_v59  ;;  %v8804_v59 = vld [vmem:[%s11922_s20 + $0x20] sm:$0x3] }
0x22f7   :  { %8473 = vmatmul.mubr.msk.f32.vlgmr.msra.gmra.mxu1 %vm194_vm1, %v6799_v45 }
0x22f8   :  { %8476 = vmatpush3.msra.mxu1 %v11129_v6  ;;  %8477 = vmatprep.mubr.msk.f32.mxu1 %vm9028_vm0, %v11971_v11 }
0x22f9   :  { %7111 = vmatprep.subr.mxu1 %v11163_v23 }
0x23b7   :  { %v6869_v50 = vpop.f32.mrf.mxu1 }
0x23b8   :  { %v6870_v22 = vadd.f32 %v11140_v46, %v6869_v50 }
0x23b9   :  { %v8474_v42 = vpop.f32.mrf.mxu1 }
0x23ba   :  { %v6873_v44 = vmul.f32 %v6870_v22, %v6709_v63  ;;  %v6883_v25 = vsub.f32 %v7580_v58, %v6870_v22  ;;  %v12235_v63 = vld [vmem:[#allocation29_spill] sm:$0xff]  ;;  %v5107_v22 = vmul.f32 %v8804_v59, %v10940_v18  ;;  %v12236_v42 = vld [vmem:[#allocation27_spill] sm:$0xff] }
0x23bb   :  { %v4216_v50 = vmul.f32 %v8803_v9, %v12235_v63  ;;  %v12265_v63 = vld [vmem:[#allocation56_spill] sm:$0xff] }
0x23bc   :  { %v6876_v36 = vadd.f32 %v6875_v31, %v6873_v44  ;;  %v6884_v6 = vand.u32 2147483647, %v6883_v25  ;;  %v5108_v44 = vsel %vm444_vm3, %v5107_v22, 0.0  ;;  %v5998_v25 = vmul.f32 %v11064_v8, %v11148_v26  ;;  %v12269_v22 = vld [vmem:[#allocation62_spill] sm:$0xff] }
0x23bd   :  { %v4217_v34 = vsel %vm444_vm3, %v4216_v50, 0.0  ;;  %v4037_v26 = vsel %vm444_vm3, %v8803_v9, 0.0  ;;  %v12264_v9 = vld [vmem:[#allocation58_spill] sm:$0xff]  ;;  %v12266_v50 = vld [vmem:[#allocation60_spill] sm:$0xff] }
0x23be   :  { %v6877_v35 = vmul.f32 %v6876_v36, %v6797_v40  ;;  %v6885_v39 = vadd.f32 %v6884_v6, %v6882_v21  ;;  %v6886_v27 = vsub.f32 %v7580_v58, %v6876_v36  ;;  %v12233_v58 = vld [vmem:[#allocation28_spill] sm:$0xff]  ;;  %v5999_v36 = vsel %vm444_vm3, %v5998_v25, 0.0 }
0x23c0   :  { %v6878_v52 = vadd.f32 %v6877_v35, %v6796_v33  ;;  %v6887_v23 = vand.u32 2147483647, %v6886_v27  ;;  %v12234_v33 = vld [vmem:[#allocation72_spill] sm:$0xff]  ;;  %v4928_v27 = vsel %vm444_vm3, %v8804_v59, 0.0  ;;  %v12268_v59 = vld [vmem:[#allocation59_spill] sm:$0xff] }
0x23c1   :  { %v3325_v2 = vmul.f32 %v8802_v56, %v12234_v33  ;;  %v12262_v33 = vld [vmem:[#allocation54_spill] sm:$0xff] }
0x23c2   :  { %7588 = vst.msk [vmem:[%s11728_s21 + $0xe] sm:$0x3] %vm444_vm3, %v6878_v52  ;;  %8478 = vmatmul.mubr.msk.f32.vlgmr.msra.gmra.mxu1 %vm194_vm1, %v6878_v52  ;;  %v6888_v15 = vadd.f32 %v6887_v23, %v6885_v39  ;;  %v3146_v39 = vsel %vm444_vm3, %v8802_v56, 0.0  ;;  %v5819_v52 = vsel %vm444_vm3, %v11064_v8, 0.0  ;;  %v6710_v23 = vsel %vm444_vm3, %v11469_v12, 0.0  ;;  %v12237_v8 = vld [vmem:[#allocation30_spill] sm:$0xff] }
0x23c3   :  { %7112 = vmatpush1.msra.mxu1 %v11175_v41  ;;  %7151 = vmatprep.mubr.f32.mxu1 %v11971_v11  ;;  %v3326_v45 = vsel %vm444_vm3, %v3325_v2, 0.0  ;;  %v12261_v56 = vld [vmem:[#allocation55_spill] sm:$0xff]  ;;  %v12263_v2 = vld [vmem:[#allocation57_spill] sm:$0xff] }
0x23c4   :  { %7113 = vmatprep.subr.mxu1 %v11187_v55  ;;  %v6889_v6 = vmul.f32 %v11469_v12, %v6888_v15  ;;  %v12247_v12 = vld [vmem:[#allocation40_spill] sm:$0xff] }
0x23c5   :  { %7114 = vmatpush1.msra.mxu1 %v11199_v20 }
0x23c6   :  { %7115 = vmatprep.subr.mxu1 %v11211_v24  ;;  %v6890_v18 = vsel %vm444_vm3, %v6889_v6, 0.0  ;;  %v12274_v6 = vld [vmem:[#allocation26_spill] sm:$0xff] }
0x23c7   :  { %7116 = vmatpush1.msra.mxu1 %v11223_v53 }
0x23c8   :  { %7117 = vmatprep.subr.mxu1 %v11235_v49  ;;  %v8799_v49 = vld [vmem:[%s11922_s20 + $0x2] sm:$0x3] }
0x23c9   :  { %7118 = vmatpush1.msra.mxu1 %v11247_v37  ;;  %v8800_v37 = vld [vmem:[%s11922_s20 + $0x8] sm:$0x3]  ;;  %v637_v31 = vmul.f32 %v8799_v49, %v12236_v42  ;;  %v12270_v42 = vld [vmem:[#allocation63_spill] sm:$0xff] }
0x23ca   :  { %8480 = vmatprep.subr.mxu1 %v11971_v11  ;;  %v1365_v62 = vsel %vm444_vm3, %v8800_v37, 0.0 }
0x23cb   :  { %v638_v21 = vsel %vm444_vm3, %v637_v31, 0.0  ;;  %v12271_v31 = vld [vmem:[#allocation64_spill] sm:$0xff] }
0x2482   :  { %v6973_v46 = vpop.f32.mrf.mxu1 }
0x2483   :  { %v6974_v32 = vadd.f32 %v6973_v46, %v6790_v16  ;;  %v8801_v16 = vld [vmem:[%s11922_s20 + $0xe] sm:$0x3]  ;;  %s9032_s20 = smov [#allocation15]  }
0x2484   :  { %v8479_v4 = vpop.f32.mrf.mxu1  ;;  %v2434_v40 = vmul.f32 %v8801_v16, %v12233_v58  ;;  %v2255_v35 = vsel %vm444_vm3, %v8801_v16, 0.0  ;;  %v12257_v16 = vld [vmem:[#allocation51_spill] sm:$0xff]  ;;  %v12258_v58 = vld [vmem:[#allocation49_spill] sm:$0xff]  ;;  %s7440_s29 = sshll.u32 %s9032_s20, 4  ;;  %s7441_s29 = int_to_ptr.vmem [resolvable:$true] %s7440_s29 }
0x2485   :  { %v6977_v41 = vadd.f32 %v6974_v32, %v6631_v61  ;;  %v1544_v61 = vmul.f32 %v8800_v37, %v12232_v7  ;;  %v12253_v37 = vld [vmem:[#allocation44_spill] sm:$0xff]  ;;  %s8946_s27 = scalar_lea.vmem %s7441_s29, 16  ;;  %s8950_s12 = scalar_lea.vmem %s7441_s29, 32 }
0x2486   :  { %v2435_v48 = vsel %vm444_vm3, %v2434_v40, 0.0  ;;  %v12259_v40 = vld [vmem:[#allocation52_spill] sm:$0xff]  ;;  %p8947_p7 = scmp.ne.s32.totalorder %s7441_s29, %s8946_s27  ;;  %p8951_p8 = scmp.lt.s32.totalorder %s7441_s29, %s7441_s29 }
0x2487   :  { %v6978_v17 = vadd.f32 %v11151_v5, %v6977_v41  ;;  %v445_v5 = vsel %vm444_vm3, %v8799_v49, 0.0  ;;  %v1545_v14 = vsel %vm444_vm3, %v1544_v61, 0.0  ;;  %v12251_v49 = vld [vmem:[#allocation47_spill] sm:$0xff]  ;;  %v12255_v61 = vld [vmem:[#allocation45_spill] sm:$0xff]  ;;  %p8952_p9 = scmp.lt.s32.totalorder %s8950_s12, %s8946_s27 }
0x2489   :  { %v7590_v57 = vmul.f32 -1.442695, %v6978_v17  ;;  %8686 = vtanh.f32 %v6978_v17  ;;  %p8953_p10 = por %p8952_p9, %p8951_p8 }
0x248b   :  { %8688 = vpow2.f32 %v7590_v57  ;;  %p8954_p11 = pnand %p8953_p10, %p8947_p7 }
0x2496   :  { %v8687_v55 = vpop.eup %8686 }
0x2497   :  { %6988 = vrot.lane.b32.xlu0 %v8687_v55, %s9031_s6 }
0x2498   :  { %v8689_v20 = vpop.eup %8688 }
0x2499   :  { %v6982_v24 = vadd.f32 1.0, %v8689_v20  ;;  %v12248_v20 = vld [vmem:[#allocation42_spill] sm:$0xff] }
0x249b   :  { %8690 = vrcp.f32 %v6982_v24  ;;  %v12249_v24 = vld [vmem:[#allocation43_spill] sm:$0xff] }
0x24a8   :  { %v8691_v53 = vpop.eup %8690 }
0x24a9   :  { %6986 = vrot.lane.b32.xlu1 %v8691_v53, %s9030_s8 }
0x24ad   :  { %6990 = vrot.lane.b32.xlu1 %v8691_v53, %s9029_s1 }
0x24b6   :  { %446 = vadd.xlane.f32.xlu0 %v445_v5  ;;  %v12252_v5 = vld [vmem:[#allocation46_spill] sm:$0xff] }
0x24ba   :  { %1366 = vadd.xlane.f32.xlu0 %v1365_v62  ;;  %v12254_v62 = vld [vmem:[#allocation50_spill] sm:$0xff] }
0x24be   :  { %1546 = vadd.xlane.f32.xlu0 %v1545_v14  ;;  %v12256_v14 = vld [vmem:[#allocation48_spill] sm:$0xff] }
0x24c2   :  { %2436 = vadd.xlane.f32.xlu0 %v2435_v48  ;;  %v12260_v48 = vld [vmem:[#allocation53_spill] sm:$0xff] }
0x24c6   :  { %3327 = vadd.xlane.f32.xlu0 %v3326_v45 }
0x24ca   :  { %4218 = vadd.xlane.f32.xlu0 %v4217_v34  ;;  %v12267_v34 = vld [vmem:[#allocation61_spill] sm:$0xff] }
0x24ce   :  { %5109 = vadd.xlane.f32.xlu0 %v5108_v44 }
0x24d1   :  { %639 = vadd.xlane.f32.xlu1 %v638_v21  ;;  %v12272_v21 = vld [vmem:[#allocation66_spill] sm:$0xff] }
0x24d2   :  { %6000 = vadd.xlane.f32.xlu0 %v5999_v36  ;;  %v12273_v36 = vld [vmem:[#allocation65_spill] sm:$0xff] }
0x24d5   :  { %2256 = vadd.xlane.f32.xlu1 %v2255_v35  ;;  %v12275_v35 = vld [vmem:[#allocation25_spill] sm:$0xff] }
0x24d6   :  { %6891 = vadd.xlane.f32.xlu0 %v6890_v18 }
0x24d9   :  { %3147 = vadd.xlane.f32.xlu1 %v3146_v39 }
0x24dd   :  { %4038 = vadd.xlane.f32.xlu1 %v4037_v26 }
0x24e1   :  { %4929 = vadd.xlane.f32.xlu1 %v4928_v27 }
0x24e5   :  { %5820 = vadd.xlane.f32.xlu1 %v5819_v52 }
0x24e9   :  { %6711 = vadd.xlane.f32.xlu1 %v6710_v23 }
0x2509   :  { %v6989_v15 = vpop.permute.xlu0 %6988 }
0x250a   :  { %v6993_v32 = vmul.f32 %v8691_v53, %v6989_v15  ;;  %v12250_v53 = vld [vmem:[#allocation41_spill] sm:$0xff] }
0x251b   :  { %v6987_v46 = vpop.permute.xlu1 %6986 }
0x251c   :  { %v6992_v4 = vmul.f32 %v6987_v46, %v11258_v29  ;;  %v12238_v29 = vld [vmem:[#allocation31_spill] sm:$0xff] }
0x251e   :  { %v6994_v41 = vadd.f32 %v6993_v32, %v6992_v4 }
0x251f   :  { %v6991_v57 = vpop.permute.xlu1 %6990 }
0x2520   :  { %8692 = vtanh.f32 %v6994_v41 }
0x252d   :  { %v8693_v17 = vpop.eup %8692 }
0x252e   :  { %v6996_v55 = vmul.f32 %v8693_v17, %v6991_v57 }
0x2530   :  { %7591 = vmatmul.mubr.msk.f32.vlgmr.msra.gmra.mxu0 %vm457_vm2, %v6996_v55  ;;  %7592 = vmatmul.mubr.msk.f32.vlgmr.msra.gmra.mxu1 %vm457_vm2, %v6996_v55 }
0x2531   :  { %8481 = vmatpush3.msra.mxu1 %v11263_v51  ;;  %8024 = vmatpush3.msra.mxu0 %v11265_v19  ;;  %v12239_v51 = vld [vmem:[#allocation32_spill] sm:$0xff]  ;;  %v12240_v19 = vld [vmem:[#allocation33_spill] sm:$0xff] }
0x2532   :  { %8482 = vmatprep.subr.mxu1 %v11971_v11  ;;  %8025 = vmatprep.subr.mxu0 %v11267_v47  ;;  %v12241_v47 = vld [vmem:[#allocation34_spill] sm:$0xff] }
0x2533   :  { %8483 = vmatpush3.msra.mxu1 %v11273_v1  ;;  %8026 = vmatpush3.msra.mxu0 %v11275_v3  ;;  %v12242_v1 = vld [vmem:[#allocation35_spill] sm:$0xff]  ;;  %v12243_v3 = vld [vmem:[#allocation36_spill] sm:$0xff] }
0x2534   :  { %8484 = vmatprep.subr.mxu1 %v11971_v11  ;;  %8027 = vmatprep.subr.mxu0 %v11279_v0  ;;  %v12244_v0 = vld [vmem:[#allocation38_spill] sm:$0xff] }
0x2535   :  { %8485 = vmatpush3.msra.mxu1 %v11283_v13  ;;  %8028 = vmatpush3.msra.mxu0 %v11285_v43  ;;  %v12245_v13 = vld [vmem:[#allocation37_spill] sm:$0xff]  ;;  %v12246_v43 = vld [vmem:[#allocation39_spill] sm:$0xff] }
0x2536   :  { %8486 = vmatprep.subr.mxu1 %v11971_v11  ;;  %8029 = vmatprep.subr.mxu0 %v12237_v8 }
0x2537   :  { %8487 = vmatpush3.msra.mxu1 %v12238_v29  ;;  %8030 = vmatpush3.msra.mxu0 %v12239_v51 }
0x2538   :  { %8488 = vmatprep.subr.mxu1 %v11971_v11  ;;  %8031 = vmatprep.subr.mxu0 %v12240_v19 }
0x2539   :  { %8489 = vmatpush3.msra.mxu1 %v12241_v47  ;;  %8032 = vmatpush3.msra.mxu0 %v12242_v1 }
0x253a   :  { %8490 = vmatprep.subr.mxu1 %v11971_v11  ;;  %8033 = vmatprep.subr.mxu0 %v12243_v3 }
0x253b   :  { %8491 = vmatpush3.msra.mxu1 %v12244_v0  ;;  %8034 = vmatpush3.msra.mxu0 %v12245_v13 }
0x253c   :  { %8492 = vmatprep.subr.mxu1 %v11971_v11  ;;  %8035 = vmatprep.subr.mxu0 %v12246_v43 }
0x253d   :  { %8493 = vmatpush3.msra.mxu1 %v12247_v12  ;;  %8036 = vmatpush3.msra.mxu0 %v12248_v20 }
0x253e   :  { %8494 = vmatprep.subr.mxu1 %v11971_v11  ;;  %8037 = vmatprep.subr.mxu0 %v12249_v24 }
0x253f   :  { %8495 = vmatpush3.msra.mxu1 %v12250_v53  ;;  %8038 = vmatpush3.msra.mxu0 %v12251_v49  ;;  %v447_v7 = vpop.xlane.xlu0 %446 }
0x2540   :  { %8496 = vmatprep.subr.mxu1 %v11971_v11  ;;  %8039 = vmatprep.subr.mxu0 %v12252_v5  ;;  %v449_v44 = vsel %vm448_vm4, %v447_v7, 0.0 }
0x2541   :  { %8497 = vmatpush3.msra.mxu1 %v12253_v37  ;;  %8040 = vmatpush3.msra.mxu0 %v12254_v62  ;;  %v450_v18 = vrot.slane %v449_v44, 4 }
0x2542   :  { %8498 = vmatprep.subr.mxu1 %v11971_v11  ;;  %8041 = vmatprep.subr.mxu0 %v12255_v61 }
0x2543   :  { %8499 = vmatpush3.msra.mxu1 %v12256_v14  ;;  %8042 = vmatpush3.msra.mxu0 %v12257_v16  ;;  %v1367_v45 = vpop.xlane.xlu0 %1366  ;;  %v451_v27 = vadd.f32 %v450_v18, %v449_v44 }
0x2544   :  { %8500 = vmatprep.subr.mxu1 %v11971_v11  ;;  %8043 = vmatprep.subr.mxu0 %v12258_v58  ;;  %v1368_v39 = vsel %vm448_vm4, %v1367_v45, 0.0 }
0x2545   :  { %8501 = vmatpush3.msra.mxu1 %v12259_v40  ;;  %8044 = vmatpush3.msra.mxu0 %v12260_v48  ;;  %v1369_v52 = vrot.slane %v1368_v39, 4  ;;  %v452_v23 = vrot.slane %v451_v27, 2 }
0x2546   :  { %8502 = vmatprep.subr.mxu1 %v11971_v11  ;;  %8045 = vmatprep.subr.mxu0 %v12261_v56 }
0x2547   :  { %8503 = vmatpush3.msra.mxu1 %v12262_v33  ;;  %8046 = vmatpush3.msra.mxu0 %v12263_v2  ;;  %v1547_v25 = vpop.xlane.xlu0 %1546  ;;  %v1370_v15 = vadd.f32 %v1369_v52, %v1368_v39  ;;  %v453_v4 = vadd.f32 %v452_v23, %v451_v27 }
0x2548   :  { %8504 = vmatprep.subr.mxu1 %v11971_v11  ;;  %8047 = vmatprep.subr.mxu0 %v12264_v9  ;;  %v1548_v51 = vsel %vm448_vm4, %v1547_v25, 0.0 }
0x2549   :  { %8505 = vmatpush3.msra.mxu1 %v12265_v63  ;;  %8048 = vmatpush3.msra.mxu0 %v12266_v50  ;;  %v454_v8 = vrot.slane %v453_v4, 1  ;;  %v1549_v20 = vrot.slane %v1548_v51, 4 }
0x254a   :  { %8506 = vmatprep.subr.mxu1 %v11971_v11  ;;  %8049 = vmatprep.subr.mxu0 %v12267_v34 }
0x254b   :  { %8507 = vmatpush3.msra.mxu1 %v12268_v59  ;;  %8050 = vmatpush3.msra.mxu0 %v12269_v22  ;;  %v2437_v26 = vpop.xlane.xlu0 %2436  ;;  %v455_v43 = vadd.f32 %v454_v8, %v453_v4  ;;  %v1550_v48 = vadd.f32 %v1549_v20, %v1548_v51 }
0x254c   :  { %8508 = vmatprep.subr.mxu1 %v11971_v11  ;;  %8051 = vmatprep.subr.mxu0 %v12270_v42  ;;  %v2438_v3 = vsel %vm448_vm4, %v2437_v26, 0.0 }
0x254d   :  { %8509 = vmatpush3.msra.mxu1 %v12271_v31  ;;  %8512 = vmatprep.mubr.msk.f32.mxu1 %vm9028_vm0, %v11971_v11  ;;  %v2439_v62 = vrot.slane %v2438_v3, 4  ;;  %v648_v58 = vadd.f32 1e-05, %v455_v43  ;;  %v1551_v25 = vrot.slane %v1550_v48, 2 }
0x254e   :  { %8510 = vmatprep.subr.mxu1 %v11971_v11  ;;  %8052 = vmatpush3.msra.mxu0 %v12272_v21  ;;  %v1371_v11 = vrot.slane %v1370_v15, 2 }
0x254f   :  { %8511 = vmatpush3.msra.mxu1 %v12273_v36  ;;  %8053 = vmatprep.subr.mxu0 %v12274_v6  ;;  %v3328_v46 = vpop.xlane.xlu0 %3327  ;;  %v2440_v9 = vadd.f32 %v2439_v62, %v2438_v3  ;;  %8694 = vrcp.f32 %v648_v58 }
0x2550   :  { %8054 = vmatpush3.msra.mxu0 %v12275_v35  ;;  %v1372_v29 = vadd.f32 %v1371_v11, %v1370_v15  ;;  %v3329_v34 = vsel %vm448_vm4, %v3328_v46, 0.0 }
0x2551   :  { %v2441_v26 = vrot.slane %v2440_v9, 2  ;;  %v3330_v27 = vrot.slane %v3329_v34, 4 }
0x2552   :  { %v1373_v12 = vrot.slane %v1372_v29, 1 }
0x2553   :  { %v4219_v57 = vpop.xlane.xlu0 %4218 }
0x2554   :  { %v1374_v40 = vadd.f32 %v1373_v12, %v1372_v29  ;;  %v4220_v36 = vsel %vm448_vm4, %v4219_v57, 0.0 }
0x2555   :  { %v4221_v11 = vrot.slane %v4220_v36, 4 }
0x2556   :  { %v1555_v44 = vadd.f32 1e-05, %v1374_v40 }
0x2557   :  { %v5110_v24 = vpop.xlane.xlu0 %5109  ;;  %v4222_v20 = vadd.f32 %v4221_v11, %v4220_v36 }
0x2558   :  { %v5111_v15 = vsel %vm448_vm4, %v5110_v24, 0.0  ;;  %8696 = vrcp.f32 %v1555_v44 }
0x255a   :  { %v640_v32 = vpop.xlane.xlu1 %639 }
0x255b   :  { %v641_v53 = vsel %vm448_vm4, %v640_v32, 0.0  ;;  %v6001_v59 = vpop.xlane.xlu0 %6000 }
0x255c   :  { %v642_v56 = vrot.slane %v641_v53, 4 }
0x255e   :  { %v2257_v41 = vpop.xlane.xlu1 %2256  ;;  %v643_v21 = vadd.f32 %v642_v56, %v641_v53  ;;  %v2442_v56 = vadd.f32 %v2441_v26, %v2440_v9 }
0x255f   :  { %v2258_v17 = vsel %vm448_vm4, %v2257_v41, 0.0  ;;  %v6892_v57 = vpop.xlane.xlu0 %6891 }
0x2560   :  { %v2259_v55 = vrot.slane %v2258_v17, 4  ;;  %v644_v41 = vrot.slane %v643_v21, 2 }
0x2562   :  { %v2260_v19 = vadd.f32 %v2259_v55, %v2258_v17  ;;  %v3148_v47 = vpop.xlane.xlu1 %3147  ;;  %v6002_v17 = vsel %vm448_vm4, %v6001_v59, 0.0  ;;  %v645_v24 = vadd.f32 %v644_v41, %v643_v21 }
0x2563   :  { %v3149_v1 = vsel %vm448_vm4, %v3148_v47, 0.0  ;;  %v3331_v47 = vadd.f32 %v3330_v27, %v3329_v34  ;;  %v6003_v53 = vrot.slane %v6002_v17, 4 }
0x2564   :  { %v2261_v0 = vrot.slane %v2260_v19, 2  ;;  %v3150_v13 = vrot.slane %v3149_v1, 4 }
0x2566   :  { %v2262_v49 = vadd.f32 %v2261_v0, %v2260_v19  ;;  %v3151_v5 = vadd.f32 %v3150_v13, %v3149_v1  ;;  %v4039_v37 = vpop.xlane.xlu1 %4038  ;;  %v5112_v1 = vrot.slane %v5111_v15, 4 }
0x2567   :  { %v4040_v7 = vsel %vm448_vm4, %v4039_v37, 0.0 }
0x2568   :  { %v2263_v61 = vrot.slane %v2262_v49, 1  ;;  %v3152_v14 = vrot.slane %v3151_v5, 2  ;;  %v4041_v16 = vrot.slane %v4040_v7, 4 }
0x256a   :  { %v3153_v33 = vadd.f32 %v3152_v14, %v3151_v5  ;;  %v4042_v2 = vadd.f32 %v4041_v16, %v4040_v7  ;;  %v4930_v45 = vpop.xlane.xlu1 %4929  ;;  %v2264_v63 = vadd.f32 %v2263_v61, %v2262_v49  ;;  %v6893_v49 = vsel %vm448_vm4, %v6892_v57, 0.0 }
0x256b   :  { %v4931_v50 = vsel %vm448_vm4, %v4930_v45, 0.0  ;;  %v1552_v7 = vadd.f32 %v1551_v25, %v1550_v48  ;;  %v3332_v61 = vrot.slane %v3331_v47, 2  ;;  %v5113_v14 = vadd.f32 %v5112_v1, %v5111_v15 }
0x256c   :  { %v3154_v22 = vrot.slane %v3153_v33, 1  ;;  %v4043_v42 = vrot.slane %v4042_v2, 2  ;;  %v4932_v31 = vrot.slane %v4931_v50, 4  ;;  %v2445_v52 = vadd.f32 1e-05, %v2264_v63  ;;  %v8695_v63 = vpop.eup %8694 }
0x256d   :  { %v6894_v45 = vrot.slane %v6893_v49, 4  ;;  %v1553_v48 = vrot.slane %v1552_v7, 1  ;;  %v2443_v25 = vrot.slane %v2442_v56, 1 }
0x256e   :  { %v3155_v6 = vadd.f32 %v3154_v22, %v3153_v33  ;;  %v4044_v35 = vadd.f32 %v4043_v42, %v4042_v2  ;;  %v4933_v18 = vadd.f32 %v4932_v31, %v4931_v50  ;;  %v5821_v39 = vpop.xlane.xlu1 %5820  ;;  %8698 = vrcp.f32 %v2445_v52 }
0x256f   :  { %v5822_v23 = vsel %vm448_vm4, %v5821_v39, 0.0  ;;  %v4223_v33 = vrot.slane %v4222_v20, 2  ;;  %v6004_v2 = vadd.f32 %v6003_v53, %v6002_v17  ;;  %v646_v50 = vrot.slane %v645_v24, 1 }
0x2570   :  { %v4045_v46 = vrot.slane %v4044_v35, 1  ;;  %v4934_v32 = vrot.slane %v4933_v18, 2  ;;  %v5823_v4 = vrot.slane %v5822_v23, 4  ;;  %v3336_v55 = vadd.f32 1e-05, %v3155_v6  ;;  %v8697_v6 = vpop.eup %8696 }
0x2571   :  { %v3333_v22 = vadd.f32 %v3332_v61, %v3331_v47  ;;  %v5114_v42 = vrot.slane %v5113_v14, 2  ;;  %v4224_v21 = vadd.f32 %v4223_v33, %v4222_v20  ;;  %v6005_v36 = vrot.slane %v6004_v2, 2 }
0x2572   :  { %v4046_v8 = vadd.f32 %v4045_v46, %v4044_v35  ;;  %v4935_v29 = vadd.f32 %v4934_v32, %v4933_v18  ;;  %v5824_v51 = vadd.f32 %v5823_v4, %v5822_v23  ;;  %v6712_v19 = vpop.xlane.xlu1 %6711  ;;  %8700 = vrcp.f32 %v3336_v55 }
0x2573   :  { %v6713_v3 = vsel %vm448_vm4, %v6712_v19, 0.0  ;;  %v647_v35 = vadd.f32 %v646_v50, %v645_v24  ;;  %v6895_v18 = vadd.f32 %v6894_v45, %v6893_v49  ;;  %v3334_v26 = vrot.slane %v3333_v22, 1 }
0x2574   :  { %v4227_v0 = vadd.f32 1e-05, %v4046_v8  ;;  %v4936_v13 = vrot.slane %v4935_v29, 1  ;;  %v5825_v43 = vrot.slane %v5824_v51, 2  ;;  %v6714_v12 = vrot.slane %v6713_v3, 4 }
0x2575   :  { %v5115_v27 = vadd.f32 %v5114_v42, %v5113_v14  ;;  %v1554_v23 = vadd.f32 %v1553_v48, %v1552_v7  ;;  %v2444_v15 = vadd.f32 %v2443_v25, %v2442_v56  ;;  %v4225_v46 = vrot.slane %v4224_v21, 1 }
0x2576   :  { %v4937_v5 = vadd.f32 %v4936_v13, %v4935_v29  ;;  %v5826_v37 = vadd.f32 %v5825_v43, %v5824_v51  ;;  %v6715_v62 = vadd.f32 %v6714_v12, %v6713_v3  ;;  %8702 = vrcp.f32 %v4227_v0 }
0x2577   :  { %v650_v32 = vmul.f32 %v8695_v63, %v647_v35  ;;  %v6006_v4 = vadd.f32 %v6005_v36, %v6004_v2  ;;  %v6896_v11 = vrot.slane %v6895_v18, 2  ;;  %v1557_v17 = vmul.f32 %v8697_v6, %v1554_v23  ;;  %v8805_v36 = vld [vmem:[#allocation14] ss:$0 sm:$0xff] }
0x2578   :  { %v5118_v16 = vadd.f32 1e-05, %v4937_v5  ;;  %v5827_v58 = vrot.slane %v5826_v37, 1  ;;  %v6716_v40 = vrot.slane %v6715_v62, 2  ;;  %v3335_v57 = vadd.f32 %v3334_v26, %v3333_v22 }
0x2579   :  { %v5116_v55 = vrot.slane %v5115_v27, 1  ;;  %v4226_v51 = vadd.f32 %v4225_v46, %v4224_v21  ;;  %v1558_v19 = vadd.f32 %v1557_v17, %v650_v32  ;;  %v6007_v47 = vrot.slane %v6006_v4, 1 }
0x257a   :  { %8704 = vrcp.f32 %v5118_v16  ;;  %v5828_v34 = vadd.f32 %v5827_v58, %v5826_v37  ;;  %v6717_v59 = vadd.f32 %v6716_v40, %v6715_v62  ;;  %v6897_v1 = vadd.f32 %v6896_v11, %v6895_v18 }
0x257b   :  { %v8699_v39 = vpop.eup %8698  ;;  %v5117_v13 = vadd.f32 %v5116_v55, %v5115_v27  ;;  %v6008_v20 = vadd.f32 %v6007_v47, %v6006_v4 }
0x257c   :  { %v6009_v31 = vadd.f32 1e-05, %v5828_v34  ;;  %v6718_v44 = vrot.slane %v6717_v59, 1  ;;  %v2447_v8 = vmul.f32 %v8699_v39, %v2444_v15  ;;  %v6898_v24 = vrot.slane %v6897_v1, 1 }
0x257e   :  { %8706 = vrcp.f32 %v6009_v31  ;;  %v6719_v9 = vadd.f32 %v6718_v44, %v6717_v59  ;;  %v2448_v43 = vadd.f32 %v2447_v8, %v1558_v19  ;;  %v6899_v7 = vadd.f32 %v6898_v24, %v6897_v1 }
0x257f   :  { %v8701_v41 = vpop.eup %8700 }
0x2580   :  { %v6900_v52 = vadd.f32 1e-05, %v6719_v9  ;;  %v3338_v3 = vmul.f32 %v8701_v41, %v3335_v57 }
0x2582   :  { %8708 = vrcp.f32 %v6900_v52  ;;  %v3339_v53 = vadd.f32 %v3338_v3, %v2448_v43 }
0x2583   :  { %v8703_v29 = vpop.eup %8702 }
0x2584   :  { %v4229_v12 = vmul.f32 %v8703_v29, %v4226_v51 }
0x2586   :  { %v4230_v37 = vadd.f32 %v4229_v12, %v3339_v53 }
0x2587   :  { %v8705_v0 = vpop.eup %8704 }
0x2588   :  { %v5120_v49 = vmul.f32 %v8705_v0, %v5117_v13 }
0x258a   :  { %v5121_v61 = vadd.f32 %v5120_v49, %v4230_v37 }
0x258b   :  { %v8707_v5 = vpop.eup %8706 }
0x258c   :  { %v6011_v62 = vmul.f32 %v8707_v5, %v6008_v20 }
0x258e   :  { %v6012_v16 = vadd.f32 %v6011_v62, %v5121_v61 }
0x258f   :  { %v8709_v14 = vpop.eup %8708 }
0x2590   :  { %v6902_v58 = vmul.f32 %v8709_v14, %v6899_v7 }
0x2592   :  { %v6903_v40 = vadd.f32 %v6902_v58, %v6012_v16 }
0x2594   :  { %v11672_v56 = vmul.f32 0.125, %v6903_v40 }
0x2596   :  { %7426 = vst.msk [vmem:[#allocation15] sm:$0x1] %vm7425_vm5, %v11672_v56 }
0x25f0   :  { %v7082_v33 = vpop.f32.mrf.mxu0  ;;  %v7153_v2 = vpop.f32.mrf.mxu1 }
0x25f1   :  { %v7160_v45 = vadd.f32 %v7153_v2, %v9622_v28  ;;  %v7158_v63 = vadd.f32 %v7082_v33, %v9624_v54 }
0x25f2   :  { %v7084_v50 = vpop.f32.mrf.mxu0  ;;  %v7155_v31 = vpop.f32.mrf.mxu1 }
0x25f3   :  { %v7159_v34 = vadd.f32 %v7084_v50, %v9626_v60  ;;  %8710 = vtanh.f32 %v7160_v45 }
0x25f5   :  { %8712 = vtanh.f32 %v7159_v34 }
0x25f6   :  { %8714 = vtanh.f32 %v7158_v63 }
0x2600   :  { %v8711_v59 = vpop.eup %8710 }
0x2601   :  { %8513 = vmatmul.mubr.f32.vlgmr.msra.gmra.mxu1 %v8711_v59 }
0x2602   :  { %v8713_v22 = vpop.eup %8712 }
0x2603   :  { %v8715_v42 = vpop.eup %8714  ;;  %7276 = vmatprep.mubr.f32.mxu0 %v8713_v22 }
0x2604   :  { %7277 = vmatmul.mubr.f32.vlgmr.msra.gmra.mxu0 %v8715_v42 }
0x26c1   :  { %v7348_v44 = vpop.f32.mrf.mxu1 }
0x26c3   :  { %v8514_v48 = vpop.f32.mrf.mxu1 }
0x26c4   :  { %v8055_v25 = vpop.f32.mrf.mxu0 }
0x26c6   :  { %v8056_v21 = vpop.f32.mrf.mxu0 }
0x26c7   :  { %v8057_v28 = vadd.f32 %v8056_v21, %v8055_v25 }
0x26c9   :  { %v7279_v54 = vadd.f32 %v8805_v36, %v8057_v28 }
0x26cb   :  { %v7349_v6 = vadd.f32 %v7348_v44, %v7279_v54 }
0x26cd   :  { %v7352_v60 = vmax.f32 %v11491_v10, %v7349_v6 }
0x26cf   :  { %v7353_v35 = vsub.f32 %v11491_v10, %v7352_v60  ;;  %v7356_v18 = vsub.f32 %v7349_v6, %v7352_v60 }
0x26d1   :  { %v7354_v9 = vmul.f32 1.442695, %v7353_v35  ;;  %v7357_v39 = vmul.f32 1.442695, %v7356_v18 }
0x26d3   :  { %8716 = vpow2.f32 %v7354_v9 }
0x26d4   :  { %8718 = vpow2.f32 %v7357_v39 }
0x26e0   :  { %v8717_v26 = vpop.eup %8716 }
0x26e1   :  { %v8719_v27 = vpop.eup %8718  ;;  %v7359_v52 = vmul.f32 %v8717_v26, %v11506_v38  ;;  %v7362_v23 = vmul.f32 %v8717_v26, %v11503_v30 }
0x26e2   :  { %v7360_v15 = vmul.f32 %v8719_v27, %v7155_v31 }
0x26e3   :  { %v7363_v46 = vadd.f32 %v8719_v27, %v7362_v23 }
0x26e4   :  { %v7361_v32 = vadd.f32 %v7360_v15, %v7359_v52 }
0x26e5   :  { %8720 = vrcp.f32 %v7363_v46 }
0x26f2   :  { %v8721_v4 = vpop.eup %8720 }
0x26f3   :  { %v7365_v11 = vmul.f32 %v8721_v4, %v7361_v32 }
0x26f5   :  { %v7367_v41 = vsel %vm7366_vm6, %v7365_v11, 0.0 }
0x26f6   :  { %7368 = vadd.xlane.f32.xlu1 %v7367_v41 }
0x26f7   :  { %8957 = shalt.err (!%p8954_p11)
}
0x26f8   :  { %7443 = dma.vmem_to_hbm [thread:$0]  %s7441_s29, 16, %s11730_s23, [#allocation5]   ;;  %v7593_v10 = vld [vmem:[#allocation2] ss:$0 sm:$0xff]  ;;  %vm7384_vm7 = vcmask 1024  }
0x26f9   :  { %s12276_s16 = sld [smem:[#allocation76_spill]]  ;;  %s9033_s3 = smov [#allocation16]  }
0x26fa   :  { %s12277_s7 = sld [smem:[#allocation75_spill]]  ;;  %s9034_s18 = smov [#allocation18]  }
0x26fb   :  { %s7460_s21 = sshll.u32 %s9034_s18, 4  ;;  %s7461_s21 = int_to_ptr.vmem [resolvable:$true] %s7460_s21 }
0x26ff   :  { %v7387_v47 = vld [vmem:[%s12276_s16] sm:$0x3] }
0x2700   :  { %v7413_v1 = vsel %vm7384_vm7, %v7387_v47, 0.0  ;;  %v7386_v5 = vld [vmem:[%s12277_s7] sm:$0x3] }
0x2701   :  { %v7414_v3 = vrot.slane %v7413_v1, 4 }
0x2703   :  { %v7415_v43 = vadd.f32 %v7414_v3, %v7413_v1 }
0x2705   :  { %v7416_v24 = vrot.slane %v7415_v43, 2 }
0x2707   :  { %v7417_v49 = vadd.f32 %v7416_v24, %v7415_v43 }
0x2709   :  { %v7418_v37 = vrot.slane %v7417_v49, 1 }
0x270b   :  { %v7419_v61 = vadd.f32 %v7418_v37, %v7417_v49 }
0x270d   :  { %v7420_v58 = vadd.f32 1e-05, %v7419_v61 }
0x277f   :  { %v7369_v30 = vpop.xlane.xlu1 %7368 }
0x2780   :  { %v7377_v38 = vadd.f32 %v7593_v10, %v7369_v30 }
0x2782   :  { %v7594_v17 = vmul.f32 -1.442695, %v7377_v38  ;;  %v7388_v57 = vsub.f32 0.0, %v7377_v38  ;;  %v7390_v7 = vmul.f32 %v7386_v5, %v7377_v38 }
0x2784   :  { %8722 = vpow2.f32 %v7594_v17  ;;  %v7389_v55 = vmax.f32 %v7388_v57, 0.0  ;;  %v7391_v14 = vsub.f32 %v7377_v38, %v7390_v7 }
0x2786   :  { %v7393_v8 = vsub.f32 0.0, %v7389_v55  ;;  %v7396_v29 = vsub.f32 %v7388_v57, %v7389_v55  ;;  %v7392_v40 = vadd.f32 %v7391_v14, %v7389_v55 }
0x2788   :  { %v7394_v51 = vmul.f32 1.442695, %v7393_v8  ;;  %v7397_v19 = vmul.f32 1.442695, %v7396_v29 }
0x278a   :  { %8724 = vpow2.f32 %v7394_v51 }
0x278b   :  { %8726 = vpow2.f32 %v7397_v19 }
0x2791   :  { %v8723_v0 = vpop.eup %8722 }
0x2792   :  { %v7381_v13 = vadd.f32 1.0, %v8723_v0 }
0x2794   :  { %8728 = vrcp.f32 %v7381_v13 }
0x2797   :  { %v8725_v12 = vpop.eup %8724 }
0x2798   :  { %v8727_v20 = vpop.eup %8726 }
0x2799   :  { %v7399_v53 = vadd.f32 %v8727_v20, %v8725_v12 }
0x279b   :  { %8730 = vlog2.f32 %v7399_v53 }
0x279c   :  { %8732 = vrcp.f32 %v7420_v58 }
0x27a1   :  { %v8729_v62 = vpop.eup %8728 }
0x27a2   :  { %7385 = vst.msk [vmem:[%s11729_s22] sm:$0x3] %vm7384_vm7, %v8729_v62  ;;  %s7450_s22 = sshll.u32 %s9033_s3, 4  ;;  %s7451_s22 = int_to_ptr.vmem [resolvable:$true] %s7450_s22 }
0x27a3   :  { %s8966_s28 = scalar_lea.vmem %s7451_s22, 16  ;;  %s8970_s5 = scalar_lea.vmem %s7451_s22, 32 }
0x27a4   :  { %p8967_p12 = scmp.ne.s32.totalorder %s7451_s22, %s8966_s28  ;;  %p8971_p13 = scmp.lt.s32.totalorder %s7451_s22, %s7451_s22 }
0x27a5   :  { %p8972_p0 = scmp.lt.s32.totalorder %s8970_s5, %s8966_s28 }
0x27a7   :  { %p8973_p1 = por %p8972_p0, %p8971_p13 }
0x27a8   :  { %v8731_v16 = vpop.eup %8730 }
0x27a9   :  { %v7401_v33 = vmul.f32 0.6931472, %v8731_v16  ;;  %v8733_v31 = vpop.eup %8732  ;;  %p8974_p2 = pnand %p8973_p1, %p8967_p12 }
0x27ab   :  { %v7402_v2 = vadd.f32 %v7401_v33, %v7392_v40 }
0x27ad   :  { %v7403_v45 = vmul.f32 %v7402_v2, %v7387_v47 }
0x27af   :  { %v7405_v63 = vsel %vm7384_vm7, %v7403_v45, 0.0 }
0x27b0   :  { %v7406_v50 = vrot.slane %v7405_v63, 4 }
0x27b2   :  { %v7407_v34 = vadd.f32 %v7406_v50, %v7405_v63 }
0x27b4   :  { %v7408_v59 = vrot.slane %v7407_v34, 2 }
0x27b6   :  { %v7409_v22 = vadd.f32 %v7408_v59, %v7407_v34 }
0x27b8   :  { %v7410_v42 = vrot.slane %v7409_v22, 1 }
0x27ba   :  { %v7411_v44 = vadd.f32 %v7410_v42, %v7409_v22 }
0x27bc   :  { %v7422_v48 = vmul.f32 %v8733_v31, %v7411_v44 }
0x27be   :  { %v7424_v25 = vmul.f32 0.1, %v7422_v48 }
0x27c0   :  { %7427 = vst.msk [vmem:[#allocation16] sm:$0x1] %vm7425_vm5, %v7424_v25  ;;  %v7428_v21 = vadd.f32 %v7424_v25, %v11672_v56 }
0x27c1   :  { %8977 = shalt.err (!%p8974_p2)
}
0x27c2   :  { %7453 = dma.vmem_to_hbm [thread:$0]  %s7451_s22, 16, %s11731_s24, [#allocation17]   ;;  %7429 = vst.msk [vmem:[#allocation18] sm:$0x1] %vm7425_vm5, %v7428_v21 }
0x27c3   :  { %s8986_s1 = scalar_lea.vmem %s7461_s21, 16  ;;  %s8990_s6 = scalar_lea.vmem %s7461_s21, 32 }
0x27c4   :  { %p8987_p3 = scmp.ne.s32.totalorder %s7461_s21, %s8986_s1  ;;  %p8991_p4 = scmp.lt.s32.totalorder %s7461_s21, %s7461_s21 }
0x27c5   :  { %p8992_p5 = scmp.lt.s32.totalorder %s8990_s6, %s8986_s1 }
0x27c7   :  { %p8993_p6 = por %p8992_p5, %p8991_p4 }
0x27c9   :  { %p8994_p7 = pnand %p8993_p6, %p8987_p3 }
0x27cb   :  { %8997 = shalt.err (!%p8994_p7)
}
0x27cc   :  { %7463 = dma.vmem_to_hbm [thread:$0]  %s7461_s21, 16, %s11732_s25, [#allocation17]  }
0x27cd   :  { %9014 = dma.done.wait [#allocation5], 16  }
0x27ce   :  { %9015 = vsyncadd [#allocation5], 4294967280 }
0x27cf   :  { %9016 = dma.done.wait [#allocation17], 32  }
0x27d0   :  { %9017 = vsyncadd [#allocation17], 4294967264 }
0x27d1   :  { %7477 = vsyncpa [#allocation4], 1 }
0x27d2   :  { %7478 = vsyncpa [#allocation7], 1 }
0x27d3   :  { %7479 = vsyncpa [#allocation10], 1 }
0x27d4   :  { %7480 = vsyncpa [#allocation13], 1 }
0x27d5   :  { %7481 = vsyncpa [#allocation5], 1 }
0x27d6   :  { %7482 = vsyncpa [#allocation17], 1 }

</bundles_post_ra>
